<compile_context>
chip_gen: v6e
topology: v6e:2x2x1
jax: 0.10.0
libtpu: 0.0.40
codegen_flags: <defaults>
</compile_context>

<pallas_src>
import jax
import jax.numpy as jnp
from jax.experimental import pallas as pl
from jax.experimental.pallas import tpu as pltpu

IN_F, HID_F, OUT_F = 645, 1002, 963   # logical (PyTorch) feature dims
HID_P = 1024                          # hidden padded to a lane multiple (weights only)


def _round_up(n, m):
    return ((n + m - 1) // m) * m


def _pick_batch_tile(B):
    if B <= 128:
        return _round_up(B, 16)   # bf16 packs 16 rows per sublane group
    if B <= 512:
        return 128                # >=2 grid steps -> both v7x TCs busy; MXU-M multiple on all gens
    return 256                    # amortize per-step overhead; still fine for v5e's tighter VMEM


def mlp_kernel(x_ref, w1_ref, b1_ref, w2_ref, b2_ref, o_ref):
    # Fused hot path: cast -> matmul -> bias -> ReLU -> cast -> matmul -> bias, all in VMEM.
    x = x_ref[...].astype(jnp.bfloat16)                                # (TB, 645)
    h = jnp.dot(x, w1_ref[...], preferred_element_type=jnp.float32)   # (TB, 1024), f32 acc
    h = jnp.maximum(h + b1_ref[...], 0.0)                             # bias + ReLU in f32
    h = h.astype(jnp.bfloat16)                                        # halve 2nd matmul bytes
    y = jnp.dot(h, w2_ref[...], preferred_element_type=jnp.float32)   # (TB, 963), f32 acc
    o_ref[...] = (y + b2_ref[...]).astype(o_ref.dtype)


def prepare_params(w1, b1, w2, b2):
    """Pad the hidden dim to 1024 (weights only) and cast matmul weights to bf16."""
    w1p = jnp.pad(w1, ((0, 0), (0, HID_P - HID_F))).astype(jnp.bfloat16)   # (645, 1024)
    b1p = jnp.pad(b1, ((0, 0), (0, HID_P - HID_F))).astype(jnp.float32)    # (1, 1024)
    w2p = jnp.pad(w2, ((0, HID_P - HID_F), (0, 0))).astype(jnp.bfloat16)   # (1024, 963)
    b2p = b2.astype(jnp.float32)                                           # (1, 963)
    return w1p, b1p, w2p, b2p


def _build_call(B, TB, out_dtype, single_buffer_weights):
    resident = {}
    if single_buffer_weights:
        # Constant index_map -> never re-fetched across grid steps; a second
        # VMEM copy of the weights is pure waste.
        resident = dict(pipeline_mode=pl.Buffered(buffer_count=1))

    grid = (pl.cdiv(B, TB),)
    flops = 2 * B * (IN_F * HID_P + HID_P * OUT_F)
    bytes_accessed = (B * IN_F * 4                        # x (f32 in)
                      + IN_F * HID_P * 2 + HID_P * 4      # W1 + b1
                      + HID_P * OUT_F * 2 + OUT_F * 4     # W2 + b2
                      + B * OUT_F * jnp.dtype(out_dtype).itemsize)

    return pl.pallas_call(
        mlp_kernel,
        out_shape=jax.ShapeDtypeStruct((B, OUT_F), out_dtype),
        grid=grid,
        in_specs=[
            pl.BlockSpec((TB, IN_F), lambda i: (i, 0)),                # x: batch-tiled, unpadded f32
            pl.BlockSpec((IN_F, HID_P), lambda i: (0, 0), **resident),  # W1: resident in VMEM
            pl.BlockSpec((1, HID_P), lambda i: (0, 0), **resident),     # b1: resident
            pl.BlockSpec((HID_P, OUT_F), lambda i: (0, 0), **resident), # W2: resident
            pl.BlockSpec((1, OUT_F), lambda i: (0, 0), **resident),     # b2: resident
        ],
        out_specs=pl.BlockSpec((TB, OUT_F), lambda i: (i, 0)),
        compiler_params=pltpu.CompilerParams(
            dimension_semantics=("parallel",),   # shard batch tiles across TensorCores
            vmem_limit_bytes=(16 << 20) if single_buffer_weights else (24 << 20),
        ),
        cost_estimate=pl.CostEstimate(
            flops=flops, transcendentals=0, bytes_accessed=bytes_accessed),
    )


def mlp_forward(x, w1p, b1p, w2p, b2p, out_dtype=jnp.bfloat16):
    B = x.shape[0]
    TB = _pick_batch_tile(B)
    try:
        return _build_call(B, TB, out_dtype, True)(x, w1p, b1p, w2p, b2p)
    except Exception:
        # Fallback for JAX builds that reject BlockSpec(pipeline_mode=...):
        # identical kernel, default (double) buffering on the resident operands.
        return _build_call(B, TB, out_dtype, False)(x, w1p, b1p, w2p, b2p)


def init_params(key):
    # Deterministic init mimicking nn.Linear default (uniform +/- 1/sqrt(fan_in)).
    k1, k2, k3, k4 = jax.random.split(key, 4)
    bound1 = 1.0 / jnp.sqrt(IN_F)
    bound2 = 1.0 / jnp.sqrt(HID_F)
    w1 = jax.random.uniform(k1, (IN_F, HID_F), jnp.float32, -bound1, bound1)
    b1 = jax.random.uniform(k2, (1, HID_F), jnp.float32, -bound1, bound1)
    w2 = jax.random.uniform(k3, (HID_F, OUT_F), jnp.float32, -bound2, bound2)
    b2 = jax.random.uniform(k4, (1, OUT_F), jnp.float32, -bound2, bound2)
    return w1, b1, w2, b2


if __name__ == "__main__":
    key = jax.random.PRNGKey(0)
    kx, kp = jax.random.split(key)
    B = 8
    x = jax.random.normal(kx, (B, IN_F), jnp.float32)
    w1, b1, w2, b2 = init_params(kp)

    w1p, b1p, w2p, b2p = prepare_params(w1, b1, w2, b2)
    out = mlp_forward(x, w1p, b1p, w2p, b2p)
    out = jax.block_until_ready(out)

    # Reference check in plain f32 JAX (bf16 operands + bf16 output => ~1e-2-scale
    # deviation, so use a correspondingly loose tolerance).
    ref = jnp.maximum(x @ w1 + b1, 0.0) @ w2 + b2
    assert out.shape == (B, OUT_F)
    out_f32 = out.astype(jnp.float32)
    assert jnp.allclose(out_f32, ref, atol=5e-2, rtol=5e-2), (
        float(jnp.max(jnp.abs(out_f32 - ref))))

    print("KERNEL_OK")
</pallas_src>

<mosaic_0001>
module attributes {stable_mosaic.version = 11 : i64} {
  func.func @mlp_kernel(%arg0: i32, %arg1: memref<16x645xf32, #tpu.memory_space<vmem>>, %arg2: memref<645x1024xbf16, #tpu.memory_space<vmem>>, %arg3: memref<1x1024xf32, #tpu.memory_space<vmem>>, %arg4: memref<1024x963xbf16, #tpu.memory_space<vmem>>, %arg5: memref<1x963xf32, #tpu.memory_space<vmem>>, %arg6: memref<16x963xbf16, #tpu.memory_space<vmem>>) attributes {dimension_semantics = [#tpu.dimension_semantics<parallel>], iteration_bounds = array<i64: 1>, scalar_prefetch = 0 : i64, scratch_operands = 0 : i64, tpu.core_type = #tpu.core_type<tc>, window_params = [{transform_indices = @transform_0, window_bounds = array<i64: 16, 645>}, {pipeline_mode = #tpu.pipeline_mode<synchronous>, transform_indices = @transform_1, window_bounds = array<i64: 645, 1024>}, {pipeline_mode = #tpu.pipeline_mode<synchronous>, transform_indices = @transform_2, window_bounds = array<i64: 1, 1024>}, {pipeline_mode = #tpu.pipeline_mode<synchronous>, transform_indices = @transform_3, window_bounds = array<i64: 1024, 963>}, {pipeline_mode = #tpu.pipeline_mode<synchronous>, transform_indices = @transform_4, window_bounds = array<i64: 1, 963>}, {transform_indices = @transform_5, window_bounds = array<i64: 16, 963>}]} {
    %c0 = arith.constant 0 : index
    %c0_0 = arith.constant 0 : index
    %0 = vector.load %arg1[%c0, %c0_0] : memref<16x645xf32, #tpu.memory_space<vmem>>, vector<16x645xf32>
    %1 = arith.truncf %0 : vector<16x645xf32> to vector<16x645xbf16>
    %c0_1 = arith.constant 0 : index
    %c0_2 = arith.constant 0 : index
    %2 = vector.load %arg2[%c0_1, %c0_2] : memref<645x1024xbf16, #tpu.memory_space<vmem>>, vector<645x1024xbf16>
    %cst = arith.constant dense<0.000000e+00> : vector<16x1024xf32>
    %3 = tpu.matmul %1, %2, %cst {dimension_numbers = #tpu.dot_dimension_numbers<[1], [0], [0], [1], [0, 0, 1, 1], [], []>} : vector<16x645xbf16>, vector<645x1024xbf16>, vector<16x1024xf32> -> vector<16x1024xf32>
    %c0_3 = arith.constant 0 : index
    %c0_4 = arith.constant 0 : index
    %4 = vector.load %arg3[%c0_3, %c0_4] : memref<1x1024xf32, #tpu.memory_space<vmem>>, vector<1x1024xf32>
    %5 = vector.broadcast %4 : vector<1x1024xf32> to vector<16x1024xf32>
    %6 = arith.addf %3, %5 : vector<16x1024xf32>
    %cst_5 = arith.constant 0.000000e+00 : f32
    %7 = vector.broadcast %cst_5 : f32 to vector<16x1024xf32>
    %8 = arith.maximumf %6, %7 : vector<16x1024xf32>
    %9 = arith.truncf %8 : vector<16x1024xf32> to vector<16x1024xbf16>
    %c0_6 = arith.constant 0 : index
    %c0_7 = arith.constant 0 : index
    %10 = vector.load %arg4[%c0_6, %c0_7] : memref<1024x963xbf16, #tpu.memory_space<vmem>>, vector<1024x963xbf16>
    %cst_8 = arith.constant dense<0.000000e+00> : vector<16x963xf32>
    %11 = tpu.matmul %9, %10, %cst_8 {dimension_numbers = #tpu.dot_dimension_numbers<[1], [0], [0], [1], [0, 0, 1, 1], [], []>} : vector<16x1024xbf16>, vector<1024x963xbf16>, vector<16x963xf32> -> vector<16x963xf32>
    %c0_9 = arith.constant 0 : index
    %c0_10 = arith.constant 0 : index
    %12 = vector.load %arg5[%c0_9, %c0_10] : memref<1x963xf32, #tpu.memory_space<vmem>>, vector<1x963xf32>
    %13 = vector.broadcast %12 : vector<1x963xf32> to vector<16x963xf32>
    %14 = arith.addf %11, %13 : vector<16x963xf32>
    %15 = arith.truncf %14 : vector<16x963xf32> to vector<16x963xbf16>
    %c0_11 = arith.constant 0 : index
    %c0_12 = arith.constant 0 : index
    %16 = vector.load %arg6[%c0_11, %c0_12] : memref<16x963xbf16, #tpu.memory_space<vmem>>, vector<16x963xbf16>
    tpu.vector_store %arg6[%c0_11, %c0_12], %15 {strides = array<i32>} : memref<16x963xbf16, #tpu.memory_space<vmem>>, vector<16x963xbf16>,
    return
  }
  func.func @transform_0(%arg0: i32) -> (i32, i32) {
    %c0_i32 = arith.constant 0 : i32
    %c0_i32_0 = arith.constant 0 : i32
    return %arg0, %c0_i32 : i32, i32
  }
  func.func @transform_1(%arg0: i32) -> (i32, i32) {
    %c0_i32 = arith.constant 0 : i32
    %c0_i32_0 = arith.constant 0 : i32
    %c0_i32_1 = arith.constant 0 : i32
    return %c0_i32, %c0_i32_0 : i32, i32
  }
  func.func @transform_2(%arg0: i32) -> (i32, i32) {
    %c0_i32 = arith.constant 0 : i32
    %c0_i32_0 = arith.constant 0 : i32
    %c0_i32_1 = arith.constant 0 : i32
    return %c0_i32, %c0_i32_0 : i32, i32
  }
  func.func @transform_3(%arg0: i32) -> (i32, i32) {
    %c0_i32 = arith.constant 0 : i32
    %c0_i32_0 = arith.constant 0 : i32
    %c0_i32_1 = arith.constant 0 : i32
    return %c0_i32, %c0_i32_0 : i32, i32
  }
  func.func @transform_4(%arg0: i32) -> (i32, i32) {
    %c0_i32 = arith.constant 0 : i32
    %c0_i32_0 = arith.constant 0 : i32
    %c0_i32_1 = arith.constant 0 : i32
    return %c0_i32, %c0_i32_0 : i32, i32
  }
  func.func @transform_5(%arg0: i32) -> (i32, i32) {
    %c0_i32 = arith.constant 0 : i32
    %c0_i32_0 = arith.constant 0 : i32
    return %arg0, %c0_i32 : i32, i32
  }
}

module attributes {stable_mosaic.version = 11 : i64} {
  func.func @mlp_kernel(%arg0: i32, %arg1: memref<16x645xf32, #tpu.memory_space<vmem>>, %arg2: memref<645x1024xbf16, #tpu.memory_space<vmem>>, %arg3: memref<1x1024xf32, #tpu.memory_space<vmem>>, %arg4: memref<1024x963xbf16, #tpu.memory_space<vmem>>, %arg5: memref<1x963xf32, #tpu.memory_space<vmem>>, %arg6: memref<16x963xbf16, #tpu.memory_space<vmem>>) attributes {dimension_semantics = [#tpu.dimension_semantics<parallel>], iteration_bounds = array<i64: 1>, scalar_prefetch = 0 : i64, scratch_operands = 0 : i64, tpu.core_type = #tpu.core_type<tc>, window_params = [{transform_indices = @transform_0, window_bounds = array<i64: 16, 645>}, {pipeline_mode = #tpu.pipeline_mode<synchronous>, transform_indices = @transform_1, window_bounds = array<i64: 645, 1024>}, {pipeline_mode = #tpu.pipeline_mode<synchronous>, transform_indices = @transform_2, window_bounds = array<i64: 1, 1024>}, {pipeline_mode = #tpu.pipeline_mode<synchronous>, transform_indices = @transform_3, window_bounds = array<i64: 1024, 963>}, {pipeline_mode = #tpu.pipeline_mode<synchronous>, transform_indices = @transform_4, window_bounds = array<i64: 1, 963>}, {transform_indices = @transform_5, window_bounds = array<i64: 16, 963>}]} {
    %c0 = arith.constant 0 : index
    %c0_0 = arith.constant 0 : index
    %0 = vector.load %arg1[%c0, %c0_0] : memref<16x645xf32, #tpu.memory_space<vmem>>, vector<16x645xf32>
    %1 = arith.truncf %0 : vector<16x645xf32> to vector<16x645xbf16>
    %c0_1 = arith.constant 0 : index
    %c0_2 = arith.constant 0 : index
    %2 = vector.load %arg2[%c0_1, %c0_2] : memref<645x1024xbf16, #tpu.memory_space<vmem>>, vector<645x1024xbf16>
    %cst = arith.constant dense<0.000000e+00> : vector<16x1024xf32>
    %3 = tpu.matmul %1, %2, %cst {dimension_numbers = #tpu.dot_dimension_numbers<[1], [0], [0], [1], [0, 0, 1, 1], [], []>} : vector<16x645xbf16>, vector<645x1024xbf16>, vector<16x1024xf32> -> vector<16x1024xf32>
    %c0_3 = arith.constant 0 : index
    %c0_4 = arith.constant 0 : index
    %4 = vector.load %arg3[%c0_3, %c0_4] : memref<1x1024xf32, #tpu.memory_space<vmem>>, vector<1x1024xf32>
    %5 = vector.broadcast %4 : vector<1x1024xf32> to vector<16x1024xf32>
    %6 = arith.addf %3, %5 : vector<16x1024xf32>
    %cst_5 = arith.constant 0.000000e+00 : f32
    %7 = vector.broadcast %cst_5 : f32 to vector<16x1024xf32>
    %8 = arith.maximumf %6, %7 : vector<16x1024xf32>
    %9 = arith.truncf %8 : vector<16x1024xf32> to vector<16x1024xbf16>
    %c0_6 = arith.constant 0 : index
    %c0_7 = arith.constant 0 : index
    %10 = vector.load %arg4[%c0_6, %c0_7] : memref<1024x963xbf16, #tpu.memory_space<vmem>>, vector<1024x963xbf16>
    %cst_8 = arith.constant dense<0.000000e+00> : vector<16x963xf32>
    %11 = tpu.matmul %9, %10, %cst_8 {dimension_numbers = #tpu.dot_dimension_numbers<[1], [0], [0], [1], [0, 0, 1, 1], [], []>} : vector<16x1024xbf16>, vector<1024x963xbf16>, vector<16x963xf32> -> vector<16x963xf32>
    %c0_9 = arith.constant 0 : index
    %c0_10 = arith.constant 0 : index
    %12 = vector.load %arg5[%c0_9, %c0_10] : memref<1x963xf32, #tpu.memory_space<vmem>>, vector<1x963xf32>
    %13 = vector.broadcast %12 : vector<1x963xf32> to vector<16x963xf32>
    %14 = arith.addf %11, %13 : vector<16x963xf32>
    %15 = arith.truncf %14 : vector<16x963xf32> to vector<16x963xbf16>
    %c0_11 = arith.constant 0 : index
    %c0_12 = arith.constant 0 : index
    %16 = vector.load %arg6[%c0_11, %c0_12] : memref<16x963xbf16, #tpu.memory_space<vmem>>, vector<16x963xbf16>
    tpu.vector_store %arg6[%c0_11, %c0_12], %15 {strides = array<i32>} : memref<16x963xbf16, #tpu.memory_space<vmem>>, vector<16x963xbf16>,
    return
  }
  func.func @transform_0(%arg0: i32) -> (i32, i32) {
    %c0_i32 = arith.constant 0 : i32
    %c0_i32_0 = arith.constant 0 : i32
    return %arg0, %c0_i32 : i32, i32
  }
  func.func @transform_1(%arg0: i32) -> (i32, i32) {
    %c0_i32 = arith.constant 0 : i32
    %c0_i32_0 = arith.constant 0 : i32
    %c0_i32_1 = arith.constant 0 : i32
    return %c0_i32, %c0_i32_0 : i32, i32
  }
  func.func @transform_2(%arg0: i32) -> (i32, i32) {
    %c0_i32 = arith.constant 0 : i32
    %c0_i32_0 = arith.constant 0 : i32
    %c0_i32_1 = arith.constant 0 : i32
    return %c0_i32, %c0_i32_0 : i32, i32
  }
  func.func @transform_3(%arg0: i32) -> (i32, i32) {
    %c0_i32 = arith.constant 0 : i32
    %c0_i32_0 = arith.constant 0 : i32
    %c0_i32_1 = arith.constant 0 : i32
    return %c0_i32, %c0_i32_0 : i32, i32
  }
  func.func @transform_4(%arg0: i32) -> (i32, i32) {
    %c0_i32 = arith.constant 0 : i32
    %c0_i32_0 = arith.constant 0 : i32
    %c0_i32_1 = arith.constant 0 : i32
    return %c0_i32, %c0_i32_0 : i32, i32
  }
  func.func @transform_5(%arg0: i32) -> (i32, i32) {
    %c0_i32 = arith.constant 0 : i32
    %c0_i32_0 = arith.constant 0 : i32
    return %arg0, %c0_i32 : i32, i32
  }
}

</mosaic_0001>

<bundles_post_ra>
// kernel: tpu_custom_call.1
= control target key start
LH: loop header
LB: loop body
LE: loop exit
PB: predicated region body
PF: predicated region fallthrough
CT: control target
= control target key end

     0   :  { %10 = vsyncpa [#allocation3], 0  ;;  %vm2026_vm0 = vcmask 39936   ;;  %vm2030_vm1 = vcmask 1041408   ;;  %vm2031_vm2 = vcmask 1042432   ;;  %vm6451_vm3 = vcmask 1043456   ;;  %s10169_s0 = inlined_call_operand.vmem [shape: f32[8,645], index: 0, kind: input, shape index: {}]   ;;  %s10170_s1 = inlined_call_operand.vmem [shape: bf16[645,1024], index: 1, kind: input, shape index: {}]   ;;  %s10171_s2 = inlined_call_operand.vmem [shape: f32[1,1024], index: 2, kind: input, shape index: {}]   ;;  %s10172_s3 = inlined_call_operand.vmem [shape: bf16[1024,963], index: 3, kind: input, shape index: {}]   ;;  %s10173_s4 = inlined_call_operand.vmem [shape: f32[1,963], index: 4, kind: input, shape index: {}]   ;;  %s10174_s5 = inlined_call_operand.hbm [shape: bf16[8,963], index: 5, kind: output, shape index: {}]  }
   0x1   :  { %v96_v0 = vld [vmem:[%s10170_s1 + $0x1c0] sm:$0xff]  ;;  %v23_v55 = vld [vmem:[%s10169_s0 + $0x8] sm:$0xff]  ;;  %v29_v57 = vld [vmem:[%s10169_s0 + $0x38] sm:$0xff]  ;;  %vm6452_vm4 = vcmask 547844  }
   0x2   :  { %v100_v1 = vld [vmem:[%s10170_s1 + $0x1e0] sm:$0xff]  ;;  %v25_v58 = vld [vmem:[%s10169_s0 + $0x18] sm:$0xff]  ;;  %v31_v59 = vld [vmem:[%s10169_s0 + $0x48] sm:$0xff]  ;;  %v7513_v62 = vpack.c.bf16 %v29_v57, %v23_v55 }
   0x3   :  { %v6532_v2 = vcombine.high %v96_v0, %v100_v1  ;;  %v224_v3 = vld [vmem:[%s10170_s1 + $0x5c0] sm:$0xff]  ;;  %v6531_v5 = vcombine.low %v96_v0, %v100_v1  ;;  %v7515_v63 = vpack.c.bf16 %v31_v59, %v25_v58  ;;  %vm6453_vm5 = vmor %vm6452_vm4, %vm6451_vm3 }
   0x4   :  { %v228_v4 = vld [vmem:[%s10170_s1 + $0x5e0] sm:$0xff]  ;;  %2090 = vmatprep.mubr.bf16.mxu0 %v7513_v62 }
   0x5   :  { %v88_v6 = vld [vmem:[%s10170_s1 + $0x180] sm:$0xff]  ;;  %v6660_v7 = vcombine.high %v224_v3, %v228_v4  ;;  %v6659_v8 = vcombine.low %v224_v3, %v228_v4  ;;  %2058 = vmatprep.subr.bf16.mxu0 %v6532_v2  ;;  %2133 = vmatprep.mubr.bf16.mxu1 %v7515_v63 }
   0x6   :  { %v92_v9 = vld [vmem:[%s10170_s1 + $0x1a0] sm:$0xff]  ;;  %2059 = vmatpush1.bf16.msra.mxu0 %v6531_v5 }
   0x7   :  { %v216_v10 = vld [vmem:[%s10170_s1 + $0x580] sm:$0xff]  ;;  %v6524_v12 = vcombine.high %v88_v6, %v92_v9  ;;  %2101 = vmatprep.subr.bf16.mxu1 %v6660_v7  ;;  %v6523_v17 = vcombine.low %v88_v6, %v92_v9 }
   0x8   :  { %v220_v11 = vld [vmem:[%s10170_s1 + $0x5a0] sm:$0xff]  ;;  %2102 = vmatpush1.bf16.msra.mxu1 %v6659_v8 }
   0x9   :  { %v6652_v13 = vcombine.high %v216_v10, %v220_v11  ;;  %v80_v14 = vld [vmem:[%s10170_s1 + $0x140] sm:$0xff]  ;;  %2060 = vmatprep.subr.bf16.mxu0 %v6524_v12  ;;  %v6651_v19 = vcombine.low %v216_v10, %v220_v11 }
   0xa   :  { %v84_v15 = vld [vmem:[%s10170_s1 + $0x160] sm:$0xff]  ;;  %2061 = vmatpush1.bf16.msra.mxu0 %v6523_v17 }
   0xb   :  { %v208_v16 = vld [vmem:[%s10170_s1 + $0x540] sm:$0xff]  ;;  %v6516_v20 = vcombine.high %v80_v14, %v84_v15  ;;  %2103 = vmatprep.subr.bf16.mxu1 %v6652_v13  ;;  %v6515_v26 = vcombine.low %v80_v14, %v84_v15 }
   0xc   :  { %v212_v18 = vld [vmem:[%s10170_s1 + $0x560] sm:$0xff]  ;;  %2104 = vmatpush1.bf16.msra.mxu1 %v6651_v19 }
   0xd   :  { %v6644_v21 = vcombine.high %v208_v16, %v212_v18  ;;  %v72_v22 = vld [vmem:[%s10170_s1 + $0x100] sm:$0xff]  ;;  %2062 = vmatprep.subr.bf16.mxu0 %v6516_v20  ;;  %v6643_v27 = vcombine.low %v208_v16, %v212_v18 }
   0xe   :  { %v76_v23 = vld [vmem:[%s10170_s1 + $0x120] sm:$0xff]  ;;  %2063 = vmatpush1.bf16.msra.mxu0 %v6515_v26 }
   0xf   :  { %v200_v24 = vld [vmem:[%s10170_s1 + $0x500] sm:$0xff]  ;;  %v6508_v28 = vcombine.high %v72_v22, %v76_v23  ;;  %2105 = vmatprep.subr.bf16.mxu1 %v6644_v21  ;;  %v6507_v34 = vcombine.low %v72_v22, %v76_v23 }
  0x10   :  { %v204_v25 = vld [vmem:[%s10170_s1 + $0x520] sm:$0xff]  ;;  %2106 = vmatpush1.bf16.msra.mxu1 %v6643_v27 }
  0x11   :  { %v6636_v29 = vcombine.high %v200_v24, %v204_v25  ;;  %v64_v30 = vld [vmem:[%s10170_s1 + $0xc0] sm:$0xff]  ;;  %2064 = vmatprep.subr.bf16.mxu0 %v6508_v28  ;;  %v6635_v35 = vcombine.low %v200_v24, %v204_v25 }
  0x12   :  { %v68_v31 = vld [vmem:[%s10170_s1 + $0xe0] sm:$0xff]  ;;  %2065 = vmatpush1.bf16.msra.mxu0 %v6507_v34 }
  0x13   :  { %v192_v32 = vld [vmem:[%s10170_s1 + $0x4c0] sm:$0xff]  ;;  %v6500_v36 = vcombine.high %v64_v30, %v68_v31  ;;  %2107 = vmatprep.subr.bf16.mxu1 %v6636_v29  ;;  %v6499_v42 = vcombine.low %v64_v30, %v68_v31 }
  0x14   :  { %v196_v33 = vld [vmem:[%s10170_s1 + $0x4e0] sm:$0xff]  ;;  %2108 = vmatpush1.bf16.msra.mxu1 %v6635_v35 }
  0x15   :  { %v6628_v37 = vcombine.high %v192_v32, %v196_v33  ;;  %v56_v38 = vld [vmem:[%s10170_s1 + $0x80] sm:$0xff]  ;;  %2066 = vmatprep.subr.bf16.mxu0 %v6500_v36  ;;  %v6627_v43 = vcombine.low %v192_v32, %v196_v33 }
  0x16   :  { %v60_v39 = vld [vmem:[%s10170_s1 + $0xa0] sm:$0xff]  ;;  %2067 = vmatpush1.bf16.msra.mxu0 %v6499_v42 }
  0x17   :  { %v184_v40 = vld [vmem:[%s10170_s1 + $0x480] sm:$0xff]  ;;  %v6492_v44 = vcombine.high %v56_v38, %v60_v39  ;;  %2109 = vmatprep.subr.bf16.mxu1 %v6628_v37  ;;  %v6491_v50 = vcombine.low %v56_v38, %v60_v39 }
  0x18   :  { %v188_v41 = vld [vmem:[%s10170_s1 + $0x4a0] sm:$0xff]  ;;  %2110 = vmatpush1.bf16.msra.mxu1 %v6627_v43 }
  0x19   :  { %v6620_v45 = vcombine.high %v184_v40, %v188_v41  ;;  %v48_v46 = vld [vmem:[%s10170_s1 + $0x40] sm:$0xff]  ;;  %2068 = vmatprep.subr.bf16.mxu0 %v6492_v44  ;;  %v6619_v51 = vcombine.low %v184_v40, %v188_v41 }
  0x1a   :  { %v52_v47 = vld [vmem:[%s10170_s1 + $0x60] sm:$0xff]  ;;  %2069 = vmatpush1.bf16.msra.mxu0 %v6491_v50 }
  0x1b   :  { %v176_v48 = vld [vmem:[%s10170_s1 + $0x440] sm:$0xff]  ;;  %v6484_v52 = vcombine.high %v48_v46, %v52_v47  ;;  %2111 = vmatprep.subr.bf16.mxu1 %v6620_v45  ;;  %v6483_v0 = vcombine.low %v48_v46, %v52_v47 }
  0x1c   :  { %v180_v49 = vld [vmem:[%s10170_s1 + $0x460] sm:$0xff]  ;;  %2112 = vmatpush1.bf16.msra.mxu1 %v6619_v51 }
  0x1d   :  { %v40_v53 = vld [vmem:[%s10170_s1] sm:$0xff]  ;;  %v6612_v56 = vcombine.high %v176_v48, %v180_v49  ;;  %2070 = vmatprep.subr.bf16.mxu0 %v6484_v52  ;;  %v6611_v1 = vcombine.low %v176_v48, %v180_v49 }
  0x1e   :  { %v44_v54 = vld [vmem:[%s10170_s1 + $0x20] sm:$0xff]  ;;  %2071 = vmatpush1.bf16.msra.mxu0 %v6483_v0 }
  0x1f   :  { %v168_v60 = vld [vmem:[%s10170_s1 + $0x400] sm:$0xff]  ;;  %v6476_v2 = vcombine.high %v40_v53, %v44_v54  ;;  %2113 = vmatprep.subr.bf16.mxu1 %v6612_v56  ;;  %v6475_v8 = vcombine.low %v40_v53, %v44_v54 }
  0x20   :  { %v172_v61 = vld [vmem:[%s10170_s1 + $0x420] sm:$0xff]  ;;  %2114 = vmatpush1.bf16.msra.mxu1 %v6611_v1 }
  0x21   :  { %v6604_v3 = vcombine.high %v168_v60, %v172_v61  ;;  %v160_v4 = vld [vmem:[%s10170_s1 + $0x3c0] sm:$0xff]  ;;  %2072 = vmatprep.subr.bf16.mxu0 %v6476_v2  ;;  %v6603_v9 = vcombine.low %v168_v60, %v172_v61 }
  0x22   :  { %v164_v5 = vld [vmem:[%s10170_s1 + $0x3e0] sm:$0xff]  ;;  %2073 = vmatpush1.bf16.msra.mxu0 %v6475_v8  ;;  %v97_v8 = vld [vmem:[%s10170_s1 + $0x1c8] sm:$0xff] }
  0x23   :  { %v288_v6 = vld [vmem:[%s10170_s1 + $0x7c0] sm:$0xff]  ;;  %v6596_v10 = vcombine.high %v160_v4, %v164_v5  ;;  %2115 = vmatprep.subr.bf16.mxu1 %v6604_v3  ;;  %v6595_v16 = vcombine.low %v160_v4, %v164_v5 }
  0x24   :  { %v292_v7 = vld [vmem:[%s10170_s1 + $0x7e0] sm:$0xff]  ;;  %2116 = vmatpush1.bf16.msra.mxu1 %v6603_v9  ;;  %v101_v9 = vld [vmem:[%s10170_s1 + $0x1e8] sm:$0xff] }
  0x25   :  { %v6724_v11 = vcombine.high %v288_v6, %v292_v7  ;;  %v152_v12 = vld [vmem:[%s10170_s1 + $0x380] sm:$0xff]  ;;  %2074 = vmatprep.subr.bf16.mxu0 %v6596_v10  ;;  %v6723_v17 = vcombine.low %v288_v6, %v292_v7 }
  0x26   :  { %v156_v13 = vld [vmem:[%s10170_s1 + $0x3a0] sm:$0xff]  ;;  %2075 = vmatpush2.bf16.msra.mxu0 %v6595_v16 }
  0x27   :  { %v280_v14 = vld [vmem:[%s10170_s1 + $0x780] sm:$0xff]  ;;  %v6588_v18 = vcombine.high %v152_v12, %v156_v13  ;;  %2117 = vmatprep.subr.bf16.mxu1 %v6724_v11  ;;  %v6587_v24 = vcombine.low %v152_v12, %v156_v13  ;;  %v28_v12 = vld [vmem:[%s10169_s0 + $0x30] sm:$0xff] }
  0x28   :  { %v284_v15 = vld [vmem:[%s10170_s1 + $0x7a0] sm:$0xff]  ;;  %2118 = vmatpush2.bf16.msra.mxu1 %v6723_v17  ;;  %v6534_v17 = vcombine.high %v97_v8, %v101_v9 }
  0x29   :  { %v6716_v19 = vcombine.high %v280_v14, %v284_v15  ;;  %v144_v20 = vld [vmem:[%s10170_s1 + $0x340] sm:$0xff]  ;;  %2076 = vmatprep.subr.bf16.mxu0 %v6588_v18  ;;  %v6715_v25 = vcombine.low %v280_v14, %v284_v15  ;;  %v24_v14 = vld [vmem:[%s10169_s0 + $0x10] sm:$0xff] }
  0x2a   :  { %v148_v21 = vld [vmem:[%s10170_s1 + $0x360] sm:$0xff]  ;;  %2077 = vmatpush2.bf16.msra.mxu0 %v6587_v24  ;;  %v33_v24 = vld [vmem:[%s10169_s0 + $0x58] sm:$0xff] }
  0x2b   :  { %v272_v22 = vld [vmem:[%s10170_s1 + $0x740] sm:$0xff]  ;;  %v6580_v26 = vcombine.high %v144_v20, %v148_v21  ;;  %2119 = vmatprep.subr.bf16.mxu1 %v6716_v19  ;;  %v6579_v32 = vcombine.low %v144_v20, %v148_v21  ;;  %v89_v20 = vld [vmem:[%s10170_s1 + $0x188] sm:$0xff] }
  0x2c   :  { %v276_v23 = vld [vmem:[%s10170_s1 + $0x760] sm:$0xff]  ;;  %2120 = vmatpush2.bf16.msra.mxu1 %v6715_v25 }
  0x2d   :  { %v6708_v27 = vcombine.high %v272_v22, %v276_v23  ;;  %v136_v28 = vld [vmem:[%s10170_s1 + $0x300] sm:$0xff]  ;;  %2078 = vmatprep.subr.bf16.mxu0 %v6580_v26  ;;  %v6707_v33 = vcombine.low %v272_v22, %v276_v23  ;;  %v93_v22 = vld [vmem:[%s10170_s1 + $0x1a8] sm:$0xff] }
  0x2e   :  { %v140_v29 = vld [vmem:[%s10170_s1 + $0x320] sm:$0xff]  ;;  %2079 = vmatpush2.bf16.msra.mxu0 %v6579_v32  ;;  %v27_v23 = vld [vmem:[%s10169_s0 + $0x28] sm:$0xff] }
  0x2f   :  { %v264_v30 = vld [vmem:[%s10170_s1 + $0x700] sm:$0xff]  ;;  %v6572_v34 = vcombine.high %v136_v28, %v140_v29  ;;  %2121 = vmatprep.subr.bf16.mxu1 %v6708_v27  ;;  %v6571_v40 = vcombine.low %v136_v28, %v140_v29  ;;  %v6533_v27 = vcombine.low %v97_v8, %v101_v9  ;;  %v6526_v29 = vcombine.high %v89_v20, %v93_v22 }
  0x30   :  { %v268_v31 = vld [vmem:[%s10170_s1 + $0x720] sm:$0xff]  ;;  %2122 = vmatpush2.bf16.msra.mxu1 %v6707_v33  ;;  %v7667_v32 = vpack.c.bf16 %v33_v24, %v27_v23  ;;  %v81_v33 = vld [vmem:[%s10170_s1 + $0x148] sm:$0xff] }
  0x31   :  { %v6700_v35 = vcombine.high %v264_v30, %v268_v31  ;;  %v128_v36 = vld [vmem:[%s10170_s1 + $0x2c0] sm:$0xff]  ;;  %2080 = vmatprep.subr.bf16.mxu0 %v6572_v34  ;;  %v6699_v41 = vcombine.low %v264_v30, %v268_v31  ;;  %v85_v34 = vld [vmem:[%s10170_s1 + $0x168] sm:$0xff] }
  0x32   :  { %v132_v37 = vld [vmem:[%s10170_s1 + $0x2e0] sm:$0xff]  ;;  %2081 = vmatpush2.bf16.msra.mxu0 %v6571_v40  ;;  %v161_v23 = vld [vmem:[%s10170_s1 + $0x3c8] sm:$0xff] }
  0x33   :  { %v256_v38 = vld [vmem:[%s10170_s1 + $0x6c0] sm:$0xff]  ;;  %v6564_v42 = vcombine.high %v128_v36, %v132_v37  ;;  %2123 = vmatprep.subr.bf16.mxu1 %v6700_v35  ;;  %v6563_v48 = vcombine.low %v128_v36, %v132_v37  ;;  %v6525_v36 = vcombine.low %v89_v20, %v93_v22  ;;  %v165_v24 = vld [vmem:[%s10170_s1 + $0x3e8] sm:$0xff] }
  0x34   :  { %v260_v39 = vld [vmem:[%s10170_s1 + $0x6e0] sm:$0xff]  ;;  %2124 = vmatpush2.bf16.msra.mxu1 %v6699_v41  ;;  %v73_v41 = vld [vmem:[%s10170_s1 + $0x108] sm:$0xff] }
  0x35   :  { %v6692_v43 = vcombine.high %v256_v38, %v260_v39  ;;  %v120_v44 = vld [vmem:[%s10170_s1 + $0x280] sm:$0xff]  ;;  %2082 = vmatprep.subr.bf16.mxu0 %v6564_v42  ;;  %v6691_v49 = vcombine.low %v256_v38, %v260_v39  ;;  %v6518_v38 = vcombine.high %v81_v33, %v85_v34  ;;  %v77_v42 = vld [vmem:[%s10170_s1 + $0x128] sm:$0xff] }
  0x36   :  { %v124_v45 = vld [vmem:[%s10170_s1 + $0x2a0] sm:$0xff]  ;;  %2083 = vmatpush2.bf16.msra.mxu0 %v6563_v48 }
  0x37   :  { %v248_v46 = vld [vmem:[%s10170_s1 + $0x680] sm:$0xff]  ;;  %v6556_v50 = vcombine.high %v120_v44, %v124_v45  ;;  %2125 = vmatprep.subr.bf16.mxu1 %v6692_v43  ;;  %v6555_v56 = vcombine.low %v120_v44, %v124_v45  ;;  %v6517_v44 = vcombine.low %v81_v33, %v85_v34  ;;  %v229_v33 = vld [vmem:[%s10170_s1 + $0x5e8] sm:$0xff] }
  0x38   :  { %v252_v47 = vld [vmem:[%s10170_s1 + $0x6a0] sm:$0xff]  ;;  %2126 = vmatpush2.bf16.msra.mxu1 %v6691_v49  ;;  %v65_v49 = vld [vmem:[%s10170_s1 + $0xc8] sm:$0xff] }
  0x39   :  { %v6684_v51 = vcombine.high %v248_v46, %v252_v47  ;;  %v112_v52 = vld [vmem:[%s10170_s1 + $0x240] sm:$0xff]  ;;  %2084 = vmatprep.subr.bf16.mxu0 %v6556_v50  ;;  %v6683_v57 = vcombine.low %v248_v46, %v252_v47  ;;  %v6510_v46 = vcombine.high %v73_v41, %v77_v42  ;;  %v69_v50 = vld [vmem:[%s10170_s1 + $0xe8] sm:$0xff] }
  0x3a   :  { %v116_v53 = vld [vmem:[%s10170_s1 + $0x260] sm:$0xff]  ;;  %2085 = vmatpush2.bf16.msra.mxu0 %v6555_v56  ;;  %v153_v34 = vld [vmem:[%s10170_s1 + $0x388] sm:$0xff] }
  0x3b   :  { %v240_v54 = vld [vmem:[%s10170_s1 + $0x640] sm:$0xff]  ;;  %v6548_v58 = vcombine.high %v112_v52, %v116_v53  ;;  %2127 = vmatprep.subr.bf16.mxu1 %v6684_v51  ;;  %v6547_v2 = vcombine.low %v112_v52, %v116_v53  ;;  %v6509_v52 = vcombine.low %v73_v41, %v77_v42  ;;  %v217_v42 = vld [vmem:[%s10170_s1 + $0x588] sm:$0xff] }
  0x3c   :  { %v244_v55 = vld [vmem:[%s10170_s1 + $0x660] sm:$0xff]  ;;  %2128 = vmatpush2.bf16.msra.mxu1 %v6683_v57  ;;  %v57_v57 = vld [vmem:[%s10170_s1 + $0x88] sm:$0xff] }
  0x3d   :  { %v6676_v59 = vcombine.high %v240_v54, %v244_v55  ;;  %v104_v60 = vld [vmem:[%s10170_s1 + $0x200] sm:$0xff]  ;;  %2086 = vmatprep.subr.bf16.mxu0 %v6548_v58  ;;  %v6675_v3 = vcombine.low %v240_v54, %v244_v55  ;;  %v6502_v54 = vcombine.high %v65_v49, %v69_v50  ;;  %v61_v58 = vld [vmem:[%s10170_s1 + $0xa8] sm:$0xff] }
  0x3e   :  { %v108_v61 = vld [vmem:[%s10170_s1 + $0x220] sm:$0xff]  ;;  %2087 = vmatpush2.bf16.msra.mxu0 %v6547_v2 }
  0x3f   :  { %v232_v0 = vld [vmem:[%s10170_s1 + $0x600] sm:$0xff]  ;;  %v6540_v4 = vcombine.high %v104_v60, %v108_v61  ;;  %2129 = vmatprep.subr.bf16.mxu1 %v6676_v59  ;;  %v6539_v10 = vcombine.low %v104_v60, %v108_v61  ;;  %v6501_v60 = vcombine.low %v65_v49, %v69_v50 }
  0x40   :  { %v236_v1 = vld [vmem:[%s10170_s1 + $0x620] sm:$0xff]  ;;  %2130 = vmatpush2.bf16.msra.mxu1 %v6675_v3  ;;  %v49_v3 = vld [vmem:[%s10170_s1 + $0x48] sm:$0xff] }
  0x41   :  { %v6668_v5 = vcombine.high %v232_v0, %v236_v1  ;;  %v352_v6 = vld [vmem:[%s10170_s1 + $0x9c0] sm:$0xff]  ;;  %2088 = vmatprep.subr.bf16.mxu0 %v6540_v4  ;;  %v6667_v13 = vcombine.low %v232_v0, %v236_v1  ;;  %v6494_v0 = vcombine.high %v57_v57, %v61_v58  ;;  %v53_v4 = vld [vmem:[%s10170_s1 + $0x68] sm:$0xff] }
  0x42   :  { %v356_v7 = vld [vmem:[%s10170_s1 + $0x9e0] sm:$0xff]  ;;  %2089 = vmatpush2.bf16.msra.mxu0 %v6539_v10  ;;  %v6486_v8 = vcombine.high %v49_v3, %v53_v4 }
  0x43   :  { %v22_v11 = vld [vmem:[%s10169_s0] sm:$0xff]  ;;  %v6788_v16 = vcombine.high %v352_v6, %v356_v7  ;;  %2131 = vmatprep.subr.bf16.mxu1 %v6668_v5  ;;  %v6787_v26 = vcombine.low %v352_v6, %v356_v7  ;;  %v6493_v6 = vcombine.low %v57_v57, %v61_v58 }
  0x44   :  { %v30_v15 = vld [vmem:[%s10169_s0 + $0x40] sm:$0xff]  ;;  %v7648_v21 = vpack.c.bf16 %v28_v12, %v22_v11  ;;  %2132 = vmatpush2.bf16.msra.mxu1 %v6667_v13  ;;  %v41_v12 = vld [vmem:[%s10170_s1 + $0x8] sm:$0xff] }
  0x45   :  { %v344_v18 = vld [vmem:[%s10170_s1 + $0x980] sm:$0xff]  ;;  %v7659_v25 = vpack.c.bf16 %v30_v15, %v24_v14  ;;  %2144 = vmatprep.subr.bf16.mxu0 %v6788_v16  ;;  %2187 = vmatprep.subr.bf16.mxu1 %v6534_v17  ;;  %v45_v13 = vld [vmem:[%s10170_s1 + $0x28] sm:$0xff]  ;;  %v7371_v14 = vmov 65535   ;;  %v6485_v17 = vcombine.low %v49_v3, %v53_v4 }
  0x46   :  { %v348_v19 = vld [vmem:[%s10170_s1 + $0x9a0] sm:$0xff]  ;;  %2091 = vmatmul.mubr.bf16.vlgmr.msra.gmra.mxu0 %v7648_v21  ;;  %v2032_v15 = vsel %vm2030_vm1, 4294967295, %v7371_v14  ;;  %v6478_v20 = vcombine.high %v41_v12, %v45_v13  ;;  %v189_v14 = vld [vmem:[%s10170_s1 + $0x4a8] sm:$0xff] }
  0x47   :  { %v6780_v28 = vcombine.high %v344_v18, %v348_v19  ;;  %v336_v30 = vld [vmem:[%s10170_s1 + $0x940] sm:$0xff]  ;;  %2134 = vmatmul.mubr.bf16.vlgmr.msra.gmra.mxu1 %v7659_v25  ;;  %2145 = vmatpush1.bf16.msra.mxu0 %v6787_v26  ;;  %v6779_v35 = vcombine.low %v344_v18, %v348_v19  ;;  %v7743_v22 = vsel %vm2031_vm2, %v2032_v15, 0  ;;  %v113_v15 = vld [vmem:[%s10170_s1 + $0x248] sm:$0xff] }
  0x48   :  { %v340_v31 = vld [vmem:[%s10170_s1 + $0x960] sm:$0xff]  ;;  %2188 = vmatpush1.bf16.msra.mxu1 %v6533_v27  ;;  %6803 = vmatprep.mubr.msk.bf16.mxu0 %vm2026_vm0, %v7667_v32 }
  0x49   :  { %2146 = vmatprep.subr.bf16.mxu0 %v6780_v28  ;;  %v6772_v37 = vcombine.high %v336_v30, %v340_v31  ;;  %2189 = vmatprep.subr.bf16.mxu1 %v6526_v29  ;;  %v328_v39 = vld [vmem:[%s10170_s1 + $0x900] sm:$0xff]  ;;  %v6771_v43 = vcombine.low %v336_v30, %v340_v31  ;;  %v6477_v28 = vcombine.low %v41_v12, %v45_v13  ;;  %v225_v31 = vld [vmem:[%s10170_s1 + $0x5c8] sm:$0xff] }
  0x4a   :  { %v332_v40 = vld [vmem:[%s10170_s1 + $0x920] sm:$0xff]  ;;  %2219 = vmatprep.mubr.bf16.mxu1 %v7513_v62  ;;  %v6598_v30 = vcombine.high %v161_v23, %v165_v24  ;;  %v185_v13 = vld [vmem:[%s10170_s1 + $0x488] sm:$0xff] }
  0x4b   :  { %2147 = vmatpush1.bf16.msra.mxu0 %v6779_v35  ;;  %v6764_v45 = vcombine.high %v328_v39, %v332_v40  ;;  %v320_v47 = vld [vmem:[%s10170_s1 + $0x8c0] sm:$0xff]  ;;  %v6763_v51 = vcombine.low %v328_v39, %v332_v40  ;;  %v157_v35 = vld [vmem:[%s10170_s1 + $0x3a8] sm:$0xff]  ;;  %v6597_v39 = vcombine.low %v161_v23, %v165_v24  ;;  %v6662_v40 = vcombine.high %v225_v31, %v229_v33 }
  0x4c   :  { %2190 = vmatpush1.bf16.msra.mxu1 %v6525_v36  ;;  %2148 = vmatprep.subr.bf16.mxu0 %v6772_v37  ;;  %v324_v48 = vld [vmem:[%s10170_s1 + $0x8e0] sm:$0xff]  ;;  %v6590_v41 = vcombine.high %v153_v34, %v157_v35  ;;  %v177_v23 = vld [vmem:[%s10170_s1 + $0x448] sm:$0xff] }
  0x4d   :  { %2191 = vmatprep.subr.bf16.mxu1 %v6518_v38  ;;  %v6756_v53 = vcombine.high %v320_v47, %v324_v48  ;;  %v312_v55 = vld [vmem:[%s10170_s1 + $0x880] sm:$0xff]  ;;  %v6755_v59 = vcombine.low %v320_v47, %v324_v48  ;;  %v32_v38 = vld [vmem:[%s10169_s0 + $0x50] sm:$0xff]  ;;  %v6661_v47 = vcombine.low %v225_v31, %v229_v33  ;;  %v6589_v48 = vcombine.low %v153_v34, %v157_v35  ;;  %v181_v24 = vld [vmem:[%s10170_s1 + $0x468] sm:$0xff] }
  0x4e   :  { %v316_v56 = vld [vmem:[%s10170_s1 + $0x8a0] sm:$0xff]  ;;  %v169_v33 = vld [vmem:[%s10170_s1 + $0x408] sm:$0xff] }
  0x4f   :  { %2149 = vmatpush1.bf16.msra.mxu0 %v6771_v43  ;;  %v6748_v61 = vcombine.high %v312_v55, %v316_v56  ;;  %v304_v1 = vld [vmem:[%s10170_s1 + $0x840] sm:$0xff]  ;;  %v6747_v5 = vcombine.low %v312_v55, %v316_v56  ;;  %v221_v43 = vld [vmem:[%s10170_s1 + $0x5a8] sm:$0xff] }
  0x50   :  { %2192 = vmatpush1.bf16.msra.mxu1 %v6517_v44  ;;  %2150 = vmatprep.subr.bf16.mxu0 %v6764_v45  ;;  %v308_v2 = vld [vmem:[%s10170_s1 + $0x860] sm:$0xff]  ;;  %v145_v45 = vld [vmem:[%s10170_s1 + $0x348] sm:$0xff]  ;;  %v6654_v49 = vcombine.high %v217_v42, %v221_v43  ;;  %v6653_v55 = vcombine.low %v217_v42, %v221_v43 }
  0x51   :  { %2193 = vmatprep.subr.bf16.mxu1 %v6510_v46  ;;  %v6740_v7 = vcombine.high %v304_v1, %v308_v2  ;;  %v296_v9 = vld [vmem:[%s10170_s1 + $0x800] sm:$0xff]  ;;  %v6739_v16 = vcombine.low %v304_v1, %v308_v2  ;;  %v149_v46 = vld [vmem:[%s10170_s1 + $0x368] sm:$0xff] }
  0x52   :  { %v300_v10 = vld [vmem:[%s10170_s1 + $0x820] sm:$0xff]  ;;  %v6582_v50 = vcombine.high %v145_v45, %v149_v46  ;;  %v6581_v56 = vcombine.low %v145_v45, %v149_v46  ;;  %v173_v34 = vld [vmem:[%s10170_s1 + $0x428] sm:$0xff] }
  0x53   :  { %2151 = vmatpush1.bf16.msra.mxu0 %v6763_v51  ;;  %v360_v11 = vld [vmem:[%s10170_s1 + $0xa00] sm:$0x77]  ;;  %v6732_v18 = vcombine.high %v296_v9, %v300_v10  ;;  %v6731_v26 = vcombine.low %v296_v9, %v300_v10  ;;  %v209_v51 = vld [vmem:[%s10170_s1 + $0x548] sm:$0xff]  ;;  %v6605_v46 = vcombine.low %v169_v33, %v173_v34 }
  0x54   :  { %2194 = vmatpush1.bf16.msra.mxu1 %v6509_v52  ;;  %2152 = vmatprep.subr.bf16.mxu0 %v6756_v53  ;;  %v6796_v19 = vcombine.high %v360_v11, %v360_v11  ;;  %v6795_v27 = vcombine.low %v360_v11, %v360_v11  ;;  %v26_v37 = vld [vmem:[%s10169_s0 + $0x20] sm:$0xff]  ;;  %v213_v52 = vld [vmem:[%s10170_s1 + $0x568] sm:$0xff] }
  0x55   :  { %2195 = vmatprep.subr.bf16.mxu1 %v6502_v54  ;;  %v7777_v44 = vpack.c.bf16 %v32_v38, %v26_v37  ;;  %v137_v53 = vld [vmem:[%s10170_s1 + $0x308] sm:$0xff]  ;;  %v6646_v57 = vcombine.high %v209_v51, %v213_v52  ;;  %v6645_v1 = vcombine.low %v209_v51, %v213_v52  ;;  %v6613_v37 = vcombine.low %v177_v23, %v181_v24 }
  0x56   :  { %v2038_v29 = vand.u32 %v6796_v19, %v7743_v22  ;;  %v2035_v36 = vand.u32 %v6795_v27, %v7743_v22  ;;  %v141_v54 = vld [vmem:[%s10170_s1 + $0x328] sm:$0xff]  ;;  %v6622_v19 = vcombine.high %v185_v13, %v189_v14 }
  0x57   :  { %2153 = vmatpush1.bf16.msra.mxu0 %v6755_v59  ;;  %v6574_v58 = vcombine.high %v137_v53, %v141_v54  ;;  %v201_v59 = vld [vmem:[%s10170_s1 + $0x508] sm:$0xff]  ;;  %v6573_v2 = vcombine.low %v137_v53, %v141_v54 }
  0x58   :  { %2196 = vmatpush1.bf16.msra.mxu1 %v6501_v60  ;;  %2154 = vmatprep.subr.bf16.mxu0 %v6748_v61  ;;  %v205_v60 = vld [vmem:[%s10170_s1 + $0x528] sm:$0xff] }
  0x59   :  { %2197 = vmatprep.subr.bf16.mxu1 %v6494_v0  ;;  %v129_v61 = vld [vmem:[%s10170_s1 + $0x2c8] sm:$0xff]  ;;  %v6638_v3 = vcombine.high %v201_v59, %v205_v60  ;;  %v6637_v9 = vcombine.low %v201_v59, %v205_v60 }
  0x5a   :  { %v133_v0 = vld [vmem:[%s10170_s1 + $0x2e8] sm:$0xff] }
  0x5b   :  { %2155 = vmatpush1.bf16.msra.mxu0 %v6747_v5  ;;  %v6566_v4 = vcombine.high %v129_v61, %v133_v0  ;;  %v193_v5 = vld [vmem:[%s10170_s1 + $0x4c8] sm:$0xff]  ;;  %v6565_v10 = vcombine.low %v129_v61, %v133_v0 }
  0x5c   :  { %2198 = vmatpush1.bf16.msra.mxu1 %v6493_v6  ;;  %2156 = vmatprep.subr.bf16.mxu0 %v6740_v7  ;;  %v197_v6 = vld [vmem:[%s10170_s1 + $0x4e8] sm:$0xff] }
  0x5d   :  { %2199 = vmatprep.subr.bf16.mxu1 %v6486_v8  ;;  %v121_v7 = vld [vmem:[%s10170_s1 + $0x288] sm:$0xff]  ;;  %v6630_v11 = vcombine.high %v193_v5, %v197_v6 }
  0x5e   :  { %v125_v8 = vld [vmem:[%s10170_s1 + $0x2a8] sm:$0xff] }
  0x5f   :  { %2157 = vmatpush1.bf16.msra.mxu0 %v6739_v16  ;;  %v6558_v12 = vcombine.high %v121_v7, %v125_v8  ;;  %v117_v16 = vld [vmem:[%s10170_s1 + $0x268] sm:$0xff] }
  0x60   :  { %2200 = vmatpush1.bf16.msra.mxu1 %v6485_v17  ;;  %2158 = vmatprep.subr.bf16.mxu0 %v6732_v18  ;;  %v6629_v17 = vcombine.low %v193_v5, %v197_v6  ;;  %v6557_v18 = vcombine.low %v121_v7, %v125_v8  ;;  %v109_v27 = vld [vmem:[%s10170_s1 + $0x228] sm:$0xff] }
  0x61   :  { %2201 = vmatprep.subr.bf16.mxu1 %v6478_v20  ;;  %v6550_v20 = vcombine.high %v113_v15, %v117_v16  ;;  %v353_v35 = vld [vmem:[%s10170_s1 + $0x9c8] sm:$0xff] }
  0x62   :  { %v293_v42 = vld [vmem:[%s10170_s1 + $0x7e8] sm:$0xff] }
  0x63   :  { %2159 = vmatpush1.bf16.msra.mxu0 %v6731_v26  ;;  %v105_v26 = vld [vmem:[%s10170_s1 + $0x208] sm:$0xff] }
  0x64   :  { %2202 = vmatpush1.bf16.msra.mxu1 %v6477_v28  ;;  %2174 = vmatprep.subr.bf16.mxu0 %v2038_v29  ;;  %v6621_v28 = vcombine.low %v185_v13, %v189_v14  ;;  %v6549_v29 = vcombine.low %v113_v15, %v117_v16  ;;  %v6542_v31 = vcombine.high %v105_v26, %v109_v27  ;;  %v345_v43 = vld [vmem:[%s10170_s1 + $0x988] sm:$0xff] }
  0x65   :  { %2203 = vmatprep.subr.bf16.mxu1 %v6598_v30  ;;  %v6614_v30 = vcombine.high %v177_v23, %v181_v24  ;;  %v6541_v38 = vcombine.low %v105_v26, %v109_v27  ;;  %v349_v45 = vld [vmem:[%s10170_s1 + $0x9a8] sm:$0xff] }
  0x66   :  { %v285_v51 = vld [vmem:[%s10170_s1 + $0x7a8] sm:$0xff] }
  0x67   :  { %2175 = vmatpush2.bf16.msra.mxu0 %v2035_v36  ;;  %v357_v36 = vld [vmem:[%s10170_s1 + $0x9e8] sm:$0xff] }
  0x68   :  { %2204 = vmatpush2.bf16.msra.mxu1 %v6597_v39  ;;  %2230 = vmatprep.subr.bf16.mxu0 %v6662_v40  ;;  %v6606_v39 = vcombine.high %v169_v33, %v173_v34  ;;  %v6790_v40 = vcombine.high %v353_v35, %v357_v36  ;;  %v337_v52 = vld [vmem:[%s10170_s1 + $0x948] sm:$0xff] }
  0x69   :  { %2205 = vmatprep.subr.bf16.mxu1 %v6590_v41  ;;  %v289_v41 = vld [vmem:[%s10170_s1 + $0x7c8] sm:$0xff] }
  0x6a   :  { %2177 = vmatmul.mubr.bf16.vlgmr.msra.gmra.mxu0 %v7777_v44  ;;  %v341_v53 = vld [vmem:[%s10170_s1 + $0x968] sm:$0xff]  ;;  %v6725_v54 = vcombine.low %v289_v41, %v293_v42 }
  0x6b   :  { %2231 = vmatpush1.bf16.msra.mxu0 %v6661_v47  ;;  %2262 = vmatprep.mubr.bf16.mxu0 %v7515_v63  ;;  %v6789_v47 = vcombine.low %v353_v35, %v357_v36  ;;  %v277_v59 = vld [vmem:[%s10170_s1 + $0x768] sm:$0xff] }
  0x6c   :  { %2206 = vmatpush2.bf16.msra.mxu1 %v6589_v48  ;;  %2232 = vmatprep.subr.bf16.mxu0 %v6654_v49  ;;  %v6726_v48 = vcombine.high %v289_v41, %v293_v42  ;;  %v6782_v49 = vcombine.high %v345_v43, %v349_v45  ;;  %v329_v60 = vld [vmem:[%s10170_s1 + $0x908] sm:$0xff] }
  0x6d   :  { %2207 = vmatprep.subr.bf16.mxu1 %v6582_v50  ;;  %v281_v50 = vld [vmem:[%s10170_s1 + $0x788] sm:$0xff] }
  0x6e   :  { %v333_v61 = vld [vmem:[%s10170_s1 + $0x928] sm:$0xff]  ;;  %v6717_v0 = vcombine.low %v281_v50, %v285_v51 }
  0x6f   :  { %2233 = vmatpush1.bf16.msra.mxu0 %v6653_v55  ;;  %v6781_v55 = vcombine.low %v345_v43, %v349_v45  ;;  %v269_v5 = vld [vmem:[%s10170_s1 + $0x728] sm:$0xff] }
  0x70   :  { %2208 = vmatpush2.bf16.msra.mxu1 %v6581_v56  ;;  %2234 = vmatprep.subr.bf16.mxu0 %v6646_v57  ;;  %v6718_v56 = vcombine.high %v281_v50, %v285_v51  ;;  %v6774_v57 = vcombine.high %v337_v52, %v341_v53  ;;  %v321_v6 = vld [vmem:[%s10170_s1 + $0x8c8] sm:$0xff]  ;;  %v98_v50 = vld [vmem:[%s10170_s1 + $0x1d0] sm:$0xff] }
  0x71   :  { %2209 = vmatprep.subr.bf16.mxu1 %v6574_v58  ;;  %v273_v58 = vld [vmem:[%s10170_s1 + $0x748] sm:$0xff]  ;;  %v102_v51 = vld [vmem:[%s10170_s1 + $0x1f0] sm:$0xff] }
  0x72   :  { %v325_v7 = vld [vmem:[%s10170_s1 + $0x8e8] sm:$0xff]  ;;  %v6709_v8 = vcombine.low %v273_v58, %v277_v59 }
  0x73   :  { %2235 = vmatpush1.bf16.msra.mxu0 %v6645_v1  ;;  %v6773_v1 = vcombine.low %v337_v52, %v341_v53  ;;  %v261_v13 = vld [vmem:[%s10170_s1 + $0x6e8] sm:$0xff]  ;;  %v226_v52 = vld [vmem:[%s10170_s1 + $0x5d0] sm:$0xff] }
  0x74   :  { %2210 = vmatpush2.bf16.msra.mxu1 %v6573_v2  ;;  %2236 = vmatprep.subr.bf16.mxu0 %v6638_v3  ;;  %v6710_v2 = vcombine.high %v273_v58, %v277_v59  ;;  %v6766_v3 = vcombine.high %v329_v60, %v333_v61  ;;  %v313_v14 = vld [vmem:[%s10170_s1 + $0x888] sm:$0xff]  ;;  %v230_v53 = vld [vmem:[%s10170_s1 + $0x5f0] sm:$0xff] }
  0x75   :  { %2211 = vmatprep.subr.bf16.mxu1 %v6566_v4  ;;  %v265_v4 = vld [vmem:[%s10170_s1 + $0x708] sm:$0xff]  ;;  %v90_v58 = vld [vmem:[%s10170_s1 + $0x190] sm:$0xff] }
  0x76   :  { %v317_v15 = vld [vmem:[%s10170_s1 + $0x8a8] sm:$0xff]  ;;  %v6701_v16 = vcombine.low %v265_v4, %v269_v5  ;;  %v94_v59 = vld [vmem:[%s10170_s1 + $0x1b0] sm:$0xff] }
  0x77   :  { %2237 = vmatpush1.bf16.msra.mxu0 %v6637_v9  ;;  %v6765_v9 = vcombine.low %v329_v60, %v333_v61  ;;  %v253_v23 = vld [vmem:[%s10170_s1 + $0x6a8] sm:$0xff]  ;;  %v218_v60 = vld [vmem:[%s10170_s1 + $0x590] sm:$0xff] }
  0x78   :  { %2212 = vmatpush2.bf16.msra.mxu1 %v6565_v10  ;;  %2238 = vmatprep.subr.bf16.mxu0 %v6630_v11  ;;  %v6702_v10 = vcombine.high %v265_v4, %v269_v5  ;;  %v6758_v11 = vcombine.high %v321_v6, %v325_v7  ;;  %v305_v24 = vld [vmem:[%s10170_s1 + $0x848] sm:$0xff]  ;;  %v222_v61 = vld [vmem:[%s10170_s1 + $0x5b0] sm:$0xff] }
  0x79   :  { %2213 = vmatprep.subr.bf16.mxu1 %v6558_v12  ;;  %v257_v12 = vld [vmem:[%s10170_s1 + $0x6c8] sm:$0xff]  ;;  %v82_v4 = vld [vmem:[%s10170_s1 + $0x150] sm:$0xff] }
  0x7a   :  { %v309_v26 = vld [vmem:[%s10170_s1 + $0x868] sm:$0xff]  ;;  %v6693_v27 = vcombine.low %v257_v12, %v261_v13  ;;  %v86_v5 = vld [vmem:[%s10170_s1 + $0x170] sm:$0xff] }
  0x7b   :  { %2239 = vmatpush1.bf16.msra.mxu0 %v6629_v17  ;;  %v6757_v17 = vcombine.low %v321_v6, %v325_v7  ;;  %v245_v33 = vld [vmem:[%s10170_s1 + $0x668] sm:$0xff]  ;;  %v210_v6 = vld [vmem:[%s10170_s1 + $0x550] sm:$0xff] }
  0x7c   :  { %2214 = vmatpush2.bf16.msra.mxu1 %v6557_v18  ;;  %2240 = vmatprep.subr.bf16.mxu0 %v6622_v19  ;;  %v6694_v18 = vcombine.high %v257_v12, %v261_v13  ;;  %v6750_v19 = vcombine.high %v313_v14, %v317_v15  ;;  %v297_v34 = vld [vmem:[%s10170_s1 + $0x808] sm:$0xff]  ;;  %v214_v7 = vld [vmem:[%s10170_s1 + $0x570] sm:$0xff] }
  0x7d   :  { %2215 = vmatprep.subr.bf16.mxu1 %v6550_v20  ;;  %v249_v20 = vld [vmem:[%s10170_s1 + $0x688] sm:$0xff]  ;;  %v74_v12 = vld [vmem:[%s10170_s1 + $0x110] sm:$0xff] }
  0x7e   :  { %v301_v35 = vld [vmem:[%s10170_s1 + $0x828] sm:$0xff]  ;;  %v78_v13 = vld [vmem:[%s10170_s1 + $0x130] sm:$0xff] }
  0x7f   :  { %2241 = vmatpush1.bf16.msra.mxu0 %v6621_v28  ;;  %v6749_v28 = vcombine.low %v313_v14, %v317_v15  ;;  %v361_v36 = vld [vmem:[%s10170_s1 + $0xa08] sm:$0x77]  ;;  %v202_v14 = vld [vmem:[%s10170_s1 + $0x510] sm:$0xff] }
  0x80   :  { %2216 = vmatpush2.bf16.msra.mxu1 %v6549_v29  ;;  %2242 = vmatprep.subr.bf16.mxu0 %v6614_v30  ;;  %v6686_v29 = vcombine.high %v249_v20, %v253_v23  ;;  %v6742_v30 = vcombine.high %v305_v24, %v309_v26  ;;  %v233_v41 = vld [vmem:[%s10170_s1 + $0x608] sm:$0xff]  ;;  %v6798_v43 = vcombine.high %v361_v36, %v361_v36  ;;  %v206_v15 = vld [vmem:[%s10170_s1 + $0x530] sm:$0xff] }
  0x81   :  { %2217 = vmatprep.subr.bf16.mxu1 %v6542_v31  ;;  %v241_v31 = vld [vmem:[%s10170_s1 + $0x648] sm:$0xff] }
  0x82   :  { %v237_v42 = vld [vmem:[%s10170_s1 + $0x628] sm:$0xff]  ;;  %v6677_v45 = vcombine.low %v241_v31, %v245_v33 }
  0x83   :  { %2243 = vmatpush1.bf16.msra.mxu0 %v6613_v37  ;;  %v6685_v37 = vcombine.low %v249_v20, %v253_v23  ;;  %v66_v20 = vld [vmem:[%s10170_s1 + $0xd0] sm:$0xff] }
  0x84   :  { %2218 = vmatpush2.bf16.msra.mxu1 %v6541_v38  ;;  %2244 = vmatprep.subr.bf16.mxu0 %v6606_v39  ;;  %v6741_v38 = vcombine.low %v305_v24, %v309_v26  ;;  %v6678_v39 = vcombine.high %v241_v31, %v245_v33  ;;  %v70_v23 = vld [vmem:[%s10170_s1 + $0xf0] sm:$0xff] }
  0x85   :  { %2273 = vmatprep.subr.bf16.mxu1 %v6790_v40  ;;  %v6734_v40 = vcombine.high %v297_v34, %v301_v35  ;;  %v194_v24 = vld [vmem:[%s10170_s1 + $0x4d0] sm:$0xff] }
  0x86   :  { %v198_v26 = vld [vmem:[%s10170_s1 + $0x4f0] sm:$0xff] }
  0x87   :  { %2220 = vmatmul.mubr.bf16.vlgmr.msra.gmra.mxu1 %v7648_v21  ;;  %2245 = vmatpush1.bf16.msra.mxu0 %v6605_v46  ;;  %v6733_v46 = vcombine.low %v297_v34, %v301_v35  ;;  %v58_v31 = vld [vmem:[%s10170_s1 + $0x90] sm:$0xff] }
  0x88   :  { %2274 = vmatpush1.bf16.msra.mxu1 %v6789_v47  ;;  %2246 = vmatprep.subr.bf16.mxu0 %v6726_v48  ;;  %v6670_v47 = vcombine.high %v233_v41, %v237_v42  ;;  %v6797_v48 = vcombine.low %v361_v36, %v361_v36  ;;  %v62_v33 = vld [vmem:[%s10170_s1 + $0xb0] sm:$0xff]  ;;  %v6503_v36 = vcombine.low %v66_v20, %v70_v23 }
  0x89   :  { %2275 = vmatprep.subr.bf16.mxu1 %v6782_v49  ;;  %6804 = vmatprep.mubr.msk.bf16.mxu1 %vm2026_vm0, %v7667_v32  ;;  %v2044_v49 = vand.u32 %v6798_v43, %v7743_v22  ;;  %v186_v34 = vld [vmem:[%s10170_s1 + $0x490] sm:$0xff] }
  0x8a   :  { %v190_v35 = vld [vmem:[%s10170_s1 + $0x4b0] sm:$0xff] }
  0x8b   :  { %2247 = vmatpush2.bf16.msra.mxu0 %v6725_v54  ;;  %v6669_v54 = vcombine.low %v233_v41, %v237_v42  ;;  %v54_v41 = vld [vmem:[%s10170_s1 + $0x70] sm:$0xff] }
  0x8c   :  { %2276 = vmatpush1.bf16.msra.mxu1 %v6781_v55  ;;  %2248 = vmatprep.subr.bf16.mxu0 %v6718_v56  ;;  %v2041_v55 = vand.u32 %v6797_v48, %v7743_v22  ;;  %v6536_v56 = vcombine.high %v98_v50, %v102_v51  ;;  %v178_v42 = vld [vmem:[%s10170_s1 + $0x450] sm:$0xff] }
  0x8d   :  { %2277 = vmatprep.subr.bf16.mxu1 %v6774_v57  ;;  %v6664_v57 = vcombine.high %v226_v52, %v230_v53  ;;  %v182_v43 = vld [vmem:[%s10170_s1 + $0x470] sm:$0xff] }
  0x8e   :  { %v6616_v48 = vcombine.high %v178_v42, %v182_v43 }
  0x8f   :  { %2249 = vmatpush2.bf16.msra.mxu0 %v6717_v0  ;;  %v6535_v0 = vcombine.low %v98_v50, %v102_v51  ;;  %v46_v50 = vld [vmem:[%s10170_s1 + $0x30] sm:$0xff] }
  0x90   :  { %2278 = vmatpush1.bf16.msra.mxu1 %v6773_v1  ;;  %2250 = vmatprep.subr.bf16.mxu0 %v6710_v2  ;;  %v6663_v1 = vcombine.low %v226_v52, %v230_v53  ;;  %v6528_v2 = vcombine.high %v90_v58, %v94_v59  ;;  %v170_v51 = vld [vmem:[%s10170_s1 + $0x410] sm:$0xff] }
  0x91   :  { %2279 = vmatprep.subr.bf16.mxu1 %v6766_v3  ;;  %v6656_v3 = vcombine.high %v218_v60, %v222_v61  ;;  %v174_v52 = vld [vmem:[%s10170_s1 + $0x430] sm:$0xff] }
  0x93   :  { %2251 = vmatpush2.bf16.msra.mxu0 %v6709_v8  ;;  %v6527_v8 = vcombine.low %v90_v58, %v94_v59  ;;  %v166_v58 = vld [vmem:[%s10170_s1 + $0x3f0] sm:$0xff] }
  0x94   :  { %2280 = vmatpush1.bf16.msra.mxu1 %v6765_v9  ;;  %2252 = vmatprep.subr.bf16.mxu0 %v6702_v10  ;;  %v6655_v9 = vcombine.low %v218_v60, %v222_v61  ;;  %v6520_v10 = vcombine.high %v82_v4, %v86_v5  ;;  %v290_v59 = vld [vmem:[%s10170_s1 + $0x7d0] sm:$0xff] }
  0x95   :  { %2281 = vmatprep.subr.bf16.mxu1 %v6758_v11  ;;  %v6648_v11 = vcombine.high %v210_v6, %v214_v7  ;;  %v294_v60 = vld [vmem:[%s10170_s1 + $0x7f0] sm:$0xff] }
  0x97   :  { %2253 = vmatpush2.bf16.msra.mxu0 %v6701_v16  ;;  %v6519_v16 = vcombine.low %v82_v4, %v86_v5  ;;  %v158_v4 = vld [vmem:[%s10170_s1 + $0x3b0] sm:$0xff] }
  0x98   :  { %2282 = vmatpush1.bf16.msra.mxu1 %v6757_v17  ;;  %2254 = vmatprep.subr.bf16.mxu0 %v6694_v18  ;;  %v6647_v17 = vcombine.low %v210_v6, %v214_v7  ;;  %v6512_v18 = vcombine.high %v74_v12, %v78_v13  ;;  %v282_v5 = vld [vmem:[%s10170_s1 + $0x790] sm:$0xff] }
  0x99   :  { %2283 = vmatprep.subr.bf16.mxu1 %v6750_v19  ;;  %v6640_v19 = vcombine.high %v202_v14, %v206_v15  ;;  %v286_v6 = vld [vmem:[%s10170_s1 + $0x7b0] sm:$0xff] }
  0x9b   :  { %2255 = vmatpush2.bf16.msra.mxu0 %v6693_v27  ;;  %v6511_v27 = vcombine.low %v74_v12, %v78_v13  ;;  %v150_v12 = vld [vmem:[%s10170_s1 + $0x370] sm:$0xff] }
  0x9c   :  { %2284 = vmatpush1.bf16.msra.mxu1 %v6749_v28  ;;  %2256 = vmatprep.subr.bf16.mxu0 %v6686_v29  ;;  %v6639_v28 = vcombine.low %v202_v14, %v206_v15  ;;  %v6504_v29 = vcombine.high %v66_v20, %v70_v23  ;;  %v274_v13 = vld [vmem:[%s10170_s1 + $0x750] sm:$0xff] }
  0x9d   :  { %2285 = vmatprep.subr.bf16.mxu1 %v6742_v30  ;;  %v6632_v30 = vcombine.high %v194_v24, %v198_v26  ;;  %v278_v14 = vld [vmem:[%s10170_s1 + $0x770] sm:$0xff] }
  0x9e   :  { %v142_v20 = vld [vmem:[%s10170_s1 + $0x330] sm:$0xff] }
  0x9f   :  { %2257 = vmatpush2.bf16.msra.mxu0 %v6685_v37  ;;  %v6631_v37 = vcombine.low %v194_v24, %v198_v26  ;;  %v266_v23 = vld [vmem:[%s10170_s1 + $0x710] sm:$0xff] }
  0xa0   :  { %2286 = vmatpush1.bf16.msra.mxu1 %v6741_v38  ;;  %2258 = vmatprep.subr.bf16.mxu0 %v6678_v39  ;;  %v6496_v38 = vcombine.high %v58_v31, %v62_v33  ;;  %v6624_v39 = vcombine.high %v186_v34, %v190_v35  ;;  %v270_v24 = vld [vmem:[%s10170_s1 + $0x730] sm:$0xff] }
  0xa1   :  { %2287 = vmatprep.subr.bf16.mxu1 %v6734_v40  ;;  %v50_v40 = vld [vmem:[%s10170_s1 + $0x50] sm:$0xff] }
  0xa2   :  { %v6487_v53 = vcombine.low %v50_v40, %v54_v41 }
  0xa3   :  { %2259 = vmatpush2.bf16.msra.mxu0 %v6677_v45  ;;  %v6495_v45 = vcombine.low %v58_v31, %v62_v33  ;;  %v134_v31 = vld [vmem:[%s10170_s1 + $0x2f0] sm:$0xff] }
  0xa4   :  { %2288 = vmatpush1.bf16.msra.mxu1 %v6733_v46  ;;  %2260 = vmatprep.subr.bf16.mxu0 %v6670_v47  ;;  %v6623_v46 = vcombine.low %v186_v34, %v190_v35  ;;  %v6488_v47 = vcombine.high %v50_v40, %v54_v41  ;;  %v258_v33 = vld [vmem:[%s10170_s1 + $0x6d0] sm:$0xff] }
  0xa5   :  { %2303 = vmatprep.subr.bf16.mxu1 %v2044_v49  ;;  %v42_v49 = vld [vmem:[%s10170_s1 + $0x10] sm:$0xff] }
  0xa6   :  { %v6479_v61 = vcombine.low %v42_v49, %v46_v50  ;;  %v262_v34 = vld [vmem:[%s10170_s1 + $0x6f0] sm:$0xff] }
  0xa7   :  { %2261 = vmatpush2.bf16.msra.mxu0 %v6669_v54  ;;  %v6615_v54 = vcombine.low %v178_v42, %v182_v43  ;;  %v126_v40 = vld [vmem:[%s10170_s1 + $0x2b0] sm:$0xff] }
  0xa8   :  { %2304 = vmatpush2.bf16.msra.mxu1 %v2041_v55  ;;  %2316 = vmatprep.subr.bf16.mxu0 %v6536_v56  ;;  %v6480_v55 = vcombine.high %v42_v49, %v46_v50  ;;  %v6608_v56 = vcombine.high %v170_v51, %v174_v52  ;;  %v250_v41 = vld [vmem:[%s10170_s1 + $0x690] sm:$0xff] }
  0xa9   :  { %2359 = vmatprep.subr.bf16.mxu1 %v6664_v57  ;;  %v162_v57 = vld [vmem:[%s10170_s1 + $0x3d0] sm:$0xff] }
  0xaa   :  { %2263 = vmatmul.mubr.bf16.vlgmr.msra.gmra.mxu0 %v7659_v25  ;;  %v6599_v7 = vcombine.low %v162_v57, %v166_v58  ;;  %v254_v42 = vld [vmem:[%s10170_s1 + $0x6b0] sm:$0xff] }
  0xab   :  { %2306 = vmatmul.mubr.bf16.vlgmr.msra.gmra.mxu1 %v7777_v44  ;;  %2317 = vmatpush1.bf16.msra.mxu0 %v6535_v0  ;;  %v6607_v0 = vcombine.low %v170_v51, %v174_v52  ;;  %v118_v49 = vld [vmem:[%s10170_s1 + $0x270] sm:$0xff] }
  0xac   :  { %2360 = vmatpush1.bf16.msra.mxu1 %v6663_v1  ;;  %2318 = vmatprep.subr.bf16.mxu0 %v6528_v2  ;;  %v6600_v1 = vcombine.high %v162_v57, %v166_v58  ;;  %v6728_v2 = vcombine.high %v290_v59, %v294_v60  ;;  %v242_v50 = vld [vmem:[%s10170_s1 + $0x650] sm:$0xff] }
  0xad   :  { %2361 = vmatprep.subr.bf16.mxu1 %v6656_v3  ;;  %2348 = vmatprep.mubr.bf16.mxu0 %v7513_v62  ;;  %v154_v3 = vld [vmem:[%s10170_s1 + $0x390] sm:$0xff] }
  0xae   :  { %2391 = vmatprep.mubr.bf16.mxu1 %v7515_v63  ;;  %v6591_v15 = vcombine.low %v154_v3, %v158_v4  ;;  %v246_v51 = vld [vmem:[%s10170_s1 + $0x670] sm:$0xff] }
  0xaf   :  { %2319 = vmatpush1.bf16.msra.mxu0 %v6527_v8  ;;  %v6727_v8 = vcombine.low %v290_v59, %v294_v60  ;;  %v110_v57 = vld [vmem:[%s10170_s1 + $0x230] sm:$0xff] }
  0xb0   :  { %2362 = vmatpush1.bf16.msra.mxu1 %v6655_v9  ;;  %2320 = vmatprep.subr.bf16.mxu0 %v6520_v10  ;;  %v6592_v9 = vcombine.high %v154_v3, %v158_v4  ;;  %v6720_v10 = vcombine.high %v282_v5, %v286_v6  ;;  %v234_v58 = vld [vmem:[%s10170_s1 + $0x610] sm:$0xff]  ;;  %v99_v4 = vld [vmem:[%s10170_s1 + $0x1d8] sm:$0xff] }
  0xb1   :  { %2363 = vmatprep.subr.bf16.mxu1 %v6648_v11  ;;  %v146_v11 = vld [vmem:[%s10170_s1 + $0x350] sm:$0xff] }
  0xb2   :  { %v6583_v26 = vcombine.low %v146_v11, %v150_v12  ;;  %v238_v59 = vld [vmem:[%s10170_s1 + $0x630] sm:$0xff] }
  0xb3   :  { %2321 = vmatpush1.bf16.msra.mxu0 %v6519_v16  ;;  %v6719_v16 = vcombine.low %v282_v5, %v286_v6  ;;  %v358_v3 = vld [vmem:[%s10170_s1 + $0x9f0] sm:$0xff]  ;;  %v103_v5 = vld [vmem:[%s10170_s1 + $0x1f8] sm:$0xff] }
  0xb4   :  { %2364 = vmatpush1.bf16.msra.mxu1 %v6647_v17  ;;  %2322 = vmatprep.subr.bf16.mxu0 %v6512_v18  ;;  %v6584_v17 = vcombine.high %v146_v11, %v150_v12  ;;  %v6712_v18 = vcombine.high %v274_v13, %v278_v14  ;;  %v350_v11 = vld [vmem:[%s10170_s1 + $0x9b0] sm:$0xff]  ;;  %v91_v12 = vld [vmem:[%s10170_s1 + $0x198] sm:$0xff] }
  0xb5   :  { %2365 = vmatprep.subr.bf16.mxu1 %v6640_v19  ;;  %v138_v19 = vld [vmem:[%s10170_s1 + $0x310] sm:$0xff] }
  0xb6   :  { %v6575_v35 = vcombine.low %v138_v19, %v142_v20 }
  0xb7   :  { %2323 = vmatpush1.bf16.msra.mxu0 %v6511_v27  ;;  %v6711_v27 = vcombine.low %v274_v13, %v278_v14  ;;  %v95_v13 = vld [vmem:[%s10170_s1 + $0x1b8] sm:$0xff] }
  0xb8   :  { %2366 = vmatpush1.bf16.msra.mxu1 %v6639_v28  ;;  %2324 = vmatprep.subr.bf16.mxu0 %v6504_v29  ;;  %v6576_v28 = vcombine.high %v138_v19, %v142_v20  ;;  %v6704_v29 = vcombine.high %v266_v23, %v270_v24  ;;  %v342_v19 = vld [vmem:[%s10170_s1 + $0x970] sm:$0xff]  ;;  %v83_v20 = vld [vmem:[%s10170_s1 + $0x158] sm:$0xff] }
  0xb9   :  { %2367 = vmatprep.subr.bf16.mxu1 %v6632_v30  ;;  %v130_v30 = vld [vmem:[%s10170_s1 + $0x2d0] sm:$0xff] }
  0xba   :  { %v6567_v43 = vcombine.low %v130_v30, %v134_v31 }
  0xbb   :  { %2325 = vmatpush1.bf16.msra.mxu0 %v6503_v36  ;;  %v6703_v36 = vcombine.low %v266_v23, %v270_v24  ;;  %v87_v23 = vld [vmem:[%s10170_s1 + $0x178] sm:$0xff] }
  0xbc   :  { %2368 = vmatpush1.bf16.msra.mxu1 %v6631_v37  ;;  %2326 = vmatprep.subr.bf16.mxu0 %v6496_v38  ;;  %v6568_v37 = vcombine.high %v130_v30, %v134_v31  ;;  %v6696_v38 = vcombine.high %v258_v33, %v262_v34  ;;  %v334_v30 = vld [vmem:[%s10170_s1 + $0x930] sm:$0xff]  ;;  %v75_v31 = vld [vmem:[%s10170_s1 + $0x118] sm:$0xff] }
  0xbd   :  { %2369 = vmatprep.subr.bf16.mxu1 %v6624_v39  ;;  %v122_v39 = vld [vmem:[%s10170_s1 + $0x290] sm:$0xff] }
  0xbe   :  { %v6559_v52 = vcombine.low %v122_v39, %v126_v40 }
  0xbf   :  { %2327 = vmatpush1.bf16.msra.mxu0 %v6495_v45  ;;  %v6695_v45 = vcombine.low %v258_v33, %v262_v34  ;;  %v79_v33 = vld [vmem:[%s10170_s1 + $0x138] sm:$0xff] }
  0xc0   :  { %2370 = vmatpush1.bf16.msra.mxu1 %v6623_v46  ;;  %2328 = vmatprep.subr.bf16.mxu0 %v6488_v47  ;;  %v6560_v46 = vcombine.high %v122_v39, %v126_v40  ;;  %v6688_v47 = vcombine.high %v250_v41, %v254_v42  ;;  %v326_v39 = vld [vmem:[%s10170_s1 + $0x8f0] sm:$0xff]  ;;  %v71_v40 = vld [vmem:[%s10170_s1 + $0xf8] sm:$0xff] }
  0xc1   :  { %2371 = vmatprep.subr.bf16.mxu1 %v6616_v48  ;;  %v114_v48 = vld [vmem:[%s10170_s1 + $0x250] sm:$0xff] }
  0xc2   :  { %v6551_v60 = vcombine.low %v114_v48, %v118_v49 }
  0xc3   :  { %2329 = vmatpush1.bf16.msra.mxu0 %v6487_v53  ;;  %v6687_v53 = vcombine.low %v250_v41, %v254_v42  ;;  %v6513_v42 = vcombine.low %v75_v31, %v79_v33 }
  0xc4   :  { %2372 = vmatpush1.bf16.msra.mxu1 %v6615_v54  ;;  %2330 = vmatprep.subr.bf16.mxu0 %v6480_v55  ;;  %v6552_v54 = vcombine.high %v114_v48, %v118_v49  ;;  %v6680_v55 = vcombine.high %v242_v50, %v246_v51  ;;  %v59_v48 = vld [vmem:[%s10170_s1 + $0x98] sm:$0xff] }
  0xc5   :  { %2373 = vmatprep.subr.bf16.mxu1 %v6608_v56  ;;  %v106_v56 = vld [vmem:[%s10170_s1 + $0x210] sm:$0xff]  ;;  %v63_v49 = vld [vmem:[%s10170_s1 + $0xb8] sm:$0xff] }
  0xc6   :  { %v6543_v6 = vcombine.low %v106_v56, %v110_v57 }
  0xc7   :  { %2331 = vmatpush1.bf16.msra.mxu0 %v6479_v61  ;;  %v6679_v61 = vcombine.low %v242_v50, %v246_v51  ;;  %v366_v51 = vlaneseq }
  0xc8   :  { %2374 = vmatpush1.bf16.msra.mxu1 %v6607_v0  ;;  %2332 = vmatprep.subr.bf16.mxu0 %v6600_v1  ;;  %v6544_v0 = vcombine.high %v106_v56, %v110_v57  ;;  %v6672_v1 = vcombine.high %v234_v58, %v238_v59  ;;  %v310_v56 = vld [vmem:[%s10170_s1 + $0x870] sm:$0xff]  ;;  %v51_v57 = vld [vmem:[%s10170_s1 + $0x58] sm:$0xff] }
  0xc9   :  { %2375 = vmatprep.subr.bf16.mxu1 %v6728_v2  ;;  %v354_v2 = vld [vmem:[%s10170_s1 + $0x9d0] sm:$0xff] }
  0xca   :  { %v6791_v14 = vcombine.low %v354_v2, %v358_v3 }
  0xcb   :  { %2333 = vmatpush2.bf16.msra.mxu0 %v6599_v7  ;;  %v6671_v7 = vcombine.low %v234_v58, %v238_v59  ;;  %v55_v58 = vld [vmem:[%s10170_s1 + $0x78] sm:$0xff] }
  0xcc   :  { %2376 = vmatpush2.bf16.msra.mxu1 %v6727_v8  ;;  %2334 = vmatprep.subr.bf16.mxu0 %v6592_v9  ;;  %v6792_v8 = vcombine.high %v354_v2, %v358_v3  ;;  %v6538_v9 = vcombine.high %v99_v4, %v103_v5  ;;  %v298_v2 = vld [vmem:[%s10170_s1 + $0x810] sm:$0xff] }
  0xcd   :  { %2377 = vmatprep.subr.bf16.mxu1 %v6720_v10  ;;  %v346_v10 = vld [vmem:[%s10170_s1 + $0x990] sm:$0xff] }
  0xce   :  { %v6783_v24 = vcombine.low %v346_v10, %v350_v11  ;;  %v302_v3 = vld [vmem:[%s10170_s1 + $0x830] sm:$0xff] }
  0xcf   :  { %2335 = vmatpush2.bf16.msra.mxu0 %v6591_v15  ;;  %v6537_v15 = vcombine.low %v99_v4, %v103_v5  ;;  %v362_v4 = vld [vmem:[%s10170_s1 + $0xa10] sm:$0x77]  ;;  %v43_v5 = vld [vmem:[%s10170_s1 + $0x18] sm:$0xff] }
  0xd0   :  { %2378 = vmatpush2.bf16.msra.mxu1 %v6719_v16  ;;  %2336 = vmatprep.subr.bf16.mxu0 %v6584_v17  ;;  %v6784_v16 = vcombine.high %v346_v10, %v350_v11  ;;  %v6530_v17 = vcombine.high %v91_v12, %v95_v13  ;;  %v8263_v10 = vld [vmem:[%s10171_s2] sm:$0xff]  ;;  %v6736_v11 = vcombine.high %v298_v2, %v302_v3 }
  0xd1   :  { %2379 = vmatprep.subr.bf16.mxu1 %v6712_v18  ;;  %v338_v18 = vld [vmem:[%s10170_s1 + $0x950] sm:$0xff] }
  0xd2   :  { %v6775_v34 = vcombine.low %v338_v18, %v342_v19 }
  0xd3   :  { %2337 = vmatpush2.bf16.msra.mxu0 %v6583_v26  ;;  %v6529_v26 = vcombine.low %v91_v12, %v95_v13  ;;  %v6800_v12 = vcombine.high %v362_v4, %v362_v4 }
  0xd4   :  { %2380 = vmatpush2.bf16.msra.mxu1 %v6711_v27  ;;  %2338 = vmatprep.subr.bf16.mxu0 %v6576_v28  ;;  %v6776_v27 = vcombine.high %v338_v18, %v342_v19  ;;  %v6522_v28 = vcombine.high %v83_v20, %v87_v23  ;;  %v6799_v18 = vcombine.low %v362_v4, %v362_v4 }
  0xd5   :  { %2381 = vmatprep.subr.bf16.mxu1 %v6704_v29  ;;  %v330_v29 = vld [vmem:[%s10170_s1 + $0x910] sm:$0xff] }
  0xd6   :  { %v6767_v41 = vcombine.low %v330_v29, %v334_v30 }
  0xd7   :  { %2339 = vmatpush2.bf16.msra.mxu0 %v6575_v35  ;;  %v6521_v35 = vcombine.low %v83_v20, %v87_v23  ;;  %v2050_v20 = vand.u32 %v6800_v12, %v7743_v22 }
  0xd8   :  { %2382 = vmatpush2.bf16.msra.mxu1 %v6703_v36  ;;  %2340 = vmatprep.subr.bf16.mxu0 %v6568_v37  ;;  %v6768_v36 = vcombine.high %v330_v29, %v334_v30  ;;  %v6514_v37 = vcombine.high %v75_v31, %v79_v33  ;;  %v159_v29 = vld [vmem:[%s10170_s1 + $0x3b8] sm:$0xff]  ;;  %v2047_v33 = vand.u32 %v6799_v18, %v7743_v22 }
  0xd9   :  { %2383 = vmatprep.subr.bf16.mxu1 %v6696_v38  ;;  %v322_v38 = vld [vmem:[%s10170_s1 + $0x8d0] sm:$0xff]  ;;  %v115_v18 = vld [vmem:[%s10170_s1 + $0x258] sm:$0xff] }
  0xda   :  { %v6759_v50 = vcombine.low %v322_v38, %v326_v39 }
  0xdb   :  { %2341 = vmatpush2.bf16.msra.mxu0 %v6567_v43  ;;  %v6760_v43 = vcombine.high %v322_v38, %v326_v39 }
  0xdc   :  { %2384 = vmatpush2.bf16.msra.mxu1 %v6695_v45  ;;  %2342 = vmatprep.subr.bf16.mxu0 %v6560_v46  ;;  %v314_v46 = vld [vmem:[%s10170_s1 + $0x890] sm:$0xff] }
  0xdd   :  { %2385 = vmatprep.subr.bf16.mxu1 %v6688_v47  ;;  %v318_v47 = vld [vmem:[%s10170_s1 + $0x8b0] sm:$0xff] }
  0xde   :  { %v6751_v59 = vcombine.low %v314_v46, %v318_v47 }
  0xdf   :  { %2343 = vmatpush2.bf16.msra.mxu0 %v6559_v52 }
  0xe0   :  { %2386 = vmatpush2.bf16.msra.mxu1 %v6687_v53  ;;  %2344 = vmatprep.subr.bf16.mxu0 %v6552_v54  ;;  %v6752_v53 = vcombine.high %v314_v46, %v318_v47  ;;  %v6498_v54 = vcombine.high %v59_v48, %v63_v49 }
  0xe1   :  { %2387 = vmatprep.subr.bf16.mxu1 %v6680_v55  ;;  %v306_v55 = vld [vmem:[%s10170_s1 + $0x850] sm:$0xff] }
  0xe3   :  { %2345 = vmatpush2.bf16.msra.mxu0 %v6551_v60  ;;  %v8242_v60 = vshrl.u32 %v366_v51, 7 }
  0xe4   :  { %2388 = vmatpush2.bf16.msra.mxu1 %v6679_v61  ;;  %2346 = vmatprep.subr.bf16.mxu0 %v6544_v0  ;;  %v6497_v61 = vcombine.low %v59_v48, %v63_v49  ;;  %v6744_v0 = vcombine.high %v306_v55, %v310_v56 }
  0xe5   :  { %2389 = vmatprep.subr.bf16.mxu1 %v6672_v1  ;;  %v6490_v1 = vcombine.high %v51_v57, %v55_v58 }
  0xe7   :  { %2347 = vmatpush2.bf16.msra.mxu0 %v6543_v6  ;;  %v47_v6 = vld [vmem:[%s10170_s1 + $0x38] sm:$0xff] }
  0xe8   :  { %2390 = vmatpush2.bf16.msra.mxu1 %v6671_v7  ;;  %2402 = vmatprep.subr.bf16.mxu0 %v6792_v8  ;;  %v6743_v7 = vcombine.low %v306_v55, %v310_v56  ;;  %v368_v8 = vsub.s32 0, %v8242_v60  ;;  %v6482_v13 = vcombine.high %v43_v5, %v47_v6  ;;  %v6481_v19 = vcombine.low %v43_v5, %v47_v6  ;;  %v143_v55 = vld [vmem:[%s10170_s1 + $0x338] sm:$0xff] }
  0xe9   :  { %2445 = vmatprep.subr.bf16.mxu1 %v6538_v9  ;;  %v6489_v9 = vcombine.low %v51_v57, %v55_v58  ;;  %v195_v6 = vld [vmem:[%s10170_s1 + $0x4d8] sm:$0xff] }
  0xea   :  { %2349 = vmatmul.mubr.bf16.vlgmr.msra.gmra.mxu0 %v7648_v21 }
  0xeb   :  { %2392 = vmatmul.mubr.bf16.vlgmr.msra.gmra.mxu1 %v7659_v25  ;;  %2403 = vmatpush1.bf16.msra.mxu0 %v6791_v14  ;;  %v163_v14 = vld [vmem:[%s10170_s1 + $0x3d8] sm:$0xff] }
  0xec   :  { %2446 = vmatpush1.bf16.msra.mxu1 %v6537_v15  ;;  %2404 = vmatprep.subr.bf16.mxu0 %v6784_v16  ;;  %v167_v15 = vld [vmem:[%s10170_s1 + $0x3f8] sm:$0xff]  ;;  %v369_v16 = vrot.slane %v8263_v10, %v368_v8 }
  0xed   :  { %2447 = vmatprep.subr.bf16.mxu1 %v6530_v17  ;;  %6805 = vmatprep.mubr.msk.bf16.mxu0 %vm2026_vm0, %v7667_v32  ;;  %v6735_v17 = vcombine.low %v298_v2, %v302_v3  ;;  %v6602_v23 = vcombine.high %v163_v14, %v167_v15 }
  0xee   :  { %2477 = vmatprep.mubr.bf16.mxu1 %v7513_v62  ;;  %v67_v62 = vld [vmem:[%s10170_s1 + $0xd8] sm:$0xff] }
  0xef   :  { %2405 = vmatpush1.bf16.msra.mxu0 %v6783_v24  ;;  %v6506_v45 = vcombine.high %v67_v62, %v71_v40  ;;  %v6505_v52 = vcombine.low %v67_v62, %v71_v40  ;;  %v227_v24 = vld [vmem:[%s10170_s1 + $0x5d8] sm:$0xff] }
  0xf0   :  { %2448 = vmatpush1.bf16.msra.mxu1 %v6529_v26  ;;  %2406 = vmatprep.subr.bf16.mxu0 %v6776_v27  ;;  %v231_v26 = vld [vmem:[%s10170_s1 + $0x5f8] sm:$0xff] }
  0xf1   :  { %2449 = vmatprep.subr.bf16.mxu1 %v6522_v28  ;;  %v155_v28 = vld [vmem:[%s10170_s1 + $0x398] sm:$0xff]  ;;  %v6665_v46 = vcombine.low %v227_v24, %v231_v26 }
  0xf2   :  { %v6594_v39 = vcombine.high %v155_v28, %v159_v29  ;;  %v219_v62 = vld [vmem:[%s10170_s1 + $0x598] sm:$0xff]  ;;  %v6593_v48 = vcombine.low %v155_v28, %v159_v29 }
  0xf3   :  { %2407 = vmatpush1.bf16.msra.mxu0 %v6775_v34  ;;  %v223_v40 = vld [vmem:[%s10170_s1 + $0x5b8] sm:$0xff] }
  0xf4   :  { %2450 = vmatpush1.bf16.msra.mxu1 %v6521_v35  ;;  %2408 = vmatprep.subr.bf16.mxu0 %v6768_v36  ;;  %v6601_v35 = vcombine.low %v163_v14, %v167_v15  ;;  %v6666_v36 = vcombine.high %v227_v24, %v231_v26  ;;  %v6658_v49 = vcombine.high %v219_v62, %v223_v40  ;;  %v183_v28 = vld [vmem:[%s10170_s1 + $0x478] sm:$0xff] }
  0xf5   :  { %2451 = vmatprep.subr.bf16.mxu1 %v6514_v37  ;;  %v6657_v56 = vcombine.low %v219_v62, %v223_v40  ;;  %v107_v29 = vld [vmem:[%s10170_s1 + $0x218] sm:$0xff] }
  0xf6   :  { %v175_v62 = vld [vmem:[%s10170_s1 + $0x438] sm:$0xff] }
  0xf7   :  { %2409 = vmatpush1.bf16.msra.mxu0 %v6767_v41  ;;  %v355_v40 = vld [vmem:[%s10170_s1 + $0x9d8] sm:$0xff] }
  0xf8   :  { %2452 = vmatpush1.bf16.msra.mxu1 %v6513_v42  ;;  %2410 = vmatprep.subr.bf16.mxu0 %v6760_v43  ;;  %v147_v42 = vld [vmem:[%s10170_s1 + $0x358] sm:$0xff] }
  0xf9   :  { %2453 = vmatprep.subr.bf16.mxu1 %v6506_v45  ;;  %v151_v43 = vld [vmem:[%s10170_s1 + $0x378] sm:$0xff] }
  0xfa   :  { %v6586_v51 = vcombine.high %v147_v42, %v151_v43  ;;  %v6585_v57 = vcombine.low %v147_v42, %v151_v43 }
  0xfb   :  { %2411 = vmatpush1.bf16.msra.mxu0 %v6759_v50 }
  0xfc   :  { %2454 = vmatpush1.bf16.msra.mxu1 %v6505_v52  ;;  %2412 = vmatprep.subr.bf16.mxu0 %v6752_v53  ;;  %v211_v52 = vld [vmem:[%s10170_s1 + $0x558] sm:$0xff] }
  0xfd   :  { %2455 = vmatprep.subr.bf16.mxu1 %v6498_v54  ;;  %v215_v53 = vld [vmem:[%s10170_s1 + $0x578] sm:$0xff] }
  0xfe   :  { %v139_v54 = vld [vmem:[%s10170_s1 + $0x318] sm:$0xff]  ;;  %v6650_v58 = vcombine.high %v211_v52, %v215_v53  ;;  %v6649_v2 = vcombine.low %v211_v52, %v215_v53 }
  0xff   :  { %2413 = vmatpush1.bf16.msra.mxu0 %v6751_v59  ;;  %v6578_v59 = vcombine.high %v139_v54, %v143_v55  ;;  %v6577_v3 = vcombine.low %v139_v54, %v143_v55 }
 0x100   :  { %2456 = vmatpush1.bf16.msra.mxu1 %v6497_v61  ;;  %2414 = vmatprep.subr.bf16.mxu0 %v6744_v0  ;;  %v203_v61 = vld [vmem:[%s10170_s1 + $0x518] sm:$0xff] }
 0x101   :  { %2457 = vmatprep.subr.bf16.mxu1 %v6490_v1  ;;  %v207_v0 = vld [vmem:[%s10170_s1 + $0x538] sm:$0xff] }
 0x102   :  { %v131_v1 = vld [vmem:[%s10170_s1 + $0x2d8] sm:$0xff]  ;;  %v6642_v4 = vcombine.high %v203_v61, %v207_v0  ;;  %v6641_v12 = vcombine.low %v203_v61, %v207_v0 }
 0x103   :  { %2415 = vmatpush1.bf16.msra.mxu0 %v6743_v7  ;;  %v199_v7 = vld [vmem:[%s10170_s1 + $0x4f8] sm:$0xff] }
 0x104   :  { %2458 = vmatpush1.bf16.msra.mxu1 %v6489_v9  ;;  %2416 = vmatprep.subr.bf16.mxu0 %v6736_v11  ;;  %v123_v9 = vld [vmem:[%s10170_s1 + $0x298] sm:$0xff]  ;;  %v6634_v14 = vcombine.high %v195_v6, %v199_v7 }
 0x105   :  { %2459 = vmatprep.subr.bf16.mxu1 %v6482_v13  ;;  %v127_v11 = vld [vmem:[%s10170_s1 + $0x2b8] sm:$0xff] }
 0x106   :  { %v2092_v27 = vpop.f32.mrf.mxu0  ;;  %v6562_v15 = vcombine.high %v123_v9, %v127_v11  ;;  %v339_v61 = vld [vmem:[%s10170_s1 + $0x958] sm:$0xff] }
 0x107   :  { %v2093_v30 = vadd.f32 %v2092_v27, %v369_v16  ;;  %v2135_v31 = vpop.f32.mrf.mxu1  ;;  %2417 = vmatpush1.bf16.msra.mxu0 %v6735_v17  ;;  %v191_v17 = vld [vmem:[%s10170_s1 + $0x4b8] sm:$0xff] }
 0x108   :  { %2460 = vmatpush1.bf16.msra.mxu1 %v6481_v19  ;;  %v8288_v34 = vpop.f32.mrf.mxu0  ;;  %2432 = vmatprep.subr.bf16.mxu0 %v2050_v20  ;;  %v119_v19 = vld [vmem:[%s10170_s1 + $0x278] sm:$0xff]  ;;  %v6633_v20 = vcombine.low %v195_v6, %v199_v7 }
 0x109   :  { %v8290_v37 = vadd.f32 %v2135_v31, %v2093_v30  ;;  %v8292_v38 = vpop.f32.mrf.mxu1  ;;  %2461 = vmatprep.subr.bf16.mxu1 %v6602_v23  ;;  %v6561_v23 = vcombine.low %v123_v9, %v127_v11  ;;  %v6554_v26 = vcombine.high %v115_v18, %v119_v19  ;;  %v179_v27 = vld [vmem:[%s10170_s1 + $0x458] sm:$0xff] }
 0x10a   :  { %v2096_v41 = vpop.f32.mrf.mxu0  ;;  %v111_v30 = vld [vmem:[%s10170_s1 + $0x238] sm:$0xff]  ;;  %v6617_v42 = vcombine.low %v179_v27, %v183_v28 }
 0x10b   :  { %v2097_v45 = vadd.f32 %v2096_v41, %v369_v16  ;;  %2433 = vmatpush2.bf16.msra.mxu0 %v2047_v33  ;;  %v2139_v47 = vpop.f32.mrf.mxu1  ;;  %v187_v16 = vld [vmem:[%s10170_s1 + $0x498] sm:$0xff]  ;;  %v6553_v33 = vcombine.low %v115_v18, %v119_v19  ;;  %v6545_v43 = vcombine.low %v107_v29, %v111_v30 }
 0x10c   :  { %2462 = vmatpush2.bf16.msra.mxu1 %v6601_v35  ;;  %2488 = vmatprep.subr.bf16.mxu0 %v6666_v36  ;;  %v6626_v24 = vcombine.high %v187_v16, %v191_v17  ;;  %v6625_v31 = vcombine.low %v187_v16, %v191_v17  ;;  %v6618_v35 = vcombine.high %v179_v27, %v183_v28  ;;  %v359_v41 = vld [vmem:[%s10170_s1 + $0x9f8] sm:$0xff]  ;;  %v8394_v53 = vpop.f32.mrf.mxu0 }
 0x10d   :  { %v8306_v50 = vadd.f32 %v2139_v47, %v2097_v45  ;;  %2463 = vmatprep.subr.bf16.mxu1 %v6594_v39  ;;  %v6546_v36 = vcombine.high %v107_v29, %v111_v30  ;;  %v171_v39 = vld [vmem:[%s10170_s1 + $0x418] sm:$0xff]  ;;  %v6793_v54 = vcombine.low %v355_v40, %v359_v41 }
 0x10e   :  { %2435 = vmatmul.mubr.bf16.vlgmr.msra.gmra.mxu0 %v7777_v44  ;;  %v6610_v45 = vcombine.high %v171_v39, %v175_v62  ;;  %v291_v47 = vld [vmem:[%s10170_s1 + $0x7d8] sm:$0xff]  ;;  %v6609_v52 = vcombine.low %v171_v39, %v175_v62 }
 0x10f   :  { %2489 = vmatpush1.bf16.msra.mxu0 %v6665_v46  ;;  %2520 = vmatprep.mubr.bf16.mxu0 %v7515_v63  ;;  %v135_v63 = vld [vmem:[%s10170_s1 + $0x2f8] sm:$0xff]  ;;  %v6794_v46 = vcombine.high %v355_v40, %v359_v41  ;;  %v372_v41 = vsub.s32 1, %v8242_v60 }
 0x110   :  { %2464 = vmatpush2.bf16.msra.mxu1 %v6593_v48  ;;  %2490 = vmatprep.subr.bf16.mxu0 %v6658_v49  ;;  %v6570_v5 = vcombine.high %v131_v1, %v135_v63  ;;  %v6569_v13 = vcombine.low %v131_v1, %v135_v63  ;;  %v295_v48 = vld [vmem:[%s10170_s1 + $0x7f8] sm:$0xff] }
 0x111   :  { %2465 = vmatprep.subr.bf16.mxu1 %v6586_v51  ;;  %v347_v49 = vld [vmem:[%s10170_s1 + $0x998] sm:$0xff]  ;;  %v6730_v55 = vcombine.high %v291_v47, %v295_v48  ;;  %v6729_v63 = vcombine.low %v291_v47, %v295_v48 }
 0x112   :  { %v351_v51 = vld [vmem:[%s10170_s1 + $0x9b8] sm:$0xff] }
 0x113   :  { %2491 = vmatpush1.bf16.msra.mxu0 %v6657_v56  ;;  %v6786_v56 = vcombine.high %v347_v49, %v351_v51  ;;  %v343_v0 = vld [vmem:[%s10170_s1 + $0x978] sm:$0xff] }
 0x114   :  { %2466 = vmatpush2.bf16.msra.mxu1 %v6585_v57  ;;  %2492 = vmatprep.subr.bf16.mxu0 %v6650_v58  ;;  %v283_v57 = vld [vmem:[%s10170_s1 + $0x798] sm:$0xff] }
 0x115   :  { %2467 = vmatprep.subr.bf16.mxu1 %v6578_v59  ;;  %v287_v58 = vld [vmem:[%s10170_s1 + $0x7b8] sm:$0xff] }
 0x116   :  { %v275_v6 = vld [vmem:[%s10170_s1 + $0x758] sm:$0xff] }
 0x117   :  { %2493 = vmatpush1.bf16.msra.mxu0 %v6649_v2  ;;  %v331_v7 = vld [vmem:[%s10170_s1 + $0x918] sm:$0xff] }
 0x118   :  { %2468 = vmatpush2.bf16.msra.mxu1 %v6577_v3  ;;  %2494 = vmatprep.subr.bf16.mxu0 %v6642_v4  ;;  %v6785_v3 = vcombine.low %v347_v49, %v351_v51  ;;  %v6722_v4 = vcombine.high %v283_v57, %v287_v58  ;;  %v335_v9 = vld [vmem:[%s10170_s1 + $0x938] sm:$0xff] }
 0x119   :  { %2469 = vmatprep.subr.bf16.mxu1 %v6570_v5  ;;  %v6778_v5 = vcombine.high %v339_v61, %v343_v0  ;;  %v267_v17 = vld [vmem:[%s10170_s1 + $0x718] sm:$0xff] }
 0x11a   :  { %v271_v18 = vld [vmem:[%s10170_s1 + $0x738] sm:$0xff] }
 0x11b   :  { %2495 = vmatpush1.bf16.msra.mxu0 %v6641_v12  ;;  %v6721_v12 = vcombine.low %v283_v57, %v287_v58  ;;  %v327_v19 = vld [vmem:[%s10170_s1 + $0x8f8] sm:$0xff] }
 0x11c   :  { %2470 = vmatpush2.bf16.msra.mxu1 %v6569_v13  ;;  %2496 = vmatprep.subr.bf16.mxu0 %v6634_v14  ;;  %v6777_v13 = vcombine.low %v339_v61, %v343_v0  ;;  %v259_v28 = vld [vmem:[%s10170_s1 + $0x6d8] sm:$0xff] }
 0x11d   :  { %2471 = vmatprep.subr.bf16.mxu1 %v6562_v15  ;;  %v263_v29 = vld [vmem:[%s10170_s1 + $0x6f8] sm:$0xff] }
 0x11e   :  { %v315_v30 = vld [vmem:[%s10170_s1 + $0x898] sm:$0xff] }
 0x11f   :  { %2497 = vmatpush1.bf16.msra.mxu0 %v6633_v20  ;;  %v251_v62 = vld [vmem:[%s10170_s1 + $0x698] sm:$0xff] }
 0x120   :  { %2472 = vmatpush2.bf16.msra.mxu1 %v6561_v23  ;;  %2498 = vmatprep.subr.bf16.mxu0 %v6626_v24  ;;  %v6769_v24 = vcombine.low %v331_v7, %v335_v9  ;;  %v255_v40 = vld [vmem:[%s10170_s1 + $0x6b8] sm:$0xff] }
 0x121   :  { %2473 = vmatprep.subr.bf16.mxu1 %v6554_v26  ;;  %v6706_v26 = vcombine.high %v267_v17, %v271_v18  ;;  %v6690_v47 = vcombine.high %v251_v62, %v255_v40  ;;  %v243_v49 = vld [vmem:[%s10170_s1 + $0x658] sm:$0xff]  ;;  %v6689_v57 = vcombine.low %v251_v62, %v255_v40 }
 0x122   :  { %v247_v51 = vld [vmem:[%s10170_s1 + $0x678] sm:$0xff] }
 0x123   :  { %2499 = vmatpush1.bf16.msra.mxu0 %v6625_v31  ;;  %v319_v31 = vld [vmem:[%s10170_s1 + $0x8b8] sm:$0xff]  ;;  %v6682_v61 = vcombine.high %v243_v49, %v247_v51 }
 0x124   :  { %2474 = vmatpush2.bf16.msra.mxu1 %v6553_v33  ;;  %2500 = vmatprep.subr.bf16.mxu0 %v6618_v35  ;;  %v6705_v33 = vcombine.low %v267_v17, %v271_v18  ;;  %v6754_v39 = vcombine.high %v315_v30, %v319_v31 }
 0x125   :  { %2475 = vmatprep.subr.bf16.mxu1 %v6546_v36  ;;  %v6698_v36 = vcombine.high %v259_v28, %v263_v29 }
 0x127   :  { %2501 = vmatpush1.bf16.msra.mxu0 %v6617_v42  ;;  %v307_v42 = vld [vmem:[%s10170_s1 + $0x858] sm:$0xff] }
 0x128   :  { %2476 = vmatpush2.bf16.msra.mxu1 %v6545_v43  ;;  %2502 = vmatprep.subr.bf16.mxu0 %v6610_v45  ;;  %v311_v43 = vld [vmem:[%s10170_s1 + $0x878] sm:$0xff]  ;;  %v6697_v45 = vcombine.low %v259_v28, %v263_v29 }
 0x129   :  { %2531 = vmatprep.subr.bf16.mxu1 %v6794_v46  ;;  %v6753_v46 = vcombine.low %v315_v30, %v319_v31  ;;  %v6746_v48 = vcombine.high %v307_v42, %v311_v43  ;;  %v2638_v31 = vld [vmem:[%s10172_s3 + $0x140] sm:$0xff] }
 0x12a   :  { %v2178_v59 = vpop.f32.mrf.mxu0 }
 0x12b   :  { %v2179_v1 = vadd.f32 %v2178_v59, %v8290_v37  ;;  %2478 = vmatmul.mubr.bf16.vlgmr.msra.gmra.mxu1 %v7648_v21  ;;  %2503 = vmatpush1.bf16.msra.mxu0 %v6609_v52  ;;  %v279_v37 = vld [vmem:[%s10170_s1 + $0x778] sm:$0xff]  ;;  %v373_v52 = vrot.slane %v8263_v10, %v372_v41  ;;  %v6745_v59 = vcombine.low %v307_v42, %v311_v43  ;;  %v2630_v43 = vld [vmem:[%s10172_s3 + $0x100] sm:$0xff] }
 0x12c   :  { %2532 = vmatpush1.bf16.msra.mxu1 %v6793_v54  ;;  %v8410_v2 = vpop.f32.mrf.mxu0  ;;  %2504 = vmatprep.subr.bf16.mxu0 %v6730_v55  ;;  %v6714_v14 = vcombine.high %v275_v6, %v279_v37  ;;  %v6713_v23 = vcombine.low %v275_v6, %v279_v37  ;;  %v299_v54 = vld [vmem:[%s10170_s1 + $0x818] sm:$0xff] }
 0x12d   :  { %2533 = vmatprep.subr.bf16.mxu1 %v6786_v56  ;;  %6806 = vmatprep.mubr.msk.bf16.mxu1 %vm2026_vm0, %v7667_v32  ;;  %v2574_v15 = vmax.f32 %v2179_v1, 0.0  ;;  %v6770_v32 = vcombine.high %v331_v7, %v335_v9  ;;  %v303_v55 = vld [vmem:[%s10170_s1 + $0x838] sm:$0xff]  ;;  %v2099_v58 = vadd.f32 %v8394_v53, %v373_v52  ;;  %v6681_v53 = vcombine.low %v243_v49, %v247_v51 }
 0x12e   :  { %v2182_v21 = vpop.f32.mrf.mxu0  ;;  %v363_v56 = vld [vmem:[%s10170_s1 + $0xa18] sm:$0x77]  ;;  %v6738_v0 = vcombine.high %v299_v54, %v303_v55  ;;  %v6737_v37 = vcombine.low %v299_v54, %v303_v55  ;;  %v2626_v54 = vld [vmem:[%s10172_s3 + $0xe0] sm:$0xff] }
 0x12f   :  { %v2183_v11 = vadd.f32 %v2182_v21, %v8306_v50  ;;  %2505 = vmatpush2.bf16.msra.mxu0 %v6729_v63  ;;  %v323_v50 = vld [vmem:[%s10170_s1 + $0x8d8] sm:$0xff]  ;;  %v6801_v9 = vcombine.low %v363_v56, %v363_v56  ;;  %v2750_v55 = vld [vmem:[%s10172_s3 + $0x4c0] sm:$0xff] }
 0x130   :  { %2534 = vmatpush1.bf16.msra.mxu1 %v6785_v3  ;;  %2506 = vmatprep.subr.bf16.mxu0 %v6722_v4  ;;  %v6762_v27 = vcombine.high %v323_v50, %v327_v19  ;;  %v6761_v35 = vcombine.low %v323_v50, %v327_v19  ;;  %v235_v1 = vld [vmem:[%s10170_s1 + $0x618] sm:$0xff]  ;;  %v6802_v3 = vcombine.high %v363_v56, %v363_v56  ;;  %v2184_v6 = vpop.f32.mrf.mxu0  ;;  %v2646_v19 = vld [vmem:[%s10172_s3 + $0x180] sm:$0xff] }
 0x131   :  { %v2582_v16 = vmax.f32 %v2183_v11, 0.0  ;;  %2535 = vmatprep.subr.bf16.mxu1 %v6778_v5  ;;  %v239_v63 = vld [vmem:[%s10170_s1 + $0x638] sm:$0xff]  ;;  %v2095_v4 = vadd.f32 %v8288_v34, %v373_v52  ;;  %v2141_v5 = vpop.f32.mrf.mxu1  ;;  %v2658_v34 = vld [vmem:[%s10172_s3 + $0x1e0] sm:$0xff]  ;;  %v2053_v18 = vand.u32 %v6801_v9, %v7743_v22 }
 0x132   :  { %v2142_v21 = vadd.f32 %v2141_v5, %v2099_v58  ;;  %v6674_v7 = vcombine.high %v235_v1, %v239_v63  ;;  %v2056_v11 = vand.u32 %v6802_v3, %v7743_v22  ;;  %v2778_v22 = vld [vmem:[%s10172_s3 + $0x5a0] sm:$0xff] }
 0x133   :  { %v8439_v20 = vpack.c.bf16 %v2582_v16, %v2574_v15  ;;  %2507 = vmatpush2.bf16.msra.mxu0 %v6721_v12  ;;  %v2654_v12 = vld [vmem:[%s10172_s3 + $0x1c0] sm:$0xff] }
 0x134   :  { %2536 = vmatpush1.bf16.msra.mxu1 %v6777_v13  ;;  %2508 = vmatprep.subr.bf16.mxu0 %v6714_v14  ;;  %v2138_v13 = vadd.f32 %v8292_v38, %v2095_v4  ;;  %v2185_v14 = vadd.f32 %v2184_v6, %v2142_v21  ;;  %v2782_v15 = vld [vmem:[%s10172_s3 + $0x5c0] sm:$0xff]  ;;  %v6864_v50 = vcombine.high %v2654_v12, %v2658_v34 }
 0x135   :  { %2537 = vmatprep.subr.bf16.mxu1 %v6770_v32  ;;  %v2786_v16 = vld [vmem:[%s10172_s3 + $0x5e0] sm:$0xff]  ;;  %v6673_v32 = vcombine.low %v235_v1, %v239_v63 }
 0x136   :  { %v2181_v17 = vadd.f32 %v8410_v2, %v2138_v13  ;;  %v6992_v38 = vcombine.high %v2782_v15, %v2786_v16  ;;  %v2774_v2 = vld [vmem:[%s10172_s3 + $0x580] sm:$0xff]  ;;  %v6991_v28 = vcombine.low %v2782_v15, %v2786_v16 }
 0x137   :  { %2509 = vmatpush2.bf16.msra.mxu0 %v6713_v23  ;;  %v2583_v23 = vmax.f32 %v2185_v14, 0.0  ;;  %v6984_v30 = vcombine.high %v2774_v2, %v2778_v22  ;;  %v6983_v40 = vcombine.low %v2774_v2, %v2778_v22  ;;  %v2622_v52 = vld [vmem:[%s10172_s3 + $0xc0] sm:$0xff] }
 0x138   :  { %2538 = vmatpush1.bf16.msra.mxu1 %v6769_v24  ;;  %2510 = vmatprep.subr.bf16.mxu0 %v6706_v26  ;;  %v2650_v24 = vld [vmem:[%s10172_s3 + $0x1a0] sm:$0xff]  ;;  %v6863_v26 = vcombine.low %v2654_v12, %v2658_v34  ;;  %v6831_v4 = vcombine.low %v2622_v52, %v2626_v54 }
 0x139   :  { %2539 = vmatprep.subr.bf16.mxu1 %v6762_v27  ;;  %v2575_v27 = vmax.f32 %v2181_v17, 0.0  ;;  %v6856_v29 = vcombine.high %v2646_v19, %v2650_v24  ;;  %v6855_v62 = vcombine.low %v2646_v19, %v2650_v24  ;;  %v2754_v56 = vld [vmem:[%s10172_s3 + $0x4e0] sm:$0xff] }
 0x13a   :  { %v2618_v1 = vld [vmem:[%s10172_s3 + $0xa0] sm:$0xff]  ;;  %v6959_v5 = vcombine.low %v2750_v55, %v2754_v56 }
 0x13b   :  { %2511 = vmatpush2.bf16.msra.mxu0 %v6705_v33  ;;  %v2642_v33 = vld [vmem:[%s10172_s3 + $0x160] sm:$0xff] }
 0x13c   :  { %2540 = vmatpush1.bf16.msra.mxu1 %v6761_v35  ;;  %2512 = vmatprep.subr.bf16.mxu0 %v6698_v36  ;;  %v8526_v35 = vpack.c.bf16 %v2583_v23, %v2575_v27  ;;  %v2766_v36 = vld [vmem:[%s10172_s3 + $0x540] sm:$0xff]  ;;  %v6848_v42 = vcombine.high %v2638_v31, %v2642_v33 }
 0x13d   :  { %2541 = vmatprep.subr.bf16.mxu1 %v6754_v39  ;;  %v2770_v39 = vld [vmem:[%s10172_s3 + $0x560] sm:$0xff] }
 0x13e   :  { %v2742_v63 = vld [vmem:[%s10172_s3 + $0x480] sm:$0xff] }
 0x13f   :  { %2513 = vmatpush2.bf16.msra.mxu0 %v6697_v45  ;;  %v2634_v45 = vld [vmem:[%s10172_s3 + $0x120] sm:$0xff] }
 0x140   :  { %2542 = vmatpush1.bf16.msra.mxu1 %v6753_v46  ;;  %2514 = vmatprep.subr.bf16.mxu0 %v6690_v47  ;;  %v2762_v46 = vld [vmem:[%s10172_s3 + $0x520] sm:$0xff]  ;;  %v6847_v47 = vcombine.low %v2638_v31, %v2642_v33  ;;  %v6840_v49 = vcombine.high %v2630_v43, %v2634_v45 }
 0x141   :  { %2543 = vmatprep.subr.bf16.mxu1 %v6746_v48  ;;  %v6975_v48 = vcombine.low %v2766_v36, %v2770_v39  ;;  %v2746_v3 = vld [vmem:[%s10172_s3 + $0x4a0] sm:$0xff] }
 0x142   :  { %v2606_v21 = vld [vmem:[%s10172_s3 + $0x40] sm:$0xff]  ;;  %v6951_v34 = vcombine.low %v2742_v63, %v2746_v3 }
 0x143   :  { %2515 = vmatpush2.bf16.msra.mxu0 %v6689_v57  ;;  %v6839_v57 = vcombine.low %v2630_v43, %v2634_v45  ;;  %v2734_v9 = vld [vmem:[%s10172_s3 + $0x440] sm:$0xff] }
 0x144   :  { %2544 = vmatpush1.bf16.msra.mxu1 %v6745_v59  ;;  %2516 = vmatprep.subr.bf16.mxu0 %v6682_v61  ;;  %v6832_v59 = vcombine.high %v2622_v52, %v2626_v54  ;;  %v6960_v61 = vcombine.high %v2750_v55, %v2754_v56  ;;  %v2598_v16 = vld [vmem:[%s10172_s3] sm:$0xff] }
 0x145   :  { %2545 = vmatprep.subr.bf16.mxu1 %v6738_v0  ;;  %v2614_v0 = vld [vmem:[%s10172_s3 + $0x80] sm:$0xff] }
 0x146   :  { %v6824_v6 = vcombine.high %v2614_v0, %v2618_v1  ;;  %v6823_v12 = vcombine.low %v2614_v0, %v2618_v1  ;;  %v2726_v17 = vld [vmem:[%s10172_s3 + $0x400] sm:$0xff] }
 0x147   :  { %2517 = vmatpush2.bf16.msra.mxu0 %v6681_v53  ;;  %v8573_v53 = vpop.f32.mrf.mxu1  ;;  %v2718_v22 = vld [vmem:[%s10172_s3 + $0x3c0] sm:$0xff] }
 0x148   :  { %2546 = vmatpush1.bf16.msra.mxu1 %v6737_v37  ;;  %2518 = vmatprep.subr.bf16.mxu0 %v6674_v7  ;;  %v6952_v37 = vcombine.high %v2742_v63, %v2746_v3  ;;  %v2610_v7 = vld [vmem:[%s10172_s3 + $0x60] sm:$0xff] }
 0x149   :  { %2561 = vmatprep.subr.bf16.mxu1 %v2056_v11  ;;  %v2738_v11 = vld [vmem:[%s10172_s3 + $0x460] sm:$0xff]  ;;  %v6816_v13 = vcombine.high %v2606_v21, %v2610_v7  ;;  %v2223_v14 = vpop.f32.mrf.mxu1 }
 0x14a   :  { %v6944_v15 = vcombine.high %v2734_v9, %v2738_v11  ;;  %v6943_v19 = vcombine.low %v2734_v9, %v2738_v11  ;;  %v2846_v27 = vld [vmem:[%s10172_s3 + $0x7c0] sm:$0xff] }
 0x14b   :  { %2519 = vmatpush2.bf16.msra.mxu0 %v6673_v32  ;;  %v2602_v32 = vld [vmem:[%s10172_s3 + $0x20] sm:$0xff]  ;;  %v8600_v24 = vpop.f32.mrf.mxu1 }
 0x14c   :  { %2562 = vmatpush2.bf16.msra.mxu1 %v2053_v18  ;;  %5712 = vmatprep.subr.bf16.mxu0 %v6864_v50  ;;  %v2730_v18 = vld [vmem:[%s10172_s3 + $0x420] sm:$0xff]  ;;  %v380_v50 = vsub.s32 3, %v8242_v60  ;;  %v6808_v23 = vcombine.high %v2598_v16, %v2602_v32 }
 0x14d   :  { %5755 = vmatprep.subr.bf16.mxu1 %v6992_v38  ;;  %v6815_v38 = vcombine.low %v2606_v21, %v2610_v7  ;;  %v6936_v2 = vcombine.high %v2726_v17, %v2730_v18  ;;  %v6935_v31 = vcombine.low %v2726_v17, %v2730_v18  ;;  %v2842_v43 = vld [vmem:[%s10172_s3 + $0x7a0] sm:$0xff] }
 0x14e   :  { %2521 = vmatmul.mubr.bf16.vlgmr.msra.gmra.mxu0 %v7659_v25  ;;  %v6976_v25 = vcombine.high %v2766_v36, %v2770_v39  ;;  %v2227_v36 = vpop.f32.mrf.mxu1  ;;  %v2702_v55 = vld [vmem:[%s10172_s3 + $0x340] sm:$0xff] }
 0x14f   :  { %2564 = vmatmul.mubr.bf16.vlgmr.msra.gmra.mxu1 %v7777_v44  ;;  %5713 = vmatpush1.bf16.msra.mxu0 %v6863_v26  ;;  %v2758_v44 = vld [vmem:[%s10172_s3 + $0x500] sm:$0xff] }
 0x150   :  { %5744 = vmatprep.mubr.bf16.mxu0 %v8526_v35  ;;  %5756 = vmatpush1.bf16.msra.mxu1 %v6991_v28  ;;  %v6968_v51 = vcombine.high %v2758_v44, %v2762_v46  ;;  %v6967_v58 = vcombine.low %v2758_v44, %v2762_v46  ;;  %v2722_v26 = vld [vmem:[%s10172_s3 + $0x3e0] sm:$0xff] }
 0x151   :  { %5714 = vmatprep.subr.bf16.mxu0 %v6856_v29  ;;  %5757 = vmatprep.subr.bf16.mxu1 %v6984_v30  ;;  %v2850_v28 = vld [vmem:[%s10172_s3 + $0x7e0] sm:$0xff]  ;;  %v381_v29 = vrot.slane %v8263_v10, %v380_v50  ;;  %v6807_v30 = vcombine.low %v2598_v16, %v2602_v32  ;;  %v6928_v33 = vcombine.high %v2718_v22, %v2722_v26 }
 0x152   :  { %v7056_v39 = vcombine.high %v2846_v27, %v2850_v28  ;;  %v6927_v46 = vcombine.low %v2718_v22, %v2722_v26  ;;  %v2706_v56 = vld [vmem:[%s10172_s3 + $0x360] sm:$0xff] }
 0x153   :  { %5715 = vmatpush1.bf16.msra.mxu0 %v6855_v62  ;;  %v2710_v62 = vld [vmem:[%s10172_s3 + $0x380] sm:$0xff]  ;;  %v2224_v45 = vadd.f32 %v2223_v14, %v381_v29 }
 0x154   :  { %5758 = vmatpush1.bf16.msra.mxu1 %v6983_v40  ;;  %5716 = vmatprep.subr.bf16.mxu0 %v6848_v42  ;;  %v2714_v40 = vld [vmem:[%s10172_s3 + $0x3a0] sm:$0xff] }
 0x155   :  { %5759 = vmatprep.subr.bf16.mxu1 %v6976_v25  ;;  %v2838_v25 = vld [vmem:[%s10172_s3 + $0x780] sm:$0xff]  ;;  %v6919_v1 = vcombine.low %v2710_v62, %v2714_v40 }
 0x156   :  { %v7048_v54 = vcombine.high %v2838_v25, %v2842_v43  ;;  %v7047_v3 = vcombine.low %v2838_v25, %v2842_v43  ;;  %v2694_v21 = vld [vmem:[%s10172_s3 + $0x300] sm:$0xff] }
 0x157   :  { %5717 = vmatpush1.bf16.msra.mxu0 %v6847_v47  ;;  %v2698_v7 = vld [vmem:[%s10172_s3 + $0x320] sm:$0xff] }
 0x158   :  { %5760 = vmatpush1.bf16.msra.mxu1 %v6975_v48  ;;  %5718 = vmatprep.subr.bf16.mxu0 %v6840_v49  ;;  %v7055_v48 = vcombine.low %v2846_v27, %v2850_v28  ;;  %v6920_v49 = vcombine.high %v2710_v62, %v2714_v40  ;;  %v2822_v11 = vld [vmem:[%s10172_s3 + $0x700] sm:$0xff]  ;;  %v6903_v26 = vcombine.low %v2694_v21, %v2698_v7 }
 0x159   :  { %5761 = vmatprep.subr.bf16.mxu1 %v6968_v51  ;;  %v2686_v18 = vld [vmem:[%s10172_s3 + $0x2c0] sm:$0xff] }
 0x15b   :  { %5719 = vmatpush1.bf16.msra.mxu0 %v6839_v57 }
 0x15c   :  { %5762 = vmatpush1.bf16.msra.mxu1 %v6967_v58  ;;  %5720 = vmatprep.subr.bf16.mxu0 %v6832_v59  ;;  %v2830_v58 = vld [vmem:[%s10172_s3 + $0x740] sm:$0xff] }
 0x15d   :  { %5763 = vmatprep.subr.bf16.mxu1 %v6960_v61  ;;  %v2834_v59 = vld [vmem:[%s10172_s3 + $0x760] sm:$0xff]  ;;  %v2228_v61 = vadd.f32 %v2227_v36, %v381_v29 }
 0x15e   :  { %v7039_v14 = vcombine.low %v2830_v58, %v2834_v59  ;;  %v2810_v36 = vld [vmem:[%s10172_s3 + $0x6a0] sm:$0xff] }
 0x15f   :  { %5721 = vmatpush1.bf16.msra.mxu0 %v6831_v4  ;;  %v6912_v4 = vcombine.high %v2702_v55, %v2706_v56 }
 0x160   :  { %5764 = vmatpush1.bf16.msra.mxu1 %v6959_v5  ;;  %5722 = vmatprep.subr.bf16.mxu0 %v6824_v6 }
 0x161   :  { %5765 = vmatprep.subr.bf16.mxu1 %v6952_v37  ;;  %v7040_v37 = vcombine.high %v2830_v58, %v2834_v59  ;;  %v2662_v58 = vld [vmem:[%s10172_s3 + $0x200] sm:$0xff] }
 0x162   :  { %v2790_v59 = vld [vmem:[%s10172_s3 + $0x600] sm:$0xff] }
 0x163   :  { %5723 = vmatpush1.bf16.msra.mxu0 %v6823_v12  ;;  %v2826_v12 = vld [vmem:[%s10172_s3 + $0x720] sm:$0xff] }
 0x164   :  { %5766 = vmatpush1.bf16.msra.mxu1 %v6951_v34  ;;  %5724 = vmatprep.subr.bf16.mxu0 %v6816_v13  ;;  %v6911_v13 = vcombine.low %v2702_v55, %v2706_v56  ;;  %v7032_v17 = vcombine.high %v2822_v11, %v2826_v12  ;;  %v7031_v27 = vcombine.low %v2822_v11, %v2826_v12  ;;  %v2902_v12 = vld [vmem:[%s10172_s3 + $0x980] sm:$0xff] }
 0x165   :  { %5767 = vmatprep.subr.bf16.mxu1 %v6944_v15  ;;  %v6904_v15 = vcombine.high %v2694_v21, %v2698_v7 }
 0x167   :  { %5725 = vmatpush1.bf16.msra.mxu0 %v6815_v38  ;;  %v2690_v38 = vld [vmem:[%s10172_s3 + $0x2e0] sm:$0xff] }
 0x168   :  { %5768 = vmatpush1.bf16.msra.mxu1 %v6943_v19  ;;  %5726 = vmatprep.subr.bf16.mxu0 %v6808_v23  ;;  %v2814_v19 = vld [vmem:[%s10172_s3 + $0x6c0] sm:$0xff]  ;;  %v6896_v28 = vcombine.high %v2686_v18, %v2690_v38  ;;  %v6895_v62 = vcombine.low %v2686_v18, %v2690_v38 }
 0x169   :  { %5769 = vmatprep.subr.bf16.mxu1 %v6936_v2  ;;  %v2818_v23 = vld [vmem:[%s10172_s3 + $0x6e0] sm:$0xff]  ;;  %v376_v2 = vsub.s32 2, %v8242_v60 }
 0x16a   :  { %v8623_v42 = vpop.f32.mrf.mxu0  ;;  %v7024_v29 = vcombine.high %v2814_v19, %v2818_v23  ;;  %v7023_v40 = vcombine.low %v2814_v19, %v2818_v23  ;;  %v2894_v38 = vld [vmem:[%s10172_s3 + $0x940] sm:$0xff] }
 0x16b   :  { %v8631_v44 = vpop.f32.mrf.mxu1  ;;  %5727 = vmatpush1.bf16.msra.mxu0 %v6807_v30  ;;  %v2678_v30 = vld [vmem:[%s10172_s3 + $0x280] sm:$0xff] }
 0x16c   :  { %5770 = vmatpush1.bf16.msra.mxu1 %v6935_v31  ;;  %v2266_v47 = vpop.f32.mrf.mxu0  ;;  %5728 = vmatprep.subr.bf16.mxu0 %v6928_v33  ;;  %v2682_v31 = vld [vmem:[%s10172_s3 + $0x2a0] sm:$0xff] }
 0x16d   :  { %v2267_v51 = vadd.f32 %v2266_v47, %v2224_v45  ;;  %v2309_v52 = vpop.f32.mrf.mxu1  ;;  %5771 = vmatprep.subr.bf16.mxu1 %v7056_v39  ;;  %v2806_v33 = vld [vmem:[%s10172_s3 + $0x680] sm:$0xff]  ;;  %v377_v39 = vrot.slane %v8263_v10, %v376_v2  ;;  %v6888_v25 = vcombine.high %v2678_v30, %v2682_v31 }
 0x16e   :  { %v8639_v57 = vpop.f32.mrf.mxu0  ;;  %v7016_v43 = vcombine.high %v2806_v33, %v2810_v36  ;;  %v2670_v45 = vld [vmem:[%s10172_s3 + $0x240] sm:$0xff] }
 0x16f   :  { %v8647_v0 = vpop.f32.mrf.mxu1  ;;  %5729 = vmatpush2.bf16.msra.mxu0 %v6927_v46  ;;  %v2310_v5 = vadd.f32 %v2309_v52, %v2267_v51  ;;  %v2674_v46 = vld [vmem:[%s10172_s3 + $0x260] sm:$0xff]  ;;  %v7015_v51 = vcombine.low %v2806_v33, %v2810_v36 }
 0x170   :  { %5772 = vmatpush2.bf16.msra.mxu1 %v7055_v48  ;;  %v2270_v63 = vpop.f32.mrf.mxu0  ;;  %5730 = vmatprep.subr.bf16.mxu0 %v6920_v49  ;;  %v2798_v10 = vld [vmem:[%s10172_s3 + $0x640] sm:$0xff]  ;;  %v2226_v48 = vadd.f32 %v8600_v24, %v377_v39  ;;  %v6887_v49 = vcombine.low %v2678_v30, %v2682_v31  ;;  %v6880_v52 = vcombine.high %v2670_v45, %v2674_v46 }
 0x171   :  { %v2271_v6 = vadd.f32 %v2270_v63, %v2228_v61  ;;  %5773 = vmatprep.subr.bf16.mxu1 %v7048_v54  ;;  %v2313_v9 = vpop.f32.mrf.mxu1  ;;  %v2577_v16 = vmax.f32 %v2310_v5, 0.0  ;;  %v2802_v47 = vld [vmem:[%s10172_s3 + $0x660] sm:$0xff]  ;;  %v2222_v54 = vadd.f32 %v8573_v53, %v377_v39  ;;  %v6879_v61 = vcombine.low %v2670_v45, %v2674_v46 }
 0x172   :  { %v2269_v55 = vadd.f32 %v8639_v57, %v2226_v48  ;;  %v7008_v56 = vcombine.high %v2798_v10, %v2802_v47  ;;  %v2666_v24 = vld [vmem:[%s10172_s3 + $0x220] sm:$0xff] }
 0x173   :  { %v2314_v34 = vadd.f32 %v2313_v9, %v2271_v6  ;;  %5731 = vmatpush2.bf16.msra.mxu0 %v6919_v1  ;;  %v2794_v53 = vld [vmem:[%s10172_s3 + $0x620] sm:$0xff]  ;;  %v2265_v57 = vadd.f32 %v8623_v42, %v2222_v54  ;;  %v7007_v1 = vcombine.low %v2798_v10, %v2802_v47  ;;  %v6872_v63 = vcombine.high %v2662_v58, %v2666_v24 }
 0x174   :  { %5774 = vmatpush2.bf16.msra.mxu1 %v7047_v3  ;;  %5732 = vmatprep.subr.bf16.mxu0 %v6912_v4  ;;  %v2312_v3 = vadd.f32 %v8647_v0, %v2269_v55  ;;  %v7000_v4 = vcombine.high %v2790_v59, %v2794_v53  ;;  %v2910_v5 = vld [vmem:[%s10172_s3 + $0x9c0] sm:$0xff]  ;;  %v6871_v21 = vcombine.low %v2662_v58, %v2666_v24 }
 0x175   :  { %v2585_v32 = vmax.f32 %v2314_v34, 0.0  ;;  %5775 = vmatprep.subr.bf16.mxu1 %v7040_v37  ;;  %v2914_v6 = vld [vmem:[%s10172_s3 + $0x9e0] sm:$0xff]  ;;  %v2308_v0 = vadd.f32 %v8631_v44, %v2265_v57  ;;  %v6999_v7 = vcombine.low %v2790_v59, %v2794_v53  ;;  %v8801_v53 = vld [vmem:[%s10172_s3 + $0x5c8] sm:$0xff] }
 0x176   :  { %v3038_v42 = vld [vmem:[%s10172_s3 + $0xdc0] sm:$0xff]  ;;  %v7120_v9 = vcombine.high %v2910_v5, %v2914_v6  ;;  %v2584_v11 = vmax.f32 %v2312_v3, 0.0  ;;  %v8806_v57 = vld [vmem:[%s10172_s3 + $0x5e8] sm:$0xff] }
 0x177   :  { %v8674_v22 = vpack.c.bf16 %v2585_v32, %v2577_v16  ;;  %5733 = vmatpush2.bf16.msra.mxu0 %v6911_v13  ;;  %v3042_v37 = vld [vmem:[%s10172_s3 + $0xde0] sm:$0xff]  ;;  %v7119_v16 = vcombine.low %v2910_v5, %v2914_v6  ;;  %v6993_v5 = vcombine.low %v8801_v53, %v8806_v57 }
 0x178   :  { %5776 = vmatpush2.bf16.msra.mxu1 %v7039_v14  ;;  %5734 = vmatprep.subr.bf16.mxu0 %v6904_v15  ;;  %v2906_v34 = vld [vmem:[%s10172_s3 + $0x9a0] sm:$0xff]  ;;  %v7248_v13 = vcombine.high %v3038_v42, %v3042_v37  ;;  %v2576_v15 = vmax.f32 %v2308_v0, 0.0 }
 0x179   :  { %5787 = vmatprep.mubr.bf16.mxu1 %v8674_v22  ;;  %5777 = vmatprep.subr.bf16.mxu1 %v7032_v17  ;;  %v3030_v44 = vld [vmem:[%s10172_s3 + $0xd80] sm:$0xff]  ;;  %v7112_v32 = vcombine.high %v2902_v12, %v2906_v34  ;;  %v7247_v17 = vcombine.low %v3038_v42, %v3042_v37 }
 0x17a   :  { %v3034_v14 = vld [vmem:[%s10172_s3 + $0xda0] sm:$0xff]  ;;  %v8746_v18 = vpack.c.bf16 %v2584_v11, %v2576_v15 }
 0x17b   :  { %5735 = vmatpush2.bf16.msra.mxu0 %v6903_v26  ;;  %v2898_v19 = vld [vmem:[%s10172_s3 + $0x960] sm:$0xff]  ;;  %v7240_v23 = vcombine.high %v3030_v44, %v3034_v14  ;;  %v7239_v30 = vcombine.low %v3030_v44, %v3034_v14 }
 0x17c   :  { %5778 = vmatpush2.bf16.msra.mxu1 %v7031_v27  ;;  %5736 = vmatprep.subr.bf16.mxu0 %v6896_v28  ;;  %v3022_v26 = vld [vmem:[%s10172_s3 + $0xd40] sm:$0xff]  ;;  %v7111_v28 = vcombine.low %v2902_v12, %v2906_v34 }
 0x17d   :  { %5779 = vmatprep.subr.bf16.mxu1 %v7024_v29  ;;  %v3026_v27 = vld [vmem:[%s10172_s3 + $0xd60] sm:$0xff]  ;;  %v7104_v29 = vcombine.high %v2894_v38, %v2898_v19 }
 0x17e   :  { %v2886_v31 = vld [vmem:[%s10172_s3 + $0x900] sm:$0xff]  ;;  %v7232_v36 = vcombine.high %v3022_v26, %v3026_v27 }
 0x17f   :  { %5737 = vmatpush2.bf16.msra.mxu0 %v6895_v62  ;;  %v2890_v33 = vld [vmem:[%s10172_s3 + $0x920] sm:$0xff] }
 0x180   :  { %5780 = vmatpush2.bf16.msra.mxu1 %v7023_v40  ;;  %5738 = vmatprep.subr.bf16.mxu0 %v6888_v25  ;;  %v3014_v39 = vld [vmem:[%s10172_s3 + $0xd00] sm:$0xff]  ;;  %v7103_v40 = vcombine.low %v2894_v38, %v2898_v19  ;;  %v7096_v25 = vcombine.high %v2886_v31, %v2890_v33 }
 0x181   :  { %5781 = vmatprep.subr.bf16.mxu1 %v7016_v43  ;;  %v3018_v62 = vld [vmem:[%s10172_s3 + $0xd20] sm:$0xff]  ;;  %v7231_v43 = vcombine.low %v3022_v26, %v3026_v27 }
 0x182   :  { %v2878_v45 = vld [vmem:[%s10172_s3 + $0x8c0] sm:$0xff]  ;;  %v7224_v10 = vcombine.high %v3014_v39, %v3018_v62 }
 0x183   :  { %5739 = vmatpush2.bf16.msra.mxu0 %v6887_v49  ;;  %v2882_v46 = vld [vmem:[%s10172_s3 + $0x8e0] sm:$0xff]  ;;  %v7095_v49 = vcombine.low %v2886_v31, %v2890_v33 }
 0x184   :  { %5782 = vmatpush2.bf16.msra.mxu1 %v7015_v51  ;;  %5740 = vmatprep.subr.bf16.mxu0 %v6880_v52  ;;  %v3006_v47 = vld [vmem:[%s10172_s3 + $0xcc0] sm:$0xff]  ;;  %v7088_v51 = vcombine.high %v2878_v45, %v2882_v46  ;;  %v7223_v52 = vcombine.low %v3014_v39, %v3018_v62  ;;  %v7087_v59 = vcombine.low %v2878_v45, %v2882_v46 }
 0x185   :  { %5783 = vmatprep.subr.bf16.mxu1 %v7008_v56  ;;  %v3010_v48 = vld [vmem:[%s10172_s3 + $0xce0] sm:$0xff] }
 0x186   :  { %v2870_v54 = vld [vmem:[%s10172_s3 + $0x880] sm:$0xff]  ;;  %v7216_v56 = vcombine.high %v3006_v47, %v3010_v48 }
 0x187   :  { %5741 = vmatpush2.bf16.msra.mxu0 %v6879_v61  ;;  %v2874_v55 = vld [vmem:[%s10172_s3 + $0x8a0] sm:$0xff] }
 0x188   :  { %5784 = vmatpush2.bf16.msra.mxu1 %v7007_v1  ;;  %5742 = vmatprep.subr.bf16.mxu0 %v6872_v63  ;;  %v2998_v58 = vld [vmem:[%s10172_s3 + $0xc80] sm:$0xff]  ;;  %v7080_v61 = vcombine.high %v2870_v54, %v2874_v55  ;;  %v7215_v1 = vcombine.low %v3006_v47, %v3010_v48  ;;  %v7079_v37 = vcombine.low %v2870_v54, %v2874_v55 }
 0x189   :  { %5785 = vmatprep.subr.bf16.mxu1 %v7000_v4  ;;  %v3002_v24 = vld [vmem:[%s10172_s3 + $0xca0] sm:$0xff] }
 0x18a   :  { %v2862_v63 = vld [vmem:[%s10172_s3 + $0x840] sm:$0xff]  ;;  %v7208_v4 = vcombine.high %v2998_v58, %v3002_v24 }
 0x18b   :  { %5743 = vmatpush2.bf16.msra.mxu0 %v6871_v21  ;;  %v2866_v3 = vld [vmem:[%s10172_s3 + $0x860] sm:$0xff]  ;;  %v7207_v21 = vcombine.low %v2998_v58, %v3002_v24 }
 0x18c   :  { %5786 = vmatpush2.bf16.msra.mxu1 %v6999_v7  ;;  %5798 = vmatprep.subr.bf16.mxu0 %v7120_v9  ;;  %v2990_v6 = vld [vmem:[%s10172_s3 + $0xc40] sm:$0xff]  ;;  %v7072_v0 = vcombine.high %v2862_v63, %v2866_v3 }
 0x18d   :  { %5841 = vmatprep.subr.bf16.mxu1 %v7248_v13  ;;  %v2994_v42 = vld [vmem:[%s10172_s3 + $0xc60] sm:$0xff]  ;;  %v7071_v13 = vcombine.low %v2862_v63, %v2866_v3 }
 0x18e   :  { %5745 = vmatmul.mubr.bf16.vlgmr.msra.gmra.mxu0 %v8439_v20  ;;  %v2854_v7 = vld [vmem:[%s10172_s3 + $0x800] sm:$0xff]  ;;  %v7200_v11 = vcombine.high %v2990_v6, %v2994_v42  ;;  %v7199_v14 = vcombine.low %v2990_v6, %v2994_v42 }
 0x18f   :  { %5788 = vmatmul.mubr.bf16.vlgmr.msra.gmra.mxu1 %v8746_v18  ;;  %5799 = vmatpush1.bf16.msra.mxu0 %v7119_v16  ;;  %v2858_v9 = vld [vmem:[%s10172_s3 + $0x820] sm:$0xff] }
 0x190   :  { %5800 = vmatprep.subr.bf16.mxu0 %v7112_v32  ;;  %5842 = vmatpush1.bf16.msra.mxu1 %v7247_v17  ;;  %v2982_v12 = vld [vmem:[%s10172_s3 + $0xc00] sm:$0xff]  ;;  %v7064_v44 = vcombine.high %v2854_v7, %v2858_v9  ;;  %v7063_v19 = vcombine.low %v2854_v7, %v2858_v9 }
 0x191   :  { %5843 = vmatprep.subr.bf16.mxu1 %v7240_v23  ;;  %v2986_v34 = vld [vmem:[%s10172_s3 + $0xc20] sm:$0xff] }
 0x192   :  { %v2974_v15 = vld [vmem:[%s10172_s3 + $0xbc0] sm:$0xff]  ;;  %v7192_v32 = vcombine.high %v2982_v12, %v2986_v34  ;;  %v7191_v26 = vcombine.low %v2982_v12, %v2986_v34 }
 0x193   :  { %5801 = vmatpush1.bf16.msra.mxu0 %v7111_v28  ;;  %v2978_v16 = vld [vmem:[%s10172_s3 + $0xbe0] sm:$0xff] }
 0x194   :  { %5802 = vmatprep.subr.bf16.mxu0 %v7104_v29  ;;  %5844 = vmatpush1.bf16.msra.mxu1 %v7239_v30  ;;  %v3102_v17 = vld [vmem:[%s10172_s3 + $0xfc0] sm:$0xff]  ;;  %v7184_v23 = vcombine.high %v2974_v15, %v2978_v16  ;;  %v7183_v33 = vcombine.low %v2974_v15, %v2978_v16 }
 0x195   :  { %5845 = vmatprep.subr.bf16.mxu1 %v7232_v36  ;;  %v3106_v38 = vld [vmem:[%s10172_s3 + $0xfe0] sm:$0xff] }
 0x196   :  { %v2966_v27 = vld [vmem:[%s10172_s3 + $0xb80] sm:$0xff]  ;;  %v7312_v29 = vcombine.high %v3102_v17, %v3106_v38  ;;  %v7311_v39 = vcombine.low %v3102_v17, %v3106_v38 }
 0x197   :  { %5803 = vmatpush1.bf16.msra.mxu0 %v7103_v40  ;;  %v2970_v28 = vld [vmem:[%s10172_s3 + $0xba0] sm:$0xff] }
 0x198   :  { %5804 = vmatprep.subr.bf16.mxu0 %v7096_v25  ;;  %5846 = vmatpush1.bf16.msra.mxu1 %v7231_v43  ;;  %v3094_v30 = vld [vmem:[%s10172_s3 + $0xf80] sm:$0xff]  ;;  %v7176_v36 = vcombine.high %v2966_v27, %v2970_v28  ;;  %v7175_v46 = vcombine.low %v2966_v27, %v2970_v28 }
 0x199   :  { %5847 = vmatprep.subr.bf16.mxu1 %v7224_v10  ;;  %v3098_v31 = vld [vmem:[%s10172_s3 + $0xfa0] sm:$0xff] }
 0x19a   :  { %v2958_v62 = vld [vmem:[%s10172_s3 + $0xb40] sm:$0xff]  ;;  %v7304_v25 = vcombine.high %v3094_v30, %v3098_v31  ;;  %v7303_v47 = vcombine.low %v3094_v30, %v3098_v31 }
 0x19b   :  { %5805 = vmatpush1.bf16.msra.mxu0 %v7095_v49  ;;  %v2962_v40 = vld [vmem:[%s10172_s3 + $0xb60] sm:$0xff] }
 0x19c   :  { %5806 = vmatprep.subr.bf16.mxu0 %v7088_v51  ;;  %5848 = vmatpush1.bf16.msra.mxu1 %v7223_v52  ;;  %v3086_v43 = vld [vmem:[%s10172_s3 + $0xf40] sm:$0xff]  ;;  %v7168_v10 = vcombine.high %v2958_v62, %v2962_v40  ;;  %v7167_v55 = vcombine.low %v2958_v62, %v2962_v40  ;;  %v2659_v62 = vld [vmem:[%s10172_s3 + $0x1e8] sm:$0xff] }
 0x19d   :  { %5849 = vmatprep.subr.bf16.mxu1 %v7216_v56  ;;  %v3090_v45 = vld [vmem:[%s10172_s3 + $0xf60] sm:$0xff] }
 0x19e   :  { %v2950_v48 = vld [vmem:[%s10172_s3 + $0xb00] sm:$0xff]  ;;  %v7296_v51 = vcombine.high %v3086_v43, %v3090_v45  ;;  %v7295_v58 = vcombine.low %v3086_v43, %v3090_v45 }
 0x19f   :  { %5807 = vmatpush1.bf16.msra.mxu0 %v7087_v59  ;;  %v2954_v49 = vld [vmem:[%s10172_s3 + $0xb20] sm:$0xff] }
 0x1a0   :  { %5808 = vmatprep.subr.bf16.mxu0 %v7080_v61  ;;  %5850 = vmatpush1.bf16.msra.mxu1 %v7215_v1  ;;  %v3078_v52 = vld [vmem:[%s10172_s3 + $0xf00] sm:$0xff]  ;;  %v7160_v56 = vcombine.high %v2950_v48, %v2954_v49  ;;  %v7159_v3 = vcombine.low %v2950_v48, %v2954_v49 }
 0x1a1   :  { %5851 = vmatprep.subr.bf16.mxu1 %v7208_v4  ;;  %v3082_v54 = vld [vmem:[%s10172_s3 + $0xf20] sm:$0xff] }
 0x1a2   :  { %v2942_v24 = vld [vmem:[%s10172_s3 + $0xac0] sm:$0xff]  ;;  %v7288_v61 = vcombine.high %v3078_v52, %v3082_v54  ;;  %v7287_v6 = vcombine.low %v3078_v52, %v3082_v54 }
 0x1a3   :  { %5809 = vmatpush1.bf16.msra.mxu0 %v7079_v37  ;;  %v2946_v59 = vld [vmem:[%s10172_s3 + $0xae0] sm:$0xff] }
 0x1a4   :  { %5810 = vmatprep.subr.bf16.mxu0 %v7072_v0  ;;  %5852 = vmatpush1.bf16.msra.mxu1 %v7207_v21  ;;  %v3070_v1 = vld [vmem:[%s10172_s3 + $0xec0] sm:$0xff]  ;;  %v7152_v4 = vcombine.high %v2942_v24, %v2946_v59  ;;  %v7151_v9 = vcombine.low %v2942_v24, %v2946_v59 }
 0x1a5   :  { %5853 = vmatprep.subr.bf16.mxu1 %v7200_v11  ;;  %v3074_v63 = vld [vmem:[%s10172_s3 + $0xee0] sm:$0xff] }
 0x1a6   :  { %v2934_v42 = vld [vmem:[%s10172_s3 + $0xa80] sm:$0xff]  ;;  %v7280_v0 = vcombine.high %v3070_v1, %v3074_v63  ;;  %v7279_v12 = vcombine.low %v3070_v1, %v3074_v63 }
 0x1a7   :  { %5811 = vmatpush1.bf16.msra.mxu0 %v7071_v13  ;;  %v2938_v37 = vld [vmem:[%s10172_s3 + $0xaa0] sm:$0xff] }
 0x1a8   :  { %5812 = vmatprep.subr.bf16.mxu0 %v7064_v44  ;;  %5854 = vmatpush1.bf16.msra.mxu1 %v7199_v14  ;;  %v3062_v21 = vld [vmem:[%s10172_s3 + $0xe80] sm:$0xff]  ;;  %v7144_v11 = vcombine.high %v2934_v42, %v2938_v37  ;;  %v7143_v16 = vcombine.low %v2934_v42, %v2938_v37 }
 0x1a9   :  { %5855 = vmatprep.subr.bf16.mxu1 %v7192_v32  ;;  %v3066_v7 = vld [vmem:[%s10172_s3 + $0xea0] sm:$0xff] }
 0x1aa   :  { %v2926_v34 = vld [vmem:[%s10172_s3 + $0xa40] sm:$0xff]  ;;  %v7272_v44 = vcombine.high %v3062_v21, %v3066_v7  ;;  %v2350_v32 = vpop.f32.mrf.mxu0  ;;  %v7271_v38 = vcombine.low %v3062_v21, %v3066_v7 }
 0x1ab   :  { %5813 = vmatpush1.bf16.msra.mxu0 %v7063_v19  ;;  %v2930_v13 = vld [vmem:[%s10172_s3 + $0xa60] sm:$0xff]  ;;  %v2393_v43 = vpop.f32.mrf.mxu1 }
 0x1ac   :  { %5814 = vmatprep.subr.bf16.mxu0 %v7184_v23  ;;  %5856 = vmatpush1.bf16.msra.mxu1 %v7191_v26  ;;  %v3054_v14 = vld [vmem:[%s10172_s3 + $0xe40] sm:$0xff]  ;;  %v7136_v17 = vcombine.high %v2926_v34, %v2930_v13  ;;  %v2352_v30 = vpop.f32.mrf.mxu0 }
 0x1ad   :  { %5857 = vmatprep.subr.bf16.mxu1 %v7312_v29  ;;  %v3058_v15 = vld [vmem:[%s10172_s3 + $0xe60] sm:$0xff]  ;;  %v7135_v29 = vcombine.low %v2926_v34, %v2930_v13  ;;  %v2395_v54 = vpop.f32.mrf.mxu1 }
 0x1ae   :  { %v2918_v19 = vld [vmem:[%s10172_s3 + $0xa00] sm:$0xff]  ;;  %v7264_v26 = vcombine.high %v3054_v14, %v3058_v15 }
 0x1af   :  { %5815 = vmatpush2.bf16.msra.mxu0 %v7183_v33  ;;  %v2922_v23 = vld [vmem:[%s10172_s3 + $0xa20] sm:$0xff]  ;;  %v7263_v33 = vcombine.low %v3054_v14, %v3058_v15  ;;  %v2397_v59 = vpop.f32.mrf.mxu1  ;;  %v2647_v14 = vld [vmem:[%s10172_s3 + $0x188] sm:$0xff] }
 0x1b0   :  { %5816 = vmatprep.subr.bf16.mxu0 %v7176_v36  ;;  %5858 = vmatpush2.bf16.msra.mxu1 %v7311_v39  ;;  %v3046_v27 = vld [vmem:[%s10172_s3 + $0xe00] sm:$0xff]  ;;  %v7128_v31 = vcombine.high %v2918_v19, %v2922_v23  ;;  %v388_v36 = vsub.s32 5, %v8242_v60  ;;  %v2655_v39 = vld [vmem:[%s10172_s3 + $0x1c8] sm:$0xff]  ;;  %v7127_v45 = vcombine.low %v2918_v19, %v2922_v23 }
 0x1b1   :  { %5859 = vmatprep.subr.bf16.mxu1 %v7304_v25  ;;  %v3050_v28 = vld [vmem:[%s10172_s3 + $0xe20] sm:$0xff]  ;;  %v384_v25 = vsub.s32 4, %v8242_v60  ;;  %v2399_v42 = vpop.f32.mrf.mxu1  ;;  %v2651_v15 = vld [vmem:[%s10172_s3 + $0x1a8] sm:$0xff] }
 0x1b2   :  { %v7256_v40 = vcombine.high %v3046_v27, %v3050_v28  ;;  %v8941_v48 = vld [vmem:[%s10171_s2] sm:$0xff]  ;;  %v6858_v19 = vcombine.high %v2647_v14, %v2651_v15  ;;  %v2639_v23 = vld [vmem:[%s10172_s3 + $0x148] sm:$0xff] }
 0x1b3   :  { %5817 = vmatpush2.bf16.msra.mxu0 %v7175_v46  ;;  %v2354_v46 = vpop.f32.mrf.mxu0  ;;  %v389_v49 = vrot.slane %v8941_v48, %v388_v36  ;;  %v385_v52 = vrot.slane %v8941_v48, %v384_v25 }
 0x1b4   :  { %5818 = vmatprep.subr.bf16.mxu0 %v7168_v10  ;;  %5860 = vmatpush2.bf16.msra.mxu1 %v7303_v47  ;;  %v6866_v10 = vcombine.high %v2655_v39, %v2659_v62  ;;  %v7255_v47 = vcombine.low %v3046_v27, %v3050_v28  ;;  %v6857_v27 = vcombine.low %v2647_v14, %v2651_v15  ;;  %v2691_v14 = vld [vmem:[%s10172_s3 + $0x2e8] sm:$0xff] }
 0x1b5   :  { %5861 = vmatprep.subr.bf16.mxu1 %v7296_v51  ;;  %v6994_v51 = vcombine.high %v8801_v53, %v8806_v57  ;;  %v2351_v24 = vadd.f32 %v2350_v32, %v385_v52  ;;  %v2879_v53 = vld [vmem:[%s10172_s3 + $0x8c8] sm:$0xff] }
 0x1b6   :  { %v2883_v57 = vld [vmem:[%s10172_s3 + $0x8e8] sm:$0xff] }
 0x1b7   :  { %5819 = vmatpush2.bf16.msra.mxu0 %v7167_v55  ;;  %v2356_v55 = vpop.f32.mrf.mxu0 }
 0x1b8   :  { %5820 = vmatprep.subr.bf16.mxu0 %v7160_v56  ;;  %5862 = vmatpush2.bf16.msra.mxu1 %v7295_v58  ;;  %v2353_v56 = vadd.f32 %v2352_v30, %v389_v49  ;;  %v2355_v58 = vadd.f32 %v2354_v46, %v385_v52  ;;  %v2357_v1 = vadd.f32 %v2356_v55, %v389_v49  ;;  %v2635_v30 = vld [vmem:[%s10172_s3 + $0x128] sm:$0xff] }
 0x1b9   :  { %5863 = vmatprep.subr.bf16.mxu1 %v7288_v61  ;;  %v2619_v46 = vld [vmem:[%s10172_s3 + $0xa8] sm:$0xff] }
 0x1ba   :  { %v2607_v49 = vld [vmem:[%s10172_s3 + $0x48] sm:$0xff] }
 0x1bb   :  { %5821 = vmatpush2.bf16.msra.mxu0 %v7159_v3  ;;  %v2396_v3 = vadd.f32 %v2395_v54, %v2353_v56  ;;  %v2599_v55 = vld [vmem:[%s10172_s3 + $0x8] sm:$0xff] }
 0x1bc   :  { %5822 = vmatprep.subr.bf16.mxu0 %v7152_v4  ;;  %5864 = vmatpush2.bf16.msra.mxu1 %v7287_v6  ;;  %v2398_v4 = vadd.f32 %v2397_v59, %v2355_v58  ;;  %v2394_v6 = vadd.f32 %v2393_v43, %v2351_v24  ;;  %v2603_v56 = vld [vmem:[%s10172_s3 + $0x28] sm:$0xff] }
 0x1bd   :  { %5865 = vmatprep.subr.bf16.mxu1 %v7280_v0  ;;  %v2400_v0 = vadd.f32 %v2399_v42, %v2357_v1  ;;  %v6810_v24 = vcombine.high %v2599_v55, %v2603_v56  ;;  %v2719_v59 = vld [vmem:[%s10172_s3 + $0x3c8] sm:$0xff]  ;;  %v6809_v1 = vcombine.low %v2599_v55, %v2603_v56 }
 0x1bf   :  { %5823 = vmatpush2.bf16.msra.mxu0 %v7151_v9 }
 0x1c0   :  { %5824 = vmatprep.subr.bf16.mxu0 %v7144_v11  ;;  %5866 = vmatpush2.bf16.msra.mxu1 %v7279_v12 }
 0x1c1   :  { %5867 = vmatprep.subr.bf16.mxu1 %v7272_v44 }
 0x1c3   :  { %5825 = vmatpush2.bf16.msra.mxu0 %v7143_v16 }
 0x1c4   :  { %5826 = vmatprep.subr.bf16.mxu0 %v7136_v17  ;;  %5868 = vmatpush2.bf16.msra.mxu1 %v7271_v38  ;;  %v6865_v17 = vcombine.low %v2655_v39, %v2659_v62  ;;  %v2623_v39 = vld [vmem:[%s10172_s3 + $0xc8] sm:$0xff] }
 0x1c5   :  { %5869 = vmatprep.subr.bf16.mxu1 %v7264_v26  ;;  %v2643_v26 = vld [vmem:[%s10172_s3 + $0x168] sm:$0xff] }
 0x1c6   :  { %v6850_v28 = vcombine.high %v2639_v23, %v2643_v26  ;;  %v2627_v62 = vld [vmem:[%s10172_s3 + $0xe8] sm:$0xff] }
 0x1c7   :  { %5827 = vmatpush2.bf16.msra.mxu0 %v7135_v29  ;;  %v2631_v29 = vld [vmem:[%s10172_s3 + $0x108] sm:$0xff]  ;;  %v6834_v43 = vcombine.high %v2623_v39, %v2627_v62 }
 0x1c8   :  { %5828 = vmatprep.subr.bf16.mxu0 %v7128_v31  ;;  %5870 = vmatpush2.bf16.msra.mxu1 %v7263_v33  ;;  %v6849_v31 = vcombine.low %v2639_v23, %v2643_v26  ;;  %v6842_v33 = vcombine.high %v2631_v29, %v2635_v30  ;;  %v2679_v23 = vld [vmem:[%s10172_s3 + $0x288] sm:$0xff] }
 0x1c9   :  { %5871 = vmatprep.subr.bf16.mxu1 %v7256_v40  ;;  %v6841_v40 = vcombine.low %v2631_v29, %v2635_v30  ;;  %v2683_v26 = vld [vmem:[%s10172_s3 + $0x2a8] sm:$0xff] }
 0x1ca   :  { %v6890_v30 = vcombine.high %v2679_v23, %v2683_v26 }
 0x1cb   :  { %5829 = vmatpush2.bf16.msra.mxu0 %v7127_v45  ;;  %v2615_v45 = vld [vmem:[%s10172_s3 + $0x88] sm:$0xff] }
 0x1cc   :  { %5884 = vmatprep.subr.bf16.mxu0 %v6866_v10  ;;  %5872 = vmatpush2.bf16.msra.mxu1 %v7255_v47  ;;  %v6833_v10 = vcombine.low %v2623_v39, %v2627_v62  ;;  %v6826_v47 = vcombine.high %v2615_v45, %v2619_v46  ;;  %v6825_v52 = vcombine.low %v2615_v45, %v2619_v46  ;;  %v2675_v39 = vld [vmem:[%s10172_s3 + $0x268] sm:$0xff] }
 0x1cd   :  { %5927 = vmatprep.subr.bf16.mxu1 %v6994_v51  ;;  %v2611_v51 = vld [vmem:[%s10172_s3 + $0x68] sm:$0xff] }
 0x1ce   :  { %v2436_v61 = vpop.f32.mrf.mxu0  ;;  %v6818_v54 = vcombine.high %v2607_v49, %v2611_v51  ;;  %v6817_v58 = vcombine.low %v2607_v49, %v2611_v51  ;;  %v2663_v49 = vld [vmem:[%s10172_s3 + $0x208] sm:$0xff] }
 0x1cf   :  { %v2437_v9 = vadd.f32 %v2436_v61, %v2394_v6  ;;  %v2723_v61 = vld [vmem:[%s10172_s3 + $0x3e8] sm:$0xff] }
 0x1d0   :  { %v2438_v63 = vpop.f32.mrf.mxu0  ;;  %v6929_v6 = vcombine.low %v2719_v59, %v2723_v61  ;;  %v2667_v51 = vld [vmem:[%s10172_s3 + $0x228] sm:$0xff] }
 0x1d1   :  { %v2439_v21 = vadd.f32 %v2438_v63, %v2396_v3  ;;  %v2578_v16 = vmax.f32 %v2437_v9, 0.0  ;;  %v6930_v63 = vcombine.high %v2719_v59, %v2723_v61  ;;  %v2711_v3 = vld [vmem:[%s10172_s3 + $0x388] sm:$0xff]  ;;  %v6874_v59 = vcombine.high %v2663_v49, %v2667_v51 }
 0x1d2   :  { %v2440_v37 = vpop.f32.mrf.mxu0  ;;  %v2695_v9 = vld [vmem:[%s10172_s3 + $0x308] sm:$0xff] }
 0x1d3   :  { %v2441_v7 = vadd.f32 %v2440_v37, %v2398_v4  ;;  %v2579_v13 = vmax.f32 %v2439_v21, 0.0  ;;  %v2715_v4 = vld [vmem:[%s10172_s3 + $0x3a8] sm:$0xff] }
 0x1d4   :  { %v2442_v11 = vpop.f32.mrf.mxu0  ;;  %v6922_v42 = vcombine.high %v2711_v3, %v2715_v4  ;;  %v2703_v37 = vld [vmem:[%s10172_s3 + $0x348] sm:$0xff]  ;;  %v6921_v21 = vcombine.low %v2711_v3, %v2715_v4 }
 0x1d5   :  { %v2443_v12 = vadd.f32 %v2442_v11, %v2400_v0  ;;  %v2586_v34 = vmax.f32 %v2441_v7, 0.0  ;;  %v2707_v0 = vld [vmem:[%s10172_s3 + $0x368] sm:$0xff] }
 0x1d6   :  { %v6914_v7 = vcombine.high %v2703_v37, %v2707_v0  ;;  %v2699_v11 = vld [vmem:[%s10172_s3 + $0x328] sm:$0xff] }
 0x1d7   :  { %v2587_v44 = vmax.f32 %v2443_v12, 0.0  ;;  %v8959_v38 = vpack.c.bf16 %v2586_v34, %v2578_v16  ;;  %v6913_v34 = vcombine.low %v2703_v37, %v2707_v0  ;;  %v6905_v16 = vcombine.low %v2695_v9, %v2699_v11  ;;  %v2911_v4 = vld [vmem:[%s10172_s3 + $0x9c8] sm:$0xff] }
 0x1d9   :  { %v8957_v32 = vpack.c.bf16 %v2587_v44, %v2579_v13  ;;  %v6906_v13 = vcombine.high %v2695_v9, %v2699_v11  ;;  %v2687_v44 = vld [vmem:[%s10172_s3 + $0x2c8] sm:$0xff] }
 0x1da   :  { %v6897_v29 = vcombine.low %v2687_v44, %v2691_v14 }
 0x1db   :  { %5830 = vmatprep.mubr.bf16.mxu0 %v8957_v32 }
 0x1dc   :  { %5831 = vmatmul.mubr.bf16.vlgmr.msra.gmra.mxu0 %v8959_v38 }
 0x1dd   :  { %5885 = vmatpush1.bf16.msra.mxu0 %v6865_v17  ;;  %5916 = vmatprep.mubr.bf16.mxu0 %v8526_v35  ;;  %v6898_v17 = vcombine.high %v2687_v44, %v2691_v14  ;;  %v2907_v44 = vld [vmem:[%s10172_s3 + $0x9a8] sm:$0xff] }
 0x1de   :  { %5886 = vmatprep.subr.bf16.mxu0 %v6858_v19  ;;  %v396_v19 = vsub.s32 7, %v8242_v60 }
 0x1e1   :  { %5887 = vmatpush1.bf16.msra.mxu0 %v6857_v27  ;;  %v392_v27 = vsub.s32 6, %v8242_v60 }
 0x1e2   :  { %5888 = vmatprep.subr.bf16.mxu0 %v6850_v28 }
 0x1e3   :  { %v393_v62 = vrot.slane %v8941_v48, %v392_v27 }
 0x1e5   :  { %5889 = vmatpush1.bf16.msra.mxu0 %v6849_v31  ;;  %v397_v31 = vrot.slane %v8941_v48, %v396_v19 }
 0x1e6   :  { %5890 = vmatprep.subr.bf16.mxu0 %v6842_v33  ;;  %v2671_v33 = vld [vmem:[%s10172_s3 + $0x248] sm:$0xff] }
 0x1e7   :  { %v6882_v46 = vcombine.high %v2671_v33, %v2675_v39 }
 0x1e9   :  { %5891 = vmatpush1.bf16.msra.mxu0 %v6841_v40 }
 0x1ea   :  { %5892 = vmatprep.subr.bf16.mxu0 %v6834_v43  ;;  %v6889_v43 = vcombine.low %v2679_v23, %v2683_v26  ;;  %v2775_v26 = vld [vmem:[%s10172_s3 + $0x588] sm:$0xff] }
 0x1eb   :  { %v2479_v12 = vpop.f32.mrf.mxu1 }
 0x1ed   :  { %5893 = vmatpush1.bf16.msra.mxu0 %v6833_v10  ;;  %v2481_v15 = vpop.f32.mrf.mxu1 }
 0x1ee   :  { %5894 = vmatprep.subr.bf16.mxu0 %v6826_v47  ;;  %v2482_v10 = vadd.f32 %v2481_v15, %v397_v31 }
 0x1ef   :  { %v2483_v28 = vpop.f32.mrf.mxu1 }
 0x1f0   :  { %v2484_v55 = vadd.f32 %v2483_v28, %v393_v62  ;;  %v2779_v28 = vld [vmem:[%s10172_s3 + $0x5a8] sm:$0xff] }
 0x1f1   :  { %5895 = vmatpush1.bf16.msra.mxu0 %v6825_v52  ;;  %v2485_v40 = vpop.f32.mrf.mxu1 }
 0x1f2   :  { %5896 = vmatprep.subr.bf16.mxu0 %v6818_v54  ;;  %v2480_v54 = vadd.f32 %v2479_v12, %v393_v62  ;;  %v2486_v61 = vadd.f32 %v2485_v40, %v397_v31  ;;  %v2895_v31 = vld [vmem:[%s10172_s3 + $0x948] sm:$0xff]  ;;  %v6986_v40 = vcombine.high %v2775_v26, %v2779_v28 }
 0x1f5   :  { %5897 = vmatpush1.bf16.msra.mxu0 %v6817_v58  ;;  %v6881_v58 = vcombine.low %v2671_v33, %v2675_v39  ;;  %v2899_v33 = vld [vmem:[%s10172_s3 + $0x968] sm:$0xff] }
 0x1f6   :  { %5898 = vmatprep.subr.bf16.mxu0 %v6810_v24 }
 0x1f9   :  { %5899 = vmatpush1.bf16.msra.mxu0 %v6809_v1 }
 0x1fa   :  { %5900 = vmatprep.subr.bf16.mxu0 %v6930_v63 }
 0x1fd   :  { %5901 = vmatpush2.bf16.msra.mxu0 %v6929_v6  ;;  %v2915_v6 = vld [vmem:[%s10172_s3 + $0x9e8] sm:$0xff] }
 0x1fe   :  { %5902 = vmatprep.subr.bf16.mxu0 %v6922_v42  ;;  %v7122_v11 = vcombine.high %v2911_v4, %v2915_v6 }
 0x201   :  { %5903 = vmatpush2.bf16.msra.mxu0 %v6921_v21 }
 0x202   :  { %5904 = vmatprep.subr.bf16.mxu0 %v6914_v7  ;;  %v6873_v7 = vcombine.low %v2663_v49, %v2667_v51  ;;  %v6985_v49 = vcombine.low %v2775_v26, %v2779_v28  ;;  %v7105_v51 = vcombine.low %v2895_v31, %v2899_v33  ;;  %v2727_v28 = vld [vmem:[%s10172_s3 + $0x408] sm:$0xff] }
 0x205   :  { %5905 = vmatpush2.bf16.msra.mxu0 %v6913_v34 }
 0x206   :  { %5906 = vmatprep.subr.bf16.mxu0 %v6906_v13  ;;  %v2903_v13 = vld [vmem:[%s10172_s3 + $0x988] sm:$0xff] }
 0x207   :  { %v7114_v23 = vcombine.high %v2903_v13, %v2907_v44  ;;  %v7113_v62 = vcombine.low %v2903_v13, %v2907_v44  ;;  %v2735_v13 = vld [vmem:[%s10172_s3 + $0x448] sm:$0xff] }
 0x208   :  { %v2739_v44 = vld [vmem:[%s10172_s3 + $0x468] sm:$0xff] }
 0x209   :  { %5907 = vmatpush2.bf16.msra.mxu0 %v6905_v16 }
 0x20a   :  { %5908 = vmatprep.subr.bf16.mxu0 %v6898_v17  ;;  %v7121_v17 = vcombine.low %v2911_v4, %v2915_v6  ;;  %v7089_v4 = vcombine.low %v2879_v53, %v2883_v57 }
 0x20d   :  { %5909 = vmatpush2.bf16.msra.mxu0 %v6897_v29 }
 0x20e   :  { %v2522_v45 = vpop.f32.mrf.mxu0  ;;  %5910 = vmatprep.subr.bf16.mxu0 %v6890_v30 }
 0x20f   :  { %v2565_v47 = vpop.f32.mrf.mxu1  ;;  %v2523_v1 = vadd.f32 %v2522_v45, %v2480_v54  ;;  %v2767_v45 = vld [vmem:[%s10172_s3 + $0x548] sm:$0xff] }
 0x210   :  { %v2524_v52 = vpop.f32.mrf.mxu0 }
 0x211   :  { %v2525_v48 = vadd.f32 %v2524_v52, %v2482_v10  ;;  %v2567_v56 = vpop.f32.mrf.mxu1  ;;  %5911 = vmatpush2.bf16.msra.mxu0 %v6889_v43  ;;  %v2566_v12 = vadd.f32 %v2565_v47, %v2523_v1  ;;  %v7106_v43 = vcombine.high %v2895_v31, %v2899_v33  ;;  %v2887_v10 = vld [vmem:[%s10172_s3 + $0x908] sm:$0xff] }
 0x212   :  { %v2526_v24 = vpop.f32.mrf.mxu0  ;;  %5912 = vmatprep.subr.bf16.mxu0 %v6882_v46  ;;  %v2771_v46 = vld [vmem:[%s10172_s3 + $0x568] sm:$0xff] }
 0x213   :  { %v2527_v63 = vadd.f32 %v2526_v24, %v2484_v55  ;;  %v2569_v3 = vpop.f32.mrf.mxu1  ;;  %v2568_v37 = vadd.f32 %v2567_v56, %v2525_v48  ;;  %v2580_v29 = vmax.f32 %v2566_v12, 0.0  ;;  %v2891_v47 = vld [vmem:[%s10172_s3 + $0x928] sm:$0xff]  ;;  %v6978_v52 = vcombine.high %v2767_v45, %v2771_v46 }
 0x214   :  { %v2528_v42 = vpop.f32.mrf.mxu0  ;;  %v7098_v54 = vcombine.high %v2887_v10, %v2891_v47  ;;  %v2759_v55 = vld [vmem:[%s10172_s3 + $0x508] sm:$0xff]  ;;  %v7097_v56 = vcombine.low %v2887_v10, %v2891_v47  ;;  %v7090_v24 = vcombine.high %v2879_v53, %v2883_v57 }
 0x215   :  { %v2570_v0 = vadd.f32 %v2569_v3, %v2527_v63  ;;  %v2529_v21 = vadd.f32 %v2528_v42, %v2486_v61  ;;  %5913 = vmatpush2.bf16.msra.mxu0 %v6881_v58  ;;  %v2571_v9 = vpop.f32.mrf.mxu1  ;;  %v2581_v14 = vmax.f32 %v2568_v37, 0.0  ;;  %v2763_v48 = vld [vmem:[%s10172_s3 + $0x528] sm:$0xff] }
 0x216   :  { %5914 = vmatprep.subr.bf16.mxu0 %v6874_v59  ;;  %v6970_v58 = vcombine.high %v2759_v55, %v2763_v48  ;;  %v2751_v59 = vld [vmem:[%s10172_s3 + $0x4c8] sm:$0xff]  ;;  %v6969_v3 = vcombine.low %v2759_v55, %v2763_v48 }
 0x217   :  { %v2572_v34 = vadd.f32 %v2571_v9, %v2529_v21  ;;  %v2588_v15 = vmax.f32 %v2570_v0, 0.0  ;;  %v2755_v61 = vld [vmem:[%s10172_s3 + $0x4e8] sm:$0xff] }
 0x218   :  { %v2871_v1 = vld [vmem:[%s10172_s3 + $0x888] sm:$0xff]  ;;  %v6962_v6 = vcombine.high %v2751_v59, %v2755_v61  ;;  %v6961_v9 = vcombine.low %v2751_v59, %v2755_v61 }
 0x219   :  { %v2589_v16 = vmax.f32 %v2572_v34, 0.0  ;;  %5915 = vmatpush2.bf16.msra.mxu0 %v6873_v7  ;;  %v9083_v39 = vpack.c.bf16 %v2588_v15, %v2580_v29  ;;  %v2875_v63 = vld [vmem:[%s10172_s3 + $0x8a8] sm:$0xff] }
 0x21a   :  { %5970 = vmatprep.subr.bf16.mxu0 %v7122_v11  ;;  %v7082_v42 = vcombine.high %v2871_v1, %v2875_v63  ;;  %v2743_v37 = vld [vmem:[%s10172_s3 + $0x488] sm:$0xff]  ;;  %v7081_v11 = vcombine.low %v2871_v1, %v2875_v63 }
 0x21b   :  { %v9074_v30 = vpack.c.bf16 %v2589_v16, %v2581_v14  ;;  %v2747_v0 = vld [vmem:[%s10172_s3 + $0x4a8] sm:$0xff] }
 0x21c   :  { %5917 = vmatmul.mubr.bf16.vlgmr.msra.gmra.mxu0 %v8439_v20  ;;  %v2863_v21 = vld [vmem:[%s10172_s3 + $0x848] sm:$0xff]  ;;  %v6954_v12 = vcombine.high %v2743_v37, %v2747_v0  ;;  %v6953_v16 = vcombine.low %v2743_v37, %v2747_v0 }
 0x21d   :  { %5971 = vmatpush1.bf16.msra.mxu0 %v7121_v17  ;;  %6002 = vmatprep.mubr.bf16.mxu0 %v8957_v32  ;;  %v2867_v7 = vld [vmem:[%s10172_s3 + $0x868] sm:$0xff] }
 0x21e   :  { %5873 = vmatprep.mubr.bf16.mxu1 %v9074_v30  ;;  %5972 = vmatprep.subr.bf16.mxu0 %v7114_v23  ;;  %v7074_v34 = vcombine.high %v2863_v21, %v2867_v7  ;;  %v2855_v14 = vld [vmem:[%s10172_s3 + $0x808] sm:$0xff]  ;;  %v7073_v17 = vcombine.low %v2863_v21, %v2867_v7  ;;  %v6946_v23 = vcombine.high %v2735_v13, %v2739_v44 }
 0x21f   :  { %5874 = vmatmul.mubr.bf16.vlgmr.msra.gmra.mxu1 %v9083_v39  ;;  %v2859_v15 = vld [vmem:[%s10172_s3 + $0x828] sm:$0xff] }
 0x220   :  { %5928 = vmatpush1.bf16.msra.mxu1 %v6993_v5  ;;  %5959 = vmatprep.mubr.bf16.mxu1 %v8674_v22  ;;  %v6977_v5 = vcombine.low %v2767_v45, %v2771_v46  ;;  %v7066_v26 = vcombine.high %v2855_v14, %v2859_v15  ;;  %v2731_v29 = vld [vmem:[%s10172_s3 + $0x428] sm:$0xff] }
 0x221   :  { %5973 = vmatpush1.bf16.msra.mxu0 %v7113_v62  ;;  %5929 = vmatprep.subr.bf16.mxu1 %v6986_v40  ;;  %v2975_v31 = vld [vmem:[%s10172_s3 + $0xbc8] sm:$0xff]  ;;  %v6945_v62 = vcombine.low %v2735_v13, %v2739_v44  ;;  %v7065_v40 = vcombine.low %v2855_v14, %v2859_v15 }
 0x222   :  { %5974 = vmatprep.subr.bf16.mxu0 %v7106_v43  ;;  %v2979_v33 = vld [vmem:[%s10172_s3 + $0xbe8] sm:$0xff]  ;;  %v6938_v43 = vcombine.high %v2727_v28, %v2731_v29 }
 0x223   :  { %v7186_v45 = vcombine.high %v2975_v31, %v2979_v33  ;;  %v2847_v46 = vld [vmem:[%s10172_s3 + $0x7c8] sm:$0xff] }
 0x224   :  { %5930 = vmatpush1.bf16.msra.mxu1 %v6985_v49  ;;  %v2851_v10 = vld [vmem:[%s10172_s3 + $0x7e8] sm:$0xff] }
 0x225   :  { %5975 = vmatpush1.bf16.msra.mxu0 %v7105_v51  ;;  %5931 = vmatprep.subr.bf16.mxu1 %v6978_v52  ;;  %v2967_v47 = vld [vmem:[%s10172_s3 + $0xb88] sm:$0xff]  ;;  %v6937_v51 = vcombine.low %v2727_v28, %v2731_v29  ;;  %v7185_v52 = vcombine.low %v2975_v31, %v2979_v33 }
 0x226   :  { %5976 = vmatprep.subr.bf16.mxu0 %v7098_v54  ;;  %v2971_v49 = vld [vmem:[%s10172_s3 + $0xba8] sm:$0xff]  ;;  %v7058_v54 = vcombine.high %v2847_v46, %v2851_v10 }
 0x227   :  { %v7178_v55 = vcombine.high %v2967_v47, %v2971_v49  ;;  %v2839_v48 = vld [vmem:[%s10172_s3 + $0x788] sm:$0xff] }
 0x228   :  { %5932 = vmatpush1.bf16.msra.mxu1 %v6977_v5  ;;  %v2843_v53 = vld [vmem:[%s10172_s3 + $0x7a8] sm:$0xff] }
 0x229   :  { %5977 = vmatpush1.bf16.msra.mxu0 %v7097_v56  ;;  %5933 = vmatprep.subr.bf16.mxu1 %v6970_v58  ;;  %v2959_v57 = vld [vmem:[%s10172_s3 + $0xb48] sm:$0xff]  ;;  %v7057_v56 = vcombine.low %v2847_v46, %v2851_v10  ;;  %v7177_v58 = vcombine.low %v2967_v47, %v2971_v49 }
 0x22a   :  { %5978 = vmatprep.subr.bf16.mxu0 %v7090_v24  ;;  %v2963_v5 = vld [vmem:[%s10172_s3 + $0xb68] sm:$0xff]  ;;  %v7050_v24 = vcombine.high %v2839_v48, %v2843_v53 }
 0x22b   :  { %v7170_v59 = vcombine.high %v2959_v57, %v2963_v5  ;;  %v2831_v61 = vld [vmem:[%s10172_s3 + $0x748] sm:$0xff] }
 0x22c   :  { %5934 = vmatpush1.bf16.msra.mxu1 %v6969_v3  ;;  %v2835_v1 = vld [vmem:[%s10172_s3 + $0x768] sm:$0xff] }
 0x22d   :  { %5979 = vmatpush1.bf16.msra.mxu0 %v7089_v4  ;;  %5935 = vmatprep.subr.bf16.mxu1 %v6962_v6  ;;  %v2951_v63 = vld [vmem:[%s10172_s3 + $0xb08] sm:$0xff]  ;;  %v7049_v4 = vcombine.low %v2839_v48, %v2843_v53  ;;  %v7169_v6 = vcombine.low %v2959_v57, %v2963_v5  ;;  %v2656_v5 = vld [vmem:[%s10172_s3 + $0x1d0] sm:$0xff] }
 0x22e   :  { %5980 = vmatprep.subr.bf16.mxu0 %v7082_v42  ;;  %v2955_v3 = vld [vmem:[%s10172_s3 + $0xb28] sm:$0xff]  ;;  %v7042_v42 = vcombine.high %v2831_v61, %v2835_v1 }
 0x22f   :  { %v7162_v37 = vcombine.high %v2951_v63, %v2955_v3  ;;  %v2823_v0 = vld [vmem:[%s10172_s3 + $0x708] sm:$0xff] }
 0x230   :  { %5936 = vmatpush1.bf16.msra.mxu1 %v6961_v9  ;;  %v2827_v21 = vld [vmem:[%s10172_s3 + $0x728] sm:$0xff] }
 0x231   :  { %5981 = vmatpush1.bf16.msra.mxu0 %v7081_v11  ;;  %5937 = vmatprep.subr.bf16.mxu1 %v6954_v12  ;;  %v2943_v7 = vld [vmem:[%s10172_s3 + $0xac8] sm:$0xff]  ;;  %v7041_v11 = vcombine.low %v2831_v61, %v2835_v1  ;;  %v7161_v12 = vcombine.low %v2951_v63, %v2955_v3  ;;  %v2648_v3 = vld [vmem:[%s10172_s3 + $0x190] sm:$0xff] }
 0x232   :  { %5982 = vmatprep.subr.bf16.mxu0 %v7074_v34  ;;  %v2947_v9 = vld [vmem:[%s10172_s3 + $0xae8] sm:$0xff]  ;;  %v7034_v34 = vcombine.high %v2823_v0, %v2827_v21 }
 0x233   :  { %v7154_v13 = vcombine.high %v2943_v7, %v2947_v9  ;;  %v2815_v44 = vld [vmem:[%s10172_s3 + $0x6c8] sm:$0xff] }
 0x234   :  { %5938 = vmatpush1.bf16.msra.mxu1 %v6953_v16  ;;  %v2819_v14 = vld [vmem:[%s10172_s3 + $0x6e8] sm:$0xff] }
 0x235   :  { %5983 = vmatpush1.bf16.msra.mxu0 %v7073_v17  ;;  %5939 = vmatprep.subr.bf16.mxu1 %v6946_v23  ;;  %v2935_v15 = vld [vmem:[%s10172_s3 + $0xa88] sm:$0xff]  ;;  %v7033_v17 = vcombine.low %v2823_v0, %v2827_v21  ;;  %v7153_v23 = vcombine.low %v2943_v7, %v2947_v9  ;;  %v2640_v9 = vld [vmem:[%s10172_s3 + $0x150] sm:$0xff] }
 0x236   :  { %5984 = vmatprep.subr.bf16.mxu0 %v7066_v26  ;;  %v2939_v16 = vld [vmem:[%s10172_s3 + $0xaa8] sm:$0xff]  ;;  %v7026_v26 = vcombine.high %v2815_v44, %v2819_v14 }
 0x237   :  { %v7146_v28 = vcombine.high %v2935_v15, %v2939_v16  ;;  %v2807_v29 = vld [vmem:[%s10172_s3 + $0x688] sm:$0xff] }
 0x238   :  { %5940 = vmatpush1.bf16.msra.mxu1 %v6945_v62  ;;  %v2811_v31 = vld [vmem:[%s10172_s3 + $0x6a8] sm:$0xff] }
 0x239   :  { %5985 = vmatpush1.bf16.msra.mxu0 %v7065_v40  ;;  %5941 = vmatprep.subr.bf16.mxu1 %v6938_v43  ;;  %v2927_v33 = vld [vmem:[%s10172_s3 + $0xa48] sm:$0xff]  ;;  %v7025_v40 = vcombine.low %v2815_v44, %v2819_v14  ;;  %v7145_v43 = vcombine.low %v2935_v15, %v2939_v16  ;;  %v2632_v16 = vld [vmem:[%s10172_s3 + $0x110] sm:$0xff] }
 0x23a   :  { %5986 = vmatprep.subr.bf16.mxu0 %v7186_v45  ;;  %v2931_v62 = vld [vmem:[%s10172_s3 + $0xa68] sm:$0xff]  ;;  %v7018_v45 = vcombine.high %v2807_v29, %v2811_v31 }
 0x23b   :  { %v7138_v46 = vcombine.high %v2927_v33, %v2931_v62  ;;  %v2799_v10 = vld [vmem:[%s10172_s3 + $0x648] sm:$0xff] }
 0x23c   :  { %5942 = vmatpush1.bf16.msra.mxu1 %v6937_v51  ;;  %v2803_v47 = vld [vmem:[%s10172_s3 + $0x668] sm:$0xff] }
 0x23d   :  { %5987 = vmatpush2.bf16.msra.mxu0 %v7185_v52  ;;  %5943 = vmatprep.subr.bf16.mxu1 %v7058_v54  ;;  %v2919_v49 = vld [vmem:[%s10172_s3 + $0xa08] sm:$0xff]  ;;  %v7017_v52 = vcombine.low %v2807_v29, %v2811_v31  ;;  %v7137_v54 = vcombine.low %v2927_v33, %v2931_v62  ;;  %v2624_v62 = vld [vmem:[%s10172_s3 + $0xd0] sm:$0xff] }
 0x23e   :  { %5988 = vmatprep.subr.bf16.mxu0 %v7178_v55  ;;  %v2923_v51 = vld [vmem:[%s10172_s3 + $0xa28] sm:$0xff]  ;;  %v7010_v55 = vcombine.high %v2799_v10, %v2803_v47 }
 0x23f   :  { %v7130_v48 = vcombine.high %v2919_v49, %v2923_v51  ;;  %v2791_v53 = vld [vmem:[%s10172_s3 + $0x608] sm:$0xff] }
 0x240   :  { %5944 = vmatpush2.bf16.msra.mxu1 %v7057_v56  ;;  %v2795_v57 = vld [vmem:[%s10172_s3 + $0x628] sm:$0xff]  ;;  %v2660_v56 = vld [vmem:[%s10172_s3 + $0x1f0] sm:$0xff] }
 0x241   :  { %5989 = vmatpush2.bf16.msra.mxu0 %v7177_v58  ;;  %5945 = vmatprep.subr.bf16.mxu1 %v7050_v24  ;;  %v7009_v58 = vcombine.low %v2799_v10, %v2803_v47  ;;  %v7129_v24 = vcombine.low %v2919_v49, %v2923_v51  ;;  %v6868_v61 = vcombine.high %v2656_v5, %v2660_v56  ;;  %v3039_v1 = vld [vmem:[%s10172_s3 + $0xdc8] sm:$0xff]  ;;  %v2616_v51 = vld [vmem:[%s10172_s3 + $0x90] sm:$0xff] }
 0x242   :  { %5990 = vmatprep.subr.bf16.mxu0 %v7170_v59  ;;  %v7002_v59 = vcombine.high %v2791_v53, %v2795_v57  ;;  %v3043_v63 = vld [vmem:[%s10172_s3 + $0xde8] sm:$0xff] }
 0x243   :  { %v3031_v21 = vld [vmem:[%s10172_s3 + $0xd88] sm:$0xff] }
 0x244   :  { %5946 = vmatpush2.bf16.msra.mxu1 %v7049_v4  ;;  %v2652_v4 = vld [vmem:[%s10172_s3 + $0x1b0] sm:$0xff]  ;;  %v3035_v7 = vld [vmem:[%s10172_s3 + $0xda8] sm:$0xff] }
 0x245   :  { %5991 = vmatpush2.bf16.msra.mxu0 %v7169_v6  ;;  %5947 = vmatprep.subr.bf16.mxu1 %v7042_v42  ;;  %v7001_v6 = vcombine.low %v2791_v53, %v2795_v57  ;;  %v6867_v42 = vcombine.low %v2656_v5, %v2660_v56  ;;  %v6860_v0 = vcombine.high %v2648_v3, %v2652_v4  ;;  %v3023_v14 = vld [vmem:[%s10172_s3 + $0xd48] sm:$0xff]  ;;  %v2608_v56 = vld [vmem:[%s10172_s3 + $0x50] sm:$0xff] }
 0x246   :  { %5992 = vmatprep.subr.bf16.mxu0 %v7162_v37  ;;  %v7250_v37 = vcombine.high %v3039_v1, %v3043_v63  ;;  %v3027_v15 = vld [vmem:[%s10172_s3 + $0xd68] sm:$0xff] }
 0x247   :  { %v3015_v31 = vld [vmem:[%s10172_s3 + $0xd08] sm:$0xff] }
 0x248   :  { %5948 = vmatpush2.bf16.msra.mxu1 %v7041_v11  ;;  %v2644_v11 = vld [vmem:[%s10172_s3 + $0x170] sm:$0xff]  ;;  %v3019_v33 = vld [vmem:[%s10172_s3 + $0xd28] sm:$0xff] }
 0x249   :  { %5993 = vmatpush2.bf16.msra.mxu0 %v7161_v12  ;;  %5949 = vmatprep.subr.bf16.mxu1 %v7034_v34  ;;  %v7249_v12 = vcombine.low %v3039_v1, %v3043_v63  ;;  %v6859_v34 = vcombine.low %v2648_v3, %v2652_v4  ;;  %v6852_v44 = vcombine.high %v2640_v9, %v2644_v11  ;;  %v3007_v47 = vld [vmem:[%s10172_s3 + $0xcc8] sm:$0xff]  ;;  %v2600_v4 = vld [vmem:[%s10172_s3 + $0x10] sm:$0xff] }
 0x24a   :  { %5994 = vmatprep.subr.bf16.mxu0 %v7154_v13  ;;  %v7242_v13 = vcombine.high %v3031_v21, %v3035_v7  ;;  %v3011_v49 = vld [vmem:[%s10172_s3 + $0xce8] sm:$0xff] }
 0x24b   :  { %v2999_v57 = vld [vmem:[%s10172_s3 + $0xc88] sm:$0xff] }
 0x24c   :  { %5950 = vmatpush2.bf16.msra.mxu1 %v7033_v17  ;;  %v2636_v17 = vld [vmem:[%s10172_s3 + $0x130] sm:$0xff]  ;;  %v3003_v5 = vld [vmem:[%s10172_s3 + $0xca8] sm:$0xff] }
 0x24d   :  { %5995 = vmatpush2.bf16.msra.mxu0 %v7153_v23  ;;  %5951 = vmatprep.subr.bf16.mxu1 %v7026_v26  ;;  %v7241_v23 = vcombine.low %v3031_v21, %v3035_v7  ;;  %v6851_v26 = vcombine.low %v2640_v9, %v2644_v11  ;;  %v6844_v29 = vcombine.high %v2632_v16, %v2636_v17  ;;  %v2991_v63 = vld [vmem:[%s10172_s3 + $0xc48] sm:$0xff]  ;;  %v2720_v11 = vld [vmem:[%s10172_s3 + $0x3d0] sm:$0xff] }
 0x24e   :  { %5996 = vmatprep.subr.bf16.mxu0 %v7146_v28  ;;  %v7234_v28 = vcombine.high %v3023_v14, %v3027_v15  ;;  %v2995_v3 = vld [vmem:[%s10172_s3 + $0xc68] sm:$0xff] }
 0x24f   :  { %v2983_v7 = vld [vmem:[%s10172_s3 + $0xc08] sm:$0xff] }
 0x250   :  { %5952 = vmatpush2.bf16.msra.mxu1 %v7025_v40  ;;  %v2628_v40 = vld [vmem:[%s10172_s3 + $0xf0] sm:$0xff]  ;;  %v2987_v9 = vld [vmem:[%s10172_s3 + $0xc28] sm:$0xff] }
 0x251   :  { %5997 = vmatpush2.bf16.msra.mxu0 %v7145_v43  ;;  %5953 = vmatprep.subr.bf16.mxu1 %v7018_v45  ;;  %v7233_v43 = vcombine.low %v3023_v14, %v3027_v15  ;;  %v6843_v45 = vcombine.low %v2632_v16, %v2636_v17  ;;  %v6836_v10 = vcombine.high %v2624_v62, %v2628_v40  ;;  %v3103_v15 = vld [vmem:[%s10172_s3 + $0xfc8] sm:$0xff]  ;;  %v2712_v17 = vld [vmem:[%s10172_s3 + $0x390] sm:$0xff] }
 0x252   :  { %5998 = vmatprep.subr.bf16.mxu0 %v7138_v46  ;;  %v7226_v46 = vcombine.high %v3015_v31, %v3019_v33  ;;  %v3107_v16 = vld [vmem:[%s10172_s3 + $0xfe8] sm:$0xff] }
 0x254   :  { %5954 = vmatpush2.bf16.msra.mxu1 %v7017_v52  ;;  %v2620_v52 = vld [vmem:[%s10172_s3 + $0xb0] sm:$0xff] }
 0x255   :  { %5999 = vmatpush2.bf16.msra.mxu0 %v7137_v54  ;;  %5955 = vmatprep.subr.bf16.mxu1 %v7010_v55  ;;  %v7225_v54 = vcombine.low %v3015_v31, %v3019_v33  ;;  %v6835_v55 = vcombine.low %v2624_v62, %v2628_v40  ;;  %v6828_v53 = vcombine.high %v2616_v51, %v2620_v52  ;;  %v3095_v33 = vld [vmem:[%s10172_s3 + $0xf88] sm:$0xff]  ;;  %v2704_v40 = vld [vmem:[%s10172_s3 + $0x350] sm:$0xff] }
 0x256   :  { %6000 = vmatprep.subr.bf16.mxu0 %v7130_v48  ;;  %v7218_v48 = vcombine.high %v3007_v47, %v3011_v49  ;;  %v3099_v62 = vld [vmem:[%s10172_s3 + $0xfa8] sm:$0xff] }
 0x258   :  { %5956 = vmatpush2.bf16.msra.mxu1 %v7009_v58  ;;  %v2612_v58 = vld [vmem:[%s10172_s3 + $0x70] sm:$0xff] }
 0x259   :  { %6001 = vmatpush2.bf16.msra.mxu0 %v7129_v24  ;;  %5957 = vmatprep.subr.bf16.mxu1 %v7002_v59  ;;  %v7217_v24 = vcombine.low %v3007_v47, %v3011_v49  ;;  %v6827_v59 = vcombine.low %v2616_v51, %v2620_v52  ;;  %v6820_v1 = vcombine.high %v2608_v56, %v2612_v58  ;;  %v3087_v49 = vld [vmem:[%s10172_s3 + $0xf48] sm:$0xff]  ;;  %v2696_v52 = vld [vmem:[%s10172_s3 + $0x310] sm:$0xff] }
 0x25a   :  { %6056 = vmatprep.subr.bf16.mxu0 %v6868_v61  ;;  %v7210_v61 = vcombine.high %v2999_v57, %v3003_v5  ;;  %v3091_v51 = vld [vmem:[%s10172_s3 + $0xf68] sm:$0xff] }
 0x25c   :  { %5958 = vmatpush2.bf16.msra.mxu1 %v7001_v6  ;;  %6003 = vmatmul.mubr.bf16.vlgmr.msra.gmra.mxu0 %v8959_v38  ;;  %v2604_v6 = vld [vmem:[%s10172_s3 + $0x30] sm:$0xff] }
 0x25d   :  { %6057 = vmatpush1.bf16.msra.mxu0 %v6867_v42  ;;  %6088 = vmatprep.mubr.bf16.mxu0 %v8526_v35  ;;  %v7209_v42 = vcombine.low %v2999_v57, %v3003_v5  ;;  %v6812_v21 = vcombine.high %v2600_v4, %v2604_v6  ;;  %v3079_v5 = vld [vmem:[%s10172_s3 + $0xf08] sm:$0xff] }
 0x25e   :  { %6013 = vmatprep.subr.bf16.mxu1 %v7250_v37  ;;  %6058 = vmatprep.subr.bf16.mxu0 %v6860_v0  ;;  %v6819_v37 = vcombine.low %v2608_v56, %v2612_v58  ;;  %v7202_v0 = vcombine.high %v2991_v63, %v2995_v3  ;;  %v3083_v56 = vld [vmem:[%s10172_s3 + $0xf28] sm:$0xff]  ;;  %v2688_v58 = vld [vmem:[%s10172_s3 + $0x2d0] sm:$0xff] }
 0x25f   :  { %5960 = vmatmul.mubr.bf16.vlgmr.msra.gmra.mxu1 %v8746_v18 }
 0x260   :  { %6014 = vmatpush1.bf16.msra.mxu1 %v7249_v12  ;;  %6045 = vmatprep.mubr.bf16.mxu1 %v9074_v30  ;;  %v2724_v12 = vld [vmem:[%s10172_s3 + $0x3f0] sm:$0xff] }
 0x261   :  { %6059 = vmatpush1.bf16.msra.mxu0 %v6859_v34  ;;  %6015 = vmatprep.subr.bf16.mxu1 %v7242_v13  ;;  %v7201_v34 = vcombine.low %v2991_v63, %v2995_v3  ;;  %v6811_v13 = vcombine.low %v2600_v4, %v2604_v6  ;;  %v6932_v14 = vcombine.high %v2720_v11, %v2724_v12  ;;  %v3071_v3 = vld [vmem:[%s10172_s3 + $0xec8] sm:$0xff]  ;;  %v2680_v6 = vld [vmem:[%s10172_s3 + $0x290] sm:$0xff] }
 0x262   :  { %6060 = vmatprep.subr.bf16.mxu0 %v6852_v44  ;;  %v7194_v44 = vcombine.high %v2983_v7, %v2987_v9  ;;  %v3075_v4 = vld [vmem:[%s10172_s3 + $0xee8] sm:$0xff] }
 0x264   :  { %6016 = vmatpush1.bf16.msra.mxu1 %v7241_v23  ;;  %v2716_v23 = vld [vmem:[%s10172_s3 + $0x3b0] sm:$0xff] }
 0x265   :  { %6061 = vmatpush1.bf16.msra.mxu0 %v6851_v26  ;;  %6017 = vmatprep.subr.bf16.mxu1 %v7234_v28  ;;  %v7193_v26 = vcombine.low %v2983_v7, %v2987_v9  ;;  %v6931_v28 = vcombine.low %v2720_v11, %v2724_v12  ;;  %v6924_v31 = vcombine.high %v2712_v17, %v2716_v23  ;;  %v3063_v9 = vld [vmem:[%s10172_s3 + $0xe88] sm:$0xff]  ;;  %v2672_v12 = vld [vmem:[%s10172_s3 + $0x250] sm:$0xff] }
 0x266   :  { %6062 = vmatprep.subr.bf16.mxu0 %v6844_v29  ;;  %v7314_v29 = vcombine.high %v3103_v15, %v3107_v16  ;;  %v3067_v11 = vld [vmem:[%s10172_s3 + $0xea8] sm:$0xff] }
 0x268   :  { %6018 = vmatpush1.bf16.msra.mxu1 %v7233_v43  ;;  %v2708_v43 = vld [vmem:[%s10172_s3 + $0x370] sm:$0xff] }
 0x269   :  { %6063 = vmatpush1.bf16.msra.mxu0 %v6843_v45  ;;  %6019 = vmatprep.subr.bf16.mxu1 %v7226_v46  ;;  %v7313_v45 = vcombine.low %v3103_v15, %v3107_v16  ;;  %v6923_v46 = vcombine.low %v2712_v17, %v2716_v23  ;;  %v6916_v47 = vcombine.high %v2704_v40, %v2708_v43  ;;  %v3055_v16 = vld [vmem:[%s10172_s3 + $0xe48] sm:$0xff]  ;;  %v2664_v23 = vld [vmem:[%s10172_s3 + $0x210] sm:$0xff] }
 0x26a   :  { %6064 = vmatprep.subr.bf16.mxu0 %v6836_v10  ;;  %v7306_v10 = vcombine.high %v3095_v33, %v3099_v62  ;;  %v3059_v17 = vld [vmem:[%s10172_s3 + $0xe68] sm:$0xff] }
 0x26c   :  { %6020 = vmatpush1.bf16.msra.mxu1 %v7225_v54  ;;  %v2700_v54 = vld [vmem:[%s10172_s3 + $0x330] sm:$0xff] }
 0x26d   :  { %6065 = vmatpush1.bf16.msra.mxu0 %v6835_v55  ;;  %6021 = vmatprep.subr.bf16.mxu1 %v7218_v48  ;;  %v7305_v55 = vcombine.low %v3095_v33, %v3099_v62  ;;  %v6915_v48 = vcombine.low %v2704_v40, %v2708_v43  ;;  %v6908_v57 = vcombine.high %v2696_v52, %v2700_v54  ;;  %v3047_v62 = vld [vmem:[%s10172_s3 + $0xe08] sm:$0xff]  ;;  %v2912_v43 = vld [vmem:[%s10172_s3 + $0x9d0] sm:$0xff] }
 0x26e   :  { %6066 = vmatprep.subr.bf16.mxu0 %v6828_v53  ;;  %v7298_v53 = vcombine.high %v3087_v49, %v3091_v51  ;;  %v3051_v40 = vld [vmem:[%s10172_s3 + $0xe28] sm:$0xff] }
 0x270   :  { %6022 = vmatpush1.bf16.msra.mxu1 %v7217_v24  ;;  %v2692_v24 = vld [vmem:[%s10172_s3 + $0x2f0] sm:$0xff] }
 0x271   :  { %6067 = vmatpush1.bf16.msra.mxu0 %v6827_v59  ;;  %6023 = vmatprep.subr.bf16.mxu1 %v7210_v61  ;;  %v7297_v59 = vcombine.low %v3087_v49, %v3091_v51  ;;  %v6907_v61 = vcombine.low %v2696_v52, %v2700_v54  ;;  %v6900_v63 = vcombine.high %v2688_v58, %v2692_v24  ;;  %v2784_v51 = vld [vmem:[%s10172_s3 + $0x5d0] sm:$0xff] }
 0x272   :  { %6068 = vmatprep.subr.bf16.mxu0 %v6820_v1  ;;  %v7290_v1 = vcombine.high %v3079_v5, %v3083_v56  ;;  %v2788_v52 = vld [vmem:[%s10172_s3 + $0x5f0] sm:$0xff] }
 0x273   :  { %v2904_v54 = vld [vmem:[%s10172_s3 + $0x990] sm:$0xff] }
 0x274   :  { %6024 = vmatpush1.bf16.msra.mxu1 %v7209_v42  ;;  %v2684_v42 = vld [vmem:[%s10172_s3 + $0x2b0] sm:$0xff] }
 0x275   :  { %6069 = vmatpush1.bf16.msra.mxu0 %v6819_v37  ;;  %6025 = vmatprep.subr.bf16.mxu1 %v7202_v0  ;;  %v7289_v37 = vcombine.low %v3079_v5, %v3083_v56  ;;  %v6899_v0 = vcombine.low %v2688_v58, %v2692_v24  ;;  %v6892_v7 = vcombine.high %v2680_v6, %v2684_v42  ;;  %v2776_v56 = vld [vmem:[%s10172_s3 + $0x590] sm:$0xff] }
 0x276   :  { %6070 = vmatprep.subr.bf16.mxu0 %v6812_v21  ;;  %v7282_v21 = vcombine.high %v3071_v3, %v3075_v4  ;;  %v2780_v58 = vld [vmem:[%s10172_s3 + $0x5b0] sm:$0xff] }
 0x277   :  { %v2896_v24 = vld [vmem:[%s10172_s3 + $0x950] sm:$0xff] }
 0x278   :  { %6026 = vmatpush1.bf16.msra.mxu1 %v7201_v34  ;;  %v2676_v34 = vld [vmem:[%s10172_s3 + $0x270] sm:$0xff] }
 0x279   :  { %6071 = vmatpush1.bf16.msra.mxu0 %v6811_v13  ;;  %6027 = vmatprep.subr.bf16.mxu1 %v7194_v44  ;;  %v7281_v13 = vcombine.low %v3071_v3, %v3075_v4  ;;  %v6891_v44 = vcombine.low %v2680_v6, %v2684_v42  ;;  %v6884_v15 = vcombine.high %v2672_v12, %v2676_v34  ;;  %v2768_v4 = vld [vmem:[%s10172_s3 + $0x550] sm:$0xff] }
 0x27a   :  { %6072 = vmatprep.subr.bf16.mxu0 %v6932_v14  ;;  %v7274_v14 = vcombine.high %v3063_v9, %v3067_v11  ;;  %v2772_v6 = vld [vmem:[%s10172_s3 + $0x570] sm:$0xff] }
 0x27b   :  { %v2888_v42 = vld [vmem:[%s10172_s3 + $0x910] sm:$0xff] }
 0x27c   :  { %6028 = vmatpush1.bf16.msra.mxu1 %v7193_v26  ;;  %v2668_v26 = vld [vmem:[%s10172_s3 + $0x230] sm:$0xff] }
 0x27d   :  { %6073 = vmatpush2.bf16.msra.mxu0 %v6931_v28  ;;  %6029 = vmatprep.subr.bf16.mxu1 %v7314_v29  ;;  %v7273_v28 = vcombine.low %v3063_v9, %v3067_v11  ;;  %v6883_v29 = vcombine.low %v2672_v12, %v2676_v34  ;;  %v6876_v33 = vcombine.high %v2664_v23, %v2668_v26  ;;  %v2760_v11 = vld [vmem:[%s10172_s3 + $0x510] sm:$0xff] }
 0x27e   :  { %6074 = vmatprep.subr.bf16.mxu0 %v6924_v31  ;;  %v7266_v31 = vcombine.high %v3055_v16, %v3059_v17  ;;  %v2764_v12 = vld [vmem:[%s10172_s3 + $0x530] sm:$0xff] }
 0x27f   :  { %v2880_v34 = vld [vmem:[%s10172_s3 + $0x8d0] sm:$0xff] }
 0x280   :  { %6030 = vmatpush2.bf16.msra.mxu1 %v7313_v45  ;;  %v2916_v45 = vld [vmem:[%s10172_s3 + $0x9f0] sm:$0xff] }
 0x281   :  { %6075 = vmatpush2.bf16.msra.mxu0 %v6923_v46  ;;  %6031 = vmatprep.subr.bf16.mxu1 %v7306_v10  ;;  %v7265_v46 = vcombine.low %v3055_v16, %v3059_v17  ;;  %v6875_v10 = vcombine.low %v2664_v23, %v2668_v26  ;;  %v7124_v49 = vcombine.high %v2912_v43, %v2916_v45  ;;  %v2752_v17 = vld [vmem:[%s10172_s3 + $0x4d0] sm:$0xff] }
 0x282   :  { %6076 = vmatprep.subr.bf16.mxu0 %v6916_v47  ;;  %v7258_v47 = vcombine.high %v3047_v62, %v3051_v40  ;;  %v2756_v23 = vld [vmem:[%s10172_s3 + $0x4f0] sm:$0xff] }
 0x283   :  { %v2872_v26 = vld [vmem:[%s10172_s3 + $0x890] sm:$0xff] }
 0x284   :  { %6032 = vmatpush2.bf16.msra.mxu1 %v7305_v55  ;;  %v2908_v55 = vld [vmem:[%s10172_s3 + $0x9b0] sm:$0xff] }
 0x285   :  { %6077 = vmatpush2.bf16.msra.mxu0 %v6915_v48  ;;  %6033 = vmatprep.subr.bf16.mxu1 %v7298_v53  ;;  %v7257_v48 = vcombine.low %v3047_v62, %v3051_v40  ;;  %v7123_v53 = vcombine.low %v2912_v43, %v2916_v45  ;;  %v7116_v5 = vcombine.high %v2904_v54, %v2908_v55  ;;  %v2744_v40 = vld [vmem:[%s10172_s3 + $0x490] sm:$0xff] }
 0x286   :  { %6078 = vmatprep.subr.bf16.mxu0 %v6908_v57  ;;  %v6996_v57 = vcombine.high %v2784_v51, %v2788_v52  ;;  %v2748_v43 = vld [vmem:[%s10172_s3 + $0x4b0] sm:$0xff] }
 0x287   :  { %v2864_v45 = vld [vmem:[%s10172_s3 + $0x850] sm:$0xff] }
 0x288   :  { %6034 = vmatpush2.bf16.msra.mxu1 %v7297_v59  ;;  %v2900_v59 = vld [vmem:[%s10172_s3 + $0x970] sm:$0xff] }
 0x289   :  { %6079 = vmatpush2.bf16.msra.mxu0 %v6907_v61  ;;  %6035 = vmatprep.subr.bf16.mxu1 %v7290_v1  ;;  %v6995_v61 = vcombine.low %v2784_v51, %v2788_v52  ;;  %v7115_v1 = vcombine.low %v2904_v54, %v2908_v55  ;;  %v7108_v3 = vcombine.high %v2896_v24, %v2900_v59  ;;  %v2736_v52 = vld [vmem:[%s10172_s3 + $0x450] sm:$0xff] }
 0x28a   :  { %6080 = vmatprep.subr.bf16.mxu0 %v6900_v63  ;;  %v6988_v63 = vcombine.high %v2776_v56, %v2780_v58  ;;  %v2740_v54 = vld [vmem:[%s10172_s3 + $0x470] sm:$0xff] }
 0x28b   :  { %v2856_v55 = vld [vmem:[%s10172_s3 + $0x810] sm:$0xff] }
 0x28c   :  { %6036 = vmatpush2.bf16.msra.mxu1 %v7289_v37  ;;  %v2892_v37 = vld [vmem:[%s10172_s3 + $0x930] sm:$0xff] }
 0x28d   :  { %6081 = vmatpush2.bf16.msra.mxu0 %v6899_v0  ;;  %6037 = vmatprep.subr.bf16.mxu1 %v7282_v21  ;;  %v6987_v0 = vcombine.low %v2776_v56, %v2780_v58  ;;  %v7107_v21 = vcombine.low %v2896_v24, %v2900_v59  ;;  %v7100_v9 = vcombine.high %v2888_v42, %v2892_v37  ;;  %v2728_v58 = vld [vmem:[%s10172_s3 + $0x410] sm:$0xff] }
 0x28e   :  { %6082 = vmatprep.subr.bf16.mxu0 %v6892_v7  ;;  %v6980_v7 = vcombine.high %v2768_v4, %v2772_v6  ;;  %v2732_v24 = vld [vmem:[%s10172_s3 + $0x430] sm:$0xff] }
 0x28f   :  { %v2976_v59 = vld [vmem:[%s10172_s3 + $0xbd0] sm:$0xff] }
 0x290   :  { %6038 = vmatpush2.bf16.msra.mxu1 %v7281_v13  ;;  %v2884_v13 = vld [vmem:[%s10172_s3 + $0x8f0] sm:$0xff] }
 0x291   :  { %6083 = vmatpush2.bf16.msra.mxu0 %v6891_v44  ;;  %6039 = vmatprep.subr.bf16.mxu1 %v7274_v14  ;;  %v6979_v44 = vcombine.low %v2768_v4, %v2772_v6  ;;  %v7099_v14 = vcombine.low %v2888_v42, %v2892_v37  ;;  %v7092_v16 = vcombine.high %v2880_v34, %v2884_v13  ;;  %v2848_v6 = vld [vmem:[%s10172_s3 + $0x7d0] sm:$0xff] }
 0x292   :  { %6084 = vmatprep.subr.bf16.mxu0 %v6884_v15  ;;  %v6972_v15 = vcombine.high %v2760_v11, %v2764_v12  ;;  %v2852_v42 = vld [vmem:[%s10172_s3 + $0x7f0] sm:$0xff] }
 0x293   :  { %v2968_v37 = vld [vmem:[%s10172_s3 + $0xb90] sm:$0xff] }
 0x294   :  { %6040 = vmatpush2.bf16.msra.mxu1 %v7273_v28  ;;  %v2876_v28 = vld [vmem:[%s10172_s3 + $0x8b0] sm:$0xff] }
 0x295   :  { %6085 = vmatpush2.bf16.msra.mxu0 %v6883_v29  ;;  %6041 = vmatprep.subr.bf16.mxu1 %v7266_v31  ;;  %v6971_v29 = vcombine.low %v2760_v11, %v2764_v12  ;;  %v7091_v31 = vcombine.low %v2880_v34, %v2884_v13  ;;  %v7084_v62 = vcombine.high %v2872_v26, %v2876_v28  ;;  %v2840_v12 = vld [vmem:[%s10172_s3 + $0x790] sm:$0xff] }
 0x296   :  { %6086 = vmatprep.subr.bf16.mxu0 %v6876_v33  ;;  %v6964_v33 = vcombine.high %v2752_v17, %v2756_v23  ;;  %v2844_v34 = vld [vmem:[%s10172_s3 + $0x7b0] sm:$0xff] }
 0x297   :  { %v2960_v13 = vld [vmem:[%s10172_s3 + $0xb50] sm:$0xff] }
 0x298   :  { %6042 = vmatpush2.bf16.msra.mxu1 %v7265_v46  ;;  %v2868_v46 = vld [vmem:[%s10172_s3 + $0x870] sm:$0xff] }
 0x299   :  { %6087 = vmatpush2.bf16.msra.mxu0 %v6875_v10  ;;  %6043 = vmatprep.subr.bf16.mxu1 %v7258_v47  ;;  %v6963_v10 = vcombine.low %v2752_v17, %v2756_v23  ;;  %v7083_v47 = vcombine.low %v2872_v26, %v2876_v28  ;;  %v7076_v51 = vcombine.high %v2864_v45, %v2868_v46  ;;  %v2832_v23 = vld [vmem:[%s10172_s3 + $0x750] sm:$0xff] }
 0x29a   :  { %6142 = vmatprep.subr.bf16.mxu0 %v7124_v49  ;;  %v6956_v49 = vcombine.high %v2744_v40, %v2748_v43  ;;  %v2836_v26 = vld [vmem:[%s10172_s3 + $0x770] sm:$0xff] }
 0x29b   :  { %v2952_v28 = vld [vmem:[%s10172_s3 + $0xb10] sm:$0xff] }
 0x29c   :  { %6044 = vmatpush2.bf16.msra.mxu1 %v7257_v48  ;;  %6089 = vmatmul.mubr.bf16.vlgmr.msra.gmra.mxu0 %v8439_v20  ;;  %v2860_v48 = vld [vmem:[%s10172_s3 + $0x830] sm:$0xff] }
 0x29d   :  { %6143 = vmatpush1.bf16.msra.mxu0 %v7123_v53  ;;  %6174 = vmatprep.mubr.bf16.mxu0 %v8957_v32  ;;  %v6955_v53 = vcombine.low %v2744_v40, %v2748_v43  ;;  %v7068_v56 = vcombine.high %v2856_v55, %v2860_v48  ;;  %v2824_v43 = vld [vmem:[%s10172_s3 + $0x710] sm:$0xff] }
 0x29e   :  { %6099 = vmatprep.subr.bf16.mxu1 %v6996_v57  ;;  %6144 = vmatprep.subr.bf16.mxu0 %v7116_v5  ;;  %v7075_v57 = vcombine.low %v2864_v45, %v2868_v46  ;;  %v6948_v5 = vcombine.high %v2736_v52, %v2740_v54  ;;  %v2828_v45 = vld [vmem:[%s10172_s3 + $0x730] sm:$0xff] }
 0x29f   :  { %6046 = vmatmul.mubr.bf16.vlgmr.msra.gmra.mxu1 %v9083_v39  ;;  %v2944_v46 = vld [vmem:[%s10172_s3 + $0xad0] sm:$0xff] }
 0x2a0   :  { %6100 = vmatpush1.bf16.msra.mxu1 %v6995_v61  ;;  %6131 = vmatprep.mubr.bf16.mxu1 %v8674_v22  ;;  %v2980_v61 = vld [vmem:[%s10172_s3 + $0xbf0] sm:$0xff] }
 0x2a1   :  { %6145 = vmatpush1.bf16.msra.mxu0 %v7115_v1  ;;  %6101 = vmatprep.subr.bf16.mxu1 %v6988_v63  ;;  %v6947_v1 = vcombine.low %v2736_v52, %v2740_v54  ;;  %v7067_v63 = vcombine.low %v2856_v55, %v2860_v48  ;;  %v7188_v4 = vcombine.high %v2976_v59, %v2980_v61  ;;  %v2816_v54 = vld [vmem:[%s10172_s3 + $0x6d0] sm:$0xff]  ;;  %v5746_v48 = vpop.f32.mrf.mxu0 }
 0x2a2   :  { %6146 = vmatprep.subr.bf16.mxu0 %v7108_v3  ;;  %v6940_v3 = vcombine.high %v2728_v58, %v2732_v24  ;;  %v2820_v55 = vld [vmem:[%s10172_s3 + $0x6f0] sm:$0xff] }
 0x2a4   :  { %6102 = vmatpush1.bf16.msra.mxu1 %v6987_v0  ;;  %v2972_v0 = vld [vmem:[%s10172_s3 + $0xbb0] sm:$0xff] }
 0x2a5   :  { %6147 = vmatpush1.bf16.msra.mxu0 %v7107_v21  ;;  %6103 = vmatprep.subr.bf16.mxu1 %v6980_v7  ;;  %v6939_v21 = vcombine.low %v2728_v58, %v2732_v24  ;;  %v7187_v7 = vcombine.low %v2976_v59, %v2980_v61  ;;  %v7180_v11 = vcombine.high %v2968_v37, %v2972_v0  ;;  %v2808_v59 = vld [vmem:[%s10172_s3 + $0x690] sm:$0xff] }
 0x2a6   :  { %6148 = vmatprep.subr.bf16.mxu0 %v7100_v9  ;;  %v7060_v9 = vcombine.high %v2848_v6, %v2852_v42  ;;  %v7028_v58 = vcombine.high %v2816_v54, %v2820_v55  ;;  %v2812_v61 = vld [vmem:[%s10172_s3 + $0x6b0] sm:$0xff] }
 0x2a8   :  { %6104 = vmatpush1.bf16.msra.mxu1 %v6979_v44  ;;  %v2964_v44 = vld [vmem:[%s10172_s3 + $0xb70] sm:$0xff] }
 0x2a9   :  { %6149 = vmatpush1.bf16.msra.mxu0 %v7099_v14  ;;  %6105 = vmatprep.subr.bf16.mxu1 %v6972_v15  ;;  %v7059_v14 = vcombine.low %v2848_v6, %v2852_v42  ;;  %v7179_v15 = vcombine.low %v2968_v37, %v2972_v0  ;;  %v7172_v17 = vcombine.high %v2960_v13, %v2964_v44  ;;  %v2800_v0 = vld [vmem:[%s10172_s3 + $0x650] sm:$0xff] }
 0x2aa   :  { %6150 = vmatprep.subr.bf16.mxu0 %v7092_v16  ;;  %v7052_v16 = vcombine.high %v2840_v12, %v2844_v34  ;;  %v7020_v42 = vcombine.high %v2808_v59, %v2812_v61 }
 0x2ac   :  { %6106 = vmatpush1.bf16.msra.mxu1 %v6971_v29  ;;  %v2956_v29 = vld [vmem:[%s10172_s3 + $0xb30] sm:$0xff] }
 0x2ad   :  { %6151 = vmatpush1.bf16.msra.mxu0 %v7091_v31  ;;  %6107 = vmatprep.subr.bf16.mxu1 %v6964_v33  ;;  %v7051_v31 = vcombine.low %v2840_v12, %v2844_v34  ;;  %v7171_v33 = vcombine.low %v2960_v13, %v2964_v44  ;;  %v7164_v40 = vcombine.high %v2952_v28, %v2956_v29  ;;  %v9643_v34 = vld [vmem:[%s10173_s4] sm:$0xff]  ;;  %v5789_v13 = vpop.f32.mrf.mxu1 }
 0x2ae   :  { %6152 = vmatprep.subr.bf16.mxu0 %v7084_v62  ;;  %v7044_v62 = vcombine.high %v2832_v23, %v2836_v26  ;;  %v7019_v12 = vcombine.low %v2808_v59, %v2812_v61 }
 0x2b0   :  { %6108 = vmatpush1.bf16.msra.mxu1 %v6963_v10  ;;  %v2948_v10 = vld [vmem:[%s10172_s3 + $0xaf0] sm:$0xff] }
 0x2b1   :  { %6153 = vmatpush1.bf16.msra.mxu0 %v7083_v47  ;;  %6109 = vmatprep.subr.bf16.mxu1 %v6956_v49  ;;  %v7043_v47 = vcombine.low %v2832_v23, %v2836_v26  ;;  %v7163_v49 = vcombine.low %v2952_v28, %v2956_v29  ;;  %v7156_v52 = vcombine.high %v2944_v46, %v2948_v10  ;;  %v2657_v26 = vld [vmem:[%s10172_s3 + $0x1d8] sm:$0xff] }
 0x2b2   :  { %6154 = vmatprep.subr.bf16.mxu0 %v7076_v51  ;;  %v7036_v51 = vcombine.high %v2824_v43, %v2828_v45  ;;  %v2661_v28 = vld [vmem:[%s10172_s3 + $0x1f8] sm:$0xff]  ;;  %v3115_v29 = vrot.slane %v9643_v34, %v368_v8  ;;  %v3044_v8 = vld [vmem:[%s10172_s3 + $0xdf0] sm:$0xff] }
 0x2b4   :  { %6110 = vmatpush1.bf16.msra.mxu1 %v6955_v53  ;;  %v2936_v53 = vld [vmem:[%s10172_s3 + $0xa90] sm:$0xff] }
 0x2b5   :  { %6155 = vmatpush1.bf16.msra.mxu0 %v7075_v57  ;;  %6111 = vmatprep.subr.bf16.mxu1 %v6948_v5  ;;  %v2940_v57 = vld [vmem:[%s10172_s3 + $0xab0] sm:$0xff]  ;;  %v7035_v5 = vcombine.low %v2824_v43, %v2828_v45  ;;  %v3119_v45 = vrot.slane %v9643_v34, %v372_v41 }
 0x2b6   :  { %6156 = vmatprep.subr.bf16.mxu0 %v7068_v56  ;;  %v7155_v56 = vcombine.low %v2944_v46, %v2948_v10  ;;  %v7148_v24 = vcombine.high %v2936_v53, %v2940_v57  ;;  %v7147_v6 = vcombine.low %v2936_v53, %v2940_v57  ;;  %v6870_v46 = vcombine.high %v2657_v26, %v2661_v28  ;;  %v3040_v10 = vld [vmem:[%s10172_s3 + $0xdd0] sm:$0xff] }
 0x2b7   :  { %v7252_v57 = vcombine.high %v3040_v10, %v3044_v8  ;;  %v7251_v61 = vcombine.low %v3040_v10, %v3044_v8 }
 0x2b8   :  { %6112 = vmatpush1.bf16.msra.mxu1 %v6947_v1  ;;  %v5748_v1 = vpop.f32.mrf.mxu0 }
 0x2b9   :  { %6157 = vmatpush1.bf16.msra.mxu0 %v7067_v63  ;;  %6113 = vmatprep.subr.bf16.mxu1 %v6940_v3  ;;  %v2928_v63 = vld [vmem:[%s10172_s3 + $0xa50] sm:$0xff]  ;;  %v5749_v53 = vadd.f32 %v5748_v1, %v3119_v45 }
 0x2ba   :  { %6158 = vmatprep.subr.bf16.mxu0 %v7188_v4  ;;  %v2932_v3 = vld [vmem:[%s10172_s3 + $0xa70] sm:$0xff]  ;;  %v7027_v4 = vcombine.low %v2816_v54, %v2820_v55  ;;  %v6869_v55 = vcombine.low %v2657_v26, %v2661_v28 }
 0x2bb   :  { %v7140_v37 = vcombine.high %v2928_v63, %v2932_v3  ;;  %v7139_v44 = vcombine.low %v2928_v63, %v2932_v3 }
 0x2bc   :  { %6114 = vmatpush1.bf16.msra.mxu1 %v6939_v21  ;;  %v2804_v21 = vld [vmem:[%s10172_s3 + $0x670] sm:$0xff] }
 0x2bd   :  { %6159 = vmatpush2.bf16.msra.mxu0 %v7187_v7  ;;  %6115 = vmatprep.subr.bf16.mxu1 %v7060_v9  ;;  %v5750_v7 = vpop.f32.mrf.mxu0  ;;  %v2920_v9 = vld [vmem:[%s10172_s3 + $0xa10] sm:$0xff] }
 0x2be   :  { %6160 = vmatprep.subr.bf16.mxu0 %v7180_v11  ;;  %v2924_v11 = vld [vmem:[%s10172_s3 + $0xa30] sm:$0xff]  ;;  %v5751_v1 = vadd.f32 %v5750_v7, %v3115_v29 }
 0x2bf   :  { %v5752_v23 = vpop.f32.mrf.mxu0  ;;  %v3028_v7 = vld [vmem:[%s10172_s3 + $0xd70] sm:$0xff] }
 0x2c0   :  { %6116 = vmatpush2.bf16.msra.mxu1 %v7059_v14  ;;  %v7012_v14 = vcombine.high %v2800_v0, %v2804_v21 }
 0x2c1   :  { %6161 = vmatpush2.bf16.msra.mxu0 %v7179_v15  ;;  %6117 = vmatprep.subr.bf16.mxu1 %v7052_v16  ;;  %v7132_v15 = vcombine.high %v2920_v9, %v2924_v11  ;;  %v2792_v16 = vld [vmem:[%s10172_s3 + $0x610] sm:$0xff] }
 0x2c2   :  { %6162 = vmatprep.subr.bf16.mxu0 %v7172_v17  ;;  %v2796_v17 = vld [vmem:[%s10172_s3 + $0x630] sm:$0xff] }
 0x2c3   :  { %v7004_v43 = vcombine.high %v2792_v16, %v2796_v17  ;;  %v7003_v41 = vcombine.low %v2792_v16, %v2796_v17 }
 0x2c4   :  { %6118 = vmatpush2.bf16.msra.mxu1 %v7051_v31  ;;  %v7011_v31 = vcombine.low %v2800_v0, %v2804_v21  ;;  %v3024_v21 = vld [vmem:[%s10172_s3 + $0xd50] sm:$0xff] }
 0x2c5   :  { %6163 = vmatpush2.bf16.msra.mxu0 %v7171_v33  ;;  %6119 = vmatprep.subr.bf16.mxu1 %v7044_v62  ;;  %v5791_v33 = vpop.f32.mrf.mxu1  ;;  %v5832_v62 = vpop.f32.mrf.mxu0 }
 0x2c6   :  { %6164 = vmatprep.subr.bf16.mxu0 %v7164_v40  ;;  %v7131_v40 = vcombine.low %v2920_v9, %v2924_v11  ;;  %v2637_v11 = vld [vmem:[%s10172_s3 + $0x138] sm:$0xff] }
 0x2c7   :  { %v5834_v54 = vpop.f32.mrf.mxu0 }
 0x2c8   :  { %6120 = vmatpush2.bf16.msra.mxu1 %v7043_v47  ;;  %v2649_v47 = vld [vmem:[%s10172_s3 + $0x198] sm:$0xff] }
 0x2c9   :  { %6165 = vmatpush2.bf16.msra.mxu0 %v7163_v49  ;;  %6121 = vmatprep.subr.bf16.mxu1 %v7036_v51  ;;  %v2653_v49 = vld [vmem:[%s10172_s3 + $0x1b8] sm:$0xff]  ;;  %v5747_v51 = vadd.f32 %v5746_v48, %v3115_v29  ;;  %v5836_v3 = vpop.f32.mrf.mxu0 }
 0x2ca   :  { %6166 = vmatprep.subr.bf16.mxu0 %v7156_v52  ;;  %v5793_v52 = vpop.f32.mrf.mxu1  ;;  %v2641_v48 = vld [vmem:[%s10172_s3 + $0x158] sm:$0xff] }
 0x2cb   :  { %v5790_v59 = vadd.f32 %v5789_v13, %v5747_v51 }
 0x2cc   :  { %6122 = vmatpush2.bf16.msra.mxu1 %v7035_v5  ;;  %v6862_v5 = vcombine.high %v2649_v47, %v2653_v49  ;;  %v5795_v63 = vpop.f32.mrf.mxu1 }
 0x2cd   :  { %6167 = vmatpush2.bf16.msra.mxu0 %v7155_v56  ;;  %6123 = vmatprep.subr.bf16.mxu1 %v7028_v58  ;;  %v3032_v56 = vld [vmem:[%s10172_s3 + $0xd90] sm:$0xff] }
 0x2ce   :  { %6168 = vmatprep.subr.bf16.mxu0 %v7148_v24  ;;  %v3036_v58 = vld [vmem:[%s10172_s3 + $0xdb0] sm:$0xff]  ;;  %v2645_v24 = vld [vmem:[%s10172_s3 + $0x178] sm:$0xff] }
 0x2cf   :  { %v6854_v0 = vcombine.high %v2641_v48, %v2645_v24  ;;  %v6853_v17 = vcombine.low %v2641_v48, %v2645_v24 }
 0x2d0   :  { %6124 = vmatpush2.bf16.msra.mxu1 %v7027_v4  ;;  %v6861_v4 = vcombine.low %v2649_v47, %v2653_v49  ;;  %v7235_v47 = vcombine.low %v3024_v21, %v3028_v7 }
 0x2d1   :  { %6169 = vmatpush2.bf16.msra.mxu0 %v7147_v6  ;;  %6125 = vmatprep.subr.bf16.mxu1 %v7020_v42  ;;  %v7244_v6 = vcombine.high %v3032_v56, %v3036_v58  ;;  %v5792_v42 = vadd.f32 %v5791_v33, %v5749_v53  ;;  %v3016_v33 = vld [vmem:[%s10172_s3 + $0xd10] sm:$0xff] }
 0x2d2   :  { %6170 = vmatprep.subr.bf16.mxu0 %v7140_v37  ;;  %v5753_v37 = vadd.f32 %v5752_v23, %v3119_v45  ;;  %v7236_v23 = vcombine.high %v3024_v21, %v3028_v7  ;;  %v2629_v45 = vld [vmem:[%s10172_s3 + $0xf8] sm:$0xff]  ;;  %v3008_v53 = vld [vmem:[%s10172_s3 + $0xcd0] sm:$0xff] }
 0x2d3   :  { %v5835_v13 = vadd.f32 %v5834_v54, %v5792_v42  ;;  %v2992_v21 = vld [vmem:[%s10172_s3 + $0xc50] sm:$0xff] }
 0x2d4   :  { %6126 = vmatpush2.bf16.msra.mxu1 %v7019_v12  ;;  %v5833_v12 = vadd.f32 %v5832_v62, %v5790_v59  ;;  %v5796_v26 = vadd.f32 %v5795_v63, %v5753_v37  ;;  %v3020_v62 = vld [vmem:[%s10172_s3 + $0xd30] sm:$0xff] }
 0x2d5   :  { %6171 = vmatpush2.bf16.msra.mxu0 %v7139_v44  ;;  %6127 = vmatprep.subr.bf16.mxu1 %v7012_v14  ;;  %v7243_v44 = vcombine.low %v3032_v56, %v3036_v58  ;;  %v5794_v14 = vadd.f32 %v5793_v52, %v5751_v1  ;;  %v2621_v56 = vld [vmem:[%s10172_s3 + $0xb8] sm:$0xff]  ;;  %v7227_v48 = vcombine.low %v3016_v33, %v3020_v62  ;;  %v3000_v1 = vld [vmem:[%s10172_s3 + $0xc90] sm:$0xff] }
 0x2d6   :  { %6172 = vmatprep.subr.bf16.mxu0 %v7132_v15  ;;  %v5838_v15 = vpop.f32.mrf.mxu0  ;;  %v3004_v63 = vld [vmem:[%s10172_s3 + $0xcb0] sm:$0xff] }
 0x2d7   :  { %v5839_v10 = vadd.f32 %v5838_v15, %v5796_v26  ;;  %v7212_v37 = vcombine.high %v3000_v1, %v3004_v63  ;;  %v2996_v7 = vld [vmem:[%s10172_s3 + $0xc70] sm:$0xff] }
 0x2d8   :  { %6128 = vmatpush2.bf16.msra.mxu1 %v7011_v31  ;;  %v2988_v15 = vld [vmem:[%s10172_s3 + $0xc30] sm:$0xff] }
 0x2d9   :  { %6173 = vmatpush2.bf16.msra.mxu0 %v7131_v40  ;;  %6129 = vmatprep.subr.bf16.mxu1 %v7004_v43  ;;  %v2625_v43 = vld [vmem:[%s10172_s3 + $0xd8] sm:$0xff] }
 0x2da   :  { %6228 = vmatprep.subr.bf16.mxu0 %v6870_v46  ;;  %v5837_v46 = vadd.f32 %v5836_v3, %v5794_v14  ;;  %v6837_v24 = vcombine.low %v2625_v43, %v2629_v45  ;;  %v2609_v3 = vld [vmem:[%s10172_s3 + $0x58] sm:$0xff]  ;;  %v2984_v14 = vld [vmem:[%s10172_s3 + $0xc10] sm:$0xff] }
 0x2dc   :  { %6130 = vmatpush2.bf16.msra.mxu1 %v7003_v41  ;;  %6175 = vmatmul.mubr.bf16.vlgmr.msra.gmra.mxu0 %v8959_v38  ;;  %v7228_v41 = vcombine.high %v3016_v33, %v3020_v62  ;;  %v3108_v33 = vld [vmem:[%s10172_s3 + $0xff0] sm:$0xff]  ;;  %v2713_v62 = vld [vmem:[%s10172_s3 + $0x398] sm:$0xff] }
 0x2dd   :  { %6229 = vmatpush1.bf16.msra.mxu0 %v6869_v55  ;;  %6260 = vmatprep.mubr.bf16.mxu0 %v8526_v35  ;;  %v2633_v35 = vld [vmem:[%s10172_s3 + $0x118] sm:$0xff]  ;;  %v6838_v55 = vcombine.high %v2625_v43, %v2629_v45  ;;  %v7195_v43 = vcombine.low %v2984_v14, %v2988_v15 }
 0x2de   :  { %6185 = vmatprep.subr.bf16.mxu1 %v7252_v57  ;;  %6230 = vmatprep.subr.bf16.mxu0 %v6862_v5  ;;  %v6846_v31 = vcombine.high %v2633_v35, %v2637_v11  ;;  %v6845_v51 = vcombine.low %v2633_v35, %v2637_v11  ;;  %v3012_v57 = vld [vmem:[%s10172_s3 + $0xcf0] sm:$0xff]  ;;  %v2617_v5 = vld [vmem:[%s10172_s3 + $0x98] sm:$0xff]  ;;  %v7211_v11 = vcombine.low %v3000_v1, %v3004_v63 }
 0x2df   :  { %6132 = vmatmul.mubr.bf16.vlgmr.msra.gmra.mxu1 %v8746_v18  ;;  %v5875_v9 = vpop.f32.mrf.mxu1  ;;  %v7220_v59 = vcombine.high %v3008_v53, %v3012_v57  ;;  %v6829_v42 = vcombine.low %v2617_v5, %v2621_v56  ;;  %v2605_v35 = vld [vmem:[%s10172_s3 + $0x38] sm:$0xff]  ;;  %v3084_v1 = vld [vmem:[%s10172_s3 + $0xf30] sm:$0xff] }
 0x2e0   :  { %6186 = vmatpush1.bf16.msra.mxu1 %v7251_v61  ;;  %6217 = vmatprep.mubr.bf16.mxu1 %v9074_v30  ;;  %v5876_v28 = vadd.f32 %v5875_v9, %v5833_v12  ;;  %v6830_v61 = vcombine.high %v2617_v5, %v2621_v56  ;;  %v2601_v9 = vld [vmem:[%s10172_s3 + $0x18] sm:$0xff] }
 0x2e1   :  { %v5877_v16 = vpop.f32.mrf.mxu1  ;;  %6231 = vmatpush1.bf16.msra.mxu0 %v6861_v4  ;;  %6187 = vmatprep.subr.bf16.mxu1 %v7244_v6  ;;  %v2613_v4 = vld [vmem:[%s10172_s3 + $0x78] sm:$0xff]  ;;  %v7219_v6 = vcombine.low %v3008_v53, %v3012_v57  ;;  %v6813_v26 = vcombine.low %v2601_v9, %v2605_v35  ;;  %v3088_v53 = vld [vmem:[%s10172_s3 + $0xf50] sm:$0xff] }
 0x2e2   :  { %v5878_v29 = vadd.f32 %v5877_v16, %v5835_v13  ;;  %6232 = vmatprep.subr.bf16.mxu0 %v6854_v0  ;;  %v6822_v0 = vcombine.high %v2609_v3, %v2613_v4  ;;  %v6821_v12 = vcombine.low %v2609_v3, %v2613_v4  ;;  %v7204_v13 = vcombine.high %v2992_v21, %v2996_v7  ;;  %v2721_v16 = vld [vmem:[%s10172_s3 + $0x3d8] sm:$0xff]  ;;  %v3092_v57 = vld [vmem:[%s10172_s3 + $0xf70] sm:$0xff] }
 0x2e3   :  { %v5879_v40 = vpop.f32.mrf.mxu1  ;;  %v2697_v5 = vld [vmem:[%s10172_s3 + $0x318] sm:$0xff]  ;;  %v7299_v4 = vcombine.low %v3088_v53, %v3092_v57 }
 0x2e4   :  { %v7327_v8 = vpack.c.bf16 %v5878_v29, %v5876_v28  ;;  %6188 = vmatpush1.bf16.msra.mxu1 %v7243_v44  ;;  %v5880_v52 = vadd.f32 %v5879_v40, %v5837_v46  ;;  %v6814_v44 = vcombine.high %v2601_v9, %v2605_v35  ;;  %v7196_v28 = vcombine.high %v2984_v14, %v2988_v15  ;;  %v2717_v40 = vld [vmem:[%s10172_s3 + $0x3b8] sm:$0xff]  ;;  %v3068_v14 = vld [vmem:[%s10172_s3 + $0xeb0] sm:$0xff] }
 0x2e5   :  { %v5881_v49 = vpop.f32.mrf.mxu1  ;;  %6233 = vmatpush1.bf16.msra.mxu0 %v6853_v17  ;;  %6189 = vmatprep.subr.bf16.mxu1 %v7236_v23  ;;  %v2725_v17 = vld [vmem:[%s10172_s3 + $0x3f8] sm:$0xff]  ;;  %v7203_v23 = vcombine.low %v2992_v21, %v2996_v7  ;;  %v3076_v21 = vld [vmem:[%s10172_s3 + $0xef0] sm:$0xff] }
 0x2e6   :  { %6448 = vst [vmem:[#allocation2] sm:$0xff] %v7327_v8  ;;  %v5882_v54 = vadd.f32 %v5881_v49, %v5839_v10  ;;  %6234 = vmatprep.subr.bf16.mxu0 %v6846_v31  ;;  %v6934_v29 = vcombine.high %v2721_v16, %v2725_v17  ;;  %v3104_v31 = vld [vmem:[%s10172_s3 + $0xfd0] sm:$0xff]  ;;  %v6933_v45 = vcombine.low %v2721_v16, %v2725_v17  ;;  %v2705_v49 = vld [vmem:[%s10172_s3 + $0x358] sm:$0xff] }
 0x2e7   :  { %v7316_v46 = vcombine.high %v3104_v31, %v3108_v33  ;;  %v6926_v10 = vcombine.high %v2713_v62, %v2717_v40  ;;  %v3096_v8 = vld [vmem:[%s10172_s3 + $0xf90] sm:$0xff]  ;;  %v2701_v56 = vld [vmem:[%s10172_s3 + $0x338] sm:$0xff] }
 0x2e8   :  { %v7331_v58 = vpack.c.bf16 %v5882_v54, %v5880_v52  ;;  %6190 = vmatpush1.bf16.msra.mxu1 %v7235_v47  ;;  %v3100_v47 = vld [vmem:[%s10172_s3 + $0xfb0] sm:$0xff]  ;;  %v6925_v52 = vcombine.low %v2713_v62, %v2717_v40  ;;  %v2689_v63 = vld [vmem:[%s10172_s3 + $0x2d8] sm:$0xff] }
 0x2e9   :  { %6235 = vmatpush1.bf16.msra.mxu0 %v6845_v51  ;;  %6191 = vmatprep.subr.bf16.mxu1 %v7228_v41  ;;  %v2709_v51 = vld [vmem:[%s10172_s3 + $0x378] sm:$0xff]  ;;  %v7315_v41 = vcombine.low %v3104_v31, %v3108_v33  ;;  %v7308_v54 = vcombine.high %v3096_v8, %v3100_v47  ;;  %v3060_v31 = vld [vmem:[%s10172_s3 + $0xe70] sm:$0xff] }
 0x2ea   :  { %6455 = vst [vmem:[#allocation2 + $0x20] sm:$0xff] %v7331_v58  ;;  %6236 = vmatprep.subr.bf16.mxu0 %v6838_v55  ;;  %v6918_v55 = vcombine.high %v2705_v49, %v2709_v51  ;;  %v7307_v58 = vcombine.low %v3096_v8, %v3100_v47  ;;  %v2693_v3 = vld [vmem:[%s10172_s3 + $0x2f8] sm:$0xff]  ;;  %v3052_v8 = vld [vmem:[%s10172_s3 + $0xe30] sm:$0xff] }
 0x2eb   :  { %v2681_v7 = vld [vmem:[%s10172_s3 + $0x298] sm:$0xff] }
 0x2ec   :  { %6192 = vmatpush1.bf16.msra.mxu1 %v7227_v48  ;;  %v6917_v48 = vcombine.low %v2705_v49, %v2709_v51  ;;  %v2685_v9 = vld [vmem:[%s10172_s3 + $0x2b8] sm:$0xff] }
 0x2ed   :  { %6237 = vmatpush1.bf16.msra.mxu0 %v6837_v24  ;;  %6193 = vmatprep.subr.bf16.mxu1 %v7220_v59  ;;  %v7300_v24 = vcombine.high %v3088_v53, %v3092_v57  ;;  %v6910_v59 = vcombine.high %v2697_v5, %v2701_v56  ;;  %v2673_v15 = vld [vmem:[%s10172_s3 + $0x258] sm:$0xff] }
 0x2ee   :  { %6238 = vmatprep.subr.bf16.mxu0 %v6830_v61  ;;  %v3080_v61 = vld [vmem:[%s10172_s3 + $0xf10] sm:$0xff]  ;;  %v2677_v16 = vld [vmem:[%s10172_s3 + $0x278] sm:$0xff] }
 0x2ef   :  { %v7291_v35 = vcombine.low %v3080_v61, %v3084_v1  ;;  %v2665_v33 = vld [vmem:[%s10172_s3 + $0x218] sm:$0xff] }
 0x2f0   :  { %6194 = vmatpush1.bf16.msra.mxu1 %v7219_v6  ;;  %v6909_v6 = vcombine.low %v2697_v5, %v2701_v56  ;;  %v2669_v62 = vld [vmem:[%s10172_s3 + $0x238] sm:$0xff] }
 0x2f1   :  { %6239 = vmatpush1.bf16.msra.mxu0 %v6829_v42  ;;  %6195 = vmatprep.subr.bf16.mxu1 %v7212_v37  ;;  %v7292_v42 = vcombine.high %v3080_v61, %v3084_v1  ;;  %v6902_v37 = vcombine.high %v2689_v63, %v2693_v3  ;;  %v2913_v47 = vld [vmem:[%s10172_s3 + $0x9d8] sm:$0xff] }
 0x2f2   :  { %6240 = vmatprep.subr.bf16.mxu0 %v6822_v0  ;;  %v3072_v0 = vld [vmem:[%s10172_s3 + $0xed0] sm:$0xff]  ;;  %v2917_v49 = vld [vmem:[%s10172_s3 + $0x9f8] sm:$0xff] }
 0x2f3   :  { %v7283_v17 = vcombine.low %v3072_v0, %v3076_v21  ;;  %v2789_v53 = vld [vmem:[%s10172_s3 + $0x5f8] sm:$0xff] }
 0x2f4   :  { %6196 = vmatpush1.bf16.msra.mxu1 %v7211_v11  ;;  %v6901_v11 = vcombine.low %v2689_v63, %v2693_v3  ;;  %v2905_v57 = vld [vmem:[%s10172_s3 + $0x998] sm:$0xff] }
 0x2f5   :  { %6241 = vmatpush1.bf16.msra.mxu0 %v6821_v12  ;;  %6197 = vmatprep.subr.bf16.mxu1 %v7204_v13  ;;  %v7284_v12 = vcombine.high %v3072_v0, %v3076_v21  ;;  %v6894_v13 = vcombine.high %v2681_v7, %v2685_v9  ;;  %v2909_v5 = vld [vmem:[%s10172_s3 + $0x9b8] sm:$0xff] }
 0x2f6   :  { %6242 = vmatprep.subr.bf16.mxu0 %v6814_v44  ;;  %v3064_v44 = vld [vmem:[%s10172_s3 + $0xe90] sm:$0xff]  ;;  %v2781_v61 = vld [vmem:[%s10172_s3 + $0x5b8] sm:$0xff] }
 0x2f7   :  { %v7275_v40 = vcombine.low %v3064_v44, %v3068_v14  ;;  %v2897_v1 = vld [vmem:[%s10172_s3 + $0x958] sm:$0xff] }
 0x2f8   :  { %6198 = vmatpush1.bf16.msra.mxu1 %v7203_v23  ;;  %v6893_v23 = vcombine.low %v2681_v7, %v2685_v9  ;;  %v2901_v63 = vld [vmem:[%s10172_s3 + $0x978] sm:$0xff] }
 0x2f9   :  { %6243 = vmatpush1.bf16.msra.mxu0 %v6813_v26  ;;  %6199 = vmatprep.subr.bf16.mxu1 %v7196_v28  ;;  %v7276_v26 = vcombine.high %v3064_v44, %v3068_v14  ;;  %v6886_v28 = vcombine.high %v2673_v15, %v2677_v16  ;;  %v2773_v0 = vld [vmem:[%s10172_s3 + $0x578] sm:$0xff]  ;;  %v7109_v7 = vcombine.low %v2897_v1, %v2901_v63 }
 0x2fa   :  { %6244 = vmatprep.subr.bf16.mxu0 %v6934_v29  ;;  %v3056_v29 = vld [vmem:[%s10172_s3 + $0xe50] sm:$0xff] }
 0x2fb   :  { %v7267_v51 = vcombine.low %v3056_v29, %v3060_v31 }
 0x2fc   :  { %6200 = vmatpush1.bf16.msra.mxu1 %v7195_v43  ;;  %v6885_v43 = vcombine.low %v2673_v15, %v2677_v16 }
 0x2fd   :  { %6245 = vmatpush2.bf16.msra.mxu0 %v6933_v45  ;;  %6201 = vmatprep.subr.bf16.mxu1 %v7316_v46  ;;  %v7268_v45 = vcombine.high %v3056_v29, %v3060_v31  ;;  %v6878_v46 = vcombine.high %v2665_v33, %v2669_v62 }
 0x2fe   :  { %6246 = vmatprep.subr.bf16.mxu0 %v6926_v10  ;;  %v3048_v10 = vld [vmem:[%s10172_s3 + $0xe10] sm:$0xff] }
 0x2ff   :  { %v7259_v56 = vcombine.low %v3048_v10, %v3052_v8 }
 0x300   :  { %6202 = vmatpush2.bf16.msra.mxu1 %v7315_v41  ;;  %v6877_v41 = vcombine.low %v2665_v33, %v2669_v62 }
 0x301   :  { %6247 = vmatpush2.bf16.msra.mxu0 %v6925_v52  ;;  %6203 = vmatprep.subr.bf16.mxu1 %v7308_v54  ;;  %v7260_v52 = vcombine.high %v3048_v10, %v3052_v8  ;;  %v7126_v54 = vcombine.high %v2913_v47, %v2917_v49 }
 0x302   :  { %6248 = vmatprep.subr.bf16.mxu0 %v6918_v55  ;;  %v2785_v55 = vld [vmem:[%s10172_s3 + $0x5d8] sm:$0xff] }
 0x303   :  { %v6997_v3 = vcombine.low %v2785_v55, %v2789_v53 }
 0x304   :  { %6204 = vmatpush2.bf16.msra.mxu1 %v7307_v58  ;;  %v7125_v58 = vcombine.low %v2913_v47, %v2917_v49 }
 0x305   :  { %6249 = vmatpush2.bf16.msra.mxu0 %v6917_v48  ;;  %6205 = vmatprep.subr.bf16.mxu1 %v7300_v24  ;;  %v6998_v48 = vcombine.high %v2785_v55, %v2789_v53  ;;  %v7118_v24 = vcombine.high %v2905_v57, %v2909_v5 }
 0x306   :  { %6250 = vmatprep.subr.bf16.mxu0 %v6910_v59  ;;  %v2777_v59 = vld [vmem:[%s10172_s3 + $0x598] sm:$0xff] }
 0x307   :  { %v6989_v21 = vcombine.low %v2777_v59, %v2781_v61 }
 0x308   :  { %6206 = vmatpush2.bf16.msra.mxu1 %v7299_v4  ;;  %v7117_v4 = vcombine.low %v2905_v57, %v2909_v5 }
 0x309   :  { %6251 = vmatpush2.bf16.msra.mxu0 %v6909_v6  ;;  %6207 = vmatprep.subr.bf16.mxu1 %v7292_v42  ;;  %v6990_v6 = vcombine.high %v2777_v59, %v2781_v61  ;;  %v7110_v42 = vcombine.high %v2897_v1, %v2901_v63 }
 0x30a   :  { %6252 = vmatprep.subr.bf16.mxu0 %v6902_v37  ;;  %v2769_v37 = vld [vmem:[%s10172_s3 + $0x558] sm:$0xff] }
 0x30b   :  { %v6982_v9 = vcombine.high %v2769_v37, %v2773_v0  ;;  %v6981_v44 = vcombine.low %v2769_v37, %v2773_v0 }
 0x30c   :  { %6208 = vmatpush2.bf16.msra.mxu1 %v7291_v35 }
 0x30d   :  { %6253 = vmatpush2.bf16.msra.mxu0 %v6901_v11  ;;  %6209 = vmatprep.subr.bf16.mxu1 %v7284_v12  ;;  %v2761_v11 = vld [vmem:[%s10172_s3 + $0x518] sm:$0xff] }
 0x30e   :  { %6254 = vmatprep.subr.bf16.mxu0 %v6894_v13  ;;  %v2765_v12 = vld [vmem:[%s10172_s3 + $0x538] sm:$0xff] }
 0x30f   :  { %v2881_v13 = vld [vmem:[%s10172_s3 + $0x8d8] sm:$0xff]  ;;  %v6974_v15 = vcombine.high %v2761_v11, %v2765_v12  ;;  %v6973_v29 = vcombine.low %v2761_v11, %v2765_v12 }
 0x310   :  { %6210 = vmatpush2.bf16.msra.mxu1 %v7283_v17  ;;  %v2753_v17 = vld [vmem:[%s10172_s3 + $0x4d8] sm:$0xff] }
 0x311   :  { %6255 = vmatpush2.bf16.msra.mxu0 %v6893_v23  ;;  %6211 = vmatprep.subr.bf16.mxu1 %v7276_v26  ;;  %v2757_v23 = vld [vmem:[%s10172_s3 + $0x4f8] sm:$0xff] }
 0x312   :  { %6256 = vmatprep.subr.bf16.mxu0 %v6886_v28  ;;  %v2873_v26 = vld [vmem:[%s10172_s3 + $0x898] sm:$0xff]  ;;  %v6966_v33 = vcombine.high %v2753_v17, %v2757_v23  ;;  %v6965_v10 = vcombine.low %v2753_v17, %v2757_v23 }
 0x313   :  { %v2877_v28 = vld [vmem:[%s10172_s3 + $0x8b8] sm:$0xff] }
 0x314   :  { %6212 = vmatpush2.bf16.msra.mxu1 %v7275_v40  ;;  %v7086_v62 = vcombine.high %v2873_v26, %v2877_v28  ;;  %v2745_v40 = vld [vmem:[%s10172_s3 + $0x498] sm:$0xff]  ;;  %v7085_v8 = vcombine.low %v2873_v26, %v2877_v28 }
 0x315   :  { %6257 = vmatpush2.bf16.msra.mxu0 %v6885_v43  ;;  %6213 = vmatprep.subr.bf16.mxu1 %v7268_v45  ;;  %v2749_v43 = vld [vmem:[%s10172_s3 + $0x4b8] sm:$0xff] }
 0x316   :  { %6258 = vmatprep.subr.bf16.mxu0 %v6878_v46  ;;  %v2865_v45 = vld [vmem:[%s10172_s3 + $0x858] sm:$0xff]  ;;  %v6958_v47 = vcombine.high %v2745_v40, %v2749_v43  ;;  %v6957_v55 = vcombine.low %v2745_v40, %v2749_v43 }
 0x317   :  { %v2869_v46 = vld [vmem:[%s10172_s3 + $0x878] sm:$0xff] }
 0x318   :  { %6214 = vmatpush2.bf16.msra.mxu1 %v7267_v51  ;;  %v7078_v49 = vcombine.high %v2865_v45, %v2869_v46  ;;  %v2737_v51 = vld [vmem:[%s10172_s3 + $0x458] sm:$0xff]  ;;  %v7077_v53 = vcombine.low %v2865_v45, %v2869_v46 }
 0x319   :  { %6259 = vmatpush2.bf16.msra.mxu0 %v6877_v41  ;;  %6215 = vmatprep.subr.bf16.mxu1 %v7260_v52  ;;  %v2741_v41 = vld [vmem:[%s10172_s3 + $0x478] sm:$0xff] }
 0x31a   :  { %6314 = vmatprep.subr.bf16.mxu0 %v7126_v54  ;;  %v2857_v52 = vld [vmem:[%s10172_s3 + $0x818] sm:$0xff]  ;;  %v6950_v57 = vcombine.high %v2737_v51, %v2741_v41  ;;  %v6949_v59 = vcombine.low %v2737_v51, %v2741_v41  ;;  %v5918_v41 = vpop.f32.mrf.mxu0 }
 0x31b   :  { %v2861_v54 = vld [vmem:[%s10172_s3 + $0x838] sm:$0xff] }
 0x31c   :  { %6216 = vmatpush2.bf16.msra.mxu1 %v7259_v56  ;;  %6261 = vmatmul.mubr.bf16.vlgmr.msra.gmra.mxu0 %v8439_v20  ;;  %v2889_v20 = vld [vmem:[%s10172_s3 + $0x918] sm:$0xff]  ;;  %v7070_v5 = vcombine.high %v2857_v52, %v2861_v54  ;;  %v7069_v61 = vcombine.low %v2857_v52, %v2861_v54 }
 0x31d   :  { %6315 = vmatpush1.bf16.msra.mxu0 %v7125_v58  ;;  %6346 = vmatprep.mubr.bf16.mxu0 %v8957_v32  ;;  %v2893_v32 = vld [vmem:[%s10172_s3 + $0x938] sm:$0xff] }
 0x31e   :  { %6271 = vmatprep.subr.bf16.mxu1 %v6998_v48  ;;  %6316 = vmatprep.subr.bf16.mxu0 %v7118_v24  ;;  %v7102_v35 = vcombine.high %v2889_v20, %v2893_v32  ;;  %v7101_v14 = vcombine.low %v2889_v20, %v2893_v32  ;;  %v2729_v56 = vld [vmem:[%s10172_s3 + $0x418] sm:$0xff] }
 0x31f   :  { %6218 = vmatmul.mubr.bf16.vlgmr.msra.gmra.mxu1 %v9083_v39  ;;  %v2733_v58 = vld [vmem:[%s10172_s3 + $0x438] sm:$0xff] }
 0x320   :  { %6272 = vmatpush1.bf16.msra.mxu1 %v6997_v3  ;;  %6303 = vmatprep.mubr.bf16.mxu1 %v8674_v22  ;;  %v2885_v22 = vld [vmem:[%s10172_s3 + $0x8f8] sm:$0xff]  ;;  %v6942_v1 = vcombine.high %v2729_v56, %v2733_v58  ;;  %v6941_v37 = vcombine.low %v2729_v56, %v2733_v58 }
 0x321   :  { %6317 = vmatpush1.bf16.msra.mxu0 %v7117_v4  ;;  %6273 = vmatprep.subr.bf16.mxu1 %v6990_v6  ;;  %v7094_v16 = vcombine.high %v2881_v13, %v2885_v22  ;;  %v7093_v31 = vcombine.low %v2881_v13, %v2885_v22  ;;  %v2977_v48 = vld [vmem:[%s10172_s3 + $0xbd8] sm:$0xff] }
 0x322   :  { %6318 = vmatprep.subr.bf16.mxu0 %v7110_v42  ;;  %v2981_v24 = vld [vmem:[%s10172_s3 + $0xbf8] sm:$0xff] }
 0x323   :  { %v7190_v63 = vcombine.high %v2977_v48, %v2981_v24  ;;  %v2849_v3 = vld [vmem:[%s10172_s3 + $0x7d8] sm:$0xff]  ;;  %v7189_v0 = vcombine.low %v2977_v48, %v2981_v24  ;;  %v5920_v48 = vpop.f32.mrf.mxu0 }
 0x324   :  { %6274 = vmatpush1.bf16.msra.mxu1 %v6989_v21  ;;  %v2853_v4 = vld [vmem:[%s10172_s3 + $0x7f8] sm:$0xff] }
 0x325   :  { %6319 = vmatpush1.bf16.msra.mxu0 %v7109_v7  ;;  %6275 = vmatprep.subr.bf16.mxu1 %v6982_v9  ;;  %v2969_v6 = vld [vmem:[%s10172_s3 + $0xb98] sm:$0xff]  ;;  %v7062_v20 = vcombine.high %v2849_v3, %v2853_v4  ;;  %v7061_v11 = vcombine.low %v2849_v3, %v2853_v4 }
 0x326   :  { %6320 = vmatprep.subr.bf16.mxu0 %v7102_v35  ;;  %v2973_v42 = vld [vmem:[%s10172_s3 + $0xbb8] sm:$0xff] }
 0x327   :  { %v7182_v32 = vcombine.high %v2969_v6, %v2973_v42  ;;  %v2841_v21 = vld [vmem:[%s10172_s3 + $0x798] sm:$0xff]  ;;  %v7181_v12 = vcombine.low %v2969_v6, %v2973_v42  ;;  %v5922_v42 = vpop.f32.mrf.mxu0 }
 0x328   :  { %6276 = vmatpush1.bf16.msra.mxu1 %v6981_v44  ;;  %v2845_v7 = vld [vmem:[%s10172_s3 + $0x7b8] sm:$0xff] }
 0x329   :  { %6321 = vmatpush1.bf16.msra.mxu0 %v7101_v14  ;;  %6277 = vmatprep.subr.bf16.mxu1 %v6974_v15  ;;  %v2961_v9 = vld [vmem:[%s10172_s3 + $0xb58] sm:$0xff]  ;;  %v7054_v13 = vcombine.high %v2841_v21, %v2845_v7  ;;  %v7053_v17 = vcombine.low %v2841_v21, %v2845_v7 }
 0x32a   :  { %6322 = vmatprep.subr.bf16.mxu0 %v7094_v16  ;;  %v2965_v35 = vld [vmem:[%s10172_s3 + $0xb78] sm:$0xff] }
 0x32b   :  { %v7174_v22 = vcombine.high %v2961_v9, %v2965_v35  ;;  %v2833_v44 = vld [vmem:[%s10172_s3 + $0x758] sm:$0xff]  ;;  %v7173_v23 = vcombine.low %v2961_v9, %v2965_v35  ;;  %v3123_v35 = vrot.slane %v9643_v34, %v376_v2 }
 0x32c   :  { %6278 = vmatpush1.bf16.msra.mxu1 %v6973_v29  ;;  %v2837_v14 = vld [vmem:[%s10172_s3 + $0x778] sm:$0xff] }
 0x32d   :  { %6323 = vmatpush1.bf16.msra.mxu0 %v7093_v31  ;;  %6279 = vmatprep.subr.bf16.mxu1 %v6966_v33  ;;  %v2953_v15 = vld [vmem:[%s10172_s3 + $0xb18] sm:$0xff]  ;;  %v7046_v26 = vcombine.high %v2833_v44, %v2837_v14  ;;  %v7045_v40 = vcombine.low %v2833_v44, %v2837_v14  ;;  %v3127_v44 = vrot.slane %v9643_v34, %v380_v50 }
 0x32e   :  { %6324 = vmatprep.subr.bf16.mxu0 %v7086_v62  ;;  %v2957_v16 = vld [vmem:[%s10172_s3 + $0xb38] sm:$0xff] }
 0x32f   :  { %v7166_v28 = vcombine.high %v2953_v15, %v2957_v16  ;;  %v2825_v29 = vld [vmem:[%s10172_s3 + $0x718] sm:$0xff]  ;;  %v7165_v43 = vcombine.low %v2953_v15, %v2957_v16 }
 0x330   :  { %6280 = vmatpush1.bf16.msra.mxu1 %v6965_v10  ;;  %v2829_v31 = vld [vmem:[%s10172_s3 + $0x738] sm:$0xff] }
 0x331   :  { %6325 = vmatpush1.bf16.msra.mxu0 %v7085_v8  ;;  %6281 = vmatprep.subr.bf16.mxu1 %v6958_v47  ;;  %v2945_v33 = vld [vmem:[%s10172_s3 + $0xad8] sm:$0xff]  ;;  %v7038_v45 = vcombine.high %v2825_v29, %v2829_v31  ;;  %v7037_v51 = vcombine.low %v2825_v29, %v2829_v31 }
 0x332   :  { %6326 = vmatprep.subr.bf16.mxu0 %v7078_v49  ;;  %v2949_v62 = vld [vmem:[%s10172_s3 + $0xaf8] sm:$0xff] }
 0x333   :  { %v7158_v46 = vcombine.high %v2945_v33, %v2949_v62  ;;  %v2817_v10 = vld [vmem:[%s10172_s3 + $0x6d8] sm:$0xff]  ;;  %v7157_v52 = vcombine.low %v2945_v33, %v2949_v62 }
 0x334   :  { %6282 = vmatpush1.bf16.msra.mxu1 %v6957_v55  ;;  %v2821_v8 = vld [vmem:[%s10172_s3 + $0x6f8] sm:$0xff] }
 0x335   :  { %6327 = vmatpush1.bf16.msra.mxu0 %v7077_v53  ;;  %6283 = vmatprep.subr.bf16.mxu1 %v6950_v57  ;;  %v2937_v47 = vld [vmem:[%s10172_s3 + $0xa98] sm:$0xff]  ;;  %v7030_v54 = vcombine.high %v2817_v10, %v2821_v8  ;;  %v7029_v58 = vcombine.low %v2817_v10, %v2821_v8 }
 0x336   :  { %6328 = vmatprep.subr.bf16.mxu0 %v7070_v5  ;;  %v2941_v49 = vld [vmem:[%s10172_s3 + $0xab8] sm:$0xff] }
 0x337   :  { %v7150_v55 = vcombine.high %v2937_v47, %v2941_v49  ;;  %v2809_v53 = vld [vmem:[%s10172_s3 + $0x698] sm:$0xff]  ;;  %v7149_v24 = vcombine.low %v2937_v47, %v2941_v49 }
 0x338   :  { %6284 = vmatpush1.bf16.msra.mxu1 %v6949_v59  ;;  %v2813_v57 = vld [vmem:[%s10172_s3 + $0x6b8] sm:$0xff] }
 0x339   :  { %6329 = vmatpush1.bf16.msra.mxu0 %v7069_v61  ;;  %6285 = vmatprep.subr.bf16.mxu1 %v6942_v1  ;;  %v2929_v5 = vld [vmem:[%s10172_s3 + $0xa58] sm:$0xff]  ;;  %v7022_v59 = vcombine.high %v2809_v53, %v2813_v57  ;;  %v7021_v6 = vcombine.low %v2809_v53, %v2813_v57 }
 0x33a   :  { %6330 = vmatprep.subr.bf16.mxu0 %v7190_v63  ;;  %v2933_v56 = vld [vmem:[%s10172_s3 + $0xa78] sm:$0xff] }
 0x33b   :  { %v7142_v61 = vcombine.high %v2929_v5, %v2933_v56  ;;  %v2801_v1 = vld [vmem:[%s10172_s3 + $0x658] sm:$0xff] }
 0x33c   :  { %6286 = vmatpush1.bf16.msra.mxu1 %v6941_v37  ;;  %v2805_v63 = vld [vmem:[%s10172_s3 + $0x678] sm:$0xff]  ;;  %v5961_v37 = vpop.f32.mrf.mxu1 }
 0x33d   :  { %6331 = vmatpush2.bf16.msra.mxu0 %v7189_v0  ;;  %6287 = vmatprep.subr.bf16.mxu1 %v7062_v20  ;;  %v2921_v3 = vld [vmem:[%s10172_s3 + $0xa18] sm:$0xff]  ;;  %v7141_v0 = vcombine.low %v2929_v5, %v2933_v56  ;;  %v7014_v20 = vcombine.high %v2801_v1, %v2805_v63  ;;  %v7013_v9 = vcombine.low %v2801_v1, %v2805_v63 }
 0x33e   :  { %6332 = vmatprep.subr.bf16.mxu0 %v7182_v32  ;;  %v2925_v4 = vld [vmem:[%s10172_s3 + $0xa38] sm:$0xff] }
 0x33f   :  { %v7134_v32 = vcombine.high %v2921_v3, %v2925_v4  ;;  %v2793_v21 = vld [vmem:[%s10172_s3 + $0x618] sm:$0xff] }
 0x340   :  { %6288 = vmatpush2.bf16.msra.mxu1 %v7061_v11  ;;  %v2797_v7 = vld [vmem:[%s10172_s3 + $0x638] sm:$0xff]  ;;  %v5924_v11 = vpop.f32.mrf.mxu0 }
 0x341   :  { %6333 = vmatpush2.bf16.msra.mxu0 %v7181_v12  ;;  %6289 = vmatprep.subr.bf16.mxu1 %v7054_v13  ;;  %v5963_v12 = vpop.f32.mrf.mxu1  ;;  %v7133_v13 = vcombine.low %v2921_v3, %v2925_v4  ;;  %v3041_v14 = vld [vmem:[%s10172_s3 + $0xdd8] sm:$0xff]  ;;  %v7005_v16 = vcombine.low %v2793_v21, %v2797_v7 }
 0x342   :  { %6334 = vmatprep.subr.bf16.mxu0 %v7174_v22  ;;  %v7006_v22 = vcombine.high %v2793_v21, %v2797_v7  ;;  %v3045_v15 = vld [vmem:[%s10172_s3 + $0xdf8] sm:$0xff]  ;;  %v6004_v2 = vpop.f32.mrf.mxu0 }
 0x343   :  { %v3033_v50 = vld [vmem:[%s10172_s3 + $0xd98] sm:$0xff]  ;;  %v7253_v62 = vcombine.low %v3041_v14, %v3045_v15 }
 0x344   :  { %6290 = vmatpush2.bf16.msra.mxu1 %v7053_v17  ;;  %v5919_v17 = vadd.f32 %v5918_v41, %v3123_v35  ;;  %v3037_v34 = vld [vmem:[%s10172_s3 + $0xdb8] sm:$0xff]  ;;  %v6006_v31 = vpop.f32.mrf.mxu0 }
 0x345   :  { %6335 = vmatpush2.bf16.msra.mxu0 %v7173_v23  ;;  %6291 = vmatprep.subr.bf16.mxu1 %v7046_v26  ;;  %v5965_v23 = vpop.f32.mrf.mxu1  ;;  %v7254_v26 = vcombine.high %v3041_v14, %v3045_v15  ;;  %v3025_v10 = vld [vmem:[%s10172_s3 + $0xd58] sm:$0xff] }
 0x346   :  { %6336 = vmatprep.subr.bf16.mxu0 %v7166_v28  ;;  %v5921_v28 = vadd.f32 %v5920_v48, %v3127_v44  ;;  %v5962_v29 = vadd.f32 %v5961_v37, %v5919_v17  ;;  %v3029_v8 = vld [vmem:[%s10172_s3 + $0xd78] sm:$0xff]  ;;  %v6008_v47 = vpop.f32.mrf.mxu0 }
 0x347   :  { %v7238_v53 = vcombine.high %v3025_v10, %v3029_v8  ;;  %v3017_v56 = vld [vmem:[%s10172_s3 + $0xd18] sm:$0xff] }
 0x348   :  { %6292 = vmatpush2.bf16.msra.mxu1 %v7045_v40  ;;  %v5964_v33 = vadd.f32 %v5963_v12, %v5921_v28  ;;  %v5967_v40 = vpop.f32.mrf.mxu1  ;;  %v6005_v49 = vadd.f32 %v6004_v2, %v5962_v29  ;;  %v3005_v21 = vld [vmem:[%s10172_s3 + $0xcb8] sm:$0xff] }
 0x349   :  { %6337 = vmatpush2.bf16.msra.mxu0 %v7165_v43  ;;  %6293 = vmatprep.subr.bf16.mxu1 %v7038_v45  ;;  %v7246_v43 = vcombine.high %v3033_v50, %v3037_v34  ;;  %v5923_v45 = vadd.f32 %v5922_v42, %v3123_v35  ;;  %v3013_v42 = vld [vmem:[%s10172_s3 + $0xcf8] sm:$0xff] }
 0x34a   :  { %6338 = vmatprep.subr.bf16.mxu0 %v7158_v46  ;;  %v5925_v46 = vadd.f32 %v5924_v11, %v3127_v44  ;;  %v2993_v35 = vld [vmem:[%s10172_s3 + $0xc58] sm:$0xff] }
 0x34b   :  { %v5966_v41 = vadd.f32 %v5965_v23, %v5923_v45  ;;  %v2997_v11 = vld [vmem:[%s10172_s3 + $0xc78] sm:$0xff] }
 0x34c   :  { %6294 = vmatpush2.bf16.msra.mxu1 %v7037_v51  ;;  %v2989_v44 = vld [vmem:[%s10172_s3 + $0xc38] sm:$0xff]  ;;  %v7205_v14 = vcombine.low %v2993_v35, %v2997_v11 }
 0x34d   :  { %6339 = vmatpush2.bf16.msra.mxu0 %v7157_v52  ;;  %6295 = vmatprep.subr.bf16.mxu1 %v7030_v54  ;;  %v5968_v52 = vadd.f32 %v5967_v40, %v5925_v46  ;;  %v6007_v54 = vadd.f32 %v6006_v31, %v5964_v33  ;;  %v3105_v2 = vld [vmem:[%s10172_s3 + $0xfd8] sm:$0xff] }
 0x34e   :  { %6340 = vmatprep.subr.bf16.mxu0 %v7150_v55  ;;  %v3101_v28 = vld [vmem:[%s10172_s3 + $0xfb8] sm:$0xff] }
 0x34f   :  { %v3089_v29 = vld [vmem:[%s10172_s3 + $0xf58] sm:$0xff] }
 0x350   :  { %6296 = vmatpush2.bf16.msra.mxu1 %v7029_v58  ;;  %v6010_v58 = vpop.f32.mrf.mxu0  ;;  %v3093_v31 = vld [vmem:[%s10172_s3 + $0xf78] sm:$0xff] }
 0x351   :  { %6341 = vmatpush2.bf16.msra.mxu0 %v7149_v24  ;;  %6297 = vmatprep.subr.bf16.mxu1 %v7022_v59  ;;  %v6009_v59 = vadd.f32 %v6008_v47, %v5966_v41  ;;  %v3081_v40 = vld [vmem:[%s10172_s3 + $0xf18] sm:$0xff]  ;;  %v7301_v45 = vcombine.low %v3089_v29, %v3093_v31 }
 0x352   :  { %6342 = vmatprep.subr.bf16.mxu0 %v7142_v61  ;;  %v7237_v61 = vcombine.low %v3025_v10, %v3029_v8  ;;  %v3073_v10 = vld [vmem:[%s10172_s3 + $0xed8] sm:$0xff] }
 0x353   :  { %v3077_v8 = vld [vmem:[%s10172_s3 + $0xef8] sm:$0xff] }
 0x354   :  { %6298 = vmatpush2.bf16.msra.mxu1 %v7021_v6  ;;  %v3009_v6 = vld [vmem:[%s10172_s3 + $0xcd8] sm:$0xff]  ;;  %v7285_v41 = vcombine.low %v3073_v10, %v3077_v8 }
 0x355   :  { %6343 = vmatpush2.bf16.msra.mxu0 %v7141_v0  ;;  %6299 = vmatprep.subr.bf16.mxu1 %v7014_v20  ;;  %v7222_v20 = vcombine.high %v3009_v6, %v3013_v42  ;;  %v7221_v7 = vcombine.low %v3009_v6, %v3013_v42 }
 0x356   :  { %6344 = vmatprep.subr.bf16.mxu0 %v7134_v32  ;;  %v3001_v32 = vld [vmem:[%s10172_s3 + $0xc98] sm:$0xff] }
 0x357   :  { %v7213_v12 = vcombine.low %v3001_v32, %v3005_v21 }
 0x358   :  { %6300 = vmatpush2.bf16.msra.mxu1 %v7013_v9  ;;  %v7214_v9 = vcombine.high %v3001_v32, %v3005_v21 }
 0x359   :  { %6345 = vmatpush2.bf16.msra.mxu0 %v7133_v13  ;;  %6301 = vmatprep.subr.bf16.mxu1 %v7006_v22  ;;  %v7206_v13 = vcombine.high %v2993_v35, %v2997_v11  ;;  %v2985_v22 = vld [vmem:[%s10172_s3 + $0xc18] sm:$0xff] }
 0x35a   :  { %v7198_v15 = vcombine.high %v2985_v22, %v2989_v44  ;;  %v7197_v17 = vcombine.low %v2985_v22, %v2989_v44 }
 0x35c   :  { %6302 = vmatpush2.bf16.msra.mxu1 %v7005_v16  ;;  %6347 = vmatmul.mubr.bf16.vlgmr.msra.gmra.mxu0 %v8959_v38  ;;  %v7245_v38 = vcombine.low %v3033_v50, %v3037_v34  ;;  %v3109_v16 = vld [vmem:[%s10172_s3 + $0xff8] sm:$0xff] }
 0x35d   :  { %6357 = vmatprep.subr.bf16.mxu1 %v7254_v26  ;;  %v7318_v23 = vcombine.high %v3105_v2, %v3109_v16  ;;  %v3097_v26 = vld [vmem:[%s10172_s3 + $0xf98] sm:$0xff]  ;;  %v7317_v50 = vcombine.low %v3105_v2, %v3109_v16 }
 0x35e   :  { %v7310_v34 = vcombine.high %v3097_v26, %v3101_v28  ;;  %v7309_v33 = vcombine.low %v3097_v26, %v3101_v28 }
 0x35f   :  { %v6047_v51 = vpop.f32.mrf.mxu1  ;;  %6304 = vmatmul.mubr.bf16.vlgmr.msra.gmra.mxu1 %v8746_v18  ;;  %v3021_v18 = vld [vmem:[%s10172_s3 + $0xd38] sm:$0xff] }
 0x360   :  { %6358 = vmatpush1.bf16.msra.mxu1 %v7253_v62  ;;  %6389 = vmatprep.mubr.bf16.mxu1 %v9074_v30  ;;  %v6048_v57 = vadd.f32 %v6047_v51, %v6005_v49  ;;  %v6011_v30 = vadd.f32 %v6010_v58, %v5968_v52  ;;  %v7230_v63 = vcombine.high %v3017_v56, %v3021_v18  ;;  %v3065_v51 = vld [vmem:[%s10172_s3 + $0xe98] sm:$0xff] }
 0x361   :  { %v6049_v55 = vpop.f32.mrf.mxu1  ;;  %6359 = vmatprep.subr.bf16.mxu1 %v7246_v43  ;;  %v7229_v0 = vcombine.low %v3017_v56, %v3021_v18  ;;  %v7302_v62 = vcombine.high %v3089_v29, %v3093_v31  ;;  %v3085_v43 = vld [vmem:[%s10172_s3 + $0xf38] sm:$0xff]  ;;  %v7286_v49 = vcombine.high %v3073_v10, %v3077_v8 }
 0x362   :  { %v6050_v5 = vadd.f32 %v6049_v55, %v6007_v54  ;;  %v7294_v46 = vcombine.high %v3081_v40, %v3085_v43  ;;  %v7293_v47 = vcombine.low %v3081_v40, %v3085_v43  ;;  %v3057_v54 = vld [vmem:[%s10172_s3 + $0xe58] sm:$0xff] }
 0x363   :  { %v6051_v48 = vpop.f32.mrf.mxu1  ;;  %v3061_v55 = vld [vmem:[%s10172_s3 + $0xe78] sm:$0xff] }
 0x364   :  { %v7328_v24 = vpack.c.bf16 %v6050_v5, %v6048_v57  ;;  %6360 = vmatpush1.bf16.msra.mxu1 %v7245_v38  ;;  %v6052_v3 = vadd.f32 %v6051_v48, %v6009_v59  ;;  %v3069_v38 = vld [vmem:[%s10172_s3 + $0xeb8] sm:$0xff]  ;;  %v7270_v57 = vcombine.high %v3057_v54, %v3061_v55  ;;  %v7269_v18 = vcombine.low %v3057_v54, %v3061_v55 }
 0x365   :  { %v6053_v1 = vpop.f32.mrf.mxu1  ;;  %6361 = vmatprep.subr.bf16.mxu1 %v7238_v53  ;;  %v7278_v52 = vcombine.high %v3065_v51, %v3069_v38  ;;  %v7277_v53 = vcombine.low %v3065_v51, %v3069_v38  ;;  %v3049_v5 = vld [vmem:[%s10172_s3 + $0xe18] sm:$0xff] }
 0x366   :  { %6449 = vst [vmem:[#allocation2 + $0x8] sm:$0xff] %v7328_v24  ;;  %v6054_v4 = vadd.f32 %v6053_v1, %v6011_v30  ;;  %v3053_v56 = vld [vmem:[%s10172_s3 + $0xe38] sm:$0xff]  ;;  %v6090_v24 = vpop.f32.mrf.mxu0 }
 0x367   :  { %v7262_v58 = vcombine.high %v3049_v5, %v3053_v56  ;;  %v7261_v48 = vcombine.low %v3049_v5, %v3053_v56 }
 0x368   :  { %v7332_v37 = vpack.c.bf16 %v6054_v4, %v6052_v3  ;;  %6362 = vmatpush1.bf16.msra.mxu1 %v7237_v61  ;;  %v6092_v59 = vpop.f32.mrf.mxu0  ;;  %v7348_v3 = vld [vmem:[%s10173_s4] sm:$0xff] }
 0x369   :  { %6363 = vmatprep.subr.bf16.mxu1 %v7230_v63  ;;  %v3131_v4 = vrot.slane %v7348_v3, %v384_v25  ;;  %v3135_v6 = vrot.slane %v7348_v3, %v388_v36  ;;  %v3143_v10 = vrot.slane %v7348_v3, %v396_v19 }
 0x36a   :  { %6456 = vst [vmem:[#allocation2 + $0x28] sm:$0xff] %v7332_v37  ;;  %v6094_v30 = vpop.f32.mrf.mxu0 }
 0x36c   :  { %6364 = vmatpush1.bf16.msra.mxu1 %v7229_v0  ;;  %v6096_v1 = vpop.f32.mrf.mxu0  ;;  %v6091_v0 = vadd.f32 %v6090_v24, %v3131_v4 }
 0x36d   :  { %6365 = vmatprep.subr.bf16.mxu1 %v7222_v20  ;;  %v6097_v35 = vadd.f32 %v6096_v1, %v3135_v6 }
 0x370   :  { %6366 = vmatpush1.bf16.msra.mxu1 %v7221_v7 }
 0x371   :  { %6367 = vmatprep.subr.bf16.mxu1 %v7214_v9  ;;  %v6095_v9 = vadd.f32 %v6094_v30, %v3131_v4 }
 0x374   :  { %6368 = vmatpush1.bf16.msra.mxu1 %v7213_v12 }
 0x375   :  { %6369 = vmatprep.subr.bf16.mxu1 %v7206_v13 }
 0x378   :  { %6370 = vmatpush1.bf16.msra.mxu1 %v7205_v14 }
 0x379   :  { %6371 = vmatprep.subr.bf16.mxu1 %v7198_v15 }
 0x37c   :  { %6372 = vmatpush1.bf16.msra.mxu1 %v7197_v17 }
 0x37d   :  { %6373 = vmatprep.subr.bf16.mxu1 %v7318_v23 }
 0x380   :  { %6374 = vmatpush2.bf16.msra.mxu1 %v7317_v50 }
 0x381   :  { %6375 = vmatprep.subr.bf16.mxu1 %v7310_v34 }
 0x384   :  { %6376 = vmatpush2.bf16.msra.mxu1 %v7309_v33 }
 0x385   :  { %6377 = vmatprep.subr.bf16.mxu1 %v7302_v62 }
 0x388   :  { %6378 = vmatpush2.bf16.msra.mxu1 %v7301_v45 }
 0x389   :  { %6379 = vmatprep.subr.bf16.mxu1 %v7294_v46  ;;  %v3139_v46 = vrot.slane %v7348_v3, %v392_v27 }
 0x38c   :  { %6380 = vmatpush2.bf16.msra.mxu1 %v7293_v47 }
 0x38d   :  { %6381 = vmatprep.subr.bf16.mxu1 %v7286_v49 }
 0x390   :  { %6382 = vmatpush2.bf16.msra.mxu1 %v7285_v41 }
 0x391   :  { %6383 = vmatprep.subr.bf16.mxu1 %v7278_v52 }
 0x394   :  { %6384 = vmatpush2.bf16.msra.mxu1 %v7277_v53 }
 0x395   :  { %6385 = vmatprep.subr.bf16.mxu1 %v7270_v57 }
 0x398   :  { %6386 = vmatpush2.bf16.msra.mxu1 %v7269_v18 }
 0x399   :  { %6387 = vmatprep.subr.bf16.mxu1 %v7262_v58 }
 0x39c   :  { %6388 = vmatpush2.bf16.msra.mxu1 %v7261_v48  ;;  %v6176_v42 = vpop.f32.mrf.mxu0 }
 0x39e   :  { %v6178_v20 = vpop.f32.mrf.mxu0 }
 0x39f   :  { %6390 = vmatmul.mubr.bf16.vlgmr.msra.gmra.mxu1 %v9083_v39  ;;  %v6133_v61 = vpop.f32.mrf.mxu1  ;;  %v6093_v39 = vadd.f32 %v6092_v59, %v3135_v6 }
 0x3a0   :  { %v6134_v32 = vadd.f32 %v6133_v61, %v6091_v0  ;;  %v6180_v11 = vpop.f32.mrf.mxu0 }
 0x3a1   :  { %v6135_v63 = vpop.f32.mrf.mxu1 }
 0x3a2   :  { %v6136_v21 = vadd.f32 %v6135_v63, %v6093_v39  ;;  %v6177_v44 = vadd.f32 %v6176_v42, %v6134_v32  ;;  %v6182_v36 = vpop.f32.mrf.mxu0 }
 0x3a3   :  { %v6137_v37 = vpop.f32.mrf.mxu1 }
 0x3a4   :  { %v6138_v13 = vadd.f32 %v6137_v37, %v6095_v9  ;;  %v6179_v14 = vadd.f32 %v6178_v20, %v6136_v21 }
 0x3a5   :  { %v6139_v7 = vpop.f32.mrf.mxu1 }
 0x3a6   :  { %v6140_v22 = vadd.f32 %v6139_v7, %v6097_v35  ;;  %v6181_v23 = vadd.f32 %v6180_v11, %v6138_v13 }
 0x3a8   :  { %v6183_v26 = vadd.f32 %v6182_v36, %v6140_v22 }
 0x3dc   :  { %v6262_v31 = vpop.f32.mrf.mxu0 }
 0x3dd   :  { %v6263_v49 = vadd.f32 %v6262_v31, %v3139_v46 }
 0x3de   :  { %v6264_v33 = vpop.f32.mrf.mxu0 }
 0x3df   :  { %v6219_v12 = vpop.f32.mrf.mxu1  ;;  %v6265_v51 = vadd.f32 %v6264_v33, %v3143_v10 }
 0x3e0   :  { %v6220_v15 = vadd.f32 %v6219_v12, %v6177_v44  ;;  %v6266_v62 = vpop.f32.mrf.mxu0 }
 0x3e1   :  { %v6221_v25 = vpop.f32.mrf.mxu1  ;;  %v6267_v55 = vadd.f32 %v6266_v62, %v3139_v46 }
 0x3e2   :  { %v6222_v2 = vadd.f32 %v6221_v25, %v6179_v14  ;;  %v6268_v43 = vpop.f32.mrf.mxu0 }
 0x3e3   :  { %v6223_v16 = vpop.f32.mrf.mxu1  ;;  %v6269_v53 = vadd.f32 %v6268_v43, %v3143_v10 }
 0x3e4   :  { %v7329_v17 = vpack.c.bf16 %v6222_v2, %v6220_v15  ;;  %v6224_v50 = vadd.f32 %v6223_v16, %v6181_v23 }
 0x3e5   :  { %v6225_v28 = vpop.f32.mrf.mxu1 }
 0x3e6   :  { %6450 = vst [vmem:[#allocation2 + $0x10] sm:$0xff] %v7329_v17  ;;  %v6226_v34 = vadd.f32 %v6225_v28, %v6183_v26 }
 0x3e8   :  { %v7333_v29 = vpack.c.bf16 %v6226_v34, %v6224_v50 }
 0x3ea   :  { %6457 = vst [vmem:[#allocation2 + $0x30] sm:$0xff] %v7333_v29 }
 0x41c   :  { %v6348_v8 = vpop.f32.mrf.mxu0 }
 0x41e   :  { %v6350_v38 = vpop.f32.mrf.mxu0 }
 0x41f   :  { %v6305_v40 = vpop.f32.mrf.mxu1 }
 0x420   :  { %v6306_v41 = vadd.f32 %v6305_v40, %v6263_v49  ;;  %v6352_v57 = vpop.f32.mrf.mxu0 }
 0x421   :  { %v6307_v45 = vpop.f32.mrf.mxu1 }
 0x422   :  { %v6308_v52 = vadd.f32 %v6307_v45, %v6265_v51  ;;  %v6349_v27 = vadd.f32 %v6348_v8, %v6306_v41  ;;  %v6354_v24 = vpop.f32.mrf.mxu0 }
 0x423   :  { %v6309_v47 = vpop.f32.mrf.mxu1 }
 0x424   :  { %v6310_v56 = vadd.f32 %v6309_v47, %v6267_v55  ;;  %v6351_v58 = vadd.f32 %v6350_v38, %v6308_v52 }
 0x425   :  { %v6311_v54 = vpop.f32.mrf.mxu1 }
 0x426   :  { %v6312_v18 = vadd.f32 %v6311_v54, %v6269_v53  ;;  %v6353_v61 = vadd.f32 %v6352_v57, %v6310_v56 }
 0x428   :  { %v6355_v1 = vadd.f32 %v6354_v24, %v6312_v18 }
 0x45f   :  { %v6391_v5 = vpop.f32.mrf.mxu1 }
 0x460   :  { %v6392_v19 = vadd.f32 %v6391_v5, %v6349_v27 }
 0x461   :  { %v6393_v60 = vpop.f32.mrf.mxu1 }
 0x462   :  { %v6394_v48 = vadd.f32 %v6393_v60, %v6351_v58 }
 0x463   :  { %v6395_v59 = vpop.f32.mrf.mxu1 }
 0x464   :  { %v7330_v30 = vpack.c.bf16 %v6394_v48, %v6392_v19  ;;  %v6396_v3 = vadd.f32 %v6395_v59, %v6353_v61 }
 0x465   :  { %v6397_v63 = vpop.f32.mrf.mxu1 }
 0x466   :  { %6454 = vst.msk [vmem:[#allocation2 + $0x18] sm:$0xff] %vm6453_vm5, %v7330_v30  ;;  %v6398_v4 = vadd.f32 %v6397_v63, %v6355_v1 }
 0x468   :  { %v7334_v6 = vpack.c.bf16 %v6398_v4, %v6396_v3 }
 0x46a   :  { %6458 = vst.msk [vmem:[#allocation2 + $0x38] sm:$0xff] %vm6453_vm5, %v7334_v6 }
 0x46b   :  { %6463 = vsyncadd [#allocation3], 512  ;;  %s7372_s3 = smov [#allocation2]  }
 0x46c   :  { %s6464_s4 = sshll.u32 %s7372_s3, 4  ;;  %s6465_s4 = int_to_ptr.vmem [resolvable:$true] %s6464_s4 }
 0x46d   :  { %s7349_s27 = scalar_lea.vmem %s6465_s4, 512  ;;  %s7353_s28 = scalar_lea.vmem %s6465_s4, 1024 }
 0x46e   :  { %p7350_p0 = scmp.ne.s32.totalorder %s6465_s4, %s7349_s27  ;;  %p7354_p1 = scmp.lt.s32.totalorder %s6465_s4, %s6465_s4 }
 0x46f   :  { %p7355_p2 = scmp.lt.s32.totalorder %s7353_s28, %s7349_s27 }
 0x471   :  { %p7356_p3 = por %p7355_p2, %p7354_p1 }
 0x473   :  { %p7357_p4 = pnand %p7356_p3, %p7350_p0 }
 0x475   :  { %7360 = shalt.err (!%p7357_p4)
}
 0x476   :  { %s7373_s0 = smov 512   ;;  %s7374_s29 = smov 32  }
 0x477   :  { %6470 = dma.vmem_to_hbm [thread:$0]  %s6465_s4, 512, %s10174_s5, [#allocation3], %s7373_s0, %s7373_s0, %s7374_s29  }
 0x478   :  { %7369 = dma.done.wait [#allocation3], 1024  }
 0x479   :  { %7370 = vsyncadd [#allocation3], 4294966272 }
 0x47a   :  { %6474 = vsyncpa [#allocation3], 1 }

// kernel: tpu_custom_call.1
= control target key start
LH: loop header
LB: loop body
LE: loop exit
PB: predicated region body
PF: predicated region fallthrough
CT: control target
= control target key end

     0   :  { %10 = vsyncpa [#allocation3], 0  ;;  %vm2026_vm0 = vcmask 39936   ;;  %vm2030_vm1 = vcmask 1041408   ;;  %vm2031_vm2 = vcmask 1042432   ;;  %vm6451_vm3 = vcmask 1043456   ;;  %s10169_s0 = inlined_call_operand.vmem [shape: f32[8,645], index: 0, kind: input, shape index: {}]   ;;  %s10170_s1 = inlined_call_operand.vmem [shape: bf16[645,1024], index: 1, kind: input, shape index: {}]   ;;  %s10171_s2 = inlined_call_operand.vmem [shape: f32[1,1024], index: 2, kind: input, shape index: {}]   ;;  %s10172_s3 = inlined_call_operand.vmem [shape: bf16[1024,963], index: 3, kind: input, shape index: {}]   ;;  %s10173_s4 = inlined_call_operand.vmem [shape: f32[1,963], index: 4, kind: input, shape index: {}]   ;;  %s10174_s5 = inlined_call_operand.hbm [shape: bf16[8,963], index: 5, kind: output, shape index: {}]  }
   0x1   :  { %v96_v0 = vld [vmem:[%s10170_s1 + $0x1c0] sm:$0xff]  ;;  %v23_v55 = vld [vmem:[%s10169_s0 + $0x8] sm:$0xff]  ;;  %v29_v57 = vld [vmem:[%s10169_s0 + $0x38] sm:$0xff]  ;;  %vm6452_vm4 = vcmask 547844  }
   0x2   :  { %v100_v1 = vld [vmem:[%s10170_s1 + $0x1e0] sm:$0xff]  ;;  %v25_v58 = vld [vmem:[%s10169_s0 + $0x18] sm:$0xff]  ;;  %v31_v59 = vld [vmem:[%s10169_s0 + $0x48] sm:$0xff]  ;;  %v7513_v62 = vpack.c.bf16 %v29_v57, %v23_v55 }
   0x3   :  { %v6532_v2 = vcombine.high %v96_v0, %v100_v1  ;;  %v224_v3 = vld [vmem:[%s10170_s1 + $0x5c0] sm:$0xff]  ;;  %v6531_v5 = vcombine.low %v96_v0, %v100_v1  ;;  %v7515_v63 = vpack.c.bf16 %v31_v59, %v25_v58  ;;  %vm6453_vm5 = vmor %vm6452_vm4, %vm6451_vm3 }
   0x4   :  { %v228_v4 = vld [vmem:[%s10170_s1 + $0x5e0] sm:$0xff]  ;;  %2090 = vmatprep.mubr.bf16.mxu0 %v7513_v62 }
   0x5   :  { %v88_v6 = vld [vmem:[%s10170_s1 + $0x180] sm:$0xff]  ;;  %v6660_v7 = vcombine.high %v224_v3, %v228_v4  ;;  %v6659_v8 = vcombine.low %v224_v3, %v228_v4  ;;  %2058 = vmatprep.subr.bf16.mxu0 %v6532_v2  ;;  %2133 = vmatprep.mubr.bf16.mxu1 %v7515_v63 }
   0x6   :  { %v92_v9 = vld [vmem:[%s10170_s1 + $0x1a0] sm:$0xff]  ;;  %2059 = vmatpush1.bf16.msra.mxu0 %v6531_v5 }
   0x7   :  { %v216_v10 = vld [vmem:[%s10170_s1 + $0x580] sm:$0xff]  ;;  %v6524_v12 = vcombine.high %v88_v6, %v92_v9  ;;  %2101 = vmatprep.subr.bf16.mxu1 %v6660_v7  ;;  %v6523_v17 = vcombine.low %v88_v6, %v92_v9 }
   0x8   :  { %v220_v11 = vld [vmem:[%s10170_s1 + $0x5a0] sm:$0xff]  ;;  %2102 = vmatpush1.bf16.msra.mxu1 %v6659_v8 }
   0x9   :  { %v6652_v13 = vcombine.high %v216_v10, %v220_v11  ;;  %v80_v14 = vld [vmem:[%s10170_s1 + $0x140] sm:$0xff]  ;;  %2060 = vmatprep.subr.bf16.mxu0 %v6524_v12  ;;  %v6651_v19 = vcombine.low %v216_v10, %v220_v11 }
   0xa   :  { %v84_v15 = vld [vmem:[%s10170_s1 + $0x160] sm:$0xff]  ;;  %2061 = vmatpush1.bf16.msra.mxu0 %v6523_v17 }
   0xb   :  { %v208_v16 = vld [vmem:[%s10170_s1 + $0x540] sm:$0xff]  ;;  %v6516_v20 = vcombine.high %v80_v14, %v84_v15  ;;  %2103 = vmatprep.subr.bf16.mxu1 %v6652_v13  ;;  %v6515_v26 = vcombine.low %v80_v14, %v84_v15 }
   0xc   :  { %v212_v18 = vld [vmem:[%s10170_s1 + $0x560] sm:$0xff]  ;;  %2104 = vmatpush1.bf16.msra.mxu1 %v6651_v19 }
   0xd   :  { %v6644_v21 = vcombine.high %v208_v16, %v212_v18  ;;  %v72_v22 = vld [vmem:[%s10170_s1 + $0x100] sm:$0xff]  ;;  %2062 = vmatprep.subr.bf16.mxu0 %v6516_v20  ;;  %v6643_v27 = vcombine.low %v208_v16, %v212_v18 }
   0xe   :  { %v76_v23 = vld [vmem:[%s10170_s1 + $0x120] sm:$0xff]  ;;  %2063 = vmatpush1.bf16.msra.mxu0 %v6515_v26 }
   0xf   :  { %v200_v24 = vld [vmem:[%s10170_s1 + $0x500] sm:$0xff]  ;;  %v6508_v28 = vcombine.high %v72_v22, %v76_v23  ;;  %2105 = vmatprep.subr.bf16.mxu1 %v6644_v21  ;;  %v6507_v34 = vcombine.low %v72_v22, %v76_v23 }
  0x10   :  { %v204_v25 = vld [vmem:[%s10170_s1 + $0x520] sm:$0xff]  ;;  %2106 = vmatpush1.bf16.msra.mxu1 %v6643_v27 }
  0x11   :  { %v6636_v29 = vcombine.high %v200_v24, %v204_v25  ;;  %v64_v30 = vld [vmem:[%s10170_s1 + $0xc0] sm:$0xff]  ;;  %2064 = vmatprep.subr.bf16.mxu0 %v6508_v28  ;;  %v6635_v35 = vcombine.low %v200_v24, %v204_v25 }
  0x12   :  { %v68_v31 = vld [vmem:[%s10170_s1 + $0xe0] sm:$0xff]  ;;  %2065 = vmatpush1.bf16.msra.mxu0 %v6507_v34 }
  0x13   :  { %v192_v32 = vld [vmem:[%s10170_s1 + $0x4c0] sm:$0xff]  ;;  %v6500_v36 = vcombine.high %v64_v30, %v68_v31  ;;  %2107 = vmatprep.subr.bf16.mxu1 %v6636_v29  ;;  %v6499_v42 = vcombine.low %v64_v30, %v68_v31 }
  0x14   :  { %v196_v33 = vld [vmem:[%s10170_s1 + $0x4e0] sm:$0xff]  ;;  %2108 = vmatpush1.bf16.msra.mxu1 %v6635_v35 }
  0x15   :  { %v6628_v37 = vcombine.high %v192_v32, %v196_v33  ;;  %v56_v38 = vld [vmem:[%s10170_s1 + $0x80] sm:$0xff]  ;;  %2066 = vmatprep.subr.bf16.mxu0 %v6500_v36  ;;  %v6627_v43 = vcombine.low %v192_v32, %v196_v33 }
  0x16   :  { %v60_v39 = vld [vmem:[%s10170_s1 + $0xa0] sm:$0xff]  ;;  %2067 = vmatpush1.bf16.msra.mxu0 %v6499_v42 }
  0x17   :  { %v184_v40 = vld [vmem:[%s10170_s1 + $0x480] sm:$0xff]  ;;  %v6492_v44 = vcombine.high %v56_v38, %v60_v39  ;;  %2109 = vmatprep.subr.bf16.mxu1 %v6628_v37  ;;  %v6491_v50 = vcombine.low %v56_v38, %v60_v39 }
  0x18   :  { %v188_v41 = vld [vmem:[%s10170_s1 + $0x4a0] sm:$0xff]  ;;  %2110 = vmatpush1.bf16.msra.mxu1 %v6627_v43 }
  0x19   :  { %v6620_v45 = vcombine.high %v184_v40, %v188_v41  ;;  %v48_v46 = vld [vmem:[%s10170_s1 + $0x40] sm:$0xff]  ;;  %2068 = vmatprep.subr.bf16.mxu0 %v6492_v44  ;;  %v6619_v51 = vcombine.low %v184_v40, %v188_v41 }
  0x1a   :  { %v52_v47 = vld [vmem:[%s10170_s1 + $0x60] sm:$0xff]  ;;  %2069 = vmatpush1.bf16.msra.mxu0 %v6491_v50 }
  0x1b   :  { %v176_v48 = vld [vmem:[%s10170_s1 + $0x440] sm:$0xff]  ;;  %v6484_v52 = vcombine.high %v48_v46, %v52_v47  ;;  %2111 = vmatprep.subr.bf16.mxu1 %v6620_v45  ;;  %v6483_v0 = vcombine.low %v48_v46, %v52_v47 }
  0x1c   :  { %v180_v49 = vld [vmem:[%s10170_s1 + $0x460] sm:$0xff]  ;;  %2112 = vmatpush1.bf16.msra.mxu1 %v6619_v51 }
  0x1d   :  { %v40_v53 = vld [vmem:[%s10170_s1] sm:$0xff]  ;;  %v6612_v56 = vcombine.high %v176_v48, %v180_v49  ;;  %2070 = vmatprep.subr.bf16.mxu0 %v6484_v52  ;;  %v6611_v1 = vcombine.low %v176_v48, %v180_v49 }
  0x1e   :  { %v44_v54 = vld [vmem:[%s10170_s1 + $0x20] sm:$0xff]  ;;  %2071 = vmatpush1.bf16.msra.mxu0 %v6483_v0 }
  0x1f   :  { %v168_v60 = vld [vmem:[%s10170_s1 + $0x400] sm:$0xff]  ;;  %v6476_v2 = vcombine.high %v40_v53, %v44_v54  ;;  %2113 = vmatprep.subr.bf16.mxu1 %v6612_v56  ;;  %v6475_v8 = vcombine.low %v40_v53, %v44_v54 }
  0x20   :  { %v172_v61 = vld [vmem:[%s10170_s1 + $0x420] sm:$0xff]  ;;  %2114 = vmatpush1.bf16.msra.mxu1 %v6611_v1 }
  0x21   :  { %v6604_v3 = vcombine.high %v168_v60, %v172_v61  ;;  %v160_v4 = vld [vmem:[%s10170_s1 + $0x3c0] sm:$0xff]  ;;  %2072 = vmatprep.subr.bf16.mxu0 %v6476_v2  ;;  %v6603_v9 = vcombine.low %v168_v60, %v172_v61 }
  0x22   :  { %v164_v5 = vld [vmem:[%s10170_s1 + $0x3e0] sm:$0xff]  ;;  %2073 = vmatpush1.bf16.msra.mxu0 %v6475_v8  ;;  %v97_v8 = vld [vmem:[%s10170_s1 + $0x1c8] sm:$0xff] }
  0x23   :  { %v288_v6 = vld [vmem:[%s10170_s1 + $0x7c0] sm:$0xff]  ;;  %v6596_v10 = vcombine.high %v160_v4, %v164_v5  ;;  %2115 = vmatprep.subr.bf16.mxu1 %v6604_v3  ;;  %v6595_v16 = vcombine.low %v160_v4, %v164_v5 }
  0x24   :  { %v292_v7 = vld [vmem:[%s10170_s1 + $0x7e0] sm:$0xff]  ;;  %2116 = vmatpush1.bf16.msra.mxu1 %v6603_v9  ;;  %v101_v9 = vld [vmem:[%s10170_s1 + $0x1e8] sm:$0xff] }
  0x25   :  { %v6724_v11 = vcombine.high %v288_v6, %v292_v7  ;;  %v152_v12 = vld [vmem:[%s10170_s1 + $0x380] sm:$0xff]  ;;  %2074 = vmatprep.subr.bf16.mxu0 %v6596_v10  ;;  %v6723_v17 = vcombine.low %v288_v6, %v292_v7 }
  0x26   :  { %v156_v13 = vld [vmem:[%s10170_s1 + $0x3a0] sm:$0xff]  ;;  %2075 = vmatpush2.bf16.msra.mxu0 %v6595_v16 }
  0x27   :  { %v280_v14 = vld [vmem:[%s10170_s1 + $0x780] sm:$0xff]  ;;  %v6588_v18 = vcombine.high %v152_v12, %v156_v13  ;;  %2117 = vmatprep.subr.bf16.mxu1 %v6724_v11  ;;  %v6587_v24 = vcombine.low %v152_v12, %v156_v13  ;;  %v28_v12 = vld [vmem:[%s10169_s0 + $0x30] sm:$0xff] }
  0x28   :  { %v284_v15 = vld [vmem:[%s10170_s1 + $0x7a0] sm:$0xff]  ;;  %2118 = vmatpush2.bf16.msra.mxu1 %v6723_v17  ;;  %v6534_v17 = vcombine.high %v97_v8, %v101_v9 }
  0x29   :  { %v6716_v19 = vcombine.high %v280_v14, %v284_v15  ;;  %v144_v20 = vld [vmem:[%s10170_s1 + $0x340] sm:$0xff]  ;;  %2076 = vmatprep.subr.bf16.mxu0 %v6588_v18  ;;  %v6715_v25 = vcombine.low %v280_v14, %v284_v15  ;;  %v24_v14 = vld [vmem:[%s10169_s0 + $0x10] sm:$0xff] }
  0x2a   :  { %v148_v21 = vld [vmem:[%s10170_s1 + $0x360] sm:$0xff]  ;;  %2077 = vmatpush2.bf16.msra.mxu0 %v6587_v24  ;;  %v33_v24 = vld [vmem:[%s10169_s0 + $0x58] sm:$0xff] }
  0x2b   :  { %v272_v22 = vld [vmem:[%s10170_s1 + $0x740] sm:$0xff]  ;;  %v6580_v26 = vcombine.high %v144_v20, %v148_v21  ;;  %2119 = vmatprep.subr.bf16.mxu1 %v6716_v19  ;;  %v6579_v32 = vcombine.low %v144_v20, %v148_v21  ;;  %v89_v20 = vld [vmem:[%s10170_s1 + $0x188] sm:$0xff] }
  0x2c   :  { %v276_v23 = vld [vmem:[%s10170_s1 + $0x760] sm:$0xff]  ;;  %2120 = vmatpush2.bf16.msra.mxu1 %v6715_v25 }
  0x2d   :  { %v6708_v27 = vcombine.high %v272_v22, %v276_v23  ;;  %v136_v28 = vld [vmem:[%s10170_s1 + $0x300] sm:$0xff]  ;;  %2078 = vmatprep.subr.bf16.mxu0 %v6580_v26  ;;  %v6707_v33 = vcombine.low %v272_v22, %v276_v23  ;;  %v93_v22 = vld [vmem:[%s10170_s1 + $0x1a8] sm:$0xff] }
  0x2e   :  { %v140_v29 = vld [vmem:[%s10170_s1 + $0x320] sm:$0xff]  ;;  %2079 = vmatpush2.bf16.msra.mxu0 %v6579_v32  ;;  %v27_v23 = vld [vmem:[%s10169_s0 + $0x28] sm:$0xff] }
  0x2f   :  { %v264_v30 = vld [vmem:[%s10170_s1 + $0x700] sm:$0xff]  ;;  %v6572_v34 = vcombine.high %v136_v28, %v140_v29  ;;  %2121 = vmatprep.subr.bf16.mxu1 %v6708_v27  ;;  %v6571_v40 = vcombine.low %v136_v28, %v140_v29  ;;  %v6533_v27 = vcombine.low %v97_v8, %v101_v9  ;;  %v6526_v29 = vcombine.high %v89_v20, %v93_v22 }
  0x30   :  { %v268_v31 = vld [vmem:[%s10170_s1 + $0x720] sm:$0xff]  ;;  %2122 = vmatpush2.bf16.msra.mxu1 %v6707_v33  ;;  %v7667_v32 = vpack.c.bf16 %v33_v24, %v27_v23  ;;  %v81_v33 = vld [vmem:[%s10170_s1 + $0x148] sm:$0xff] }
  0x31   :  { %v6700_v35 = vcombine.high %v264_v30, %v268_v31  ;;  %v128_v36 = vld [vmem:[%s10170_s1 + $0x2c0] sm:$0xff]  ;;  %2080 = vmatprep.subr.bf16.mxu0 %v6572_v34  ;;  %v6699_v41 = vcombine.low %v264_v30, %v268_v31  ;;  %v85_v34 = vld [vmem:[%s10170_s1 + $0x168] sm:$0xff] }
  0x32   :  { %v132_v37 = vld [vmem:[%s10170_s1 + $0x2e0] sm:$0xff]  ;;  %2081 = vmatpush2.bf16.msra.mxu0 %v6571_v40  ;;  %v161_v23 = vld [vmem:[%s10170_s1 + $0x3c8] sm:$0xff] }
  0x33   :  { %v256_v38 = vld [vmem:[%s10170_s1 + $0x6c0] sm:$0xff]  ;;  %v6564_v42 = vcombine.high %v128_v36, %v132_v37  ;;  %2123 = vmatprep.subr.bf16.mxu1 %v6700_v35  ;;  %v6563_v48 = vcombine.low %v128_v36, %v132_v37  ;;  %v6525_v36 = vcombine.low %v89_v20, %v93_v22  ;;  %v165_v24 = vld [vmem:[%s10170_s1 + $0x3e8] sm:$0xff] }
  0x34   :  { %v260_v39 = vld [vmem:[%s10170_s1 + $0x6e0] sm:$0xff]  ;;  %2124 = vmatpush2.bf16.msra.mxu1 %v6699_v41  ;;  %v73_v41 = vld [vmem:[%s10170_s1 + $0x108] sm:$0xff] }
  0x35   :  { %v6692_v43 = vcombine.high %v256_v38, %v260_v39  ;;  %v120_v44 = vld [vmem:[%s10170_s1 + $0x280] sm:$0xff]  ;;  %2082 = vmatprep.subr.bf16.mxu0 %v6564_v42  ;;  %v6691_v49 = vcombine.low %v256_v38, %v260_v39  ;;  %v6518_v38 = vcombine.high %v81_v33, %v85_v34  ;;  %v77_v42 = vld [vmem:[%s10170_s1 + $0x128] sm:$0xff] }
  0x36   :  { %v124_v45 = vld [vmem:[%s10170_s1 + $0x2a0] sm:$0xff]  ;;  %2083 = vmatpush2.bf16.msra.mxu0 %v6563_v48 }
  0x37   :  { %v248_v46 = vld [vmem:[%s10170_s1 + $0x680] sm:$0xff]  ;;  %v6556_v50 = vcombine.high %v120_v44, %v124_v45  ;;  %2125 = vmatprep.subr.bf16.mxu1 %v6692_v43  ;;  %v6555_v56 = vcombine.low %v120_v44, %v124_v45  ;;  %v6517_v44 = vcombine.low %v81_v33, %v85_v34  ;;  %v229_v33 = vld [vmem:[%s10170_s1 + $0x5e8] sm:$0xff] }
  0x38   :  { %v252_v47 = vld [vmem:[%s10170_s1 + $0x6a0] sm:$0xff]  ;;  %2126 = vmatpush2.bf16.msra.mxu1 %v6691_v49  ;;  %v65_v49 = vld [vmem:[%s10170_s1 + $0xc8] sm:$0xff] }
  0x39   :  { %v6684_v51 = vcombine.high %v248_v46, %v252_v47  ;;  %v112_v52 = vld [vmem:[%s10170_s1 + $0x240] sm:$0xff]  ;;  %2084 = vmatprep.subr.bf16.mxu0 %v6556_v50  ;;  %v6683_v57 = vcombine.low %v248_v46, %v252_v47  ;;  %v6510_v46 = vcombine.high %v73_v41, %v77_v42  ;;  %v69_v50 = vld [vmem:[%s10170_s1 + $0xe8] sm:$0xff] }
  0x3a   :  { %v116_v53 = vld [vmem:[%s10170_s1 + $0x260] sm:$0xff]  ;;  %2085 = vmatpush2.bf16.msra.mxu0 %v6555_v56  ;;  %v153_v34 = vld [vmem:[%s10170_s1 + $0x388] sm:$0xff] }
  0x3b   :  { %v240_v54 = vld [vmem:[%s10170_s1 + $0x640] sm:$0xff]  ;;  %v6548_v58 = vcombine.high %v112_v52, %v116_v53  ;;  %2127 = vmatprep.subr.bf16.mxu1 %v6684_v51  ;;  %v6547_v2 = vcombine.low %v112_v52, %v116_v53  ;;  %v6509_v52 = vcombine.low %v73_v41, %v77_v42  ;;  %v217_v42 = vld [vmem:[%s10170_s1 + $0x588] sm:$0xff] }
  0x3c   :  { %v244_v55 = vld [vmem:[%s10170_s1 + $0x660] sm:$0xff]  ;;  %2128 = vmatpush2.bf16.msra.mxu1 %v6683_v57  ;;  %v57_v57 = vld [vmem:[%s10170_s1 + $0x88] sm:$0xff] }
  0x3d   :  { %v6676_v59 = vcombine.high %v240_v54, %v244_v55  ;;  %v104_v60 = vld [vmem:[%s10170_s1 + $0x200] sm:$0xff]  ;;  %2086 = vmatprep.subr.bf16.mxu0 %v6548_v58  ;;  %v6675_v3 = vcombine.low %v240_v54, %v244_v55  ;;  %v6502_v54 = vcombine.high %v65_v49, %v69_v50  ;;  %v61_v58 = vld [vmem:[%s10170_s1 + $0xa8] sm:$0xff] }
  0x3e   :  { %v108_v61 = vld [vmem:[%s10170_s1 + $0x220] sm:$0xff]  ;;  %2087 = vmatpush2.bf16.msra.mxu0 %v6547_v2 }
  0x3f   :  { %v232_v0 = vld [vmem:[%s10170_s1 + $0x600] sm:$0xff]  ;;  %v6540_v4 = vcombine.high %v104_v60, %v108_v61  ;;  %2129 = vmatprep.subr.bf16.mxu1 %v6676_v59  ;;  %v6539_v10 = vcombine.low %v104_v60, %v108_v61  ;;  %v6501_v60 = vcombine.low %v65_v49, %v69_v50 }
  0x40   :  { %v236_v1 = vld [vmem:[%s10170_s1 + $0x620] sm:$0xff]  ;;  %2130 = vmatpush2.bf16.msra.mxu1 %v6675_v3  ;;  %v49_v3 = vld [vmem:[%s10170_s1 + $0x48] sm:$0xff] }
  0x41   :  { %v6668_v5 = vcombine.high %v232_v0, %v236_v1  ;;  %v352_v6 = vld [vmem:[%s10170_s1 + $0x9c0] sm:$0xff]  ;;  %2088 = vmatprep.subr.bf16.mxu0 %v6540_v4  ;;  %v6667_v13 = vcombine.low %v232_v0, %v236_v1  ;;  %v6494_v0 = vcombine.high %v57_v57, %v61_v58  ;;  %v53_v4 = vld [vmem:[%s10170_s1 + $0x68] sm:$0xff] }
  0x42   :  { %v356_v7 = vld [vmem:[%s10170_s1 + $0x9e0] sm:$0xff]  ;;  %2089 = vmatpush2.bf16.msra.mxu0 %v6539_v10  ;;  %v6486_v8 = vcombine.high %v49_v3, %v53_v4 }
  0x43   :  { %v22_v11 = vld [vmem:[%s10169_s0] sm:$0xff]  ;;  %v6788_v16 = vcombine.high %v352_v6, %v356_v7  ;;  %2131 = vmatprep.subr.bf16.mxu1 %v6668_v5  ;;  %v6787_v26 = vcombine.low %v352_v6, %v356_v7  ;;  %v6493_v6 = vcombine.low %v57_v57, %v61_v58 }
  0x44   :  { %v30_v15 = vld [vmem:[%s10169_s0 + $0x40] sm:$0xff]  ;;  %v7648_v21 = vpack.c.bf16 %v28_v12, %v22_v11  ;;  %2132 = vmatpush2.bf16.msra.mxu1 %v6667_v13  ;;  %v41_v12 = vld [vmem:[%s10170_s1 + $0x8] sm:$0xff] }
  0x45   :  { %v344_v18 = vld [vmem:[%s10170_s1 + $0x980] sm:$0xff]  ;;  %v7659_v25 = vpack.c.bf16 %v30_v15, %v24_v14  ;;  %2144 = vmatprep.subr.bf16.mxu0 %v6788_v16  ;;  %2187 = vmatprep.subr.bf16.mxu1 %v6534_v17  ;;  %v45_v13 = vld [vmem:[%s10170_s1 + $0x28] sm:$0xff]  ;;  %v7371_v14 = vmov 65535   ;;  %v6485_v17 = vcombine.low %v49_v3, %v53_v4 }
  0x46   :  { %v348_v19 = vld [vmem:[%s10170_s1 + $0x9a0] sm:$0xff]  ;;  %2091 = vmatmul.mubr.bf16.vlgmr.msra.gmra.mxu0 %v7648_v21  ;;  %v2032_v15 = vsel %vm2030_vm1, 4294967295, %v7371_v14  ;;  %v6478_v20 = vcombine.high %v41_v12, %v45_v13  ;;  %v189_v14 = vld [vmem:[%s10170_s1 + $0x4a8] sm:$0xff] }
  0x47   :  { %v6780_v28 = vcombine.high %v344_v18, %v348_v19  ;;  %v336_v30 = vld [vmem:[%s10170_s1 + $0x940] sm:$0xff]  ;;  %2134 = vmatmul.mubr.bf16.vlgmr.msra.gmra.mxu1 %v7659_v25  ;;  %2145 = vmatpush1.bf16.msra.mxu0 %v6787_v26  ;;  %v6779_v35 = vcombine.low %v344_v18, %v348_v19  ;;  %v7743_v22 = vsel %vm2031_vm2, %v2032_v15, 0  ;;  %v113_v15 = vld [vmem:[%s10170_s1 + $0x248] sm:$0xff] }
  0x48   :  { %v340_v31 = vld [vmem:[%s10170_s1 + $0x960] sm:$0xff]  ;;  %2188 = vmatpush1.bf16.msra.mxu1 %v6533_v27  ;;  %6803 = vmatprep.mubr.msk.bf16.mxu0 %vm2026_vm0, %v7667_v32 }
  0x49   :  { %2146 = vmatprep.subr.bf16.mxu0 %v6780_v28  ;;  %v6772_v37 = vcombine.high %v336_v30, %v340_v31  ;;  %2189 = vmatprep.subr.bf16.mxu1 %v6526_v29  ;;  %v328_v39 = vld [vmem:[%s10170_s1 + $0x900] sm:$0xff]  ;;  %v6771_v43 = vcombine.low %v336_v30, %v340_v31  ;;  %v6477_v28 = vcombine.low %v41_v12, %v45_v13  ;;  %v225_v31 = vld [vmem:[%s10170_s1 + $0x5c8] sm:$0xff] }
  0x4a   :  { %v332_v40 = vld [vmem:[%s10170_s1 + $0x920] sm:$0xff]  ;;  %2219 = vmatprep.mubr.bf16.mxu1 %v7513_v62  ;;  %v6598_v30 = vcombine.high %v161_v23, %v165_v24  ;;  %v185_v13 = vld [vmem:[%s10170_s1 + $0x488] sm:$0xff] }
  0x4b   :  { %2147 = vmatpush1.bf16.msra.mxu0 %v6779_v35  ;;  %v6764_v45 = vcombine.high %v328_v39, %v332_v40  ;;  %v320_v47 = vld [vmem:[%s10170_s1 + $0x8c0] sm:$0xff]  ;;  %v6763_v51 = vcombine.low %v328_v39, %v332_v40  ;;  %v157_v35 = vld [vmem:[%s10170_s1 + $0x3a8] sm:$0xff]  ;;  %v6597_v39 = vcombine.low %v161_v23, %v165_v24  ;;  %v6662_v40 = vcombine.high %v225_v31, %v229_v33 }
  0x4c   :  { %2190 = vmatpush1.bf16.msra.mxu1 %v6525_v36  ;;  %2148 = vmatprep.subr.bf16.mxu0 %v6772_v37  ;;  %v324_v48 = vld [vmem:[%s10170_s1 + $0x8e0] sm:$0xff]  ;;  %v6590_v41 = vcombine.high %v153_v34, %v157_v35  ;;  %v177_v23 = vld [vmem:[%s10170_s1 + $0x448] sm:$0xff] }
  0x4d   :  { %2191 = vmatprep.subr.bf16.mxu1 %v6518_v38  ;;  %v6756_v53 = vcombine.high %v320_v47, %v324_v48  ;;  %v312_v55 = vld [vmem:[%s10170_s1 + $0x880] sm:$0xff]  ;;  %v6755_v59 = vcombine.low %v320_v47, %v324_v48  ;;  %v32_v38 = vld [vmem:[%s10169_s0 + $0x50] sm:$0xff]  ;;  %v6661_v47 = vcombine.low %v225_v31, %v229_v33  ;;  %v6589_v48 = vcombine.low %v153_v34, %v157_v35  ;;  %v181_v24 = vld [vmem:[%s10170_s1 + $0x468] sm:$0xff] }
  0x4e   :  { %v316_v56 = vld [vmem:[%s10170_s1 + $0x8a0] sm:$0xff]  ;;  %v169_v33 = vld [vmem:[%s10170_s1 + $0x408] sm:$0xff] }
  0x4f   :  { %2149 = vmatpush1.bf16.msra.mxu0 %v6771_v43  ;;  %v6748_v61 = vcombine.high %v312_v55, %v316_v56  ;;  %v304_v1 = vld [vmem:[%s10170_s1 + $0x840] sm:$0xff]  ;;  %v6747_v5 = vcombine.low %v312_v55, %v316_v56  ;;  %v221_v43 = vld [vmem:[%s10170_s1 + $0x5a8] sm:$0xff] }
  0x50   :  { %2192 = vmatpush1.bf16.msra.mxu1 %v6517_v44  ;;  %2150 = vmatprep.subr.bf16.mxu0 %v6764_v45  ;;  %v308_v2 = vld [vmem:[%s10170_s1 + $0x860] sm:$0xff]  ;;  %v145_v45 = vld [vmem:[%s10170_s1 + $0x348] sm:$0xff]  ;;  %v6654_v49 = vcombine.high %v217_v42, %v221_v43  ;;  %v6653_v55 = vcombine.low %v217_v42, %v221_v43 }
  0x51   :  { %2193 = vmatprep.subr.bf16.mxu1 %v6510_v46  ;;  %v6740_v7 = vcombine.high %v304_v1, %v308_v2  ;;  %v296_v9 = vld [vmem:[%s10170_s1 + $0x800] sm:$0xff]  ;;  %v6739_v16 = vcombine.low %v304_v1, %v308_v2  ;;  %v149_v46 = vld [vmem:[%s10170_s1 + $0x368] sm:$0xff] }
  0x52   :  { %v300_v10 = vld [vmem:[%s10170_s1 + $0x820] sm:$0xff]  ;;  %v6582_v50 = vcombine.high %v145_v45, %v149_v46  ;;  %v6581_v56 = vcombine.low %v145_v45, %v149_v46  ;;  %v173_v34 = vld [vmem:[%s10170_s1 + $0x428] sm:$0xff] }
  0x53   :  { %2151 = vmatpush1.bf16.msra.mxu0 %v6763_v51  ;;  %v360_v11 = vld [vmem:[%s10170_s1 + $0xa00] sm:$0x77]  ;;  %v6732_v18 = vcombine.high %v296_v9, %v300_v10  ;;  %v6731_v26 = vcombine.low %v296_v9, %v300_v10  ;;  %v209_v51 = vld [vmem:[%s10170_s1 + $0x548] sm:$0xff]  ;;  %v6605_v46 = vcombine.low %v169_v33, %v173_v34 }
  0x54   :  { %2194 = vmatpush1.bf16.msra.mxu1 %v6509_v52  ;;  %2152 = vmatprep.subr.bf16.mxu0 %v6756_v53  ;;  %v6796_v19 = vcombine.high %v360_v11, %v360_v11  ;;  %v6795_v27 = vcombine.low %v360_v11, %v360_v11  ;;  %v26_v37 = vld [vmem:[%s10169_s0 + $0x20] sm:$0xff]  ;;  %v213_v52 = vld [vmem:[%s10170_s1 + $0x568] sm:$0xff] }
  0x55   :  { %2195 = vmatprep.subr.bf16.mxu1 %v6502_v54  ;;  %v7777_v44 = vpack.c.bf16 %v32_v38, %v26_v37  ;;  %v137_v53 = vld [vmem:[%s10170_s1 + $0x308] sm:$0xff]  ;;  %v6646_v57 = vcombine.high %v209_v51, %v213_v52  ;;  %v6645_v1 = vcombine.low %v209_v51, %v213_v52  ;;  %v6613_v37 = vcombine.low %v177_v23, %v181_v24 }
  0x56   :  { %v2038_v29 = vand.u32 %v6796_v19, %v7743_v22  ;;  %v2035_v36 = vand.u32 %v6795_v27, %v7743_v22  ;;  %v141_v54 = vld [vmem:[%s10170_s1 + $0x328] sm:$0xff]  ;;  %v6622_v19 = vcombine.high %v185_v13, %v189_v14 }
  0x57   :  { %2153 = vmatpush1.bf16.msra.mxu0 %v6755_v59  ;;  %v6574_v58 = vcombine.high %v137_v53, %v141_v54  ;;  %v201_v59 = vld [vmem:[%s10170_s1 + $0x508] sm:$0xff]  ;;  %v6573_v2 = vcombine.low %v137_v53, %v141_v54 }
  0x58   :  { %2196 = vmatpush1.bf16.msra.mxu1 %v6501_v60  ;;  %2154 = vmatprep.subr.bf16.mxu0 %v6748_v61  ;;  %v205_v60 = vld [vmem:[%s10170_s1 + $0x528] sm:$0xff] }
  0x59   :  { %2197 = vmatprep.subr.bf16.mxu1 %v6494_v0  ;;  %v129_v61 = vld [vmem:[%s10170_s1 + $0x2c8] sm:$0xff]  ;;  %v6638_v3 = vcombine.high %v201_v59, %v205_v60  ;;  %v6637_v9 = vcombine.low %v201_v59, %v205_v60 }
  0x5a   :  { %v133_v0 = vld [vmem:[%s10170_s1 + $0x2e8] sm:$0xff] }
  0x5b   :  { %2155 = vmatpush1.bf16.msra.mxu0 %v6747_v5  ;;  %v6566_v4 = vcombine.high %v129_v61, %v133_v0  ;;  %v193_v5 = vld [vmem:[%s10170_s1 + $0x4c8] sm:$0xff]  ;;  %v6565_v10 = vcombine.low %v129_v61, %v133_v0 }
  0x5c   :  { %2198 = vmatpush1.bf16.msra.mxu1 %v6493_v6  ;;  %2156 = vmatprep.subr.bf16.mxu0 %v6740_v7  ;;  %v197_v6 = vld [vmem:[%s10170_s1 + $0x4e8] sm:$0xff] }
  0x5d   :  { %2199 = vmatprep.subr.bf16.mxu1 %v6486_v8  ;;  %v121_v7 = vld [vmem:[%s10170_s1 + $0x288] sm:$0xff]  ;;  %v6630_v11 = vcombine.high %v193_v5, %v197_v6 }
  0x5e   :  { %v125_v8 = vld [vmem:[%s10170_s1 + $0x2a8] sm:$0xff] }
  0x5f   :  { %2157 = vmatpush1.bf16.msra.mxu0 %v6739_v16  ;;  %v6558_v12 = vcombine.high %v121_v7, %v125_v8  ;;  %v117_v16 = vld [vmem:[%s10170_s1 + $0x268] sm:$0xff] }
  0x60   :  { %2200 = vmatpush1.bf16.msra.mxu1 %v6485_v17  ;;  %2158 = vmatprep.subr.bf16.mxu0 %v6732_v18  ;;  %v6629_v17 = vcombine.low %v193_v5, %v197_v6  ;;  %v6557_v18 = vcombine.low %v121_v7, %v125_v8  ;;  %v109_v27 = vld [vmem:[%s10170_s1 + $0x228] sm:$0xff] }
  0x61   :  { %2201 = vmatprep.subr.bf16.mxu1 %v6478_v20  ;;  %v6550_v20 = vcombine.high %v113_v15, %v117_v16  ;;  %v353_v35 = vld [vmem:[%s10170_s1 + $0x9c8] sm:$0xff] }
  0x62   :  { %v293_v42 = vld [vmem:[%s10170_s1 + $0x7e8] sm:$0xff] }
  0x63   :  { %2159 = vmatpush1.bf16.msra.mxu0 %v6731_v26  ;;  %v105_v26 = vld [vmem:[%s10170_s1 + $0x208] sm:$0xff] }
  0x64   :  { %2202 = vmatpush1.bf16.msra.mxu1 %v6477_v28  ;;  %2174 = vmatprep.subr.bf16.mxu0 %v2038_v29  ;;  %v6621_v28 = vcombine.low %v185_v13, %v189_v14  ;;  %v6549_v29 = vcombine.low %v113_v15, %v117_v16  ;;  %v6542_v31 = vcombine.high %v105_v26, %v109_v27  ;;  %v345_v43 = vld [vmem:[%s10170_s1 + $0x988] sm:$0xff] }
  0x65   :  { %2203 = vmatprep.subr.bf16.mxu1 %v6598_v30  ;;  %v6614_v30 = vcombine.high %v177_v23, %v181_v24  ;;  %v6541_v38 = vcombine.low %v105_v26, %v109_v27  ;;  %v349_v45 = vld [vmem:[%s10170_s1 + $0x9a8] sm:$0xff] }
  0x66   :  { %v285_v51 = vld [vmem:[%s10170_s1 + $0x7a8] sm:$0xff] }
  0x67   :  { %2175 = vmatpush2.bf16.msra.mxu0 %v2035_v36  ;;  %v357_v36 = vld [vmem:[%s10170_s1 + $0x9e8] sm:$0xff] }
  0x68   :  { %2204 = vmatpush2.bf16.msra.mxu1 %v6597_v39  ;;  %2230 = vmatprep.subr.bf16.mxu0 %v6662_v40  ;;  %v6606_v39 = vcombine.high %v169_v33, %v173_v34  ;;  %v6790_v40 = vcombine.high %v353_v35, %v357_v36  ;;  %v337_v52 = vld [vmem:[%s10170_s1 + $0x948] sm:$0xff] }
  0x69   :  { %2205 = vmatprep.subr.bf16.mxu1 %v6590_v41  ;;  %v289_v41 = vld [vmem:[%s10170_s1 + $0x7c8] sm:$0xff] }
  0x6a   :  { %2177 = vmatmul.mubr.bf16.vlgmr.msra.gmra.mxu0 %v7777_v44  ;;  %v341_v53 = vld [vmem:[%s10170_s1 + $0x968] sm:$0xff]  ;;  %v6725_v54 = vcombine.low %v289_v41, %v293_v42 }
  0x6b   :  { %2231 = vmatpush1.bf16.msra.mxu0 %v6661_v47  ;;  %2262 = vmatprep.mubr.bf16.mxu0 %v7515_v63  ;;  %v6789_v47 = vcombine.low %v353_v35, %v357_v36  ;;  %v277_v59 = vld [vmem:[%s10170_s1 + $0x768] sm:$0xff] }
  0x6c   :  { %2206 = vmatpush2.bf16.msra.mxu1 %v6589_v48  ;;  %2232 = vmatprep.subr.bf16.mxu0 %v6654_v49  ;;  %v6726_v48 = vcombine.high %v289_v41, %v293_v42  ;;  %v6782_v49 = vcombine.high %v345_v43, %v349_v45  ;;  %v329_v60 = vld [vmem:[%s10170_s1 + $0x908] sm:$0xff] }
  0x6d   :  { %2207 = vmatprep.subr.bf16.mxu1 %v6582_v50  ;;  %v281_v50 = vld [vmem:[%s10170_s1 + $0x788] sm:$0xff] }
  0x6e   :  { %v333_v61 = vld [vmem:[%s10170_s1 + $0x928] sm:$0xff]  ;;  %v6717_v0 = vcombine.low %v281_v50, %v285_v51 }
  0x6f   :  { %2233 = vmatpush1.bf16.msra.mxu0 %v6653_v55  ;;  %v6781_v55 = vcombine.low %v345_v43, %v349_v45  ;;  %v269_v5 = vld [vmem:[%s10170_s1 + $0x728] sm:$0xff] }
  0x70   :  { %2208 = vmatpush2.bf16.msra.mxu1 %v6581_v56  ;;  %2234 = vmatprep.subr.bf16.mxu0 %v6646_v57  ;;  %v6718_v56 = vcombine.high %v281_v50, %v285_v51  ;;  %v6774_v57 = vcombine.high %v337_v52, %v341_v53  ;;  %v321_v6 = vld [vmem:[%s10170_s1 + $0x8c8] sm:$0xff]  ;;  %v98_v50 = vld [vmem:[%s10170_s1 + $0x1d0] sm:$0xff] }
  0x71   :  { %2209 = vmatprep.subr.bf16.mxu1 %v6574_v58  ;;  %v273_v58 = vld [vmem:[%s10170_s1 + $0x748] sm:$0xff]  ;;  %v102_v51 = vld [vmem:[%s10170_s1 + $0x1f0] sm:$0xff] }
  0x72   :  { %v325_v7 = vld [vmem:[%s10170_s1 + $0x8e8] sm:$0xff]  ;;  %v6709_v8 = vcombine.low %v273_v58, %v277_v59 }
  0x73   :  { %2235 = vmatpush1.bf16.msra.mxu0 %v6645_v1  ;;  %v6773_v1 = vcombine.low %v337_v52, %v341_v53  ;;  %v261_v13 = vld [vmem:[%s10170_s1 + $0x6e8] sm:$0xff]  ;;  %v226_v52 = vld [vmem:[%s10170_s1 + $0x5d0] sm:$0xff] }
  0x74   :  { %2210 = vmatpush2.bf16.msra.mxu1 %v6573_v2  ;;  %2236 = vmatprep.subr.bf16.mxu0 %v6638_v3  ;;  %v6710_v2 = vcombine.high %v273_v58, %v277_v59  ;;  %v6766_v3 = vcombine.high %v329_v60, %v333_v61  ;;  %v313_v14 = vld [vmem:[%s10170_s1 + $0x888] sm:$0xff]  ;;  %v230_v53 = vld [vmem:[%s10170_s1 + $0x5f0] sm:$0xff] }
  0x75   :  { %2211 = vmatprep.subr.bf16.mxu1 %v6566_v4  ;;  %v265_v4 = vld [vmem:[%s10170_s1 + $0x708] sm:$0xff]  ;;  %v90_v58 = vld [vmem:[%s10170_s1 + $0x190] sm:$0xff] }
  0x76   :  { %v317_v15 = vld [vmem:[%s10170_s1 + $0x8a8] sm:$0xff]  ;;  %v6701_v16 = vcombine.low %v265_v4, %v269_v5  ;;  %v94_v59 = vld [vmem:[%s10170_s1 + $0x1b0] sm:$0xff] }
  0x77   :  { %2237 = vmatpush1.bf16.msra.mxu0 %v6637_v9  ;;  %v6765_v9 = vcombine.low %v329_v60, %v333_v61  ;;  %v253_v23 = vld [vmem:[%s10170_s1 + $0x6a8] sm:$0xff]  ;;  %v218_v60 = vld [vmem:[%s10170_s1 + $0x590] sm:$0xff] }
  0x78   :  { %2212 = vmatpush2.bf16.msra.mxu1 %v6565_v10  ;;  %2238 = vmatprep.subr.bf16.mxu0 %v6630_v11  ;;  %v6702_v10 = vcombine.high %v265_v4, %v269_v5  ;;  %v6758_v11 = vcombine.high %v321_v6, %v325_v7  ;;  %v305_v24 = vld [vmem:[%s10170_s1 + $0x848] sm:$0xff]  ;;  %v222_v61 = vld [vmem:[%s10170_s1 + $0x5b0] sm:$0xff] }
  0x79   :  { %2213 = vmatprep.subr.bf16.mxu1 %v6558_v12  ;;  %v257_v12 = vld [vmem:[%s10170_s1 + $0x6c8] sm:$0xff]  ;;  %v82_v4 = vld [vmem:[%s10170_s1 + $0x150] sm:$0xff] }
  0x7a   :  { %v309_v26 = vld [vmem:[%s10170_s1 + $0x868] sm:$0xff]  ;;  %v6693_v27 = vcombine.low %v257_v12, %v261_v13  ;;  %v86_v5 = vld [vmem:[%s10170_s1 + $0x170] sm:$0xff] }
  0x7b   :  { %2239 = vmatpush1.bf16.msra.mxu0 %v6629_v17  ;;  %v6757_v17 = vcombine.low %v321_v6, %v325_v7  ;;  %v245_v33 = vld [vmem:[%s10170_s1 + $0x668] sm:$0xff]  ;;  %v210_v6 = vld [vmem:[%s10170_s1 + $0x550] sm:$0xff] }
  0x7c   :  { %2214 = vmatpush2.bf16.msra.mxu1 %v6557_v18  ;;  %2240 = vmatprep.subr.bf16.mxu0 %v6622_v19  ;;  %v6694_v18 = vcombine.high %v257_v12, %v261_v13  ;;  %v6750_v19 = vcombine.high %v313_v14, %v317_v15  ;;  %v297_v34 = vld [vmem:[%s10170_s1 + $0x808] sm:$0xff]  ;;  %v214_v7 = vld [vmem:[%s10170_s1 + $0x570] sm:$0xff] }
  0x7d   :  { %2215 = vmatprep.subr.bf16.mxu1 %v6550_v20  ;;  %v249_v20 = vld [vmem:[%s10170_s1 + $0x688] sm:$0xff]  ;;  %v74_v12 = vld [vmem:[%s10170_s1 + $0x110] sm:$0xff] }
  0x7e   :  { %v301_v35 = vld [vmem:[%s10170_s1 + $0x828] sm:$0xff]  ;;  %v78_v13 = vld [vmem:[%s10170_s1 + $0x130] sm:$0xff] }
  0x7f   :  { %2241 = vmatpush1.bf16.msra.mxu0 %v6621_v28  ;;  %v6749_v28 = vcombine.low %v313_v14, %v317_v15  ;;  %v361_v36 = vld [vmem:[%s10170_s1 + $0xa08] sm:$0x77]  ;;  %v202_v14 = vld [vmem:[%s10170_s1 + $0x510] sm:$0xff] }
  0x80   :  { %2216 = vmatpush2.bf16.msra.mxu1 %v6549_v29  ;;  %2242 = vmatprep.subr.bf16.mxu0 %v6614_v30  ;;  %v6686_v29 = vcombine.high %v249_v20, %v253_v23  ;;  %v6742_v30 = vcombine.high %v305_v24, %v309_v26  ;;  %v233_v41 = vld [vmem:[%s10170_s1 + $0x608] sm:$0xff]  ;;  %v6798_v43 = vcombine.high %v361_v36, %v361_v36  ;;  %v206_v15 = vld [vmem:[%s10170_s1 + $0x530] sm:$0xff] }
  0x81   :  { %2217 = vmatprep.subr.bf16.mxu1 %v6542_v31  ;;  %v241_v31 = vld [vmem:[%s10170_s1 + $0x648] sm:$0xff] }
  0x82   :  { %v237_v42 = vld [vmem:[%s10170_s1 + $0x628] sm:$0xff]  ;;  %v6677_v45 = vcombine.low %v241_v31, %v245_v33 }
  0x83   :  { %2243 = vmatpush1.bf16.msra.mxu0 %v6613_v37  ;;  %v6685_v37 = vcombine.low %v249_v20, %v253_v23  ;;  %v66_v20 = vld [vmem:[%s10170_s1 + $0xd0] sm:$0xff] }
  0x84   :  { %2218 = vmatpush2.bf16.msra.mxu1 %v6541_v38  ;;  %2244 = vmatprep.subr.bf16.mxu0 %v6606_v39  ;;  %v6741_v38 = vcombine.low %v305_v24, %v309_v26  ;;  %v6678_v39 = vcombine.high %v241_v31, %v245_v33  ;;  %v70_v23 = vld [vmem:[%s10170_s1 + $0xf0] sm:$0xff] }
  0x85   :  { %2273 = vmatprep.subr.bf16.mxu1 %v6790_v40  ;;  %v6734_v40 = vcombine.high %v297_v34, %v301_v35  ;;  %v194_v24 = vld [vmem:[%s10170_s1 + $0x4d0] sm:$0xff] }
  0x86   :  { %v198_v26 = vld [vmem:[%s10170_s1 + $0x4f0] sm:$0xff] }
  0x87   :  { %2220 = vmatmul.mubr.bf16.vlgmr.msra.gmra.mxu1 %v7648_v21  ;;  %2245 = vmatpush1.bf16.msra.mxu0 %v6605_v46  ;;  %v6733_v46 = vcombine.low %v297_v34, %v301_v35  ;;  %v58_v31 = vld [vmem:[%s10170_s1 + $0x90] sm:$0xff] }
  0x88   :  { %2274 = vmatpush1.bf16.msra.mxu1 %v6789_v47  ;;  %2246 = vmatprep.subr.bf16.mxu0 %v6726_v48  ;;  %v6670_v47 = vcombine.high %v233_v41, %v237_v42  ;;  %v6797_v48 = vcombine.low %v361_v36, %v361_v36  ;;  %v62_v33 = vld [vmem:[%s10170_s1 + $0xb0] sm:$0xff]  ;;  %v6503_v36 = vcombine.low %v66_v20, %v70_v23 }
  0x89   :  { %2275 = vmatprep.subr.bf16.mxu1 %v6782_v49  ;;  %6804 = vmatprep.mubr.msk.bf16.mxu1 %vm2026_vm0, %v7667_v32  ;;  %v2044_v49 = vand.u32 %v6798_v43, %v7743_v22  ;;  %v186_v34 = vld [vmem:[%s10170_s1 + $0x490] sm:$0xff] }
  0x8a   :  { %v190_v35 = vld [vmem:[%s10170_s1 + $0x4b0] sm:$0xff] }
  0x8b   :  { %2247 = vmatpush2.bf16.msra.mxu0 %v6725_v54  ;;  %v6669_v54 = vcombine.low %v233_v41, %v237_v42  ;;  %v54_v41 = vld [vmem:[%s10170_s1 + $0x70] sm:$0xff] }
  0x8c   :  { %2276 = vmatpush1.bf16.msra.mxu1 %v6781_v55  ;;  %2248 = vmatprep.subr.bf16.mxu0 %v6718_v56  ;;  %v2041_v55 = vand.u32 %v6797_v48, %v7743_v22  ;;  %v6536_v56 = vcombine.high %v98_v50, %v102_v51  ;;  %v178_v42 = vld [vmem:[%s10170_s1 + $0x450] sm:$0xff] }
  0x8d   :  { %2277 = vmatprep.subr.bf16.mxu1 %v6774_v57  ;;  %v6664_v57 = vcombine.high %v226_v52, %v230_v53  ;;  %v182_v43 = vld [vmem:[%s10170_s1 + $0x470] sm:$0xff] }
  0x8e   :  { %v6616_v48 = vcombine.high %v178_v42, %v182_v43 }
  0x8f   :  { %2249 = vmatpush2.bf16.msra.mxu0 %v6717_v0  ;;  %v6535_v0 = vcombine.low %v98_v50, %v102_v51  ;;  %v46_v50 = vld [vmem:[%s10170_s1 + $0x30] sm:$0xff] }
  0x90   :  { %2278 = vmatpush1.bf16.msra.mxu1 %v6773_v1  ;;  %2250 = vmatprep.subr.bf16.mxu0 %v6710_v2  ;;  %v6663_v1 = vcombine.low %v226_v52, %v230_v53  ;;  %v6528_v2 = vcombine.high %v90_v58, %v94_v59  ;;  %v170_v51 = vld [vmem:[%s10170_s1 + $0x410] sm:$0xff] }
  0x91   :  { %2279 = vmatprep.subr.bf16.mxu1 %v6766_v3  ;;  %v6656_v3 = vcombine.high %v218_v60, %v222_v61  ;;  %v174_v52 = vld [vmem:[%s10170_s1 + $0x430] sm:$0xff] }
  0x93   :  { %2251 = vmatpush2.bf16.msra.mxu0 %v6709_v8  ;;  %v6527_v8 = vcombine.low %v90_v58, %v94_v59  ;;  %v166_v58 = vld [vmem:[%s10170_s1 + $0x3f0] sm:$0xff] }
  0x94   :  { %2280 = vmatpush1.bf16.msra.mxu1 %v6765_v9  ;;  %2252 = vmatprep.subr.bf16.mxu0 %v6702_v10  ;;  %v6655_v9 = vcombine.low %v218_v60, %v222_v61  ;;  %v6520_v10 = vcombine.high %v82_v4, %v86_v5  ;;  %v290_v59 = vld [vmem:[%s10170_s1 + $0x7d0] sm:$0xff] }
  0x95   :  { %2281 = vmatprep.subr.bf16.mxu1 %v6758_v11  ;;  %v6648_v11 = vcombine.high %v210_v6, %v214_v7  ;;  %v294_v60 = vld [vmem:[%s10170_s1 + $0x7f0] sm:$0xff] }
  0x97   :  { %2253 = vmatpush2.bf16.msra.mxu0 %v6701_v16  ;;  %v6519_v16 = vcombine.low %v82_v4, %v86_v5  ;;  %v158_v4 = vld [vmem:[%s10170_s1 + $0x3b0] sm:$0xff] }
  0x98   :  { %2282 = vmatpush1.bf16.msra.mxu1 %v6757_v17  ;;  %2254 = vmatprep.subr.bf16.mxu0 %v6694_v18  ;;  %v6647_v17 = vcombine.low %v210_v6, %v214_v7  ;;  %v6512_v18 = vcombine.high %v74_v12, %v78_v13  ;;  %v282_v5 = vld [vmem:[%s10170_s1 + $0x790] sm:$0xff] }
  0x99   :  { %2283 = vmatprep.subr.bf16.mxu1 %v6750_v19  ;;  %v6640_v19 = vcombine.high %v202_v14, %v206_v15  ;;  %v286_v6 = vld [vmem:[%s10170_s1 + $0x7b0] sm:$0xff] }
  0x9b   :  { %2255 = vmatpush2.bf16.msra.mxu0 %v6693_v27  ;;  %v6511_v27 = vcombine.low %v74_v12, %v78_v13  ;;  %v150_v12 = vld [vmem:[%s10170_s1 + $0x370] sm:$0xff] }
  0x9c   :  { %2284 = vmatpush1.bf16.msra.mxu1 %v6749_v28  ;;  %2256 = vmatprep.subr.bf16.mxu0 %v6686_v29  ;;  %v6639_v28 = vcombine.low %v202_v14, %v206_v15  ;;  %v6504_v29 = vcombine.high %v66_v20, %v70_v23  ;;  %v274_v13 = vld [vmem:[%s10170_s1 + $0x750] sm:$0xff] }
  0x9d   :  { %2285 = vmatprep.subr.bf16.mxu1 %v6742_v30  ;;  %v6632_v30 = vcombine.high %v194_v24, %v198_v26  ;;  %v278_v14 = vld [vmem:[%s10170_s1 + $0x770] sm:$0xff] }
  0x9e   :  { %v142_v20 = vld [vmem:[%s10170_s1 + $0x330] sm:$0xff] }
  0x9f   :  { %2257 = vmatpush2.bf16.msra.mxu0 %v6685_v37  ;;  %v6631_v37 = vcombine.low %v194_v24, %v198_v26  ;;  %v266_v23 = vld [vmem:[%s10170_s1 + $0x710] sm:$0xff] }
  0xa0   :  { %2286 = vmatpush1.bf16.msra.mxu1 %v6741_v38  ;;  %2258 = vmatprep.subr.bf16.mxu0 %v6678_v39  ;;  %v6496_v38 = vcombine.high %v58_v31, %v62_v33  ;;  %v6624_v39 = vcombine.high %v186_v34, %v190_v35  ;;  %v270_v24 = vld [vmem:[%s10170_s1 + $0x730] sm:$0xff] }
  0xa1   :  { %2287 = vmatprep.subr.bf16.mxu1 %v6734_v40  ;;  %v50_v40 = vld [vmem:[%s10170_s1 + $0x50] sm:$0xff] }
  0xa2   :  { %v6487_v53 = vcombine.low %v50_v40, %v54_v41 }
  0xa3   :  { %2259 = vmatpush2.bf16.msra.mxu0 %v6677_v45  ;;  %v6495_v45 = vcombine.low %v58_v31, %v62_v33  ;;  %v134_v31 = vld [vmem:[%s10170_s1 + $0x2f0] sm:$0xff] }
  0xa4   :  { %2288 = vmatpush1.bf16.msra.mxu1 %v6733_v46  ;;  %2260 = vmatprep.subr.bf16.mxu0 %v6670_v47  ;;  %v6623_v46 = vcombine.low %v186_v34, %v190_v35  ;;  %v6488_v47 = vcombine.high %v50_v40, %v54_v41  ;;  %v258_v33 = vld [vmem:[%s10170_s1 + $0x6d0] sm:$0xff] }
  0xa5   :  { %2303 = vmatprep.subr.bf16.mxu1 %v2044_v49  ;;  %v42_v49 = vld [vmem:[%s10170_s1 + $0x10] sm:$0xff] }
  0xa6   :  { %v6479_v61 = vcombine.low %v42_v49, %v46_v50  ;;  %v262_v34 = vld [vmem:[%s10170_s1 + $0x6f0] sm:$0xff] }
  0xa7   :  { %2261 = vmatpush2.bf16.msra.mxu0 %v6669_v54  ;;  %v6615_v54 = vcombine.low %v178_v42, %v182_v43  ;;  %v126_v40 = vld [vmem:[%s10170_s1 + $0x2b0] sm:$0xff] }
  0xa8   :  { %2304 = vmatpush2.bf16.msra.mxu1 %v2041_v55  ;;  %2316 = vmatprep.subr.bf16.mxu0 %v6536_v56  ;;  %v6480_v55 = vcombine.high %v42_v49, %v46_v50  ;;  %v6608_v56 = vcombine.high %v170_v51, %v174_v52  ;;  %v250_v41 = vld [vmem:[%s10170_s1 + $0x690] sm:$0xff] }
  0xa9   :  { %2359 = vmatprep.subr.bf16.mxu1 %v6664_v57  ;;  %v162_v57 = vld [vmem:[%s10170_s1 + $0x3d0] sm:$0xff] }
  0xaa   :  { %2263 = vmatmul.mubr.bf16.vlgmr.msra.gmra.mxu0 %v7659_v25  ;;  %v6599_v7 = vcombine.low %v162_v57, %v166_v58  ;;  %v254_v42 = vld [vmem:[%s10170_s1 + $0x6b0] sm:$0xff] }
  0xab   :  { %2306 = vmatmul.mubr.bf16.vlgmr.msra.gmra.mxu1 %v7777_v44  ;;  %2317 = vmatpush1.bf16.msra.mxu0 %v6535_v0  ;;  %v6607_v0 = vcombine.low %v170_v51, %v174_v52  ;;  %v118_v49 = vld [vmem:[%s10170_s1 + $0x270] sm:$0xff] }
  0xac   :  { %2360 = vmatpush1.bf16.msra.mxu1 %v6663_v1  ;;  %2318 = vmatprep.subr.bf16.mxu0 %v6528_v2  ;;  %v6600_v1 = vcombine.high %v162_v57, %v166_v58  ;;  %v6728_v2 = vcombine.high %v290_v59, %v294_v60  ;;  %v242_v50 = vld [vmem:[%s10170_s1 + $0x650] sm:$0xff] }
  0xad   :  { %2361 = vmatprep.subr.bf16.mxu1 %v6656_v3  ;;  %2348 = vmatprep.mubr.bf16.mxu0 %v7513_v62  ;;  %v154_v3 = vld [vmem:[%s10170_s1 + $0x390] sm:$0xff] }
  0xae   :  { %2391 = vmatprep.mubr.bf16.mxu1 %v7515_v63  ;;  %v6591_v15 = vcombine.low %v154_v3, %v158_v4  ;;  %v246_v51 = vld [vmem:[%s10170_s1 + $0x670] sm:$0xff] }
  0xaf   :  { %2319 = vmatpush1.bf16.msra.mxu0 %v6527_v8  ;;  %v6727_v8 = vcombine.low %v290_v59, %v294_v60  ;;  %v110_v57 = vld [vmem:[%s10170_s1 + $0x230] sm:$0xff] }
  0xb0   :  { %2362 = vmatpush1.bf16.msra.mxu1 %v6655_v9  ;;  %2320 = vmatprep.subr.bf16.mxu0 %v6520_v10  ;;  %v6592_v9 = vcombine.high %v154_v3, %v158_v4  ;;  %v6720_v10 = vcombine.high %v282_v5, %v286_v6  ;;  %v234_v58 = vld [vmem:[%s10170_s1 + $0x610] sm:$0xff]  ;;  %v99_v4 = vld [vmem:[%s10170_s1 + $0x1d8] sm:$0xff] }
  0xb1   :  { %2363 = vmatprep.subr.bf16.mxu1 %v6648_v11  ;;  %v146_v11 = vld [vmem:[%s10170_s1 + $0x350] sm:$0xff] }
  0xb2   :  { %v6583_v26 = vcombine.low %v146_v11, %v150_v12  ;;  %v238_v59 = vld [vmem:[%s10170_s1 + $0x630] sm:$0xff] }
  0xb3   :  { %2321 = vmatpush1.bf16.msra.mxu0 %v6519_v16  ;;  %v6719_v16 = vcombine.low %v282_v5, %v286_v6  ;;  %v358_v3 = vld [vmem:[%s10170_s1 + $0x9f0] sm:$0xff]  ;;  %v103_v5 = vld [vmem:[%s10170_s1 + $0x1f8] sm:$0xff] }
  0xb4   :  { %2364 = vmatpush1.bf16.msra.mxu1 %v6647_v17  ;;  %2322 = vmatprep.subr.bf16.mxu0 %v6512_v18  ;;  %v6584_v17 = vcombine.high %v146_v11, %v150_v12  ;;  %v6712_v18 = vcombine.high %v274_v13, %v278_v14  ;;  %v350_v11 = vld [vmem:[%s10170_s1 + $0x9b0] sm:$0xff]  ;;  %v91_v12 = vld [vmem:[%s10170_s1 + $0x198] sm:$0xff] }
  0xb5   :  { %2365 = vmatprep.subr.bf16.mxu1 %v6640_v19  ;;  %v138_v19 = vld [vmem:[%s10170_s1 + $0x310] sm:$0xff] }
  0xb6   :  { %v6575_v35 = vcombine.low %v138_v19, %v142_v20 }
  0xb7   :  { %2323 = vmatpush1.bf16.msra.mxu0 %v6511_v27  ;;  %v6711_v27 = vcombine.low %v274_v13, %v278_v14  ;;  %v95_v13 = vld [vmem:[%s10170_s1 + $0x1b8] sm:$0xff] }
  0xb8   :  { %2366 = vmatpush1.bf16.msra.mxu1 %v6639_v28  ;;  %2324 = vmatprep.subr.bf16.mxu0 %v6504_v29  ;;  %v6576_v28 = vcombine.high %v138_v19, %v142_v20  ;;  %v6704_v29 = vcombine.high %v266_v23, %v270_v24  ;;  %v342_v19 = vld [vmem:[%s10170_s1 + $0x970] sm:$0xff]  ;;  %v83_v20 = vld [vmem:[%s10170_s1 + $0x158] sm:$0xff] }
  0xb9   :  { %2367 = vmatprep.subr.bf16.mxu1 %v6632_v30  ;;  %v130_v30 = vld [vmem:[%s10170_s1 + $0x2d0] sm:$0xff] }
  0xba   :  { %v6567_v43 = vcombine.low %v130_v30, %v134_v31 }
  0xbb   :  { %2325 = vmatpush1.bf16.msra.mxu0 %v6503_v36  ;;  %v6703_v36 = vcombine.low %v266_v23, %v270_v24  ;;  %v87_v23 = vld [vmem:[%s10170_s1 + $0x178] sm:$0xff] }
  0xbc   :  { %2368 = vmatpush1.bf16.msra.mxu1 %v6631_v37  ;;  %2326 = vmatprep.subr.bf16.mxu0 %v6496_v38  ;;  %v6568_v37 = vcombine.high %v130_v30, %v134_v31  ;;  %v6696_v38 = vcombine.high %v258_v33, %v262_v34  ;;  %v334_v30 = vld [vmem:[%s10170_s1 + $0x930] sm:$0xff]  ;;  %v75_v31 = vld [vmem:[%s10170_s1 + $0x118] sm:$0xff] }
  0xbd   :  { %2369 = vmatprep.subr.bf16.mxu1 %v6624_v39  ;;  %v122_v39 = vld [vmem:[%s10170_s1 + $0x290] sm:$0xff] }
  0xbe   :  { %v6559_v52 = vcombine.low %v122_v39, %v126_v40 }
  0xbf   :  { %2327 = vmatpush1.bf16.msra.mxu0 %v6495_v45  ;;  %v6695_v45 = vcombine.low %v258_v33, %v262_v34  ;;  %v79_v33 = vld [vmem:[%s10170_s1 + $0x138] sm:$0xff] }
  0xc0   :  { %2370 = vmatpush1.bf16.msra.mxu1 %v6623_v46  ;;  %2328 = vmatprep.subr.bf16.mxu0 %v6488_v47  ;;  %v6560_v46 = vcombine.high %v122_v39, %v126_v40  ;;  %v6688_v47 = vcombine.high %v250_v41, %v254_v42  ;;  %v326_v39 = vld [vmem:[%s10170_s1 + $0x8f0] sm:$0xff]  ;;  %v71_v40 = vld [vmem:[%s10170_s1 + $0xf8] sm:$0xff] }
  0xc1   :  { %2371 = vmatprep.subr.bf16.mxu1 %v6616_v48  ;;  %v114_v48 = vld [vmem:[%s10170_s1 + $0x250] sm:$0xff] }
  0xc2   :  { %v6551_v60 = vcombine.low %v114_v48, %v118_v49 }
  0xc3   :  { %2329 = vmatpush1.bf16.msra.mxu0 %v6487_v53  ;;  %v6687_v53 = vcombine.low %v250_v41, %v254_v42  ;;  %v6513_v42 = vcombine.low %v75_v31, %v79_v33 }
  0xc4   :  { %2372 = vmatpush1.bf16.msra.mxu1 %v6615_v54  ;;  %2330 = vmatprep.subr.bf16.mxu0 %v6480_v55  ;;  %v6552_v54 = vcombine.high %v114_v48, %v118_v49  ;;  %v6680_v55 = vcombine.high %v242_v50, %v246_v51  ;;  %v59_v48 = vld [vmem:[%s10170_s1 + $0x98] sm:$0xff] }
  0xc5   :  { %2373 = vmatprep.subr.bf16.mxu1 %v6608_v56  ;;  %v106_v56 = vld [vmem:[%s10170_s1 + $0x210] sm:$0xff]  ;;  %v63_v49 = vld [vmem:[%s10170_s1 + $0xb8] sm:$0xff] }
  0xc6   :  { %v6543_v6 = vcombine.low %v106_v56, %v110_v57 }
  0xc7   :  { %2331 = vmatpush1.bf16.msra.mxu0 %v6479_v61  ;;  %v6679_v61 = vcombine.low %v242_v50, %v246_v51  ;;  %v366_v51 = vlaneseq }
  0xc8   :  { %2374 = vmatpush1.bf16.msra.mxu1 %v6607_v0  ;;  %2332 = vmatprep.subr.bf16.mxu0 %v6600_v1  ;;  %v6544_v0 = vcombine.high %v106_v56, %v110_v57  ;;  %v6672_v1 = vcombine.high %v234_v58, %v238_v59  ;;  %v310_v56 = vld [vmem:[%s10170_s1 + $0x870] sm:$0xff]  ;;  %v51_v57 = vld [vmem:[%s10170_s1 + $0x58] sm:$0xff] }
  0xc9   :  { %2375 = vmatprep.subr.bf16.mxu1 %v6728_v2  ;;  %v354_v2 = vld [vmem:[%s10170_s1 + $0x9d0] sm:$0xff] }
  0xca   :  { %v6791_v14 = vcombine.low %v354_v2, %v358_v3 }
  0xcb   :  { %2333 = vmatpush2.bf16.msra.mxu0 %v6599_v7  ;;  %v6671_v7 = vcombine.low %v234_v58, %v238_v59  ;;  %v55_v58 = vld [vmem:[%s10170_s1 + $0x78] sm:$0xff] }
  0xcc   :  { %2376 = vmatpush2.bf16.msra.mxu1 %v6727_v8  ;;  %2334 = vmatprep.subr.bf16.mxu0 %v6592_v9  ;;  %v6792_v8 = vcombine.high %v354_v2, %v358_v3  ;;  %v6538_v9 = vcombine.high %v99_v4, %v103_v5  ;;  %v298_v2 = vld [vmem:[%s10170_s1 + $0x810] sm:$0xff] }
  0xcd   :  { %2377 = vmatprep.subr.bf16.mxu1 %v6720_v10  ;;  %v346_v10 = vld [vmem:[%s10170_s1 + $0x990] sm:$0xff] }
  0xce   :  { %v6783_v24 = vcombine.low %v346_v10, %v350_v11  ;;  %v302_v3 = vld [vmem:[%s10170_s1 + $0x830] sm:$0xff] }
  0xcf   :  { %2335 = vmatpush2.bf16.msra.mxu0 %v6591_v15  ;;  %v6537_v15 = vcombine.low %v99_v4, %v103_v5  ;;  %v362_v4 = vld [vmem:[%s10170_s1 + $0xa10] sm:$0x77]  ;;  %v43_v5 = vld [vmem:[%s10170_s1 + $0x18] sm:$0xff] }
  0xd0   :  { %2378 = vmatpush2.bf16.msra.mxu1 %v6719_v16  ;;  %2336 = vmatprep.subr.bf16.mxu0 %v6584_v17  ;;  %v6784_v16 = vcombine.high %v346_v10, %v350_v11  ;;  %v6530_v17 = vcombine.high %v91_v12, %v95_v13  ;;  %v8263_v10 = vld [vmem:[%s10171_s2] sm:$0xff]  ;;  %v6736_v11 = vcombine.high %v298_v2, %v302_v3 }
  0xd1   :  { %2379 = vmatprep.subr.bf16.mxu1 %v6712_v18  ;;  %v338_v18 = vld [vmem:[%s10170_s1 + $0x950] sm:$0xff] }
  0xd2   :  { %v6775_v34 = vcombine.low %v338_v18, %v342_v19 }
  0xd3   :  { %2337 = vmatpush2.bf16.msra.mxu0 %v6583_v26  ;;  %v6529_v26 = vcombine.low %v91_v12, %v95_v13  ;;  %v6800_v12 = vcombine.high %v362_v4, %v362_v4 }
  0xd4   :  { %2380 = vmatpush2.bf16.msra.mxu1 %v6711_v27  ;;  %2338 = vmatprep.subr.bf16.mxu0 %v6576_v28  ;;  %v6776_v27 = vcombine.high %v338_v18, %v342_v19  ;;  %v6522_v28 = vcombine.high %v83_v20, %v87_v23  ;;  %v6799_v18 = vcombine.low %v362_v4, %v362_v4 }
  0xd5   :  { %2381 = vmatprep.subr.bf16.mxu1 %v6704_v29  ;;  %v330_v29 = vld [vmem:[%s10170_s1 + $0x910] sm:$0xff] }
  0xd6   :  { %v6767_v41 = vcombine.low %v330_v29, %v334_v30 }
  0xd7   :  { %2339 = vmatpush2.bf16.msra.mxu0 %v6575_v35  ;;  %v6521_v35 = vcombine.low %v83_v20, %v87_v23  ;;  %v2050_v20 = vand.u32 %v6800_v12, %v7743_v22 }
  0xd8   :  { %2382 = vmatpush2.bf16.msra.mxu1 %v6703_v36  ;;  %2340 = vmatprep.subr.bf16.mxu0 %v6568_v37  ;;  %v6768_v36 = vcombine.high %v330_v29, %v334_v30  ;;  %v6514_v37 = vcombine.high %v75_v31, %v79_v33  ;;  %v159_v29 = vld [vmem:[%s10170_s1 + $0x3b8] sm:$0xff]  ;;  %v2047_v33 = vand.u32 %v6799_v18, %v7743_v22 }
  0xd9   :  { %2383 = vmatprep.subr.bf16.mxu1 %v6696_v38  ;;  %v322_v38 = vld [vmem:[%s10170_s1 + $0x8d0] sm:$0xff]  ;;  %v115_v18 = vld [vmem:[%s10170_s1 + $0x258] sm:$0xff] }
  0xda   :  { %v6759_v50 = vcombine.low %v322_v38, %v326_v39 }
  0xdb   :  { %2341 = vmatpush2.bf16.msra.mxu0 %v6567_v43  ;;  %v6760_v43 = vcombine.high %v322_v38, %v326_v39 }
  0xdc   :  { %2384 = vmatpush2.bf16.msra.mxu1 %v6695_v45  ;;  %2342 = vmatprep.subr.bf16.mxu0 %v6560_v46  ;;  %v314_v46 = vld [vmem:[%s10170_s1 + $0x890] sm:$0xff] }
  0xdd   :  { %2385 = vmatprep.subr.bf16.mxu1 %v6688_v47  ;;  %v318_v47 = vld [vmem:[%s10170_s1 + $0x8b0] sm:$0xff] }
  0xde   :  { %v6751_v59 = vcombine.low %v314_v46, %v318_v47 }
  0xdf   :  { %2343 = vmatpush2.bf16.msra.mxu0 %v6559_v52 }
  0xe0   :  { %2386 = vmatpush2.bf16.msra.mxu1 %v6687_v53  ;;  %2344 = vmatprep.subr.bf16.mxu0 %v6552_v54  ;;  %v6752_v53 = vcombine.high %v314_v46, %v318_v47  ;;  %v6498_v54 = vcombine.high %v59_v48, %v63_v49 }
  0xe1   :  { %2387 = vmatprep.subr.bf16.mxu1 %v6680_v55  ;;  %v306_v55 = vld [vmem:[%s10170_s1 + $0x850] sm:$0xff] }
  0xe3   :  { %2345 = vmatpush2.bf16.msra.mxu0 %v6551_v60  ;;  %v8242_v60 = vshrl.u32 %v366_v51, 7 }
  0xe4   :  { %2388 = vmatpush2.bf16.msra.mxu1 %v6679_v61  ;;  %2346 = vmatprep.subr.bf16.mxu0 %v6544_v0  ;;  %v6497_v61 = vcombine.low %v59_v48, %v63_v49  ;;  %v6744_v0 = vcombine.high %v306_v55, %v310_v56 }
  0xe5   :  { %2389 = vmatprep.subr.bf16.mxu1 %v6672_v1  ;;  %v6490_v1 = vcombine.high %v51_v57, %v55_v58 }
  0xe7   :  { %2347 = vmatpush2.bf16.msra.mxu0 %v6543_v6  ;;  %v47_v6 = vld [vmem:[%s10170_s1 + $0x38] sm:$0xff] }
  0xe8   :  { %2390 = vmatpush2.bf16.msra.mxu1 %v6671_v7  ;;  %2402 = vmatprep.subr.bf16.mxu0 %v6792_v8  ;;  %v6743_v7 = vcombine.low %v306_v55, %v310_v56  ;;  %v368_v8 = vsub.s32 0, %v8242_v60  ;;  %v6482_v13 = vcombine.high %v43_v5, %v47_v6  ;;  %v6481_v19 = vcombine.low %v43_v5, %v47_v6  ;;  %v143_v55 = vld [vmem:[%s10170_s1 + $0x338] sm:$0xff] }
  0xe9   :  { %2445 = vmatprep.subr.bf16.mxu1 %v6538_v9  ;;  %v6489_v9 = vcombine.low %v51_v57, %v55_v58  ;;  %v195_v6 = vld [vmem:[%s10170_s1 + $0x4d8] sm:$0xff] }
  0xea   :  { %2349 = vmatmul.mubr.bf16.vlgmr.msra.gmra.mxu0 %v7648_v21 }
  0xeb   :  { %2392 = vmatmul.mubr.bf16.vlgmr.msra.gmra.mxu1 %v7659_v25  ;;  %2403 = vmatpush1.bf16.msra.mxu0 %v6791_v14  ;;  %v163_v14 = vld [vmem:[%s10170_s1 + $0x3d8] sm:$0xff] }
  0xec   :  { %2446 = vmatpush1.bf16.msra.mxu1 %v6537_v15  ;;  %2404 = vmatprep.subr.bf16.mxu0 %v6784_v16  ;;  %v167_v15 = vld [vmem:[%s10170_s1 + $0x3f8] sm:$0xff]  ;;  %v369_v16 = vrot.slane %v8263_v10, %v368_v8 }
  0xed   :  { %2447 = vmatprep.subr.bf16.mxu1 %v6530_v17  ;;  %6805 = vmatprep.mubr.msk.bf16.mxu0 %vm2026_vm0, %v7667_v32  ;;  %v6735_v17 = vcombine.low %v298_v2, %v302_v3  ;;  %v6602_v23 = vcombine.high %v163_v14, %v167_v15 }
  0xee   :  { %2477 = vmatprep.mubr.bf16.mxu1 %v7513_v62  ;;  %v67_v62 = vld [vmem:[%s10170_s1 + $0xd8] sm:$0xff] }
  0xef   :  { %2405 = vmatpush1.bf16.msra.mxu0 %v6783_v24  ;;  %v6506_v45 = vcombine.high %v67_v62, %v71_v40  ;;  %v6505_v52 = vcombine.low %v67_v62, %v71_v40  ;;  %v227_v24 = vld [vmem:[%s10170_s1 + $0x5d8] sm:$0xff] }
  0xf0   :  { %2448 = vmatpush1.bf16.msra.mxu1 %v6529_v26  ;;  %2406 = vmatprep.subr.bf16.mxu0 %v6776_v27  ;;  %v231_v26 = vld [vmem:[%s10170_s1 + $0x5f8] sm:$0xff] }
  0xf1   :  { %2449 = vmatprep.subr.bf16.mxu1 %v6522_v28  ;;  %v155_v28 = vld [vmem:[%s10170_s1 + $0x398] sm:$0xff]  ;;  %v6665_v46 = vcombine.low %v227_v24, %v231_v26 }
  0xf2   :  { %v6594_v39 = vcombine.high %v155_v28, %v159_v29  ;;  %v219_v62 = vld [vmem:[%s10170_s1 + $0x598] sm:$0xff]  ;;  %v6593_v48 = vcombine.low %v155_v28, %v159_v29 }
  0xf3   :  { %2407 = vmatpush1.bf16.msra.mxu0 %v6775_v34  ;;  %v223_v40 = vld [vmem:[%s10170_s1 + $0x5b8] sm:$0xff] }
  0xf4   :  { %2450 = vmatpush1.bf16.msra.mxu1 %v6521_v35  ;;  %2408 = vmatprep.subr.bf16.mxu0 %v6768_v36  ;;  %v6601_v35 = vcombine.low %v163_v14, %v167_v15  ;;  %v6666_v36 = vcombine.high %v227_v24, %v231_v26  ;;  %v6658_v49 = vcombine.high %v219_v62, %v223_v40  ;;  %v183_v28 = vld [vmem:[%s10170_s1 + $0x478] sm:$0xff] }
  0xf5   :  { %2451 = vmatprep.subr.bf16.mxu1 %v6514_v37  ;;  %v6657_v56 = vcombine.low %v219_v62, %v223_v40  ;;  %v107_v29 = vld [vmem:[%s10170_s1 + $0x218] sm:$0xff] }
  0xf6   :  { %v175_v62 = vld [vmem:[%s10170_s1 + $0x438] sm:$0xff] }
  0xf7   :  { %2409 = vmatpush1.bf16.msra.mxu0 %v6767_v41  ;;  %v355_v40 = vld [vmem:[%s10170_s1 + $0x9d8] sm:$0xff] }
  0xf8   :  { %2452 = vmatpush1.bf16.msra.mxu1 %v6513_v42  ;;  %2410 = vmatprep.subr.bf16.mxu0 %v6760_v43  ;;  %v147_v42 = vld [vmem:[%s10170_s1 + $0x358] sm:$0xff] }
  0xf9   :  { %2453 = vmatprep.subr.bf16.mxu1 %v6506_v45  ;;  %v151_v43 = vld [vmem:[%s10170_s1 + $0x378] sm:$0xff] }
  0xfa   :  { %v6586_v51 = vcombine.high %v147_v42, %v151_v43  ;;  %v6585_v57 = vcombine.low %v147_v42, %v151_v43 }
  0xfb   :  { %2411 = vmatpush1.bf16.msra.mxu0 %v6759_v50 }
  0xfc   :  { %2454 = vmatpush1.bf16.msra.mxu1 %v6505_v52  ;;  %2412 = vmatprep.subr.bf16.mxu0 %v6752_v53  ;;  %v211_v52 = vld [vmem:[%s10170_s1 + $0x558] sm:$0xff] }
  0xfd   :  { %2455 = vmatprep.subr.bf16.mxu1 %v6498_v54  ;;  %v215_v53 = vld [vmem:[%s10170_s1 + $0x578] sm:$0xff] }
  0xfe   :  { %v139_v54 = vld [vmem:[%s10170_s1 + $0x318] sm:$0xff]  ;;  %v6650_v58 = vcombine.high %v211_v52, %v215_v53  ;;  %v6649_v2 = vcombine.low %v211_v52, %v215_v53 }
  0xff   :  { %2413 = vmatpush1.bf16.msra.mxu0 %v6751_v59  ;;  %v6578_v59 = vcombine.high %v139_v54, %v143_v55  ;;  %v6577_v3 = vcombine.low %v139_v54, %v143_v55 }
 0x100   :  { %2456 = vmatpush1.bf16.msra.mxu1 %v6497_v61  ;;  %2414 = vmatprep.subr.bf16.mxu0 %v6744_v0  ;;  %v203_v61 = vld [vmem:[%s10170_s1 + $0x518] sm:$0xff] }
 0x101   :  { %2457 = vmatprep.subr.bf16.mxu1 %v6490_v1  ;;  %v207_v0 = vld [vmem:[%s10170_s1 + $0x538] sm:$0xff] }
 0x102   :  { %v131_v1 = vld [vmem:[%s10170_s1 + $0x2d8] sm:$0xff]  ;;  %v6642_v4 = vcombine.high %v203_v61, %v207_v0  ;;  %v6641_v12 = vcombine.low %v203_v61, %v207_v0 }
 0x103   :  { %2415 = vmatpush1.bf16.msra.mxu0 %v6743_v7  ;;  %v199_v7 = vld [vmem:[%s10170_s1 + $0x4f8] sm:$0xff] }
 0x104   :  { %2458 = vmatpush1.bf16.msra.mxu1 %v6489_v9  ;;  %2416 = vmatprep.subr.bf16.mxu0 %v6736_v11  ;;  %v123_v9 = vld [vmem:[%s10170_s1 + $0x298] sm:$0xff]  ;;  %v6634_v14 = vcombine.high %v195_v6, %v199_v7 }
 0x105   :  { %2459 = vmatprep.subr.bf16.mxu1 %v6482_v13  ;;  %v127_v11 = vld [vmem:[%s10170_s1 + $0x2b8] sm:$0xff] }
 0x106   :  { %v2092_v27 = vpop.f32.mrf.mxu0  ;;  %v6562_v15 = vcombine.high %v123_v9, %v127_v11  ;;  %v339_v61 = vld [vmem:[%s10170_s1 + $0x958] sm:$0xff] }
 0x107   :  { %v2093_v30 = vadd.f32 %v2092_v27, %v369_v16  ;;  %v2135_v31 = vpop.f32.mrf.mxu1  ;;  %2417 = vmatpush1.bf16.msra.mxu0 %v6735_v17  ;;  %v191_v17 = vld [vmem:[%s10170_s1 + $0x4b8] sm:$0xff] }
 0x108   :  { %2460 = vmatpush1.bf16.msra.mxu1 %v6481_v19  ;;  %v8288_v34 = vpop.f32.mrf.mxu0  ;;  %2432 = vmatprep.subr.bf16.mxu0 %v2050_v20  ;;  %v119_v19 = vld [vmem:[%s10170_s1 + $0x278] sm:$0xff]  ;;  %v6633_v20 = vcombine.low %v195_v6, %v199_v7 }
 0x109   :  { %v8290_v37 = vadd.f32 %v2135_v31, %v2093_v30  ;;  %v8292_v38 = vpop.f32.mrf.mxu1  ;;  %2461 = vmatprep.subr.bf16.mxu1 %v6602_v23  ;;  %v6561_v23 = vcombine.low %v123_v9, %v127_v11  ;;  %v6554_v26 = vcombine.high %v115_v18, %v119_v19  ;;  %v179_v27 = vld [vmem:[%s10170_s1 + $0x458] sm:$0xff] }
 0x10a   :  { %v2096_v41 = vpop.f32.mrf.mxu0  ;;  %v111_v30 = vld [vmem:[%s10170_s1 + $0x238] sm:$0xff]  ;;  %v6617_v42 = vcombine.low %v179_v27, %v183_v28 }
 0x10b   :  { %v2097_v45 = vadd.f32 %v2096_v41, %v369_v16  ;;  %2433 = vmatpush2.bf16.msra.mxu0 %v2047_v33  ;;  %v2139_v47 = vpop.f32.mrf.mxu1  ;;  %v187_v16 = vld [vmem:[%s10170_s1 + $0x498] sm:$0xff]  ;;  %v6553_v33 = vcombine.low %v115_v18, %v119_v19  ;;  %v6545_v43 = vcombine.low %v107_v29, %v111_v30 }
 0x10c   :  { %2462 = vmatpush2.bf16.msra.mxu1 %v6601_v35  ;;  %2488 = vmatprep.subr.bf16.mxu0 %v6666_v36  ;;  %v6626_v24 = vcombine.high %v187_v16, %v191_v17  ;;  %v6625_v31 = vcombine.low %v187_v16, %v191_v17  ;;  %v6618_v35 = vcombine.high %v179_v27, %v183_v28  ;;  %v359_v41 = vld [vmem:[%s10170_s1 + $0x9f8] sm:$0xff]  ;;  %v8394_v53 = vpop.f32.mrf.mxu0 }
 0x10d   :  { %v8306_v50 = vadd.f32 %v2139_v47, %v2097_v45  ;;  %2463 = vmatprep.subr.bf16.mxu1 %v6594_v39  ;;  %v6546_v36 = vcombine.high %v107_v29, %v111_v30  ;;  %v171_v39 = vld [vmem:[%s10170_s1 + $0x418] sm:$0xff]  ;;  %v6793_v54 = vcombine.low %v355_v40, %v359_v41 }
 0x10e   :  { %2435 = vmatmul.mubr.bf16.vlgmr.msra.gmra.mxu0 %v7777_v44  ;;  %v6610_v45 = vcombine.high %v171_v39, %v175_v62  ;;  %v291_v47 = vld [vmem:[%s10170_s1 + $0x7d8] sm:$0xff]  ;;  %v6609_v52 = vcombine.low %v171_v39, %v175_v62 }
 0x10f   :  { %2489 = vmatpush1.bf16.msra.mxu0 %v6665_v46  ;;  %2520 = vmatprep.mubr.bf16.mxu0 %v7515_v63  ;;  %v135_v63 = vld [vmem:[%s10170_s1 + $0x2f8] sm:$0xff]  ;;  %v6794_v46 = vcombine.high %v355_v40, %v359_v41  ;;  %v372_v41 = vsub.s32 1, %v8242_v60 }
 0x110   :  { %2464 = vmatpush2.bf16.msra.mxu1 %v6593_v48  ;;  %2490 = vmatprep.subr.bf16.mxu0 %v6658_v49  ;;  %v6570_v5 = vcombine.high %v131_v1, %v135_v63  ;;  %v6569_v13 = vcombine.low %v131_v1, %v135_v63  ;;  %v295_v48 = vld [vmem:[%s10170_s1 + $0x7f8] sm:$0xff] }
 0x111   :  { %2465 = vmatprep.subr.bf16.mxu1 %v6586_v51  ;;  %v347_v49 = vld [vmem:[%s10170_s1 + $0x998] sm:$0xff]  ;;  %v6730_v55 = vcombine.high %v291_v47, %v295_v48  ;;  %v6729_v63 = vcombine.low %v291_v47, %v295_v48 }
 0x112   :  { %v351_v51 = vld [vmem:[%s10170_s1 + $0x9b8] sm:$0xff] }
 0x113   :  { %2491 = vmatpush1.bf16.msra.mxu0 %v6657_v56  ;;  %v6786_v56 = vcombine.high %v347_v49, %v351_v51  ;;  %v343_v0 = vld [vmem:[%s10170_s1 + $0x978] sm:$0xff] }
 0x114   :  { %2466 = vmatpush2.bf16.msra.mxu1 %v6585_v57  ;;  %2492 = vmatprep.subr.bf16.mxu0 %v6650_v58  ;;  %v283_v57 = vld [vmem:[%s10170_s1 + $0x798] sm:$0xff] }
 0x115   :  { %2467 = vmatprep.subr.bf16.mxu1 %v6578_v59  ;;  %v287_v58 = vld [vmem:[%s10170_s1 + $0x7b8] sm:$0xff] }
 0x116   :  { %v275_v6 = vld [vmem:[%s10170_s1 + $0x758] sm:$0xff] }
 0x117   :  { %2493 = vmatpush1.bf16.msra.mxu0 %v6649_v2  ;;  %v331_v7 = vld [vmem:[%s10170_s1 + $0x918] sm:$0xff] }
 0x118   :  { %2468 = vmatpush2.bf16.msra.mxu1 %v6577_v3  ;;  %2494 = vmatprep.subr.bf16.mxu0 %v6642_v4  ;;  %v6785_v3 = vcombine.low %v347_v49, %v351_v51  ;;  %v6722_v4 = vcombine.high %v283_v57, %v287_v58  ;;  %v335_v9 = vld [vmem:[%s10170_s1 + $0x938] sm:$0xff] }
 0x119   :  { %2469 = vmatprep.subr.bf16.mxu1 %v6570_v5  ;;  %v6778_v5 = vcombine.high %v339_v61, %v343_v0  ;;  %v267_v17 = vld [vmem:[%s10170_s1 + $0x718] sm:$0xff] }
 0x11a   :  { %v271_v18 = vld [vmem:[%s10170_s1 + $0x738] sm:$0xff] }
 0x11b   :  { %2495 = vmatpush1.bf16.msra.mxu0 %v6641_v12  ;;  %v6721_v12 = vcombine.low %v283_v57, %v287_v58  ;;  %v327_v19 = vld [vmem:[%s10170_s1 + $0x8f8] sm:$0xff] }
 0x11c   :  { %2470 = vmatpush2.bf16.msra.mxu1 %v6569_v13  ;;  %2496 = vmatprep.subr.bf16.mxu0 %v6634_v14  ;;  %v6777_v13 = vcombine.low %v339_v61, %v343_v0  ;;  %v259_v28 = vld [vmem:[%s10170_s1 + $0x6d8] sm:$0xff] }
 0x11d   :  { %2471 = vmatprep.subr.bf16.mxu1 %v6562_v15  ;;  %v263_v29 = vld [vmem:[%s10170_s1 + $0x6f8] sm:$0xff] }
 0x11e   :  { %v315_v30 = vld [vmem:[%s10170_s1 + $0x898] sm:$0xff] }
 0x11f   :  { %2497 = vmatpush1.bf16.msra.mxu0 %v6633_v20  ;;  %v251_v62 = vld [vmem:[%s10170_s1 + $0x698] sm:$0xff] }
 0x120   :  { %2472 = vmatpush2.bf16.msra.mxu1 %v6561_v23  ;;  %2498 = vmatprep.subr.bf16.mxu0 %v6626_v24  ;;  %v6769_v24 = vcombine.low %v331_v7, %v335_v9  ;;  %v255_v40 = vld [vmem:[%s10170_s1 + $0x6b8] sm:$0xff] }
 0x121   :  { %2473 = vmatprep.subr.bf16.mxu1 %v6554_v26  ;;  %v6706_v26 = vcombine.high %v267_v17, %v271_v18  ;;  %v6690_v47 = vcombine.high %v251_v62, %v255_v40  ;;  %v243_v49 = vld [vmem:[%s10170_s1 + $0x658] sm:$0xff]  ;;  %v6689_v57 = vcombine.low %v251_v62, %v255_v40 }
 0x122   :  { %v247_v51 = vld [vmem:[%s10170_s1 + $0x678] sm:$0xff] }
 0x123   :  { %2499 = vmatpush1.bf16.msra.mxu0 %v6625_v31  ;;  %v319_v31 = vld [vmem:[%s10170_s1 + $0x8b8] sm:$0xff]  ;;  %v6682_v61 = vcombine.high %v243_v49, %v247_v51 }
 0x124   :  { %2474 = vmatpush2.bf16.msra.mxu1 %v6553_v33  ;;  %2500 = vmatprep.subr.bf16.mxu0 %v6618_v35  ;;  %v6705_v33 = vcombine.low %v267_v17, %v271_v18  ;;  %v6754_v39 = vcombine.high %v315_v30, %v319_v31 }
 0x125   :  { %2475 = vmatprep.subr.bf16.mxu1 %v6546_v36  ;;  %v6698_v36 = vcombine.high %v259_v28, %v263_v29 }
 0x127   :  { %2501 = vmatpush1.bf16.msra.mxu0 %v6617_v42  ;;  %v307_v42 = vld [vmem:[%s10170_s1 + $0x858] sm:$0xff] }
 0x128   :  { %2476 = vmatpush2.bf16.msra.mxu1 %v6545_v43  ;;  %2502 = vmatprep.subr.bf16.mxu0 %v6610_v45  ;;  %v311_v43 = vld [vmem:[%s10170_s1 + $0x878] sm:$0xff]  ;;  %v6697_v45 = vcombine.low %v259_v28, %v263_v29 }
 0x129   :  { %2531 = vmatprep.subr.bf16.mxu1 %v6794_v46  ;;  %v6753_v46 = vcombine.low %v315_v30, %v319_v31  ;;  %v6746_v48 = vcombine.high %v307_v42, %v311_v43  ;;  %v2638_v31 = vld [vmem:[%s10172_s3 + $0x140] sm:$0xff] }
 0x12a   :  { %v2178_v59 = vpop.f32.mrf.mxu0 }
 0x12b   :  { %v2179_v1 = vadd.f32 %v2178_v59, %v8290_v37  ;;  %2478 = vmatmul.mubr.bf16.vlgmr.msra.gmra.mxu1 %v7648_v21  ;;  %2503 = vmatpush1.bf16.msra.mxu0 %v6609_v52  ;;  %v279_v37 = vld [vmem:[%s10170_s1 + $0x778] sm:$0xff]  ;;  %v373_v52 = vrot.slane %v8263_v10, %v372_v41  ;;  %v6745_v59 = vcombine.low %v307_v42, %v311_v43  ;;  %v2630_v43 = vld [vmem:[%s10172_s3 + $0x100] sm:$0xff] }
 0x12c   :  { %2532 = vmatpush1.bf16.msra.mxu1 %v6793_v54  ;;  %v8410_v2 = vpop.f32.mrf.mxu0  ;;  %2504 = vmatprep.subr.bf16.mxu0 %v6730_v55  ;;  %v6714_v14 = vcombine.high %v275_v6, %v279_v37  ;;  %v6713_v23 = vcombine.low %v275_v6, %v279_v37  ;;  %v299_v54 = vld [vmem:[%s10170_s1 + $0x818] sm:$0xff] }
 0x12d   :  { %2533 = vmatprep.subr.bf16.mxu1 %v6786_v56  ;;  %6806 = vmatprep.mubr.msk.bf16.mxu1 %vm2026_vm0, %v7667_v32  ;;  %v2574_v15 = vmax.f32 %v2179_v1, 0.0  ;;  %v6770_v32 = vcombine.high %v331_v7, %v335_v9  ;;  %v303_v55 = vld [vmem:[%s10170_s1 + $0x838] sm:$0xff]  ;;  %v2099_v58 = vadd.f32 %v8394_v53, %v373_v52  ;;  %v6681_v53 = vcombine.low %v243_v49, %v247_v51 }
 0x12e   :  { %v2182_v21 = vpop.f32.mrf.mxu0  ;;  %v363_v56 = vld [vmem:[%s10170_s1 + $0xa18] sm:$0x77]  ;;  %v6738_v0 = vcombine.high %v299_v54, %v303_v55  ;;  %v6737_v37 = vcombine.low %v299_v54, %v303_v55  ;;  %v2626_v54 = vld [vmem:[%s10172_s3 + $0xe0] sm:$0xff] }
 0x12f   :  { %v2183_v11 = vadd.f32 %v2182_v21, %v8306_v50  ;;  %2505 = vmatpush2.bf16.msra.mxu0 %v6729_v63  ;;  %v323_v50 = vld [vmem:[%s10170_s1 + $0x8d8] sm:$0xff]  ;;  %v6801_v9 = vcombine.low %v363_v56, %v363_v56  ;;  %v2750_v55 = vld [vmem:[%s10172_s3 + $0x4c0] sm:$0xff] }
 0x130   :  { %2534 = vmatpush1.bf16.msra.mxu1 %v6785_v3  ;;  %2506 = vmatprep.subr.bf16.mxu0 %v6722_v4  ;;  %v6762_v27 = vcombine.high %v323_v50, %v327_v19  ;;  %v6761_v35 = vcombine.low %v323_v50, %v327_v19  ;;  %v235_v1 = vld [vmem:[%s10170_s1 + $0x618] sm:$0xff]  ;;  %v6802_v3 = vcombine.high %v363_v56, %v363_v56  ;;  %v2184_v6 = vpop.f32.mrf.mxu0  ;;  %v2646_v19 = vld [vmem:[%s10172_s3 + $0x180] sm:$0xff] }
 0x131   :  { %v2582_v16 = vmax.f32 %v2183_v11, 0.0  ;;  %2535 = vmatprep.subr.bf16.mxu1 %v6778_v5  ;;  %v239_v63 = vld [vmem:[%s10170_s1 + $0x638] sm:$0xff]  ;;  %v2095_v4 = vadd.f32 %v8288_v34, %v373_v52  ;;  %v2141_v5 = vpop.f32.mrf.mxu1  ;;  %v2658_v34 = vld [vmem:[%s10172_s3 + $0x1e0] sm:$0xff]  ;;  %v2053_v18 = vand.u32 %v6801_v9, %v7743_v22 }
 0x132   :  { %v2142_v21 = vadd.f32 %v2141_v5, %v2099_v58  ;;  %v6674_v7 = vcombine.high %v235_v1, %v239_v63  ;;  %v2056_v11 = vand.u32 %v6802_v3, %v7743_v22  ;;  %v2778_v22 = vld [vmem:[%s10172_s3 + $0x5a0] sm:$0xff] }
 0x133   :  { %v8439_v20 = vpack.c.bf16 %v2582_v16, %v2574_v15  ;;  %2507 = vmatpush2.bf16.msra.mxu0 %v6721_v12  ;;  %v2654_v12 = vld [vmem:[%s10172_s3 + $0x1c0] sm:$0xff] }
 0x134   :  { %2536 = vmatpush1.bf16.msra.mxu1 %v6777_v13  ;;  %2508 = vmatprep.subr.bf16.mxu0 %v6714_v14  ;;  %v2138_v13 = vadd.f32 %v8292_v38, %v2095_v4  ;;  %v2185_v14 = vadd.f32 %v2184_v6, %v2142_v21  ;;  %v2782_v15 = vld [vmem:[%s10172_s3 + $0x5c0] sm:$0xff]  ;;  %v6864_v50 = vcombine.high %v2654_v12, %v2658_v34 }
 0x135   :  { %2537 = vmatprep.subr.bf16.mxu1 %v6770_v32  ;;  %v2786_v16 = vld [vmem:[%s10172_s3 + $0x5e0] sm:$0xff]  ;;  %v6673_v32 = vcombine.low %v235_v1, %v239_v63 }
 0x136   :  { %v2181_v17 = vadd.f32 %v8410_v2, %v2138_v13  ;;  %v6992_v38 = vcombine.high %v2782_v15, %v2786_v16  ;;  %v2774_v2 = vld [vmem:[%s10172_s3 + $0x580] sm:$0xff]  ;;  %v6991_v28 = vcombine.low %v2782_v15, %v2786_v16 }
 0x137   :  { %2509 = vmatpush2.bf16.msra.mxu0 %v6713_v23  ;;  %v2583_v23 = vmax.f32 %v2185_v14, 0.0  ;;  %v6984_v30 = vcombine.high %v2774_v2, %v2778_v22  ;;  %v6983_v40 = vcombine.low %v2774_v2, %v2778_v22  ;;  %v2622_v52 = vld [vmem:[%s10172_s3 + $0xc0] sm:$0xff] }
 0x138   :  { %2538 = vmatpush1.bf16.msra.mxu1 %v6769_v24  ;;  %2510 = vmatprep.subr.bf16.mxu0 %v6706_v26  ;;  %v2650_v24 = vld [vmem:[%s10172_s3 + $0x1a0] sm:$0xff]  ;;  %v6863_v26 = vcombine.low %v2654_v12, %v2658_v34  ;;  %v6831_v4 = vcombine.low %v2622_v52, %v2626_v54 }
 0x139   :  { %2539 = vmatprep.subr.bf16.mxu1 %v6762_v27  ;;  %v2575_v27 = vmax.f32 %v2181_v17, 0.0  ;;  %v6856_v29 = vcombine.high %v2646_v19, %v2650_v24  ;;  %v6855_v62 = vcombine.low %v2646_v19, %v2650_v24  ;;  %v2754_v56 = vld [vmem:[%s10172_s3 + $0x4e0] sm:$0xff] }
 0x13a   :  { %v2618_v1 = vld [vmem:[%s10172_s3 + $0xa0] sm:$0xff]  ;;  %v6959_v5 = vcombine.low %v2750_v55, %v2754_v56 }
 0x13b   :  { %2511 = vmatpush2.bf16.msra.mxu0 %v6705_v33  ;;  %v2642_v33 = vld [vmem:[%s10172_s3 + $0x160] sm:$0xff] }
 0x13c   :  { %2540 = vmatpush1.bf16.msra.mxu1 %v6761_v35  ;;  %2512 = vmatprep.subr.bf16.mxu0 %v6698_v36  ;;  %v8526_v35 = vpack.c.bf16 %v2583_v23, %v2575_v27  ;;  %v2766_v36 = vld [vmem:[%s10172_s3 + $0x540] sm:$0xff]  ;;  %v6848_v42 = vcombine.high %v2638_v31, %v2642_v33 }
 0x13d   :  { %2541 = vmatprep.subr.bf16.mxu1 %v6754_v39  ;;  %v2770_v39 = vld [vmem:[%s10172_s3 + $0x560] sm:$0xff] }
 0x13e   :  { %v2742_v63 = vld [vmem:[%s10172_s3 + $0x480] sm:$0xff] }
 0x13f   :  { %2513 = vmatpush2.bf16.msra.mxu0 %v6697_v45  ;;  %v2634_v45 = vld [vmem:[%s10172_s3 + $0x120] sm:$0xff] }
 0x140   :  { %2542 = vmatpush1.bf16.msra.mxu1 %v6753_v46  ;;  %2514 = vmatprep.subr.bf16.mxu0 %v6690_v47  ;;  %v2762_v46 = vld [vmem:[%s10172_s3 + $0x520] sm:$0xff]  ;;  %v6847_v47 = vcombine.low %v2638_v31, %v2642_v33  ;;  %v6840_v49 = vcombine.high %v2630_v43, %v2634_v45 }
 0x141   :  { %2543 = vmatprep.subr.bf16.mxu1 %v6746_v48  ;;  %v6975_v48 = vcombine.low %v2766_v36, %v2770_v39  ;;  %v2746_v3 = vld [vmem:[%s10172_s3 + $0x4a0] sm:$0xff] }
 0x142   :  { %v2606_v21 = vld [vmem:[%s10172_s3 + $0x40] sm:$0xff]  ;;  %v6951_v34 = vcombine.low %v2742_v63, %v2746_v3 }
 0x143   :  { %2515 = vmatpush2.bf16.msra.mxu0 %v6689_v57  ;;  %v6839_v57 = vcombine.low %v2630_v43, %v2634_v45  ;;  %v2734_v9 = vld [vmem:[%s10172_s3 + $0x440] sm:$0xff] }
 0x144   :  { %2544 = vmatpush1.bf16.msra.mxu1 %v6745_v59  ;;  %2516 = vmatprep.subr.bf16.mxu0 %v6682_v61  ;;  %v6832_v59 = vcombine.high %v2622_v52, %v2626_v54  ;;  %v6960_v61 = vcombine.high %v2750_v55, %v2754_v56  ;;  %v2598_v16 = vld [vmem:[%s10172_s3] sm:$0xff] }
 0x145   :  { %2545 = vmatprep.subr.bf16.mxu1 %v6738_v0  ;;  %v2614_v0 = vld [vmem:[%s10172_s3 + $0x80] sm:$0xff] }
 0x146   :  { %v6824_v6 = vcombine.high %v2614_v0, %v2618_v1  ;;  %v6823_v12 = vcombine.low %v2614_v0, %v2618_v1  ;;  %v2726_v17 = vld [vmem:[%s10172_s3 + $0x400] sm:$0xff] }
 0x147   :  { %2517 = vmatpush2.bf16.msra.mxu0 %v6681_v53  ;;  %v8573_v53 = vpop.f32.mrf.mxu1  ;;  %v2718_v22 = vld [vmem:[%s10172_s3 + $0x3c0] sm:$0xff] }
 0x148   :  { %2546 = vmatpush1.bf16.msra.mxu1 %v6737_v37  ;;  %2518 = vmatprep.subr.bf16.mxu0 %v6674_v7  ;;  %v6952_v37 = vcombine.high %v2742_v63, %v2746_v3  ;;  %v2610_v7 = vld [vmem:[%s10172_s3 + $0x60] sm:$0xff] }
 0x149   :  { %2561 = vmatprep.subr.bf16.mxu1 %v2056_v11  ;;  %v2738_v11 = vld [vmem:[%s10172_s3 + $0x460] sm:$0xff]  ;;  %v6816_v13 = vcombine.high %v2606_v21, %v2610_v7  ;;  %v2223_v14 = vpop.f32.mrf.mxu1 }
 0x14a   :  { %v6944_v15 = vcombine.high %v2734_v9, %v2738_v11  ;;  %v6943_v19 = vcombine.low %v2734_v9, %v2738_v11  ;;  %v2846_v27 = vld [vmem:[%s10172_s3 + $0x7c0] sm:$0xff] }
 0x14b   :  { %2519 = vmatpush2.bf16.msra.mxu0 %v6673_v32  ;;  %v2602_v32 = vld [vmem:[%s10172_s3 + $0x20] sm:$0xff]  ;;  %v8600_v24 = vpop.f32.mrf.mxu1 }
 0x14c   :  { %2562 = vmatpush2.bf16.msra.mxu1 %v2053_v18  ;;  %5712 = vmatprep.subr.bf16.mxu0 %v6864_v50  ;;  %v2730_v18 = vld [vmem:[%s10172_s3 + $0x420] sm:$0xff]  ;;  %v380_v50 = vsub.s32 3, %v8242_v60  ;;  %v6808_v23 = vcombine.high %v2598_v16, %v2602_v32 }
 0x14d   :  { %5755 = vmatprep.subr.bf16.mxu1 %v6992_v38  ;;  %v6815_v38 = vcombine.low %v2606_v21, %v2610_v7  ;;  %v6936_v2 = vcombine.high %v2726_v17, %v2730_v18  ;;  %v6935_v31 = vcombine.low %v2726_v17, %v2730_v18  ;;  %v2842_v43 = vld [vmem:[%s10172_s3 + $0x7a0] sm:$0xff] }
 0x14e   :  { %2521 = vmatmul.mubr.bf16.vlgmr.msra.gmra.mxu0 %v7659_v25  ;;  %v6976_v25 = vcombine.high %v2766_v36, %v2770_v39  ;;  %v2227_v36 = vpop.f32.mrf.mxu1  ;;  %v2702_v55 = vld [vmem:[%s10172_s3 + $0x340] sm:$0xff] }
 0x14f   :  { %2564 = vmatmul.mubr.bf16.vlgmr.msra.gmra.mxu1 %v7777_v44  ;;  %5713 = vmatpush1.bf16.msra.mxu0 %v6863_v26  ;;  %v2758_v44 = vld [vmem:[%s10172_s3 + $0x500] sm:$0xff] }
 0x150   :  { %5744 = vmatprep.mubr.bf16.mxu0 %v8526_v35  ;;  %5756 = vmatpush1.bf16.msra.mxu1 %v6991_v28  ;;  %v6968_v51 = vcombine.high %v2758_v44, %v2762_v46  ;;  %v6967_v58 = vcombine.low %v2758_v44, %v2762_v46  ;;  %v2722_v26 = vld [vmem:[%s10172_s3 + $0x3e0] sm:$0xff] }
 0x151   :  { %5714 = vmatprep.subr.bf16.mxu0 %v6856_v29  ;;  %5757 = vmatprep.subr.bf16.mxu1 %v6984_v30  ;;  %v2850_v28 = vld [vmem:[%s10172_s3 + $0x7e0] sm:$0xff]  ;;  %v381_v29 = vrot.slane %v8263_v10, %v380_v50  ;;  %v6807_v30 = vcombine.low %v2598_v16, %v2602_v32  ;;  %v6928_v33 = vcombine.high %v2718_v22, %v2722_v26 }
 0x152   :  { %v7056_v39 = vcombine.high %v2846_v27, %v2850_v28  ;;  %v6927_v46 = vcombine.low %v2718_v22, %v2722_v26  ;;  %v2706_v56 = vld [vmem:[%s10172_s3 + $0x360] sm:$0xff] }
 0x153   :  { %5715 = vmatpush1.bf16.msra.mxu0 %v6855_v62  ;;  %v2710_v62 = vld [vmem:[%s10172_s3 + $0x380] sm:$0xff]  ;;  %v2224_v45 = vadd.f32 %v2223_v14, %v381_v29 }
 0x154   :  { %5758 = vmatpush1.bf16.msra.mxu1 %v6983_v40  ;;  %5716 = vmatprep.subr.bf16.mxu0 %v6848_v42  ;;  %v2714_v40 = vld [vmem:[%s10172_s3 + $0x3a0] sm:$0xff] }
 0x155   :  { %5759 = vmatprep.subr.bf16.mxu1 %v6976_v25  ;;  %v2838_v25 = vld [vmem:[%s10172_s3 + $0x780] sm:$0xff]  ;;  %v6919_v1 = vcombine.low %v2710_v62, %v2714_v40 }
 0x156   :  { %v7048_v54 = vcombine.high %v2838_v25, %v2842_v43  ;;  %v7047_v3 = vcombine.low %v2838_v25, %v2842_v43  ;;  %v2694_v21 = vld [vmem:[%s10172_s3 + $0x300] sm:$0xff] }
 0x157   :  { %5717 = vmatpush1.bf16.msra.mxu0 %v6847_v47  ;;  %v2698_v7 = vld [vmem:[%s10172_s3 + $0x320] sm:$0xff] }
 0x158   :  { %5760 = vmatpush1.bf16.msra.mxu1 %v6975_v48  ;;  %5718 = vmatprep.subr.bf16.mxu0 %v6840_v49  ;;  %v7055_v48 = vcombine.low %v2846_v27, %v2850_v28  ;;  %v6920_v49 = vcombine.high %v2710_v62, %v2714_v40  ;;  %v2822_v11 = vld [vmem:[%s10172_s3 + $0x700] sm:$0xff]  ;;  %v6903_v26 = vcombine.low %v2694_v21, %v2698_v7 }
 0x159   :  { %5761 = vmatprep.subr.bf16.mxu1 %v6968_v51  ;;  %v2686_v18 = vld [vmem:[%s10172_s3 + $0x2c0] sm:$0xff] }
 0x15b   :  { %5719 = vmatpush1.bf16.msra.mxu0 %v6839_v57 }
 0x15c   :  { %5762 = vmatpush1.bf16.msra.mxu1 %v6967_v58  ;;  %5720 = vmatprep.subr.bf16.mxu0 %v6832_v59  ;;  %v2830_v58 = vld [vmem:[%s10172_s3 + $0x740] sm:$0xff] }
 0x15d   :  { %5763 = vmatprep.subr.bf16.mxu1 %v6960_v61  ;;  %v2834_v59 = vld [vmem:[%s10172_s3 + $0x760] sm:$0xff]  ;;  %v2228_v61 = vadd.f32 %v2227_v36, %v381_v29 }
 0x15e   :  { %v7039_v14 = vcombine.low %v2830_v58, %v2834_v59  ;;  %v2810_v36 = vld [vmem:[%s10172_s3 + $0x6a0] sm:$0xff] }
 0x15f   :  { %5721 = vmatpush1.bf16.msra.mxu0 %v6831_v4  ;;  %v6912_v4 = vcombine.high %v2702_v55, %v2706_v56 }
 0x160   :  { %5764 = vmatpush1.bf16.msra.mxu1 %v6959_v5  ;;  %5722 = vmatprep.subr.bf16.mxu0 %v6824_v6 }
 0x161   :  { %5765 = vmatprep.subr.bf16.mxu1 %v6952_v37  ;;  %v7040_v37 = vcombine.high %v2830_v58, %v2834_v59  ;;  %v2662_v58 = vld [vmem:[%s10172_s3 + $0x200] sm:$0xff] }
 0x162   :  { %v2790_v59 = vld [vmem:[%s10172_s3 + $0x600] sm:$0xff] }
 0x163   :  { %5723 = vmatpush1.bf16.msra.mxu0 %v6823_v12  ;;  %v2826_v12 = vld [vmem:[%s10172_s3 + $0x720] sm:$0xff] }
 0x164   :  { %5766 = vmatpush1.bf16.msra.mxu1 %v6951_v34  ;;  %5724 = vmatprep.subr.bf16.mxu0 %v6816_v13  ;;  %v6911_v13 = vcombine.low %v2702_v55, %v2706_v56  ;;  %v7032_v17 = vcombine.high %v2822_v11, %v2826_v12  ;;  %v7031_v27 = vcombine.low %v2822_v11, %v2826_v12  ;;  %v2902_v12 = vld [vmem:[%s10172_s3 + $0x980] sm:$0xff] }
 0x165   :  { %5767 = vmatprep.subr.bf16.mxu1 %v6944_v15  ;;  %v6904_v15 = vcombine.high %v2694_v21, %v2698_v7 }
 0x167   :  { %5725 = vmatpush1.bf16.msra.mxu0 %v6815_v38  ;;  %v2690_v38 = vld [vmem:[%s10172_s3 + $0x2e0] sm:$0xff] }
 0x168   :  { %5768 = vmatpush1.bf16.msra.mxu1 %v6943_v19  ;;  %5726 = vmatprep.subr.bf16.mxu0 %v6808_v23  ;;  %v2814_v19 = vld [vmem:[%s10172_s3 + $0x6c0] sm:$0xff]  ;;  %v6896_v28 = vcombine.high %v2686_v18, %v2690_v38  ;;  %v6895_v62 = vcombine.low %v2686_v18, %v2690_v38 }
 0x169   :  { %5769 = vmatprep.subr.bf16.mxu1 %v6936_v2  ;;  %v2818_v23 = vld [vmem:[%s10172_s3 + $0x6e0] sm:$0xff]  ;;  %v376_v2 = vsub.s32 2, %v8242_v60 }
 0x16a   :  { %v8623_v42 = vpop.f32.mrf.mxu0  ;;  %v7024_v29 = vcombine.high %v2814_v19, %v2818_v23  ;;  %v7023_v40 = vcombine.low %v2814_v19, %v2818_v23  ;;  %v2894_v38 = vld [vmem:[%s10172_s3 + $0x940] sm:$0xff] }
 0x16b   :  { %v8631_v44 = vpop.f32.mrf.mxu1  ;;  %5727 = vmatpush1.bf16.msra.mxu0 %v6807_v30  ;;  %v2678_v30 = vld [vmem:[%s10172_s3 + $0x280] sm:$0xff] }
 0x16c   :  { %5770 = vmatpush1.bf16.msra.mxu1 %v6935_v31  ;;  %v2266_v47 = vpop.f32.mrf.mxu0  ;;  %5728 = vmatprep.subr.bf16.mxu0 %v6928_v33  ;;  %v2682_v31 = vld [vmem:[%s10172_s3 + $0x2a0] sm:$0xff] }
 0x16d   :  { %v2267_v51 = vadd.f32 %v2266_v47, %v2224_v45  ;;  %v2309_v52 = vpop.f32.mrf.mxu1  ;;  %5771 = vmatprep.subr.bf16.mxu1 %v7056_v39  ;;  %v2806_v33 = vld [vmem:[%s10172_s3 + $0x680] sm:$0xff]  ;;  %v377_v39 = vrot.slane %v8263_v10, %v376_v2  ;;  %v6888_v25 = vcombine.high %v2678_v30, %v2682_v31 }
 0x16e   :  { %v8639_v57 = vpop.f32.mrf.mxu0  ;;  %v7016_v43 = vcombine.high %v2806_v33, %v2810_v36  ;;  %v2670_v45 = vld [vmem:[%s10172_s3 + $0x240] sm:$0xff] }
 0x16f   :  { %v8647_v0 = vpop.f32.mrf.mxu1  ;;  %5729 = vmatpush2.bf16.msra.mxu0 %v6927_v46  ;;  %v2310_v5 = vadd.f32 %v2309_v52, %v2267_v51  ;;  %v2674_v46 = vld [vmem:[%s10172_s3 + $0x260] sm:$0xff]  ;;  %v7015_v51 = vcombine.low %v2806_v33, %v2810_v36 }
 0x170   :  { %5772 = vmatpush2.bf16.msra.mxu1 %v7055_v48  ;;  %v2270_v63 = vpop.f32.mrf.mxu0  ;;  %5730 = vmatprep.subr.bf16.mxu0 %v6920_v49  ;;  %v2798_v10 = vld [vmem:[%s10172_s3 + $0x640] sm:$0xff]  ;;  %v2226_v48 = vadd.f32 %v8600_v24, %v377_v39  ;;  %v6887_v49 = vcombine.low %v2678_v30, %v2682_v31  ;;  %v6880_v52 = vcombine.high %v2670_v45, %v2674_v46 }
 0x171   :  { %v2271_v6 = vadd.f32 %v2270_v63, %v2228_v61  ;;  %5773 = vmatprep.subr.bf16.mxu1 %v7048_v54  ;;  %v2313_v9 = vpop.f32.mrf.mxu1  ;;  %v2577_v16 = vmax.f32 %v2310_v5, 0.0  ;;  %v2802_v47 = vld [vmem:[%s10172_s3 + $0x660] sm:$0xff]  ;;  %v2222_v54 = vadd.f32 %v8573_v53, %v377_v39  ;;  %v6879_v61 = vcombine.low %v2670_v45, %v2674_v46 }
 0x172   :  { %v2269_v55 = vadd.f32 %v8639_v57, %v2226_v48  ;;  %v7008_v56 = vcombine.high %v2798_v10, %v2802_v47  ;;  %v2666_v24 = vld [vmem:[%s10172_s3 + $0x220] sm:$0xff] }
 0x173   :  { %v2314_v34 = vadd.f32 %v2313_v9, %v2271_v6  ;;  %5731 = vmatpush2.bf16.msra.mxu0 %v6919_v1  ;;  %v2794_v53 = vld [vmem:[%s10172_s3 + $0x620] sm:$0xff]  ;;  %v2265_v57 = vadd.f32 %v8623_v42, %v2222_v54  ;;  %v7007_v1 = vcombine.low %v2798_v10, %v2802_v47  ;;  %v6872_v63 = vcombine.high %v2662_v58, %v2666_v24 }
 0x174   :  { %5774 = vmatpush2.bf16.msra.mxu1 %v7047_v3  ;;  %5732 = vmatprep.subr.bf16.mxu0 %v6912_v4  ;;  %v2312_v3 = vadd.f32 %v8647_v0, %v2269_v55  ;;  %v7000_v4 = vcombine.high %v2790_v59, %v2794_v53  ;;  %v2910_v5 = vld [vmem:[%s10172_s3 + $0x9c0] sm:$0xff]  ;;  %v6871_v21 = vcombine.low %v2662_v58, %v2666_v24 }
 0x175   :  { %v2585_v32 = vmax.f32 %v2314_v34, 0.0  ;;  %5775 = vmatprep.subr.bf16.mxu1 %v7040_v37  ;;  %v2914_v6 = vld [vmem:[%s10172_s3 + $0x9e0] sm:$0xff]  ;;  %v2308_v0 = vadd.f32 %v8631_v44, %v2265_v57  ;;  %v6999_v7 = vcombine.low %v2790_v59, %v2794_v53  ;;  %v8801_v53 = vld [vmem:[%s10172_s3 + $0x5c8] sm:$0xff] }
 0x176   :  { %v3038_v42 = vld [vmem:[%s10172_s3 + $0xdc0] sm:$0xff]  ;;  %v7120_v9 = vcombine.high %v2910_v5, %v2914_v6  ;;  %v2584_v11 = vmax.f32 %v2312_v3, 0.0  ;;  %v8806_v57 = vld [vmem:[%s10172_s3 + $0x5e8] sm:$0xff] }
 0x177   :  { %v8674_v22 = vpack.c.bf16 %v2585_v32, %v2577_v16  ;;  %5733 = vmatpush2.bf16.msra.mxu0 %v6911_v13  ;;  %v3042_v37 = vld [vmem:[%s10172_s3 + $0xde0] sm:$0xff]  ;;  %v7119_v16 = vcombine.low %v2910_v5, %v2914_v6  ;;  %v6993_v5 = vcombine.low %v8801_v53, %v8806_v57 }
 0x178   :  { %5776 = vmatpush2.bf16.msra.mxu1 %v7039_v14  ;;  %5734 = vmatprep.subr.bf16.mxu0 %v6904_v15  ;;  %v2906_v34 = vld [vmem:[%s10172_s3 + $0x9a0] sm:$0xff]  ;;  %v7248_v13 = vcombine.high %v3038_v42, %v3042_v37  ;;  %v2576_v15 = vmax.f32 %v2308_v0, 0.0 }
 0x179   :  { %5787 = vmatprep.mubr.bf16.mxu1 %v8674_v22  ;;  %5777 = vmatprep.subr.bf16.mxu1 %v7032_v17  ;;  %v3030_v44 = vld [vmem:[%s10172_s3 + $0xd80] sm:$0xff]  ;;  %v7112_v32 = vcombine.high %v2902_v12, %v2906_v34  ;;  %v7247_v17 = vcombine.low %v3038_v42, %v3042_v37 }
 0x17a   :  { %v3034_v14 = vld [vmem:[%s10172_s3 + $0xda0] sm:$0xff]  ;;  %v8746_v18 = vpack.c.bf16 %v2584_v11, %v2576_v15 }
 0x17b   :  { %5735 = vmatpush2.bf16.msra.mxu0 %v6903_v26  ;;  %v2898_v19 = vld [vmem:[%s10172_s3 + $0x960] sm:$0xff]  ;;  %v7240_v23 = vcombine.high %v3030_v44, %v3034_v14  ;;  %v7239_v30 = vcombine.low %v3030_v44, %v3034_v14 }
 0x17c   :  { %5778 = vmatpush2.bf16.msra.mxu1 %v7031_v27  ;;  %5736 = vmatprep.subr.bf16.mxu0 %v6896_v28  ;;  %v3022_v26 = vld [vmem:[%s10172_s3 + $0xd40] sm:$0xff]  ;;  %v7111_v28 = vcombine.low %v2902_v12, %v2906_v34 }
 0x17d   :  { %5779 = vmatprep.subr.bf16.mxu1 %v7024_v29  ;;  %v3026_v27 = vld [vmem:[%s10172_s3 + $0xd60] sm:$0xff]  ;;  %v7104_v29 = vcombine.high %v2894_v38, %v2898_v19 }
 0x17e   :  { %v2886_v31 = vld [vmem:[%s10172_s3 + $0x900] sm:$0xff]  ;;  %v7232_v36 = vcombine.high %v3022_v26, %v3026_v27 }
 0x17f   :  { %5737 = vmatpush2.bf16.msra.mxu0 %v6895_v62  ;;  %v2890_v33 = vld [vmem:[%s10172_s3 + $0x920] sm:$0xff] }
 0x180   :  { %5780 = vmatpush2.bf16.msra.mxu1 %v7023_v40  ;;  %5738 = vmatprep.subr.bf16.mxu0 %v6888_v25  ;;  %v3014_v39 = vld [vmem:[%s10172_s3 + $0xd00] sm:$0xff]  ;;  %v7103_v40 = vcombine.low %v2894_v38, %v2898_v19  ;;  %v7096_v25 = vcombine.high %v2886_v31, %v2890_v33 }
 0x181   :  { %5781 = vmatprep.subr.bf16.mxu1 %v7016_v43  ;;  %v3018_v62 = vld [vmem:[%s10172_s3 + $0xd20] sm:$0xff]  ;;  %v7231_v43 = vcombine.low %v3022_v26, %v3026_v27 }
 0x182   :  { %v2878_v45 = vld [vmem:[%s10172_s3 + $0x8c0] sm:$0xff]  ;;  %v7224_v10 = vcombine.high %v3014_v39, %v3018_v62 }
 0x183   :  { %5739 = vmatpush2.bf16.msra.mxu0 %v6887_v49  ;;  %v2882_v46 = vld [vmem:[%s10172_s3 + $0x8e0] sm:$0xff]  ;;  %v7095_v49 = vcombine.low %v2886_v31, %v2890_v33 }
 0x184   :  { %5782 = vmatpush2.bf16.msra.mxu1 %v7015_v51  ;;  %5740 = vmatprep.subr.bf16.mxu0 %v6880_v52  ;;  %v3006_v47 = vld [vmem:[%s10172_s3 + $0xcc0] sm:$0xff]  ;;  %v7088_v51 = vcombine.high %v2878_v45, %v2882_v46  ;;  %v7223_v52 = vcombine.low %v3014_v39, %v3018_v62  ;;  %v7087_v59 = vcombine.low %v2878_v45, %v2882_v46 }
 0x185   :  { %5783 = vmatprep.subr.bf16.mxu1 %v7008_v56  ;;  %v3010_v48 = vld [vmem:[%s10172_s3 + $0xce0] sm:$0xff] }
 0x186   :  { %v2870_v54 = vld [vmem:[%s10172_s3 + $0x880] sm:$0xff]  ;;  %v7216_v56 = vcombine.high %v3006_v47, %v3010_v48 }
 0x187   :  { %5741 = vmatpush2.bf16.msra.mxu0 %v6879_v61  ;;  %v2874_v55 = vld [vmem:[%s10172_s3 + $0x8a0] sm:$0xff] }
 0x188   :  { %5784 = vmatpush2.bf16.msra.mxu1 %v7007_v1  ;;  %5742 = vmatprep.subr.bf16.mxu0 %v6872_v63  ;;  %v2998_v58 = vld [vmem:[%s10172_s3 + $0xc80] sm:$0xff]  ;;  %v7080_v61 = vcombine.high %v2870_v54, %v2874_v55  ;;  %v7215_v1 = vcombine.low %v3006_v47, %v3010_v48  ;;  %v7079_v37 = vcombine.low %v2870_v54, %v2874_v55 }
 0x189   :  { %5785 = vmatprep.subr.bf16.mxu1 %v7000_v4  ;;  %v3002_v24 = vld [vmem:[%s10172_s3 + $0xca0] sm:$0xff] }
 0x18a   :  { %v2862_v63 = vld [vmem:[%s10172_s3 + $0x840] sm:$0xff]  ;;  %v7208_v4 = vcombine.high %v2998_v58, %v3002_v24 }
 0x18b   :  { %5743 = vmatpush2.bf16.msra.mxu0 %v6871_v21  ;;  %v2866_v3 = vld [vmem:[%s10172_s3 + $0x860] sm:$0xff]  ;;  %v7207_v21 = vcombine.low %v2998_v58, %v3002_v24 }
 0x18c   :  { %5786 = vmatpush2.bf16.msra.mxu1 %v6999_v7  ;;  %5798 = vmatprep.subr.bf16.mxu0 %v7120_v9  ;;  %v2990_v6 = vld [vmem:[%s10172_s3 + $0xc40] sm:$0xff]  ;;  %v7072_v0 = vcombine.high %v2862_v63, %v2866_v3 }
 0x18d   :  { %5841 = vmatprep.subr.bf16.mxu1 %v7248_v13  ;;  %v2994_v42 = vld [vmem:[%s10172_s3 + $0xc60] sm:$0xff]  ;;  %v7071_v13 = vcombine.low %v2862_v63, %v2866_v3 }
 0x18e   :  { %5745 = vmatmul.mubr.bf16.vlgmr.msra.gmra.mxu0 %v8439_v20  ;;  %v2854_v7 = vld [vmem:[%s10172_s3 + $0x800] sm:$0xff]  ;;  %v7200_v11 = vcombine.high %v2990_v6, %v2994_v42  ;;  %v7199_v14 = vcombine.low %v2990_v6, %v2994_v42 }
 0x18f   :  { %5788 = vmatmul.mubr.bf16.vlgmr.msra.gmra.mxu1 %v8746_v18  ;;  %5799 = vmatpush1.bf16.msra.mxu0 %v7119_v16  ;;  %v2858_v9 = vld [vmem:[%s10172_s3 + $0x820] sm:$0xff] }
 0x190   :  { %5800 = vmatprep.subr.bf16.mxu0 %v7112_v32  ;;  %5842 = vmatpush1.bf16.msra.mxu1 %v7247_v17  ;;  %v2982_v12 = vld [vmem:[%s10172_s3 + $0xc00] sm:$0xff]  ;;  %v7064_v44 = vcombine.high %v2854_v7, %v2858_v9  ;;  %v7063_v19 = vcombine.low %v2854_v7, %v2858_v9 }
 0x191   :  { %5843 = vmatprep.subr.bf16.mxu1 %v7240_v23  ;;  %v2986_v34 = vld [vmem:[%s10172_s3 + $0xc20] sm:$0xff] }
 0x192   :  { %v2974_v15 = vld [vmem:[%s10172_s3 + $0xbc0] sm:$0xff]  ;;  %v7192_v32 = vcombine.high %v2982_v12, %v2986_v34  ;;  %v7191_v26 = vcombine.low %v2982_v12, %v2986_v34 }
 0x193   :  { %5801 = vmatpush1.bf16.msra.mxu0 %v7111_v28  ;;  %v2978_v16 = vld [vmem:[%s10172_s3 + $0xbe0] sm:$0xff] }
 0x194   :  { %5802 = vmatprep.subr.bf16.mxu0 %v7104_v29  ;;  %5844 = vmatpush1.bf16.msra.mxu1 %v7239_v30  ;;  %v3102_v17 = vld [vmem:[%s10172_s3 + $0xfc0] sm:$0xff]  ;;  %v7184_v23 = vcombine.high %v2974_v15, %v2978_v16  ;;  %v7183_v33 = vcombine.low %v2974_v15, %v2978_v16 }
 0x195   :  { %5845 = vmatprep.subr.bf16.mxu1 %v7232_v36  ;;  %v3106_v38 = vld [vmem:[%s10172_s3 + $0xfe0] sm:$0xff] }
 0x196   :  { %v2966_v27 = vld [vmem:[%s10172_s3 + $0xb80] sm:$0xff]  ;;  %v7312_v29 = vcombine.high %v3102_v17, %v3106_v38  ;;  %v7311_v39 = vcombine.low %v3102_v17, %v3106_v38 }
 0x197   :  { %5803 = vmatpush1.bf16.msra.mxu0 %v7103_v40  ;;  %v2970_v28 = vld [vmem:[%s10172_s3 + $0xba0] sm:$0xff] }
 0x198   :  { %5804 = vmatprep.subr.bf16.mxu0 %v7096_v25  ;;  %5846 = vmatpush1.bf16.msra.mxu1 %v7231_v43  ;;  %v3094_v30 = vld [vmem:[%s10172_s3 + $0xf80] sm:$0xff]  ;;  %v7176_v36 = vcombine.high %v2966_v27, %v2970_v28  ;;  %v7175_v46 = vcombine.low %v2966_v27, %v2970_v28 }
 0x199   :  { %5847 = vmatprep.subr.bf16.mxu1 %v7224_v10  ;;  %v3098_v31 = vld [vmem:[%s10172_s3 + $0xfa0] sm:$0xff] }
 0x19a   :  { %v2958_v62 = vld [vmem:[%s10172_s3 + $0xb40] sm:$0xff]  ;;  %v7304_v25 = vcombine.high %v3094_v30, %v3098_v31  ;;  %v7303_v47 = vcombine.low %v3094_v30, %v3098_v31 }
 0x19b   :  { %5805 = vmatpush1.bf16.msra.mxu0 %v7095_v49  ;;  %v2962_v40 = vld [vmem:[%s10172_s3 + $0xb60] sm:$0xff] }
 0x19c   :  { %5806 = vmatprep.subr.bf16.mxu0 %v7088_v51  ;;  %5848 = vmatpush1.bf16.msra.mxu1 %v7223_v52  ;;  %v3086_v43 = vld [vmem:[%s10172_s3 + $0xf40] sm:$0xff]  ;;  %v7168_v10 = vcombine.high %v2958_v62, %v2962_v40  ;;  %v7167_v55 = vcombine.low %v2958_v62, %v2962_v40  ;;  %v2659_v62 = vld [vmem:[%s10172_s3 + $0x1e8] sm:$0xff] }
 0x19d   :  { %5849 = vmatprep.subr.bf16.mxu1 %v7216_v56  ;;  %v3090_v45 = vld [vmem:[%s10172_s3 + $0xf60] sm:$0xff] }
 0x19e   :  { %v2950_v48 = vld [vmem:[%s10172_s3 + $0xb00] sm:$0xff]  ;;  %v7296_v51 = vcombine.high %v3086_v43, %v3090_v45  ;;  %v7295_v58 = vcombine.low %v3086_v43, %v3090_v45 }
 0x19f   :  { %5807 = vmatpush1.bf16.msra.mxu0 %v7087_v59  ;;  %v2954_v49 = vld [vmem:[%s10172_s3 + $0xb20] sm:$0xff] }
 0x1a0   :  { %5808 = vmatprep.subr.bf16.mxu0 %v7080_v61  ;;  %5850 = vmatpush1.bf16.msra.mxu1 %v7215_v1  ;;  %v3078_v52 = vld [vmem:[%s10172_s3 + $0xf00] sm:$0xff]  ;;  %v7160_v56 = vcombine.high %v2950_v48, %v2954_v49  ;;  %v7159_v3 = vcombine.low %v2950_v48, %v2954_v49 }
 0x1a1   :  { %5851 = vmatprep.subr.bf16.mxu1 %v7208_v4  ;;  %v3082_v54 = vld [vmem:[%s10172_s3 + $0xf20] sm:$0xff] }
 0x1a2   :  { %v2942_v24 = vld [vmem:[%s10172_s3 + $0xac0] sm:$0xff]  ;;  %v7288_v61 = vcombine.high %v3078_v52, %v3082_v54  ;;  %v7287_v6 = vcombine.low %v3078_v52, %v3082_v54 }
 0x1a3   :  { %5809 = vmatpush1.bf16.msra.mxu0 %v7079_v37  ;;  %v2946_v59 = vld [vmem:[%s10172_s3 + $0xae0] sm:$0xff] }
 0x1a4   :  { %5810 = vmatprep.subr.bf16.mxu0 %v7072_v0  ;;  %5852 = vmatpush1.bf16.msra.mxu1 %v7207_v21  ;;  %v3070_v1 = vld [vmem:[%s10172_s3 + $0xec0] sm:$0xff]  ;;  %v7152_v4 = vcombine.high %v2942_v24, %v2946_v59  ;;  %v7151_v9 = vcombine.low %v2942_v24, %v2946_v59 }
 0x1a5   :  { %5853 = vmatprep.subr.bf16.mxu1 %v7200_v11  ;;  %v3074_v63 = vld [vmem:[%s10172_s3 + $0xee0] sm:$0xff] }
 0x1a6   :  { %v2934_v42 = vld [vmem:[%s10172_s3 + $0xa80] sm:$0xff]  ;;  %v7280_v0 = vcombine.high %v3070_v1, %v3074_v63  ;;  %v7279_v12 = vcombine.low %v3070_v1, %v3074_v63 }
 0x1a7   :  { %5811 = vmatpush1.bf16.msra.mxu0 %v7071_v13  ;;  %v2938_v37 = vld [vmem:[%s10172_s3 + $0xaa0] sm:$0xff] }
 0x1a8   :  { %5812 = vmatprep.subr.bf16.mxu0 %v7064_v44  ;;  %5854 = vmatpush1.bf16.msra.mxu1 %v7199_v14  ;;  %v3062_v21 = vld [vmem:[%s10172_s3 + $0xe80] sm:$0xff]  ;;  %v7144_v11 = vcombine.high %v2934_v42, %v2938_v37  ;;  %v7143_v16 = vcombine.low %v2934_v42, %v2938_v37 }
 0x1a9   :  { %5855 = vmatprep.subr.bf16.mxu1 %v7192_v32  ;;  %v3066_v7 = vld [vmem:[%s10172_s3 + $0xea0] sm:$0xff] }
 0x1aa   :  { %v2926_v34 = vld [vmem:[%s10172_s3 + $0xa40] sm:$0xff]  ;;  %v7272_v44 = vcombine.high %v3062_v21, %v3066_v7  ;;  %v2350_v32 = vpop.f32.mrf.mxu0  ;;  %v7271_v38 = vcombine.low %v3062_v21, %v3066_v7 }
 0x1ab   :  { %5813 = vmatpush1.bf16.msra.mxu0 %v7063_v19  ;;  %v2930_v13 = vld [vmem:[%s10172_s3 + $0xa60] sm:$0xff]  ;;  %v2393_v43 = vpop.f32.mrf.mxu1 }
 0x1ac   :  { %5814 = vmatprep.subr.bf16.mxu0 %v7184_v23  ;;  %5856 = vmatpush1.bf16.msra.mxu1 %v7191_v26  ;;  %v3054_v14 = vld [vmem:[%s10172_s3 + $0xe40] sm:$0xff]  ;;  %v7136_v17 = vcombine.high %v2926_v34, %v2930_v13  ;;  %v2352_v30 = vpop.f32.mrf.mxu0 }
 0x1ad   :  { %5857 = vmatprep.subr.bf16.mxu1 %v7312_v29  ;;  %v3058_v15 = vld [vmem:[%s10172_s3 + $0xe60] sm:$0xff]  ;;  %v7135_v29 = vcombine.low %v2926_v34, %v2930_v13  ;;  %v2395_v54 = vpop.f32.mrf.mxu1 }
 0x1ae   :  { %v2918_v19 = vld [vmem:[%s10172_s3 + $0xa00] sm:$0xff]  ;;  %v7264_v26 = vcombine.high %v3054_v14, %v3058_v15 }
 0x1af   :  { %5815 = vmatpush2.bf16.msra.mxu0 %v7183_v33  ;;  %v2922_v23 = vld [vmem:[%s10172_s3 + $0xa20] sm:$0xff]  ;;  %v7263_v33 = vcombine.low %v3054_v14, %v3058_v15  ;;  %v2397_v59 = vpop.f32.mrf.mxu1  ;;  %v2647_v14 = vld [vmem:[%s10172_s3 + $0x188] sm:$0xff] }
 0x1b0   :  { %5816 = vmatprep.subr.bf16.mxu0 %v7176_v36  ;;  %5858 = vmatpush2.bf16.msra.mxu1 %v7311_v39  ;;  %v3046_v27 = vld [vmem:[%s10172_s3 + $0xe00] sm:$0xff]  ;;  %v7128_v31 = vcombine.high %v2918_v19, %v2922_v23  ;;  %v388_v36 = vsub.s32 5, %v8242_v60  ;;  %v2655_v39 = vld [vmem:[%s10172_s3 + $0x1c8] sm:$0xff]  ;;  %v7127_v45 = vcombine.low %v2918_v19, %v2922_v23 }
 0x1b1   :  { %5859 = vmatprep.subr.bf16.mxu1 %v7304_v25  ;;  %v3050_v28 = vld [vmem:[%s10172_s3 + $0xe20] sm:$0xff]  ;;  %v384_v25 = vsub.s32 4, %v8242_v60  ;;  %v2399_v42 = vpop.f32.mrf.mxu1  ;;  %v2651_v15 = vld [vmem:[%s10172_s3 + $0x1a8] sm:$0xff] }
 0x1b2   :  { %v7256_v40 = vcombine.high %v3046_v27, %v3050_v28  ;;  %v8941_v48 = vld [vmem:[%s10171_s2] sm:$0xff]  ;;  %v6858_v19 = vcombine.high %v2647_v14, %v2651_v15  ;;  %v2639_v23 = vld [vmem:[%s10172_s3 + $0x148] sm:$0xff] }
 0x1b3   :  { %5817 = vmatpush2.bf16.msra.mxu0 %v7175_v46  ;;  %v2354_v46 = vpop.f32.mrf.mxu0  ;;  %v389_v49 = vrot.slane %v8941_v48, %v388_v36  ;;  %v385_v52 = vrot.slane %v8941_v48, %v384_v25 }
 0x1b4   :  { %5818 = vmatprep.subr.bf16.mxu0 %v7168_v10  ;;  %5860 = vmatpush2.bf16.msra.mxu1 %v7303_v47  ;;  %v6866_v10 = vcombine.high %v2655_v39, %v2659_v62  ;;  %v7255_v47 = vcombine.low %v3046_v27, %v3050_v28  ;;  %v6857_v27 = vcombine.low %v2647_v14, %v2651_v15  ;;  %v2691_v14 = vld [vmem:[%s10172_s3 + $0x2e8] sm:$0xff] }
 0x1b5   :  { %5861 = vmatprep.subr.bf16.mxu1 %v7296_v51  ;;  %v6994_v51 = vcombine.high %v8801_v53, %v8806_v57  ;;  %v2351_v24 = vadd.f32 %v2350_v32, %v385_v52  ;;  %v2879_v53 = vld [vmem:[%s10172_s3 + $0x8c8] sm:$0xff] }
 0x1b6   :  { %v2883_v57 = vld [vmem:[%s10172_s3 + $0x8e8] sm:$0xff] }
 0x1b7   :  { %5819 = vmatpush2.bf16.msra.mxu0 %v7167_v55  ;;  %v2356_v55 = vpop.f32.mrf.mxu0 }
 0x1b8   :  { %5820 = vmatprep.subr.bf16.mxu0 %v7160_v56  ;;  %5862 = vmatpush2.bf16.msra.mxu1 %v7295_v58  ;;  %v2353_v56 = vadd.f32 %v2352_v30, %v389_v49  ;;  %v2355_v58 = vadd.f32 %v2354_v46, %v385_v52  ;;  %v2357_v1 = vadd.f32 %v2356_v55, %v389_v49  ;;  %v2635_v30 = vld [vmem:[%s10172_s3 + $0x128] sm:$0xff] }
 0x1b9   :  { %5863 = vmatprep.subr.bf16.mxu1 %v7288_v61  ;;  %v2619_v46 = vld [vmem:[%s10172_s3 + $0xa8] sm:$0xff] }
 0x1ba   :  { %v2607_v49 = vld [vmem:[%s10172_s3 + $0x48] sm:$0xff] }
 0x1bb   :  { %5821 = vmatpush2.bf16.msra.mxu0 %v7159_v3  ;;  %v2396_v3 = vadd.f32 %v2395_v54, %v2353_v56  ;;  %v2599_v55 = vld [vmem:[%s10172_s3 + $0x8] sm:$0xff] }
 0x1bc   :  { %5822 = vmatprep.subr.bf16.mxu0 %v7152_v4  ;;  %5864 = vmatpush2.bf16.msra.mxu1 %v7287_v6  ;;  %v2398_v4 = vadd.f32 %v2397_v59, %v2355_v58  ;;  %v2394_v6 = vadd.f32 %v2393_v43, %v2351_v24  ;;  %v2603_v56 = vld [vmem:[%s10172_s3 + $0x28] sm:$0xff] }
 0x1bd   :  { %5865 = vmatprep.subr.bf16.mxu1 %v7280_v0  ;;  %v2400_v0 = vadd.f32 %v2399_v42, %v2357_v1  ;;  %v6810_v24 = vcombine.high %v2599_v55, %v2603_v56  ;;  %v2719_v59 = vld [vmem:[%s10172_s3 + $0x3c8] sm:$0xff]  ;;  %v6809_v1 = vcombine.low %v2599_v55, %v2603_v56 }
 0x1bf   :  { %5823 = vmatpush2.bf16.msra.mxu0 %v7151_v9 }
 0x1c0   :  { %5824 = vmatprep.subr.bf16.mxu0 %v7144_v11  ;;  %5866 = vmatpush2.bf16.msra.mxu1 %v7279_v12 }
 0x1c1   :  { %5867 = vmatprep.subr.bf16.mxu1 %v7272_v44 }
 0x1c3   :  { %5825 = vmatpush2.bf16.msra.mxu0 %v7143_v16 }
 0x1c4   :  { %5826 = vmatprep.subr.bf16.mxu0 %v7136_v17  ;;  %5868 = vmatpush2.bf16.msra.mxu1 %v7271_v38  ;;  %v6865_v17 = vcombine.low %v2655_v39, %v2659_v62  ;;  %v2623_v39 = vld [vmem:[%s10172_s3 + $0xc8] sm:$0xff] }
 0x1c5   :  { %5869 = vmatprep.subr.bf16.mxu1 %v7264_v26  ;;  %v2643_v26 = vld [vmem:[%s10172_s3 + $0x168] sm:$0xff] }
 0x1c6   :  { %v6850_v28 = vcombine.high %v2639_v23, %v2643_v26  ;;  %v2627_v62 = vld [vmem:[%s10172_s3 + $0xe8] sm:$0xff] }
 0x1c7   :  { %5827 = vmatpush2.bf16.msra.mxu0 %v7135_v29  ;;  %v2631_v29 = vld [vmem:[%s10172_s3 + $0x108] sm:$0xff]  ;;  %v6834_v43 = vcombine.high %v2623_v39, %v2627_v62 }
 0x1c8   :  { %5828 = vmatprep.subr.bf16.mxu0 %v7128_v31  ;;  %5870 = vmatpush2.bf16.msra.mxu1 %v7263_v33  ;;  %v6849_v31 = vcombine.low %v2639_v23, %v2643_v26  ;;  %v6842_v33 = vcombine.high %v2631_v29, %v2635_v30  ;;  %v2679_v23 = vld [vmem:[%s10172_s3 + $0x288] sm:$0xff] }
 0x1c9   :  { %5871 = vmatprep.subr.bf16.mxu1 %v7256_v40  ;;  %v6841_v40 = vcombine.low %v2631_v29, %v2635_v30  ;;  %v2683_v26 = vld [vmem:[%s10172_s3 + $0x2a8] sm:$0xff] }
 0x1ca   :  { %v6890_v30 = vcombine.high %v2679_v23, %v2683_v26 }
 0x1cb   :  { %5829 = vmatpush2.bf16.msra.mxu0 %v7127_v45  ;;  %v2615_v45 = vld [vmem:[%s10172_s3 + $0x88] sm:$0xff] }
 0x1cc   :  { %5884 = vmatprep.subr.bf16.mxu0 %v6866_v10  ;;  %5872 = vmatpush2.bf16.msra.mxu1 %v7255_v47  ;;  %v6833_v10 = vcombine.low %v2623_v39, %v2627_v62  ;;  %v6826_v47 = vcombine.high %v2615_v45, %v2619_v46  ;;  %v6825_v52 = vcombine.low %v2615_v45, %v2619_v46  ;;  %v2675_v39 = vld [vmem:[%s10172_s3 + $0x268] sm:$0xff] }
 0x1cd   :  { %5927 = vmatprep.subr.bf16.mxu1 %v6994_v51  ;;  %v2611_v51 = vld [vmem:[%s10172_s3 + $0x68] sm:$0xff] }
 0x1ce   :  { %v2436_v61 = vpop.f32.mrf.mxu0  ;;  %v6818_v54 = vcombine.high %v2607_v49, %v2611_v51  ;;  %v6817_v58 = vcombine.low %v2607_v49, %v2611_v51  ;;  %v2663_v49 = vld [vmem:[%s10172_s3 + $0x208] sm:$0xff] }
 0x1cf   :  { %v2437_v9 = vadd.f32 %v2436_v61, %v2394_v6  ;;  %v2723_v61 = vld [vmem:[%s10172_s3 + $0x3e8] sm:$0xff] }
 0x1d0   :  { %v2438_v63 = vpop.f32.mrf.mxu0  ;;  %v6929_v6 = vcombine.low %v2719_v59, %v2723_v61  ;;  %v2667_v51 = vld [vmem:[%s10172_s3 + $0x228] sm:$0xff] }
 0x1d1   :  { %v2439_v21 = vadd.f32 %v2438_v63, %v2396_v3  ;;  %v2578_v16 = vmax.f32 %v2437_v9, 0.0  ;;  %v6930_v63 = vcombine.high %v2719_v59, %v2723_v61  ;;  %v2711_v3 = vld [vmem:[%s10172_s3 + $0x388] sm:$0xff]  ;;  %v6874_v59 = vcombine.high %v2663_v49, %v2667_v51 }
 0x1d2   :  { %v2440_v37 = vpop.f32.mrf.mxu0  ;;  %v2695_v9 = vld [vmem:[%s10172_s3 + $0x308] sm:$0xff] }
 0x1d3   :  { %v2441_v7 = vadd.f32 %v2440_v37, %v2398_v4  ;;  %v2579_v13 = vmax.f32 %v2439_v21, 0.0  ;;  %v2715_v4 = vld [vmem:[%s10172_s3 + $0x3a8] sm:$0xff] }
 0x1d4   :  { %v2442_v11 = vpop.f32.mrf.mxu0  ;;  %v6922_v42 = vcombine.high %v2711_v3, %v2715_v4  ;;  %v2703_v37 = vld [vmem:[%s10172_s3 + $0x348] sm:$0xff]  ;;  %v6921_v21 = vcombine.low %v2711_v3, %v2715_v4 }
 0x1d5   :  { %v2443_v12 = vadd.f32 %v2442_v11, %v2400_v0  ;;  %v2586_v34 = vmax.f32 %v2441_v7, 0.0  ;;  %v2707_v0 = vld [vmem:[%s10172_s3 + $0x368] sm:$0xff] }
 0x1d6   :  { %v6914_v7 = vcombine.high %v2703_v37, %v2707_v0  ;;  %v2699_v11 = vld [vmem:[%s10172_s3 + $0x328] sm:$0xff] }
 0x1d7   :  { %v2587_v44 = vmax.f32 %v2443_v12, 0.0  ;;  %v8959_v38 = vpack.c.bf16 %v2586_v34, %v2578_v16  ;;  %v6913_v34 = vcombine.low %v2703_v37, %v2707_v0  ;;  %v6905_v16 = vcombine.low %v2695_v9, %v2699_v11  ;;  %v2911_v4 = vld [vmem:[%s10172_s3 + $0x9c8] sm:$0xff] }
 0x1d9   :  { %v8957_v32 = vpack.c.bf16 %v2587_v44, %v2579_v13  ;;  %v6906_v13 = vcombine.high %v2695_v9, %v2699_v11  ;;  %v2687_v44 = vld [vmem:[%s10172_s3 + $0x2c8] sm:$0xff] }
 0x1da   :  { %v6897_v29 = vcombine.low %v2687_v44, %v2691_v14 }
 0x1db   :  { %5830 = vmatprep.mubr.bf16.mxu0 %v8957_v32 }
 0x1dc   :  { %5831 = vmatmul.mubr.bf16.vlgmr.msra.gmra.mxu0 %v8959_v38 }
 0x1dd   :  { %5885 = vmatpush1.bf16.msra.mxu0 %v6865_v17  ;;  %5916 = vmatprep.mubr.bf16.mxu0 %v8526_v35  ;;  %v6898_v17 = vcombine.high %v2687_v44, %v2691_v14  ;;  %v2907_v44 = vld [vmem:[%s10172_s3 + $0x9a8] sm:$0xff] }
 0x1de   :  { %5886 = vmatprep.subr.bf16.mxu0 %v6858_v19  ;;  %v396_v19 = vsub.s32 7, %v8242_v60 }
 0x1e1   :  { %5887 = vmatpush1.bf16.msra.mxu0 %v6857_v27  ;;  %v392_v27 = vsub.s32 6, %v8242_v60 }
 0x1e2   :  { %5888 = vmatprep.subr.bf16.mxu0 %v6850_v28 }
 0x1e3   :  { %v393_v62 = vrot.slane %v8941_v48, %v392_v27 }
 0x1e5   :  { %5889 = vmatpush1.bf16.msra.mxu0 %v6849_v31  ;;  %v397_v31 = vrot.slane %v8941_v48, %v396_v19 }
 0x1e6   :  { %5890 = vmatprep.subr.bf16.mxu0 %v6842_v33  ;;  %v2671_v33 = vld [vmem:[%s10172_s3 + $0x248] sm:$0xff] }
 0x1e7   :  { %v6882_v46 = vcombine.high %v2671_v33, %v2675_v39 }
 0x1e9   :  { %5891 = vmatpush1.bf16.msra.mxu0 %v6841_v40 }
 0x1ea   :  { %5892 = vmatprep.subr.bf16.mxu0 %v6834_v43  ;;  %v6889_v43 = vcombine.low %v2679_v23, %v2683_v26  ;;  %v2775_v26 = vld [vmem:[%s10172_s3 + $0x588] sm:$0xff] }
 0x1eb   :  { %v2479_v12 = vpop.f32.mrf.mxu1 }
 0x1ed   :  { %5893 = vmatpush1.bf16.msra.mxu0 %v6833_v10  ;;  %v2481_v15 = vpop.f32.mrf.mxu1 }
 0x1ee   :  { %5894 = vmatprep.subr.bf16.mxu0 %v6826_v47  ;;  %v2482_v10 = vadd.f32 %v2481_v15, %v397_v31 }
 0x1ef   :  { %v2483_v28 = vpop.f32.mrf.mxu1 }
 0x1f0   :  { %v2484_v55 = vadd.f32 %v2483_v28, %v393_v62  ;;  %v2779_v28 = vld [vmem:[%s10172_s3 + $0x5a8] sm:$0xff] }
 0x1f1   :  { %5895 = vmatpush1.bf16.msra.mxu0 %v6825_v52  ;;  %v2485_v40 = vpop.f32.mrf.mxu1 }
 0x1f2   :  { %5896 = vmatprep.subr.bf16.mxu0 %v6818_v54  ;;  %v2480_v54 = vadd.f32 %v2479_v12, %v393_v62  ;;  %v2486_v61 = vadd.f32 %v2485_v40, %v397_v31  ;;  %v2895_v31 = vld [vmem:[%s10172_s3 + $0x948] sm:$0xff]  ;;  %v6986_v40 = vcombine.high %v2775_v26, %v2779_v28 }
 0x1f5   :  { %5897 = vmatpush1.bf16.msra.mxu0 %v6817_v58  ;;  %v6881_v58 = vcombine.low %v2671_v33, %v2675_v39  ;;  %v2899_v33 = vld [vmem:[%s10172_s3 + $0x968] sm:$0xff] }
 0x1f6   :  { %5898 = vmatprep.subr.bf16.mxu0 %v6810_v24 }
 0x1f9   :  { %5899 = vmatpush1.bf16.msra.mxu0 %v6809_v1 }
 0x1fa   :  { %5900 = vmatprep.subr.bf16.mxu0 %v6930_v63 }
 0x1fd   :  { %5901 = vmatpush2.bf16.msra.mxu0 %v6929_v6  ;;  %v2915_v6 = vld [vmem:[%s10172_s3 + $0x9e8] sm:$0xff] }
 0x1fe   :  { %5902 = vmatprep.subr.bf16.mxu0 %v6922_v42  ;;  %v7122_v11 = vcombine.high %v2911_v4, %v2915_v6 }
 0x201   :  { %5903 = vmatpush2.bf16.msra.mxu0 %v6921_v21 }
 0x202   :  { %5904 = vmatprep.subr.bf16.mxu0 %v6914_v7  ;;  %v6873_v7 = vcombine.low %v2663_v49, %v2667_v51  ;;  %v6985_v49 = vcombine.low %v2775_v26, %v2779_v28  ;;  %v7105_v51 = vcombine.low %v2895_v31, %v2899_v33  ;;  %v2727_v28 = vld [vmem:[%s10172_s3 + $0x408] sm:$0xff] }
 0x205   :  { %5905 = vmatpush2.bf16.msra.mxu0 %v6913_v34 }
 0x206   :  { %5906 = vmatprep.subr.bf16.mxu0 %v6906_v13  ;;  %v2903_v13 = vld [vmem:[%s10172_s3 + $0x988] sm:$0xff] }
 0x207   :  { %v7114_v23 = vcombine.high %v2903_v13, %v2907_v44  ;;  %v7113_v62 = vcombine.low %v2903_v13, %v2907_v44  ;;  %v2735_v13 = vld [vmem:[%s10172_s3 + $0x448] sm:$0xff] }
 0x208   :  { %v2739_v44 = vld [vmem:[%s10172_s3 + $0x468] sm:$0xff] }
 0x209   :  { %5907 = vmatpush2.bf16.msra.mxu0 %v6905_v16 }
 0x20a   :  { %5908 = vmatprep.subr.bf16.mxu0 %v6898_v17  ;;  %v7121_v17 = vcombine.low %v2911_v4, %v2915_v6  ;;  %v7089_v4 = vcombine.low %v2879_v53, %v2883_v57 }
 0x20d   :  { %5909 = vmatpush2.bf16.msra.mxu0 %v6897_v29 }
 0x20e   :  { %v2522_v45 = vpop.f32.mrf.mxu0  ;;  %5910 = vmatprep.subr.bf16.mxu0 %v6890_v30 }
 0x20f   :  { %v2565_v47 = vpop.f32.mrf.mxu1  ;;  %v2523_v1 = vadd.f32 %v2522_v45, %v2480_v54  ;;  %v2767_v45 = vld [vmem:[%s10172_s3 + $0x548] sm:$0xff] }
 0x210   :  { %v2524_v52 = vpop.f32.mrf.mxu0 }
 0x211   :  { %v2525_v48 = vadd.f32 %v2524_v52, %v2482_v10  ;;  %v2567_v56 = vpop.f32.mrf.mxu1  ;;  %5911 = vmatpush2.bf16.msra.mxu0 %v6889_v43  ;;  %v2566_v12 = vadd.f32 %v2565_v47, %v2523_v1  ;;  %v7106_v43 = vcombine.high %v2895_v31, %v2899_v33  ;;  %v2887_v10 = vld [vmem:[%s10172_s3 + $0x908] sm:$0xff] }
 0x212   :  { %v2526_v24 = vpop.f32.mrf.mxu0  ;;  %5912 = vmatprep.subr.bf16.mxu0 %v6882_v46  ;;  %v2771_v46 = vld [vmem:[%s10172_s3 + $0x568] sm:$0xff] }
 0x213   :  { %v2527_v63 = vadd.f32 %v2526_v24, %v2484_v55  ;;  %v2569_v3 = vpop.f32.mrf.mxu1  ;;  %v2568_v37 = vadd.f32 %v2567_v56, %v2525_v48  ;;  %v2580_v29 = vmax.f32 %v2566_v12, 0.0  ;;  %v2891_v47 = vld [vmem:[%s10172_s3 + $0x928] sm:$0xff]  ;;  %v6978_v52 = vcombine.high %v2767_v45, %v2771_v46 }
 0x214   :  { %v2528_v42 = vpop.f32.mrf.mxu0  ;;  %v7098_v54 = vcombine.high %v2887_v10, %v2891_v47  ;;  %v2759_v55 = vld [vmem:[%s10172_s3 + $0x508] sm:$0xff]  ;;  %v7097_v56 = vcombine.low %v2887_v10, %v2891_v47  ;;  %v7090_v24 = vcombine.high %v2879_v53, %v2883_v57 }
 0x215   :  { %v2570_v0 = vadd.f32 %v2569_v3, %v2527_v63  ;;  %v2529_v21 = vadd.f32 %v2528_v42, %v2486_v61  ;;  %5913 = vmatpush2.bf16.msra.mxu0 %v6881_v58  ;;  %v2571_v9 = vpop.f32.mrf.mxu1  ;;  %v2581_v14 = vmax.f32 %v2568_v37, 0.0  ;;  %v2763_v48 = vld [vmem:[%s10172_s3 + $0x528] sm:$0xff] }
 0x216   :  { %5914 = vmatprep.subr.bf16.mxu0 %v6874_v59  ;;  %v6970_v58 = vcombine.high %v2759_v55, %v2763_v48  ;;  %v2751_v59 = vld [vmem:[%s10172_s3 + $0x4c8] sm:$0xff]  ;;  %v6969_v3 = vcombine.low %v2759_v55, %v2763_v48 }
 0x217   :  { %v2572_v34 = vadd.f32 %v2571_v9, %v2529_v21  ;;  %v2588_v15 = vmax.f32 %v2570_v0, 0.0  ;;  %v2755_v61 = vld [vmem:[%s10172_s3 + $0x4e8] sm:$0xff] }
 0x218   :  { %v2871_v1 = vld [vmem:[%s10172_s3 + $0x888] sm:$0xff]  ;;  %v6962_v6 = vcombine.high %v2751_v59, %v2755_v61  ;;  %v6961_v9 = vcombine.low %v2751_v59, %v2755_v61 }
 0x219   :  { %v2589_v16 = vmax.f32 %v2572_v34, 0.0  ;;  %5915 = vmatpush2.bf16.msra.mxu0 %v6873_v7  ;;  %v9083_v39 = vpack.c.bf16 %v2588_v15, %v2580_v29  ;;  %v2875_v63 = vld [vmem:[%s10172_s3 + $0x8a8] sm:$0xff] }
 0x21a   :  { %5970 = vmatprep.subr.bf16.mxu0 %v7122_v11  ;;  %v7082_v42 = vcombine.high %v2871_v1, %v2875_v63  ;;  %v2743_v37 = vld [vmem:[%s10172_s3 + $0x488] sm:$0xff]  ;;  %v7081_v11 = vcombine.low %v2871_v1, %v2875_v63 }
 0x21b   :  { %v9074_v30 = vpack.c.bf16 %v2589_v16, %v2581_v14  ;;  %v2747_v0 = vld [vmem:[%s10172_s3 + $0x4a8] sm:$0xff] }
 0x21c   :  { %5917 = vmatmul.mubr.bf16.vlgmr.msra.gmra.mxu0 %v8439_v20  ;;  %v2863_v21 = vld [vmem:[%s10172_s3 + $0x848] sm:$0xff]  ;;  %v6954_v12 = vcombine.high %v2743_v37, %v2747_v0  ;;  %v6953_v16 = vcombine.low %v2743_v37, %v2747_v0 }
 0x21d   :  { %5971 = vmatpush1.bf16.msra.mxu0 %v7121_v17  ;;  %6002 = vmatprep.mubr.bf16.mxu0 %v8957_v32  ;;  %v2867_v7 = vld [vmem:[%s10172_s3 + $0x868] sm:$0xff] }
 0x21e   :  { %5873 = vmatprep.mubr.bf16.mxu1 %v9074_v30  ;;  %5972 = vmatprep.subr.bf16.mxu0 %v7114_v23  ;;  %v7074_v34 = vcombine.high %v2863_v21, %v2867_v7  ;;  %v2855_v14 = vld [vmem:[%s10172_s3 + $0x808] sm:$0xff]  ;;  %v7073_v17 = vcombine.low %v2863_v21, %v2867_v7  ;;  %v6946_v23 = vcombine.high %v2735_v13, %v2739_v44 }
 0x21f   :  { %5874 = vmatmul.mubr.bf16.vlgmr.msra.gmra.mxu1 %v9083_v39  ;;  %v2859_v15 = vld [vmem:[%s10172_s3 + $0x828] sm:$0xff] }
 0x220   :  { %5928 = vmatpush1.bf16.msra.mxu1 %v6993_v5  ;;  %5959 = vmatprep.mubr.bf16.mxu1 %v8674_v22  ;;  %v6977_v5 = vcombine.low %v2767_v45, %v2771_v46  ;;  %v7066_v26 = vcombine.high %v2855_v14, %v2859_v15  ;;  %v2731_v29 = vld [vmem:[%s10172_s3 + $0x428] sm:$0xff] }
 0x221   :  { %5973 = vmatpush1.bf16.msra.mxu0 %v7113_v62  ;;  %5929 = vmatprep.subr.bf16.mxu1 %v6986_v40  ;;  %v2975_v31 = vld [vmem:[%s10172_s3 + $0xbc8] sm:$0xff]  ;;  %v6945_v62 = vcombine.low %v2735_v13, %v2739_v44  ;;  %v7065_v40 = vcombine.low %v2855_v14, %v2859_v15 }
 0x222   :  { %5974 = vmatprep.subr.bf16.mxu0 %v7106_v43  ;;  %v2979_v33 = vld [vmem:[%s10172_s3 + $0xbe8] sm:$0xff]  ;;  %v6938_v43 = vcombine.high %v2727_v28, %v2731_v29 }
 0x223   :  { %v7186_v45 = vcombine.high %v2975_v31, %v2979_v33  ;;  %v2847_v46 = vld [vmem:[%s10172_s3 + $0x7c8] sm:$0xff] }
 0x224   :  { %5930 = vmatpush1.bf16.msra.mxu1 %v6985_v49  ;;  %v2851_v10 = vld [vmem:[%s10172_s3 + $0x7e8] sm:$0xff] }
 0x225   :  { %5975 = vmatpush1.bf16.msra.mxu0 %v7105_v51  ;;  %5931 = vmatprep.subr.bf16.mxu1 %v6978_v52  ;;  %v2967_v47 = vld [vmem:[%s10172_s3 + $0xb88] sm:$0xff]  ;;  %v6937_v51 = vcombine.low %v2727_v28, %v2731_v29  ;;  %v7185_v52 = vcombine.low %v2975_v31, %v2979_v33 }
 0x226   :  { %5976 = vmatprep.subr.bf16.mxu0 %v7098_v54  ;;  %v2971_v49 = vld [vmem:[%s10172_s3 + $0xba8] sm:$0xff]  ;;  %v7058_v54 = vcombine.high %v2847_v46, %v2851_v10 }
 0x227   :  { %v7178_v55 = vcombine.high %v2967_v47, %v2971_v49  ;;  %v2839_v48 = vld [vmem:[%s10172_s3 + $0x788] sm:$0xff] }
 0x228   :  { %5932 = vmatpush1.bf16.msra.mxu1 %v6977_v5  ;;  %v2843_v53 = vld [vmem:[%s10172_s3 + $0x7a8] sm:$0xff] }
 0x229   :  { %5977 = vmatpush1.bf16.msra.mxu0 %v7097_v56  ;;  %5933 = vmatprep.subr.bf16.mxu1 %v6970_v58  ;;  %v2959_v57 = vld [vmem:[%s10172_s3 + $0xb48] sm:$0xff]  ;;  %v7057_v56 = vcombine.low %v2847_v46, %v2851_v10  ;;  %v7177_v58 = vcombine.low %v2967_v47, %v2971_v49 }
 0x22a   :  { %5978 = vmatprep.subr.bf16.mxu0 %v7090_v24  ;;  %v2963_v5 = vld [vmem:[%s10172_s3 + $0xb68] sm:$0xff]  ;;  %v7050_v24 = vcombine.high %v2839_v48, %v2843_v53 }
 0x22b   :  { %v7170_v59 = vcombine.high %v2959_v57, %v2963_v5  ;;  %v2831_v61 = vld [vmem:[%s10172_s3 + $0x748] sm:$0xff] }
 0x22c   :  { %5934 = vmatpush1.bf16.msra.mxu1 %v6969_v3  ;;  %v2835_v1 = vld [vmem:[%s10172_s3 + $0x768] sm:$0xff] }
 0x22d   :  { %5979 = vmatpush1.bf16.msra.mxu0 %v7089_v4  ;;  %5935 = vmatprep.subr.bf16.mxu1 %v6962_v6  ;;  %v2951_v63 = vld [vmem:[%s10172_s3 + $0xb08] sm:$0xff]  ;;  %v7049_v4 = vcombine.low %v2839_v48, %v2843_v53  ;;  %v7169_v6 = vcombine.low %v2959_v57, %v2963_v5  ;;  %v2656_v5 = vld [vmem:[%s10172_s3 + $0x1d0] sm:$0xff] }
 0x22e   :  { %5980 = vmatprep.subr.bf16.mxu0 %v7082_v42  ;;  %v2955_v3 = vld [vmem:[%s10172_s3 + $0xb28] sm:$0xff]  ;;  %v7042_v42 = vcombine.high %v2831_v61, %v2835_v1 }
 0x22f   :  { %v7162_v37 = vcombine.high %v2951_v63, %v2955_v3  ;;  %v2823_v0 = vld [vmem:[%s10172_s3 + $0x708] sm:$0xff] }
 0x230   :  { %5936 = vmatpush1.bf16.msra.mxu1 %v6961_v9  ;;  %v2827_v21 = vld [vmem:[%s10172_s3 + $0x728] sm:$0xff] }
 0x231   :  { %5981 = vmatpush1.bf16.msra.mxu0 %v7081_v11  ;;  %5937 = vmatprep.subr.bf16.mxu1 %v6954_v12  ;;  %v2943_v7 = vld [vmem:[%s10172_s3 + $0xac8] sm:$0xff]  ;;  %v7041_v11 = vcombine.low %v2831_v61, %v2835_v1  ;;  %v7161_v12 = vcombine.low %v2951_v63, %v2955_v3  ;;  %v2648_v3 = vld [vmem:[%s10172_s3 + $0x190] sm:$0xff] }
 0x232   :  { %5982 = vmatprep.subr.bf16.mxu0 %v7074_v34  ;;  %v2947_v9 = vld [vmem:[%s10172_s3 + $0xae8] sm:$0xff]  ;;  %v7034_v34 = vcombine.high %v2823_v0, %v2827_v21 }
 0x233   :  { %v7154_v13 = vcombine.high %v2943_v7, %v2947_v9  ;;  %v2815_v44 = vld [vmem:[%s10172_s3 + $0x6c8] sm:$0xff] }
 0x234   :  { %5938 = vmatpush1.bf16.msra.mxu1 %v6953_v16  ;;  %v2819_v14 = vld [vmem:[%s10172_s3 + $0x6e8] sm:$0xff] }
 0x235   :  { %5983 = vmatpush1.bf16.msra.mxu0 %v7073_v17  ;;  %5939 = vmatprep.subr.bf16.mxu1 %v6946_v23  ;;  %v2935_v15 = vld [vmem:[%s10172_s3 + $0xa88] sm:$0xff]  ;;  %v7033_v17 = vcombine.low %v2823_v0, %v2827_v21  ;;  %v7153_v23 = vcombine.low %v2943_v7, %v2947_v9  ;;  %v2640_v9 = vld [vmem:[%s10172_s3 + $0x150] sm:$0xff] }
 0x236   :  { %5984 = vmatprep.subr.bf16.mxu0 %v7066_v26  ;;  %v2939_v16 = vld [vmem:[%s10172_s3 + $0xaa8] sm:$0xff]  ;;  %v7026_v26 = vcombine.high %v2815_v44, %v2819_v14 }
 0x237   :  { %v7146_v28 = vcombine.high %v2935_v15, %v2939_v16  ;;  %v2807_v29 = vld [vmem:[%s10172_s3 + $0x688] sm:$0xff] }
 0x238   :  { %5940 = vmatpush1.bf16.msra.mxu1 %v6945_v62  ;;  %v2811_v31 = vld [vmem:[%s10172_s3 + $0x6a8] sm:$0xff] }
 0x239   :  { %5985 = vmatpush1.bf16.msra.mxu0 %v7065_v40  ;;  %5941 = vmatprep.subr.bf16.mxu1 %v6938_v43  ;;  %v2927_v33 = vld [vmem:[%s10172_s3 + $0xa48] sm:$0xff]  ;;  %v7025_v40 = vcombine.low %v2815_v44, %v2819_v14  ;;  %v7145_v43 = vcombine.low %v2935_v15, %v2939_v16  ;;  %v2632_v16 = vld [vmem:[%s10172_s3 + $0x110] sm:$0xff] }
 0x23a   :  { %5986 = vmatprep.subr.bf16.mxu0 %v7186_v45  ;;  %v2931_v62 = vld [vmem:[%s10172_s3 + $0xa68] sm:$0xff]  ;;  %v7018_v45 = vcombine.high %v2807_v29, %v2811_v31 }
 0x23b   :  { %v7138_v46 = vcombine.high %v2927_v33, %v2931_v62  ;;  %v2799_v10 = vld [vmem:[%s10172_s3 + $0x648] sm:$0xff] }
 0x23c   :  { %5942 = vmatpush1.bf16.msra.mxu1 %v6937_v51  ;;  %v2803_v47 = vld [vmem:[%s10172_s3 + $0x668] sm:$0xff] }
 0x23d   :  { %5987 = vmatpush2.bf16.msra.mxu0 %v7185_v52  ;;  %5943 = vmatprep.subr.bf16.mxu1 %v7058_v54  ;;  %v2919_v49 = vld [vmem:[%s10172_s3 + $0xa08] sm:$0xff]  ;;  %v7017_v52 = vcombine.low %v2807_v29, %v2811_v31  ;;  %v7137_v54 = vcombine.low %v2927_v33, %v2931_v62  ;;  %v2624_v62 = vld [vmem:[%s10172_s3 + $0xd0] sm:$0xff] }
 0x23e   :  { %5988 = vmatprep.subr.bf16.mxu0 %v7178_v55  ;;  %v2923_v51 = vld [vmem:[%s10172_s3 + $0xa28] sm:$0xff]  ;;  %v7010_v55 = vcombine.high %v2799_v10, %v2803_v47 }
 0x23f   :  { %v7130_v48 = vcombine.high %v2919_v49, %v2923_v51  ;;  %v2791_v53 = vld [vmem:[%s10172_s3 + $0x608] sm:$0xff] }
 0x240   :  { %5944 = vmatpush2.bf16.msra.mxu1 %v7057_v56  ;;  %v2795_v57 = vld [vmem:[%s10172_s3 + $0x628] sm:$0xff]  ;;  %v2660_v56 = vld [vmem:[%s10172_s3 + $0x1f0] sm:$0xff] }
 0x241   :  { %5989 = vmatpush2.bf16.msra.mxu0 %v7177_v58  ;;  %5945 = vmatprep.subr.bf16.mxu1 %v7050_v24  ;;  %v7009_v58 = vcombine.low %v2799_v10, %v2803_v47  ;;  %v7129_v24 = vcombine.low %v2919_v49, %v2923_v51  ;;  %v6868_v61 = vcombine.high %v2656_v5, %v2660_v56  ;;  %v3039_v1 = vld [vmem:[%s10172_s3 + $0xdc8] sm:$0xff]  ;;  %v2616_v51 = vld [vmem:[%s10172_s3 + $0x90] sm:$0xff] }
 0x242   :  { %5990 = vmatprep.subr.bf16.mxu0 %v7170_v59  ;;  %v7002_v59 = vcombine.high %v2791_v53, %v2795_v57  ;;  %v3043_v63 = vld [vmem:[%s10172_s3 + $0xde8] sm:$0xff] }
 0x243   :  { %v3031_v21 = vld [vmem:[%s10172_s3 + $0xd88] sm:$0xff] }
 0x244   :  { %5946 = vmatpush2.bf16.msra.mxu1 %v7049_v4  ;;  %v2652_v4 = vld [vmem:[%s10172_s3 + $0x1b0] sm:$0xff]  ;;  %v3035_v7 = vld [vmem:[%s10172_s3 + $0xda8] sm:$0xff] }
 0x245   :  { %5991 = vmatpush2.bf16.msra.mxu0 %v7169_v6  ;;  %5947 = vmatprep.subr.bf16.mxu1 %v7042_v42  ;;  %v7001_v6 = vcombine.low %v2791_v53, %v2795_v57  ;;  %v6867_v42 = vcombine.low %v2656_v5, %v2660_v56  ;;  %v6860_v0 = vcombine.high %v2648_v3, %v2652_v4  ;;  %v3023_v14 = vld [vmem:[%s10172_s3 + $0xd48] sm:$0xff]  ;;  %v2608_v56 = vld [vmem:[%s10172_s3 + $0x50] sm:$0xff] }
 0x246   :  { %5992 = vmatprep.subr.bf16.mxu0 %v7162_v37  ;;  %v7250_v37 = vcombine.high %v3039_v1, %v3043_v63  ;;  %v3027_v15 = vld [vmem:[%s10172_s3 + $0xd68] sm:$0xff] }
 0x247   :  { %v3015_v31 = vld [vmem:[%s10172_s3 + $0xd08] sm:$0xff] }
 0x248   :  { %5948 = vmatpush2.bf16.msra.mxu1 %v7041_v11  ;;  %v2644_v11 = vld [vmem:[%s10172_s3 + $0x170] sm:$0xff]  ;;  %v3019_v33 = vld [vmem:[%s10172_s3 + $0xd28] sm:$0xff] }
 0x249   :  { %5993 = vmatpush2.bf16.msra.mxu0 %v7161_v12  ;;  %5949 = vmatprep.subr.bf16.mxu1 %v7034_v34  ;;  %v7249_v12 = vcombine.low %v3039_v1, %v3043_v63  ;;  %v6859_v34 = vcombine.low %v2648_v3, %v2652_v4  ;;  %v6852_v44 = vcombine.high %v2640_v9, %v2644_v11  ;;  %v3007_v47 = vld [vmem:[%s10172_s3 + $0xcc8] sm:$0xff]  ;;  %v2600_v4 = vld [vmem:[%s10172_s3 + $0x10] sm:$0xff] }
 0x24a   :  { %5994 = vmatprep.subr.bf16.mxu0 %v7154_v13  ;;  %v7242_v13 = vcombine.high %v3031_v21, %v3035_v7  ;;  %v3011_v49 = vld [vmem:[%s10172_s3 + $0xce8] sm:$0xff] }
 0x24b   :  { %v2999_v57 = vld [vmem:[%s10172_s3 + $0xc88] sm:$0xff] }
 0x24c   :  { %5950 = vmatpush2.bf16.msra.mxu1 %v7033_v17  ;;  %v2636_v17 = vld [vmem:[%s10172_s3 + $0x130] sm:$0xff]  ;;  %v3003_v5 = vld [vmem:[%s10172_s3 + $0xca8] sm:$0xff] }
 0x24d   :  { %5995 = vmatpush2.bf16.msra.mxu0 %v7153_v23  ;;  %5951 = vmatprep.subr.bf16.mxu1 %v7026_v26  ;;  %v7241_v23 = vcombine.low %v3031_v21, %v3035_v7  ;;  %v6851_v26 = vcombine.low %v2640_v9, %v2644_v11  ;;  %v6844_v29 = vcombine.high %v2632_v16, %v2636_v17  ;;  %v2991_v63 = vld [vmem:[%s10172_s3 + $0xc48] sm:$0xff]  ;;  %v2720_v11 = vld [vmem:[%s10172_s3 + $0x3d0] sm:$0xff] }
 0x24e   :  { %5996 = vmatprep.subr.bf16.mxu0 %v7146_v28  ;;  %v7234_v28 = vcombine.high %v3023_v14, %v3027_v15  ;;  %v2995_v3 = vld [vmem:[%s10172_s3 + $0xc68] sm:$0xff] }
 0x24f   :  { %v2983_v7 = vld [vmem:[%s10172_s3 + $0xc08] sm:$0xff] }
 0x250   :  { %5952 = vmatpush2.bf16.msra.mxu1 %v7025_v40  ;;  %v2628_v40 = vld [vmem:[%s10172_s3 + $0xf0] sm:$0xff]  ;;  %v2987_v9 = vld [vmem:[%s10172_s3 + $0xc28] sm:$0xff] }
 0x251   :  { %5997 = vmatpush2.bf16.msra.mxu0 %v7145_v43  ;;  %5953 = vmatprep.subr.bf16.mxu1 %v7018_v45  ;;  %v7233_v43 = vcombine.low %v3023_v14, %v3027_v15  ;;  %v6843_v45 = vcombine.low %v2632_v16, %v2636_v17  ;;  %v6836_v10 = vcombine.high %v2624_v62, %v2628_v40  ;;  %v3103_v15 = vld [vmem:[%s10172_s3 + $0xfc8] sm:$0xff]  ;;  %v2712_v17 = vld [vmem:[%s10172_s3 + $0x390] sm:$0xff] }
 0x252   :  { %5998 = vmatprep.subr.bf16.mxu0 %v7138_v46  ;;  %v7226_v46 = vcombine.high %v3015_v31, %v3019_v33  ;;  %v3107_v16 = vld [vmem:[%s10172_s3 + $0xfe8] sm:$0xff] }
 0x254   :  { %5954 = vmatpush2.bf16.msra.mxu1 %v7017_v52  ;;  %v2620_v52 = vld [vmem:[%s10172_s3 + $0xb0] sm:$0xff] }
 0x255   :  { %5999 = vmatpush2.bf16.msra.mxu0 %v7137_v54  ;;  %5955 = vmatprep.subr.bf16.mxu1 %v7010_v55  ;;  %v7225_v54 = vcombine.low %v3015_v31, %v3019_v33  ;;  %v6835_v55 = vcombine.low %v2624_v62, %v2628_v40  ;;  %v6828_v53 = vcombine.high %v2616_v51, %v2620_v52  ;;  %v3095_v33 = vld [vmem:[%s10172_s3 + $0xf88] sm:$0xff]  ;;  %v2704_v40 = vld [vmem:[%s10172_s3 + $0x350] sm:$0xff] }
 0x256   :  { %6000 = vmatprep.subr.bf16.mxu0 %v7130_v48  ;;  %v7218_v48 = vcombine.high %v3007_v47, %v3011_v49  ;;  %v3099_v62 = vld [vmem:[%s10172_s3 + $0xfa8] sm:$0xff] }
 0x258   :  { %5956 = vmatpush2.bf16.msra.mxu1 %v7009_v58  ;;  %v2612_v58 = vld [vmem:[%s10172_s3 + $0x70] sm:$0xff] }
 0x259   :  { %6001 = vmatpush2.bf16.msra.mxu0 %v7129_v24  ;;  %5957 = vmatprep.subr.bf16.mxu1 %v7002_v59  ;;  %v7217_v24 = vcombine.low %v3007_v47, %v3011_v49  ;;  %v6827_v59 = vcombine.low %v2616_v51, %v2620_v52  ;;  %v6820_v1 = vcombine.high %v2608_v56, %v2612_v58  ;;  %v3087_v49 = vld [vmem:[%s10172_s3 + $0xf48] sm:$0xff]  ;;  %v2696_v52 = vld [vmem:[%s10172_s3 + $0x310] sm:$0xff] }
 0x25a   :  { %6056 = vmatprep.subr.bf16.mxu0 %v6868_v61  ;;  %v7210_v61 = vcombine.high %v2999_v57, %v3003_v5  ;;  %v3091_v51 = vld [vmem:[%s10172_s3 + $0xf68] sm:$0xff] }
 0x25c   :  { %5958 = vmatpush2.bf16.msra.mxu1 %v7001_v6  ;;  %6003 = vmatmul.mubr.bf16.vlgmr.msra.gmra.mxu0 %v8959_v38  ;;  %v2604_v6 = vld [vmem:[%s10172_s3 + $0x30] sm:$0xff] }
 0x25d   :  { %6057 = vmatpush1.bf16.msra.mxu0 %v6867_v42  ;;  %6088 = vmatprep.mubr.bf16.mxu0 %v8526_v35  ;;  %v7209_v42 = vcombine.low %v2999_v57, %v3003_v5  ;;  %v6812_v21 = vcombine.high %v2600_v4, %v2604_v6  ;;  %v3079_v5 = vld [vmem:[%s10172_s3 + $0xf08] sm:$0xff] }
 0x25e   :  { %6013 = vmatprep.subr.bf16.mxu1 %v7250_v37  ;;  %6058 = vmatprep.subr.bf16.mxu0 %v6860_v0  ;;  %v6819_v37 = vcombine.low %v2608_v56, %v2612_v58  ;;  %v7202_v0 = vcombine.high %v2991_v63, %v2995_v3  ;;  %v3083_v56 = vld [vmem:[%s10172_s3 + $0xf28] sm:$0xff]  ;;  %v2688_v58 = vld [vmem:[%s10172_s3 + $0x2d0] sm:$0xff] }
 0x25f   :  { %5960 = vmatmul.mubr.bf16.vlgmr.msra.gmra.mxu1 %v8746_v18 }
 0x260   :  { %6014 = vmatpush1.bf16.msra.mxu1 %v7249_v12  ;;  %6045 = vmatprep.mubr.bf16.mxu1 %v9074_v30  ;;  %v2724_v12 = vld [vmem:[%s10172_s3 + $0x3f0] sm:$0xff] }
 0x261   :  { %6059 = vmatpush1.bf16.msra.mxu0 %v6859_v34  ;;  %6015 = vmatprep.subr.bf16.mxu1 %v7242_v13  ;;  %v7201_v34 = vcombine.low %v2991_v63, %v2995_v3  ;;  %v6811_v13 = vcombine.low %v2600_v4, %v2604_v6  ;;  %v6932_v14 = vcombine.high %v2720_v11, %v2724_v12  ;;  %v3071_v3 = vld [vmem:[%s10172_s3 + $0xec8] sm:$0xff]  ;;  %v2680_v6 = vld [vmem:[%s10172_s3 + $0x290] sm:$0xff] }
 0x262   :  { %6060 = vmatprep.subr.bf16.mxu0 %v6852_v44  ;;  %v7194_v44 = vcombine.high %v2983_v7, %v2987_v9  ;;  %v3075_v4 = vld [vmem:[%s10172_s3 + $0xee8] sm:$0xff] }
 0x264   :  { %6016 = vmatpush1.bf16.msra.mxu1 %v7241_v23  ;;  %v2716_v23 = vld [vmem:[%s10172_s3 + $0x3b0] sm:$0xff] }
 0x265   :  { %6061 = vmatpush1.bf16.msra.mxu0 %v6851_v26  ;;  %6017 = vmatprep.subr.bf16.mxu1 %v7234_v28  ;;  %v7193_v26 = vcombine.low %v2983_v7, %v2987_v9  ;;  %v6931_v28 = vcombine.low %v2720_v11, %v2724_v12  ;;  %v6924_v31 = vcombine.high %v2712_v17, %v2716_v23  ;;  %v3063_v9 = vld [vmem:[%s10172_s3 + $0xe88] sm:$0xff]  ;;  %v2672_v12 = vld [vmem:[%s10172_s3 + $0x250] sm:$0xff] }
 0x266   :  { %6062 = vmatprep.subr.bf16.mxu0 %v6844_v29  ;;  %v7314_v29 = vcombine.high %v3103_v15, %v3107_v16  ;;  %v3067_v11 = vld [vmem:[%s10172_s3 + $0xea8] sm:$0xff] }
 0x268   :  { %6018 = vmatpush1.bf16.msra.mxu1 %v7233_v43  ;;  %v2708_v43 = vld [vmem:[%s10172_s3 + $0x370] sm:$0xff] }
 0x269   :  { %6063 = vmatpush1.bf16.msra.mxu0 %v6843_v45  ;;  %6019 = vmatprep.subr.bf16.mxu1 %v7226_v46  ;;  %v7313_v45 = vcombine.low %v3103_v15, %v3107_v16  ;;  %v6923_v46 = vcombine.low %v2712_v17, %v2716_v23  ;;  %v6916_v47 = vcombine.high %v2704_v40, %v2708_v43  ;;  %v3055_v16 = vld [vmem:[%s10172_s3 + $0xe48] sm:$0xff]  ;;  %v2664_v23 = vld [vmem:[%s10172_s3 + $0x210] sm:$0xff] }
 0x26a   :  { %6064 = vmatprep.subr.bf16.mxu0 %v6836_v10  ;;  %v7306_v10 = vcombine.high %v3095_v33, %v3099_v62  ;;  %v3059_v17 = vld [vmem:[%s10172_s3 + $0xe68] sm:$0xff] }
 0x26c   :  { %6020 = vmatpush1.bf16.msra.mxu1 %v7225_v54  ;;  %v2700_v54 = vld [vmem:[%s10172_s3 + $0x330] sm:$0xff] }
 0x26d   :  { %6065 = vmatpush1.bf16.msra.mxu0 %v6835_v55  ;;  %6021 = vmatprep.subr.bf16.mxu1 %v7218_v48  ;;  %v7305_v55 = vcombine.low %v3095_v33, %v3099_v62  ;;  %v6915_v48 = vcombine.low %v2704_v40, %v2708_v43  ;;  %v6908_v57 = vcombine.high %v2696_v52, %v2700_v54  ;;  %v3047_v62 = vld [vmem:[%s10172_s3 + $0xe08] sm:$0xff]  ;;  %v2912_v43 = vld [vmem:[%s10172_s3 + $0x9d0] sm:$0xff] }
 0x26e   :  { %6066 = vmatprep.subr.bf16.mxu0 %v6828_v53  ;;  %v7298_v53 = vcombine.high %v3087_v49, %v3091_v51  ;;  %v3051_v40 = vld [vmem:[%s10172_s3 + $0xe28] sm:$0xff] }
 0x270   :  { %6022 = vmatpush1.bf16.msra.mxu1 %v7217_v24  ;;  %v2692_v24 = vld [vmem:[%s10172_s3 + $0x2f0] sm:$0xff] }
 0x271   :  { %6067 = vmatpush1.bf16.msra.mxu0 %v6827_v59  ;;  %6023 = vmatprep.subr.bf16.mxu1 %v7210_v61  ;;  %v7297_v59 = vcombine.low %v3087_v49, %v3091_v51  ;;  %v6907_v61 = vcombine.low %v2696_v52, %v2700_v54  ;;  %v6900_v63 = vcombine.high %v2688_v58, %v2692_v24  ;;  %v2784_v51 = vld [vmem:[%s10172_s3 + $0x5d0] sm:$0xff] }
 0x272   :  { %6068 = vmatprep.subr.bf16.mxu0 %v6820_v1  ;;  %v7290_v1 = vcombine.high %v3079_v5, %v3083_v56  ;;  %v2788_v52 = vld [vmem:[%s10172_s3 + $0x5f0] sm:$0xff] }
 0x273   :  { %v2904_v54 = vld [vmem:[%s10172_s3 + $0x990] sm:$0xff] }
 0x274   :  { %6024 = vmatpush1.bf16.msra.mxu1 %v7209_v42  ;;  %v2684_v42 = vld [vmem:[%s10172_s3 + $0x2b0] sm:$0xff] }
 0x275   :  { %6069 = vmatpush1.bf16.msra.mxu0 %v6819_v37  ;;  %6025 = vmatprep.subr.bf16.mxu1 %v7202_v0  ;;  %v7289_v37 = vcombine.low %v3079_v5, %v3083_v56  ;;  %v6899_v0 = vcombine.low %v2688_v58, %v2692_v24  ;;  %v6892_v7 = vcombine.high %v2680_v6, %v2684_v42  ;;  %v2776_v56 = vld [vmem:[%s10172_s3 + $0x590] sm:$0xff] }
 0x276   :  { %6070 = vmatprep.subr.bf16.mxu0 %v6812_v21  ;;  %v7282_v21 = vcombine.high %v3071_v3, %v3075_v4  ;;  %v2780_v58 = vld [vmem:[%s10172_s3 + $0x5b0] sm:$0xff] }
 0x277   :  { %v2896_v24 = vld [vmem:[%s10172_s3 + $0x950] sm:$0xff] }
 0x278   :  { %6026 = vmatpush1.bf16.msra.mxu1 %v7201_v34  ;;  %v2676_v34 = vld [vmem:[%s10172_s3 + $0x270] sm:$0xff] }
 0x279   :  { %6071 = vmatpush1.bf16.msra.mxu0 %v6811_v13  ;;  %6027 = vmatprep.subr.bf16.mxu1 %v7194_v44  ;;  %v7281_v13 = vcombine.low %v3071_v3, %v3075_v4  ;;  %v6891_v44 = vcombine.low %v2680_v6, %v2684_v42  ;;  %v6884_v15 = vcombine.high %v2672_v12, %v2676_v34  ;;  %v2768_v4 = vld [vmem:[%s10172_s3 + $0x550] sm:$0xff] }
 0x27a   :  { %6072 = vmatprep.subr.bf16.mxu0 %v6932_v14  ;;  %v7274_v14 = vcombine.high %v3063_v9, %v3067_v11  ;;  %v2772_v6 = vld [vmem:[%s10172_s3 + $0x570] sm:$0xff] }
 0x27b   :  { %v2888_v42 = vld [vmem:[%s10172_s3 + $0x910] sm:$0xff] }
 0x27c   :  { %6028 = vmatpush1.bf16.msra.mxu1 %v7193_v26  ;;  %v2668_v26 = vld [vmem:[%s10172_s3 + $0x230] sm:$0xff] }
 0x27d   :  { %6073 = vmatpush2.bf16.msra.mxu0 %v6931_v28  ;;  %6029 = vmatprep.subr.bf16.mxu1 %v7314_v29  ;;  %v7273_v28 = vcombine.low %v3063_v9, %v3067_v11  ;;  %v6883_v29 = vcombine.low %v2672_v12, %v2676_v34  ;;  %v6876_v33 = vcombine.high %v2664_v23, %v2668_v26  ;;  %v2760_v11 = vld [vmem:[%s10172_s3 + $0x510] sm:$0xff] }
 0x27e   :  { %6074 = vmatprep.subr.bf16.mxu0 %v6924_v31  ;;  %v7266_v31 = vcombine.high %v3055_v16, %v3059_v17  ;;  %v2764_v12 = vld [vmem:[%s10172_s3 + $0x530] sm:$0xff] }
 0x27f   :  { %v2880_v34 = vld [vmem:[%s10172_s3 + $0x8d0] sm:$0xff] }
 0x280   :  { %6030 = vmatpush2.bf16.msra.mxu1 %v7313_v45  ;;  %v2916_v45 = vld [vmem:[%s10172_s3 + $0x9f0] sm:$0xff] }
 0x281   :  { %6075 = vmatpush2.bf16.msra.mxu0 %v6923_v46  ;;  %6031 = vmatprep.subr.bf16.mxu1 %v7306_v10  ;;  %v7265_v46 = vcombine.low %v3055_v16, %v3059_v17  ;;  %v6875_v10 = vcombine.low %v2664_v23, %v2668_v26  ;;  %v7124_v49 = vcombine.high %v2912_v43, %v2916_v45  ;;  %v2752_v17 = vld [vmem:[%s10172_s3 + $0x4d0] sm:$0xff] }
 0x282   :  { %6076 = vmatprep.subr.bf16.mxu0 %v6916_v47  ;;  %v7258_v47 = vcombine.high %v3047_v62, %v3051_v40  ;;  %v2756_v23 = vld [vmem:[%s10172_s3 + $0x4f0] sm:$0xff] }
 0x283   :  { %v2872_v26 = vld [vmem:[%s10172_s3 + $0x890] sm:$0xff] }
 0x284   :  { %6032 = vmatpush2.bf16.msra.mxu1 %v7305_v55  ;;  %v2908_v55 = vld [vmem:[%s10172_s3 + $0x9b0] sm:$0xff] }
 0x285   :  { %6077 = vmatpush2.bf16.msra.mxu0 %v6915_v48  ;;  %6033 = vmatprep.subr.bf16.mxu1 %v7298_v53  ;;  %v7257_v48 = vcombine.low %v3047_v62, %v3051_v40  ;;  %v7123_v53 = vcombine.low %v2912_v43, %v2916_v45  ;;  %v7116_v5 = vcombine.high %v2904_v54, %v2908_v55  ;;  %v2744_v40 = vld [vmem:[%s10172_s3 + $0x490] sm:$0xff] }
 0x286   :  { %6078 = vmatprep.subr.bf16.mxu0 %v6908_v57  ;;  %v6996_v57 = vcombine.high %v2784_v51, %v2788_v52  ;;  %v2748_v43 = vld [vmem:[%s10172_s3 + $0x4b0] sm:$0xff] }
 0x287   :  { %v2864_v45 = vld [vmem:[%s10172_s3 + $0x850] sm:$0xff] }
 0x288   :  { %6034 = vmatpush2.bf16.msra.mxu1 %v7297_v59  ;;  %v2900_v59 = vld [vmem:[%s10172_s3 + $0x970] sm:$0xff] }
 0x289   :  { %6079 = vmatpush2.bf16.msra.mxu0 %v6907_v61  ;;  %6035 = vmatprep.subr.bf16.mxu1 %v7290_v1  ;;  %v6995_v61 = vcombine.low %v2784_v51, %v2788_v52  ;;  %v7115_v1 = vcombine.low %v2904_v54, %v2908_v55  ;;  %v7108_v3 = vcombine.high %v2896_v24, %v2900_v59  ;;  %v2736_v52 = vld [vmem:[%s10172_s3 + $0x450] sm:$0xff] }
 0x28a   :  { %6080 = vmatprep.subr.bf16.mxu0 %v6900_v63  ;;  %v6988_v63 = vcombine.high %v2776_v56, %v2780_v58  ;;  %v2740_v54 = vld [vmem:[%s10172_s3 + $0x470] sm:$0xff] }
 0x28b   :  { %v2856_v55 = vld [vmem:[%s10172_s3 + $0x810] sm:$0xff] }
 0x28c   :  { %6036 = vmatpush2.bf16.msra.mxu1 %v7289_v37  ;;  %v2892_v37 = vld [vmem:[%s10172_s3 + $0x930] sm:$0xff] }
 0x28d   :  { %6081 = vmatpush2.bf16.msra.mxu0 %v6899_v0  ;;  %6037 = vmatprep.subr.bf16.mxu1 %v7282_v21  ;;  %v6987_v0 = vcombine.low %v2776_v56, %v2780_v58  ;;  %v7107_v21 = vcombine.low %v2896_v24, %v2900_v59  ;;  %v7100_v9 = vcombine.high %v2888_v42, %v2892_v37  ;;  %v2728_v58 = vld [vmem:[%s10172_s3 + $0x410] sm:$0xff] }
 0x28e   :  { %6082 = vmatprep.subr.bf16.mxu0 %v6892_v7  ;;  %v6980_v7 = vcombine.high %v2768_v4, %v2772_v6  ;;  %v2732_v24 = vld [vmem:[%s10172_s3 + $0x430] sm:$0xff] }
 0x28f   :  { %v2976_v59 = vld [vmem:[%s10172_s3 + $0xbd0] sm:$0xff] }
 0x290   :  { %6038 = vmatpush2.bf16.msra.mxu1 %v7281_v13  ;;  %v2884_v13 = vld [vmem:[%s10172_s3 + $0x8f0] sm:$0xff] }
 0x291   :  { %6083 = vmatpush2.bf16.msra.mxu0 %v6891_v44  ;;  %6039 = vmatprep.subr.bf16.mxu1 %v7274_v14  ;;  %v6979_v44 = vcombine.low %v2768_v4, %v2772_v6  ;;  %v7099_v14 = vcombine.low %v2888_v42, %v2892_v37  ;;  %v7092_v16 = vcombine.high %v2880_v34, %v2884_v13  ;;  %v2848_v6 = vld [vmem:[%s10172_s3 + $0x7d0] sm:$0xff] }
 0x292   :  { %6084 = vmatprep.subr.bf16.mxu0 %v6884_v15  ;;  %v6972_v15 = vcombine.high %v2760_v11, %v2764_v12  ;;  %v2852_v42 = vld [vmem:[%s10172_s3 + $0x7f0] sm:$0xff] }
 0x293   :  { %v2968_v37 = vld [vmem:[%s10172_s3 + $0xb90] sm:$0xff] }
 0x294   :  { %6040 = vmatpush2.bf16.msra.mxu1 %v7273_v28  ;;  %v2876_v28 = vld [vmem:[%s10172_s3 + $0x8b0] sm:$0xff] }
 0x295   :  { %6085 = vmatpush2.bf16.msra.mxu0 %v6883_v29  ;;  %6041 = vmatprep.subr.bf16.mxu1 %v7266_v31  ;;  %v6971_v29 = vcombine.low %v2760_v11, %v2764_v12  ;;  %v7091_v31 = vcombine.low %v2880_v34, %v2884_v13  ;;  %v7084_v62 = vcombine.high %v2872_v26, %v2876_v28  ;;  %v2840_v12 = vld [vmem:[%s10172_s3 + $0x790] sm:$0xff] }
 0x296   :  { %6086 = vmatprep.subr.bf16.mxu0 %v6876_v33  ;;  %v6964_v33 = vcombine.high %v2752_v17, %v2756_v23  ;;  %v2844_v34 = vld [vmem:[%s10172_s3 + $0x7b0] sm:$0xff] }
 0x297   :  { %v2960_v13 = vld [vmem:[%s10172_s3 + $0xb50] sm:$0xff] }
 0x298   :  { %6042 = vmatpush2.bf16.msra.mxu1 %v7265_v46  ;;  %v2868_v46 = vld [vmem:[%s10172_s3 + $0x870] sm:$0xff] }
 0x299   :  { %6087 = vmatpush2.bf16.msra.mxu0 %v6875_v10  ;;  %6043 = vmatprep.subr.bf16.mxu1 %v7258_v47  ;;  %v6963_v10 = vcombine.low %v2752_v17, %v2756_v23  ;;  %v7083_v47 = vcombine.low %v2872_v26, %v2876_v28  ;;  %v7076_v51 = vcombine.high %v2864_v45, %v2868_v46  ;;  %v2832_v23 = vld [vmem:[%s10172_s3 + $0x750] sm:$0xff] }
 0x29a   :  { %6142 = vmatprep.subr.bf16.mxu0 %v7124_v49  ;;  %v6956_v49 = vcombine.high %v2744_v40, %v2748_v43  ;;  %v2836_v26 = vld [vmem:[%s10172_s3 + $0x770] sm:$0xff] }
 0x29b   :  { %v2952_v28 = vld [vmem:[%s10172_s3 + $0xb10] sm:$0xff] }
 0x29c   :  { %6044 = vmatpush2.bf16.msra.mxu1 %v7257_v48  ;;  %6089 = vmatmul.mubr.bf16.vlgmr.msra.gmra.mxu0 %v8439_v20  ;;  %v2860_v48 = vld [vmem:[%s10172_s3 + $0x830] sm:$0xff] }
 0x29d   :  { %6143 = vmatpush1.bf16.msra.mxu0 %v7123_v53  ;;  %6174 = vmatprep.mubr.bf16.mxu0 %v8957_v32  ;;  %v6955_v53 = vcombine.low %v2744_v40, %v2748_v43  ;;  %v7068_v56 = vcombine.high %v2856_v55, %v2860_v48  ;;  %v2824_v43 = vld [vmem:[%s10172_s3 + $0x710] sm:$0xff] }
 0x29e   :  { %6099 = vmatprep.subr.bf16.mxu1 %v6996_v57  ;;  %6144 = vmatprep.subr.bf16.mxu0 %v7116_v5  ;;  %v7075_v57 = vcombine.low %v2864_v45, %v2868_v46  ;;  %v6948_v5 = vcombine.high %v2736_v52, %v2740_v54  ;;  %v2828_v45 = vld [vmem:[%s10172_s3 + $0x730] sm:$0xff] }
 0x29f   :  { %6046 = vmatmul.mubr.bf16.vlgmr.msra.gmra.mxu1 %v9083_v39  ;;  %v2944_v46 = vld [vmem:[%s10172_s3 + $0xad0] sm:$0xff] }
 0x2a0   :  { %6100 = vmatpush1.bf16.msra.mxu1 %v6995_v61  ;;  %6131 = vmatprep.mubr.bf16.mxu1 %v8674_v22  ;;  %v2980_v61 = vld [vmem:[%s10172_s3 + $0xbf0] sm:$0xff] }
 0x2a1   :  { %6145 = vmatpush1.bf16.msra.mxu0 %v7115_v1  ;;  %6101 = vmatprep.subr.bf16.mxu1 %v6988_v63  ;;  %v6947_v1 = vcombine.low %v2736_v52, %v2740_v54  ;;  %v7067_v63 = vcombine.low %v2856_v55, %v2860_v48  ;;  %v7188_v4 = vcombine.high %v2976_v59, %v2980_v61  ;;  %v2816_v54 = vld [vmem:[%s10172_s3 + $0x6d0] sm:$0xff]  ;;  %v5746_v48 = vpop.f32.mrf.mxu0 }
 0x2a2   :  { %6146 = vmatprep.subr.bf16.mxu0 %v7108_v3  ;;  %v6940_v3 = vcombine.high %v2728_v58, %v2732_v24  ;;  %v2820_v55 = vld [vmem:[%s10172_s3 + $0x6f0] sm:$0xff] }
 0x2a4   :  { %6102 = vmatpush1.bf16.msra.mxu1 %v6987_v0  ;;  %v2972_v0 = vld [vmem:[%s10172_s3 + $0xbb0] sm:$0xff] }
 0x2a5   :  { %6147 = vmatpush1.bf16.msra.mxu0 %v7107_v21  ;;  %6103 = vmatprep.subr.bf16.mxu1 %v6980_v7  ;;  %v6939_v21 = vcombine.low %v2728_v58, %v2732_v24  ;;  %v7187_v7 = vcombine.low %v2976_v59, %v2980_v61  ;;  %v7180_v11 = vcombine.high %v2968_v37, %v2972_v0  ;;  %v2808_v59 = vld [vmem:[%s10172_s3 + $0x690] sm:$0xff] }
 0x2a6   :  { %6148 = vmatprep.subr.bf16.mxu0 %v7100_v9  ;;  %v7060_v9 = vcombine.high %v2848_v6, %v2852_v42  ;;  %v7028_v58 = vcombine.high %v2816_v54, %v2820_v55  ;;  %v2812_v61 = vld [vmem:[%s10172_s3 + $0x6b0] sm:$0xff] }
 0x2a8   :  { %6104 = vmatpush1.bf16.msra.mxu1 %v6979_v44  ;;  %v2964_v44 = vld [vmem:[%s10172_s3 + $0xb70] sm:$0xff] }
 0x2a9   :  { %6149 = vmatpush1.bf16.msra.mxu0 %v7099_v14  ;;  %6105 = vmatprep.subr.bf16.mxu1 %v6972_v15  ;;  %v7059_v14 = vcombine.low %v2848_v6, %v2852_v42  ;;  %v7179_v15 = vcombine.low %v2968_v37, %v2972_v0  ;;  %v7172_v17 = vcombine.high %v2960_v13, %v2964_v44  ;;  %v2800_v0 = vld [vmem:[%s10172_s3 + $0x650] sm:$0xff] }
 0x2aa   :  { %6150 = vmatprep.subr.bf16.mxu0 %v7092_v16  ;;  %v7052_v16 = vcombine.high %v2840_v12, %v2844_v34  ;;  %v7020_v42 = vcombine.high %v2808_v59, %v2812_v61 }
 0x2ac   :  { %6106 = vmatpush1.bf16.msra.mxu1 %v6971_v29  ;;  %v2956_v29 = vld [vmem:[%s10172_s3 + $0xb30] sm:$0xff] }
 0x2ad   :  { %6151 = vmatpush1.bf16.msra.mxu0 %v7091_v31  ;;  %6107 = vmatprep.subr.bf16.mxu1 %v6964_v33  ;;  %v7051_v31 = vcombine.low %v2840_v12, %v2844_v34  ;;  %v7171_v33 = vcombine.low %v2960_v13, %v2964_v44  ;;  %v7164_v40 = vcombine.high %v2952_v28, %v2956_v29  ;;  %v9643_v34 = vld [vmem:[%s10173_s4] sm:$0xff]  ;;  %v5789_v13 = vpop.f32.mrf.mxu1 }
 0x2ae   :  { %6152 = vmatprep.subr.bf16.mxu0 %v7084_v62  ;;  %v7044_v62 = vcombine.high %v2832_v23, %v2836_v26  ;;  %v7019_v12 = vcombine.low %v2808_v59, %v2812_v61 }
 0x2b0   :  { %6108 = vmatpush1.bf16.msra.mxu1 %v6963_v10  ;;  %v2948_v10 = vld [vmem:[%s10172_s3 + $0xaf0] sm:$0xff] }
 0x2b1   :  { %6153 = vmatpush1.bf16.msra.mxu0 %v7083_v47  ;;  %6109 = vmatprep.subr.bf16.mxu1 %v6956_v49  ;;  %v7043_v47 = vcombine.low %v2832_v23, %v2836_v26  ;;  %v7163_v49 = vcombine.low %v2952_v28, %v2956_v29  ;;  %v7156_v52 = vcombine.high %v2944_v46, %v2948_v10  ;;  %v2657_v26 = vld [vmem:[%s10172_s3 + $0x1d8] sm:$0xff] }
 0x2b2   :  { %6154 = vmatprep.subr.bf16.mxu0 %v7076_v51  ;;  %v7036_v51 = vcombine.high %v2824_v43, %v2828_v45  ;;  %v2661_v28 = vld [vmem:[%s10172_s3 + $0x1f8] sm:$0xff]  ;;  %v3115_v29 = vrot.slane %v9643_v34, %v368_v8  ;;  %v3044_v8 = vld [vmem:[%s10172_s3 + $0xdf0] sm:$0xff] }
 0x2b4   :  { %6110 = vmatpush1.bf16.msra.mxu1 %v6955_v53  ;;  %v2936_v53 = vld [vmem:[%s10172_s3 + $0xa90] sm:$0xff] }
 0x2b5   :  { %6155 = vmatpush1.bf16.msra.mxu0 %v7075_v57  ;;  %6111 = vmatprep.subr.bf16.mxu1 %v6948_v5  ;;  %v2940_v57 = vld [vmem:[%s10172_s3 + $0xab0] sm:$0xff]  ;;  %v7035_v5 = vcombine.low %v2824_v43, %v2828_v45  ;;  %v3119_v45 = vrot.slane %v9643_v34, %v372_v41 }
 0x2b6   :  { %6156 = vmatprep.subr.bf16.mxu0 %v7068_v56  ;;  %v7155_v56 = vcombine.low %v2944_v46, %v2948_v10  ;;  %v7148_v24 = vcombine.high %v2936_v53, %v2940_v57  ;;  %v7147_v6 = vcombine.low %v2936_v53, %v2940_v57  ;;  %v6870_v46 = vcombine.high %v2657_v26, %v2661_v28  ;;  %v3040_v10 = vld [vmem:[%s10172_s3 + $0xdd0] sm:$0xff] }
 0x2b7   :  { %v7252_v57 = vcombine.high %v3040_v10, %v3044_v8  ;;  %v7251_v61 = vcombine.low %v3040_v10, %v3044_v8 }
 0x2b8   :  { %6112 = vmatpush1.bf16.msra.mxu1 %v6947_v1  ;;  %v5748_v1 = vpop.f32.mrf.mxu0 }
 0x2b9   :  { %6157 = vmatpush1.bf16.msra.mxu0 %v7067_v63  ;;  %6113 = vmatprep.subr.bf16.mxu1 %v6940_v3  ;;  %v2928_v63 = vld [vmem:[%s10172_s3 + $0xa50] sm:$0xff]  ;;  %v5749_v53 = vadd.f32 %v5748_v1, %v3119_v45 }
 0x2ba   :  { %6158 = vmatprep.subr.bf16.mxu0 %v7188_v4  ;;  %v2932_v3 = vld [vmem:[%s10172_s3 + $0xa70] sm:$0xff]  ;;  %v7027_v4 = vcombine.low %v2816_v54, %v2820_v55  ;;  %v6869_v55 = vcombine.low %v2657_v26, %v2661_v28 }
 0x2bb   :  { %v7140_v37 = vcombine.high %v2928_v63, %v2932_v3  ;;  %v7139_v44 = vcombine.low %v2928_v63, %v2932_v3 }
 0x2bc   :  { %6114 = vmatpush1.bf16.msra.mxu1 %v6939_v21  ;;  %v2804_v21 = vld [vmem:[%s10172_s3 + $0x670] sm:$0xff] }
 0x2bd   :  { %6159 = vmatpush2.bf16.msra.mxu0 %v7187_v7  ;;  %6115 = vmatprep.subr.bf16.mxu1 %v7060_v9  ;;  %v5750_v7 = vpop.f32.mrf.mxu0  ;;  %v2920_v9 = vld [vmem:[%s10172_s3 + $0xa10] sm:$0xff] }
 0x2be   :  { %6160 = vmatprep.subr.bf16.mxu0 %v7180_v11  ;;  %v2924_v11 = vld [vmem:[%s10172_s3 + $0xa30] sm:$0xff]  ;;  %v5751_v1 = vadd.f32 %v5750_v7, %v3115_v29 }
 0x2bf   :  { %v5752_v23 = vpop.f32.mrf.mxu0  ;;  %v3028_v7 = vld [vmem:[%s10172_s3 + $0xd70] sm:$0xff] }
 0x2c0   :  { %6116 = vmatpush2.bf16.msra.mxu1 %v7059_v14  ;;  %v7012_v14 = vcombine.high %v2800_v0, %v2804_v21 }
 0x2c1   :  { %6161 = vmatpush2.bf16.msra.mxu0 %v7179_v15  ;;  %6117 = vmatprep.subr.bf16.mxu1 %v7052_v16  ;;  %v7132_v15 = vcombine.high %v2920_v9, %v2924_v11  ;;  %v2792_v16 = vld [vmem:[%s10172_s3 + $0x610] sm:$0xff] }
 0x2c2   :  { %6162 = vmatprep.subr.bf16.mxu0 %v7172_v17  ;;  %v2796_v17 = vld [vmem:[%s10172_s3 + $0x630] sm:$0xff] }
 0x2c3   :  { %v7004_v43 = vcombine.high %v2792_v16, %v2796_v17  ;;  %v7003_v41 = vcombine.low %v2792_v16, %v2796_v17 }
 0x2c4   :  { %6118 = vmatpush2.bf16.msra.mxu1 %v7051_v31  ;;  %v7011_v31 = vcombine.low %v2800_v0, %v2804_v21  ;;  %v3024_v21 = vld [vmem:[%s10172_s3 + $0xd50] sm:$0xff] }
 0x2c5   :  { %6163 = vmatpush2.bf16.msra.mxu0 %v7171_v33  ;;  %6119 = vmatprep.subr.bf16.mxu1 %v7044_v62  ;;  %v5791_v33 = vpop.f32.mrf.mxu1  ;;  %v5832_v62 = vpop.f32.mrf.mxu0 }
 0x2c6   :  { %6164 = vmatprep.subr.bf16.mxu0 %v7164_v40  ;;  %v7131_v40 = vcombine.low %v2920_v9, %v2924_v11  ;;  %v2637_v11 = vld [vmem:[%s10172_s3 + $0x138] sm:$0xff] }
 0x2c7   :  { %v5834_v54 = vpop.f32.mrf.mxu0 }
 0x2c8   :  { %6120 = vmatpush2.bf16.msra.mxu1 %v7043_v47  ;;  %v2649_v47 = vld [vmem:[%s10172_s3 + $0x198] sm:$0xff] }
 0x2c9   :  { %6165 = vmatpush2.bf16.msra.mxu0 %v7163_v49  ;;  %6121 = vmatprep.subr.bf16.mxu1 %v7036_v51  ;;  %v2653_v49 = vld [vmem:[%s10172_s3 + $0x1b8] sm:$0xff]  ;;  %v5747_v51 = vadd.f32 %v5746_v48, %v3115_v29  ;;  %v5836_v3 = vpop.f32.mrf.mxu0 }
 0x2ca   :  { %6166 = vmatprep.subr.bf16.mxu0 %v7156_v52  ;;  %v5793_v52 = vpop.f32.mrf.mxu1  ;;  %v2641_v48 = vld [vmem:[%s10172_s3 + $0x158] sm:$0xff] }
 0x2cb   :  { %v5790_v59 = vadd.f32 %v5789_v13, %v5747_v51 }
 0x2cc   :  { %6122 = vmatpush2.bf16.msra.mxu1 %v7035_v5  ;;  %v6862_v5 = vcombine.high %v2649_v47, %v2653_v49  ;;  %v5795_v63 = vpop.f32.mrf.mxu1 }
 0x2cd   :  { %6167 = vmatpush2.bf16.msra.mxu0 %v7155_v56  ;;  %6123 = vmatprep.subr.bf16.mxu1 %v7028_v58  ;;  %v3032_v56 = vld [vmem:[%s10172_s3 + $0xd90] sm:$0xff] }
 0x2ce   :  { %6168 = vmatprep.subr.bf16.mxu0 %v7148_v24  ;;  %v3036_v58 = vld [vmem:[%s10172_s3 + $0xdb0] sm:$0xff]  ;;  %v2645_v24 = vld [vmem:[%s10172_s3 + $0x178] sm:$0xff] }
 0x2cf   :  { %v6854_v0 = vcombine.high %v2641_v48, %v2645_v24  ;;  %v6853_v17 = vcombine.low %v2641_v48, %v2645_v24 }
 0x2d0   :  { %6124 = vmatpush2.bf16.msra.mxu1 %v7027_v4  ;;  %v6861_v4 = vcombine.low %v2649_v47, %v2653_v49  ;;  %v7235_v47 = vcombine.low %v3024_v21, %v3028_v7 }
 0x2d1   :  { %6169 = vmatpush2.bf16.msra.mxu0 %v7147_v6  ;;  %6125 = vmatprep.subr.bf16.mxu1 %v7020_v42  ;;  %v7244_v6 = vcombine.high %v3032_v56, %v3036_v58  ;;  %v5792_v42 = vadd.f32 %v5791_v33, %v5749_v53  ;;  %v3016_v33 = vld [vmem:[%s10172_s3 + $0xd10] sm:$0xff] }
 0x2d2   :  { %6170 = vmatprep.subr.bf16.mxu0 %v7140_v37  ;;  %v5753_v37 = vadd.f32 %v5752_v23, %v3119_v45  ;;  %v7236_v23 = vcombine.high %v3024_v21, %v3028_v7  ;;  %v2629_v45 = vld [vmem:[%s10172_s3 + $0xf8] sm:$0xff]  ;;  %v3008_v53 = vld [vmem:[%s10172_s3 + $0xcd0] sm:$0xff] }
 0x2d3   :  { %v5835_v13 = vadd.f32 %v5834_v54, %v5792_v42  ;;  %v2992_v21 = vld [vmem:[%s10172_s3 + $0xc50] sm:$0xff] }
 0x2d4   :  { %6126 = vmatpush2.bf16.msra.mxu1 %v7019_v12  ;;  %v5833_v12 = vadd.f32 %v5832_v62, %v5790_v59  ;;  %v5796_v26 = vadd.f32 %v5795_v63, %v5753_v37  ;;  %v3020_v62 = vld [vmem:[%s10172_s3 + $0xd30] sm:$0xff] }
 0x2d5   :  { %6171 = vmatpush2.bf16.msra.mxu0 %v7139_v44  ;;  %6127 = vmatprep.subr.bf16.mxu1 %v7012_v14  ;;  %v7243_v44 = vcombine.low %v3032_v56, %v3036_v58  ;;  %v5794_v14 = vadd.f32 %v5793_v52, %v5751_v1  ;;  %v2621_v56 = vld [vmem:[%s10172_s3 + $0xb8] sm:$0xff]  ;;  %v7227_v48 = vcombine.low %v3016_v33, %v3020_v62  ;;  %v3000_v1 = vld [vmem:[%s10172_s3 + $0xc90] sm:$0xff] }
 0x2d6   :  { %6172 = vmatprep.subr.bf16.mxu0 %v7132_v15  ;;  %v5838_v15 = vpop.f32.mrf.mxu0  ;;  %v3004_v63 = vld [vmem:[%s10172_s3 + $0xcb0] sm:$0xff] }
 0x2d7   :  { %v5839_v10 = vadd.f32 %v5838_v15, %v5796_v26  ;;  %v7212_v37 = vcombine.high %v3000_v1, %v3004_v63  ;;  %v2996_v7 = vld [vmem:[%s10172_s3 + $0xc70] sm:$0xff] }
 0x2d8   :  { %6128 = vmatpush2.bf16.msra.mxu1 %v7011_v31  ;;  %v2988_v15 = vld [vmem:[%s10172_s3 + $0xc30] sm:$0xff] }
 0x2d9   :  { %6173 = vmatpush2.bf16.msra.mxu0 %v7131_v40  ;;  %6129 = vmatprep.subr.bf16.mxu1 %v7004_v43  ;;  %v2625_v43 = vld [vmem:[%s10172_s3 + $0xd8] sm:$0xff] }
 0x2da   :  { %6228 = vmatprep.subr.bf16.mxu0 %v6870_v46  ;;  %v5837_v46 = vadd.f32 %v5836_v3, %v5794_v14  ;;  %v6837_v24 = vcombine.low %v2625_v43, %v2629_v45  ;;  %v2609_v3 = vld [vmem:[%s10172_s3 + $0x58] sm:$0xff]  ;;  %v2984_v14 = vld [vmem:[%s10172_s3 + $0xc10] sm:$0xff] }
 0x2dc   :  { %6130 = vmatpush2.bf16.msra.mxu1 %v7003_v41  ;;  %6175 = vmatmul.mubr.bf16.vlgmr.msra.gmra.mxu0 %v8959_v38  ;;  %v7228_v41 = vcombine.high %v3016_v33, %v3020_v62  ;;  %v3108_v33 = vld [vmem:[%s10172_s3 + $0xff0] sm:$0xff]  ;;  %v2713_v62 = vld [vmem:[%s10172_s3 + $0x398] sm:$0xff] }
 0x2dd   :  { %6229 = vmatpush1.bf16.msra.mxu0 %v6869_v55  ;;  %6260 = vmatprep.mubr.bf16.mxu0 %v8526_v35  ;;  %v2633_v35 = vld [vmem:[%s10172_s3 + $0x118] sm:$0xff]  ;;  %v6838_v55 = vcombine.high %v2625_v43, %v2629_v45  ;;  %v7195_v43 = vcombine.low %v2984_v14, %v2988_v15 }
 0x2de   :  { %6185 = vmatprep.subr.bf16.mxu1 %v7252_v57  ;;  %6230 = vmatprep.subr.bf16.mxu0 %v6862_v5  ;;  %v6846_v31 = vcombine.high %v2633_v35, %v2637_v11  ;;  %v6845_v51 = vcombine.low %v2633_v35, %v2637_v11  ;;  %v3012_v57 = vld [vmem:[%s10172_s3 + $0xcf0] sm:$0xff]  ;;  %v2617_v5 = vld [vmem:[%s10172_s3 + $0x98] sm:$0xff]  ;;  %v7211_v11 = vcombine.low %v3000_v1, %v3004_v63 }
 0x2df   :  { %6132 = vmatmul.mubr.bf16.vlgmr.msra.gmra.mxu1 %v8746_v18  ;;  %v5875_v9 = vpop.f32.mrf.mxu1  ;;  %v7220_v59 = vcombine.high %v3008_v53, %v3012_v57  ;;  %v6829_v42 = vcombine.low %v2617_v5, %v2621_v56  ;;  %v2605_v35 = vld [vmem:[%s10172_s3 + $0x38] sm:$0xff]  ;;  %v3084_v1 = vld [vmem:[%s10172_s3 + $0xf30] sm:$0xff] }
 0x2e0   :  { %6186 = vmatpush1.bf16.msra.mxu1 %v7251_v61  ;;  %6217 = vmatprep.mubr.bf16.mxu1 %v9074_v30  ;;  %v5876_v28 = vadd.f32 %v5875_v9, %v5833_v12  ;;  %v6830_v61 = vcombine.high %v2617_v5, %v2621_v56  ;;  %v2601_v9 = vld [vmem:[%s10172_s3 + $0x18] sm:$0xff] }
 0x2e1   :  { %v5877_v16 = vpop.f32.mrf.mxu1  ;;  %6231 = vmatpush1.bf16.msra.mxu0 %v6861_v4  ;;  %6187 = vmatprep.subr.bf16.mxu1 %v7244_v6  ;;  %v2613_v4 = vld [vmem:[%s10172_s3 + $0x78] sm:$0xff]  ;;  %v7219_v6 = vcombine.low %v3008_v53, %v3012_v57  ;;  %v6813_v26 = vcombine.low %v2601_v9, %v2605_v35  ;;  %v3088_v53 = vld [vmem:[%s10172_s3 + $0xf50] sm:$0xff] }
 0x2e2   :  { %v5878_v29 = vadd.f32 %v5877_v16, %v5835_v13  ;;  %6232 = vmatprep.subr.bf16.mxu0 %v6854_v0  ;;  %v6822_v0 = vcombine.high %v2609_v3, %v2613_v4  ;;  %v6821_v12 = vcombine.low %v2609_v3, %v2613_v4  ;;  %v7204_v13 = vcombine.high %v2992_v21, %v2996_v7  ;;  %v2721_v16 = vld [vmem:[%s10172_s3 + $0x3d8] sm:$0xff]  ;;  %v3092_v57 = vld [vmem:[%s10172_s3 + $0xf70] sm:$0xff] }
 0x2e3   :  { %v5879_v40 = vpop.f32.mrf.mxu1  ;;  %v2697_v5 = vld [vmem:[%s10172_s3 + $0x318] sm:$0xff]  ;;  %v7299_v4 = vcombine.low %v3088_v53, %v3092_v57 }
 0x2e4   :  { %v7327_v8 = vpack.c.bf16 %v5878_v29, %v5876_v28  ;;  %6188 = vmatpush1.bf16.msra.mxu1 %v7243_v44  ;;  %v5880_v52 = vadd.f32 %v5879_v40, %v5837_v46  ;;  %v6814_v44 = vcombine.high %v2601_v9, %v2605_v35  ;;  %v7196_v28 = vcombine.high %v2984_v14, %v2988_v15  ;;  %v2717_v40 = vld [vmem:[%s10172_s3 + $0x3b8] sm:$0xff]  ;;  %v3068_v14 = vld [vmem:[%s10172_s3 + $0xeb0] sm:$0xff] }
 0x2e5   :  { %v5881_v49 = vpop.f32.mrf.mxu1  ;;  %6233 = vmatpush1.bf16.msra.mxu0 %v6853_v17  ;;  %6189 = vmatprep.subr.bf16.mxu1 %v7236_v23  ;;  %v2725_v17 = vld [vmem:[%s10172_s3 + $0x3f8] sm:$0xff]  ;;  %v7203_v23 = vcombine.low %v2992_v21, %v2996_v7  ;;  %v3076_v21 = vld [vmem:[%s10172_s3 + $0xef0] sm:$0xff] }
 0x2e6   :  { %6448 = vst [vmem:[#allocation2] sm:$0xff] %v7327_v8  ;;  %v5882_v54 = vadd.f32 %v5881_v49, %v5839_v10  ;;  %6234 = vmatprep.subr.bf16.mxu0 %v6846_v31  ;;  %v6934_v29 = vcombine.high %v2721_v16, %v2725_v17  ;;  %v3104_v31 = vld [vmem:[%s10172_s3 + $0xfd0] sm:$0xff]  ;;  %v6933_v45 = vcombine.low %v2721_v16, %v2725_v17  ;;  %v2705_v49 = vld [vmem:[%s10172_s3 + $0x358] sm:$0xff] }
 0x2e7   :  { %v7316_v46 = vcombine.high %v3104_v31, %v3108_v33  ;;  %v6926_v10 = vcombine.high %v2713_v62, %v2717_v40  ;;  %v3096_v8 = vld [vmem:[%s10172_s3 + $0xf90] sm:$0xff]  ;;  %v2701_v56 = vld [vmem:[%s10172_s3 + $0x338] sm:$0xff] }
 0x2e8   :  { %v7331_v58 = vpack.c.bf16 %v5882_v54, %v5880_v52  ;;  %6190 = vmatpush1.bf16.msra.mxu1 %v7235_v47  ;;  %v3100_v47 = vld [vmem:[%s10172_s3 + $0xfb0] sm:$0xff]  ;;  %v6925_v52 = vcombine.low %v2713_v62, %v2717_v40  ;;  %v2689_v63 = vld [vmem:[%s10172_s3 + $0x2d8] sm:$0xff] }
 0x2e9   :  { %6235 = vmatpush1.bf16.msra.mxu0 %v6845_v51  ;;  %6191 = vmatprep.subr.bf16.mxu1 %v7228_v41  ;;  %v2709_v51 = vld [vmem:[%s10172_s3 + $0x378] sm:$0xff]  ;;  %v7315_v41 = vcombine.low %v3104_v31, %v3108_v33  ;;  %v7308_v54 = vcombine.high %v3096_v8, %v3100_v47  ;;  %v3060_v31 = vld [vmem:[%s10172_s3 + $0xe70] sm:$0xff] }
 0x2ea   :  { %6455 = vst [vmem:[#allocation2 + $0x20] sm:$0xff] %v7331_v58  ;;  %6236 = vmatprep.subr.bf16.mxu0 %v6838_v55  ;;  %v6918_v55 = vcombine.high %v2705_v49, %v2709_v51  ;;  %v7307_v58 = vcombine.low %v3096_v8, %v3100_v47  ;;  %v2693_v3 = vld [vmem:[%s10172_s3 + $0x2f8] sm:$0xff]  ;;  %v3052_v8 = vld [vmem:[%s10172_s3 + $0xe30] sm:$0xff] }
 0x2eb   :  { %v2681_v7 = vld [vmem:[%s10172_s3 + $0x298] sm:$0xff] }
 0x2ec   :  { %6192 = vmatpush1.bf16.msra.mxu1 %v7227_v48  ;;  %v6917_v48 = vcombine.low %v2705_v49, %v2709_v51  ;;  %v2685_v9 = vld [vmem:[%s10172_s3 + $0x2b8] sm:$0xff] }
 0x2ed   :  { %6237 = vmatpush1.bf16.msra.mxu0 %v6837_v24  ;;  %6193 = vmatprep.subr.bf16.mxu1 %v7220_v59  ;;  %v7300_v24 = vcombine.high %v3088_v53, %v3092_v57  ;;  %v6910_v59 = vcombine.high %v2697_v5, %v2701_v56  ;;  %v2673_v15 = vld [vmem:[%s10172_s3 + $0x258] sm:$0xff] }
 0x2ee   :  { %6238 = vmatprep.subr.bf16.mxu0 %v6830_v61  ;;  %v3080_v61 = vld [vmem:[%s10172_s3 + $0xf10] sm:$0xff]  ;;  %v2677_v16 = vld [vmem:[%s10172_s3 + $0x278] sm:$0xff] }
 0x2ef   :  { %v7291_v35 = vcombine.low %v3080_v61, %v3084_v1  ;;  %v2665_v33 = vld [vmem:[%s10172_s3 + $0x218] sm:$0xff] }
 0x2f0   :  { %6194 = vmatpush1.bf16.msra.mxu1 %v7219_v6  ;;  %v6909_v6 = vcombine.low %v2697_v5, %v2701_v56  ;;  %v2669_v62 = vld [vmem:[%s10172_s3 + $0x238] sm:$0xff] }
 0x2f1   :  { %6239 = vmatpush1.bf16.msra.mxu0 %v6829_v42  ;;  %6195 = vmatprep.subr.bf16.mxu1 %v7212_v37  ;;  %v7292_v42 = vcombine.high %v3080_v61, %v3084_v1  ;;  %v6902_v37 = vcombine.high %v2689_v63, %v2693_v3  ;;  %v2913_v47 = vld [vmem:[%s10172_s3 + $0x9d8] sm:$0xff] }
 0x2f2   :  { %6240 = vmatprep.subr.bf16.mxu0 %v6822_v0  ;;  %v3072_v0 = vld [vmem:[%s10172_s3 + $0xed0] sm:$0xff]  ;;  %v2917_v49 = vld [vmem:[%s10172_s3 + $0x9f8] sm:$0xff] }
 0x2f3   :  { %v7283_v17 = vcombine.low %v3072_v0, %v3076_v21  ;;  %v2789_v53 = vld [vmem:[%s10172_s3 + $0x5f8] sm:$0xff] }
 0x2f4   :  { %6196 = vmatpush1.bf16.msra.mxu1 %v7211_v11  ;;  %v6901_v11 = vcombine.low %v2689_v63, %v2693_v3  ;;  %v2905_v57 = vld [vmem:[%s10172_s3 + $0x998] sm:$0xff] }
 0x2f5   :  { %6241 = vmatpush1.bf16.msra.mxu0 %v6821_v12  ;;  %6197 = vmatprep.subr.bf16.mxu1 %v7204_v13  ;;  %v7284_v12 = vcombine.high %v3072_v0, %v3076_v21  ;;  %v6894_v13 = vcombine.high %v2681_v7, %v2685_v9  ;;  %v2909_v5 = vld [vmem:[%s10172_s3 + $0x9b8] sm:$0xff] }
 0x2f6   :  { %6242 = vmatprep.subr.bf16.mxu0 %v6814_v44  ;;  %v3064_v44 = vld [vmem:[%s10172_s3 + $0xe90] sm:$0xff]  ;;  %v2781_v61 = vld [vmem:[%s10172_s3 + $0x5b8] sm:$0xff] }
 0x2f7   :  { %v7275_v40 = vcombine.low %v3064_v44, %v3068_v14  ;;  %v2897_v1 = vld [vmem:[%s10172_s3 + $0x958] sm:$0xff] }
 0x2f8   :  { %6198 = vmatpush1.bf16.msra.mxu1 %v7203_v23  ;;  %v6893_v23 = vcombine.low %v2681_v7, %v2685_v9  ;;  %v2901_v63 = vld [vmem:[%s10172_s3 + $0x978] sm:$0xff] }
 0x2f9   :  { %6243 = vmatpush1.bf16.msra.mxu0 %v6813_v26  ;;  %6199 = vmatprep.subr.bf16.mxu1 %v7196_v28  ;;  %v7276_v26 = vcombine.high %v3064_v44, %v3068_v14  ;;  %v6886_v28 = vcombine.high %v2673_v15, %v2677_v16  ;;  %v2773_v0 = vld [vmem:[%s10172_s3 + $0x578] sm:$0xff]  ;;  %v7109_v7 = vcombine.low %v2897_v1, %v2901_v63 }
 0x2fa   :  { %6244 = vmatprep.subr.bf16.mxu0 %v6934_v29  ;;  %v3056_v29 = vld [vmem:[%s10172_s3 + $0xe50] sm:$0xff] }
 0x2fb   :  { %v7267_v51 = vcombine.low %v3056_v29, %v3060_v31 }
 0x2fc   :  { %6200 = vmatpush1.bf16.msra.mxu1 %v7195_v43  ;;  %v6885_v43 = vcombine.low %v2673_v15, %v2677_v16 }
 0x2fd   :  { %6245 = vmatpush2.bf16.msra.mxu0 %v6933_v45  ;;  %6201 = vmatprep.subr.bf16.mxu1 %v7316_v46  ;;  %v7268_v45 = vcombine.high %v3056_v29, %v3060_v31  ;;  %v6878_v46 = vcombine.high %v2665_v33, %v2669_v62 }
 0x2fe   :  { %6246 = vmatprep.subr.bf16.mxu0 %v6926_v10  ;;  %v3048_v10 = vld [vmem:[%s10172_s3 + $0xe10] sm:$0xff] }
 0x2ff   :  { %v7259_v56 = vcombine.low %v3048_v10, %v3052_v8 }
 0x300   :  { %6202 = vmatpush2.bf16.msra.mxu1 %v7315_v41  ;;  %v6877_v41 = vcombine.low %v2665_v33, %v2669_v62 }
 0x301   :  { %6247 = vmatpush2.bf16.msra.mxu0 %v6925_v52  ;;  %6203 = vmatprep.subr.bf16.mxu1 %v7308_v54  ;;  %v7260_v52 = vcombine.high %v3048_v10, %v3052_v8  ;;  %v7126_v54 = vcombine.high %v2913_v47, %v2917_v49 }
 0x302   :  { %6248 = vmatprep.subr.bf16.mxu0 %v6918_v55  ;;  %v2785_v55 = vld [vmem:[%s10172_s3 + $0x5d8] sm:$0xff] }
 0x303   :  { %v6997_v3 = vcombine.low %v2785_v55, %v2789_v53 }
 0x304   :  { %6204 = vmatpush2.bf16.msra.mxu1 %v7307_v58  ;;  %v7125_v58 = vcombine.low %v2913_v47, %v2917_v49 }
 0x305   :  { %6249 = vmatpush2.bf16.msra.mxu0 %v6917_v48  ;;  %6205 = vmatprep.subr.bf16.mxu1 %v7300_v24  ;;  %v6998_v48 = vcombine.high %v2785_v55, %v2789_v53  ;;  %v7118_v24 = vcombine.high %v2905_v57, %v2909_v5 }
 0x306   :  { %6250 = vmatprep.subr.bf16.mxu0 %v6910_v59  ;;  %v2777_v59 = vld [vmem:[%s10172_s3 + $0x598] sm:$0xff] }
 0x307   :  { %v6989_v21 = vcombine.low %v2777_v59, %v2781_v61 }
 0x308   :  { %6206 = vmatpush2.bf16.msra.mxu1 %v7299_v4  ;;  %v7117_v4 = vcombine.low %v2905_v57, %v2909_v5 }
 0x309   :  { %6251 = vmatpush2.bf16.msra.mxu0 %v6909_v6  ;;  %6207 = vmatprep.subr.bf16.mxu1 %v7292_v42  ;;  %v6990_v6 = vcombine.high %v2777_v59, %v2781_v61  ;;  %v7110_v42 = vcombine.high %v2897_v1, %v2901_v63 }
 0x30a   :  { %6252 = vmatprep.subr.bf16.mxu0 %v6902_v37  ;;  %v2769_v37 = vld [vmem:[%s10172_s3 + $0x558] sm:$0xff] }
 0x30b   :  { %v6982_v9 = vcombine.high %v2769_v37, %v2773_v0  ;;  %v6981_v44 = vcombine.low %v2769_v37, %v2773_v0 }
 0x30c   :  { %6208 = vmatpush2.bf16.msra.mxu1 %v7291_v35 }
 0x30d   :  { %6253 = vmatpush2.bf16.msra.mxu0 %v6901_v11  ;;  %6209 = vmatprep.subr.bf16.mxu1 %v7284_v12  ;;  %v2761_v11 = vld [vmem:[%s10172_s3 + $0x518] sm:$0xff] }
 0x30e   :  { %6254 = vmatprep.subr.bf16.mxu0 %v6894_v13  ;;  %v2765_v12 = vld [vmem:[%s10172_s3 + $0x538] sm:$0xff] }
 0x30f   :  { %v2881_v13 = vld [vmem:[%s10172_s3 + $0x8d8] sm:$0xff]  ;;  %v6974_v15 = vcombine.high %v2761_v11, %v2765_v12  ;;  %v6973_v29 = vcombine.low %v2761_v11, %v2765_v12 }
 0x310   :  { %6210 = vmatpush2.bf16.msra.mxu1 %v7283_v17  ;;  %v2753_v17 = vld [vmem:[%s10172_s3 + $0x4d8] sm:$0xff] }
 0x311   :  { %6255 = vmatpush2.bf16.msra.mxu0 %v6893_v23  ;;  %6211 = vmatprep.subr.bf16.mxu1 %v7276_v26  ;;  %v2757_v23 = vld [vmem:[%s10172_s3 + $0x4f8] sm:$0xff] }
 0x312   :  { %6256 = vmatprep.subr.bf16.mxu0 %v6886_v28  ;;  %v2873_v26 = vld [vmem:[%s10172_s3 + $0x898] sm:$0xff]  ;;  %v6966_v33 = vcombine.high %v2753_v17, %v2757_v23  ;;  %v6965_v10 = vcombine.low %v2753_v17, %v2757_v23 }
 0x313   :  { %v2877_v28 = vld [vmem:[%s10172_s3 + $0x8b8] sm:$0xff] }
 0x314   :  { %6212 = vmatpush2.bf16.msra.mxu1 %v7275_v40  ;;  %v7086_v62 = vcombine.high %v2873_v26, %v2877_v28  ;;  %v2745_v40 = vld [vmem:[%s10172_s3 + $0x498] sm:$0xff]  ;;  %v7085_v8 = vcombine.low %v2873_v26, %v2877_v28 }
 0x315   :  { %6257 = vmatpush2.bf16.msra.mxu0 %v6885_v43  ;;  %6213 = vmatprep.subr.bf16.mxu1 %v7268_v45  ;;  %v2749_v43 = vld [vmem:[%s10172_s3 + $0x4b8] sm:$0xff] }
 0x316   :  { %6258 = vmatprep.subr.bf16.mxu0 %v6878_v46  ;;  %v2865_v45 = vld [vmem:[%s10172_s3 + $0x858] sm:$0xff]  ;;  %v6958_v47 = vcombine.high %v2745_v40, %v2749_v43  ;;  %v6957_v55 = vcombine.low %v2745_v40, %v2749_v43 }
 0x317   :  { %v2869_v46 = vld [vmem:[%s10172_s3 + $0x878] sm:$0xff] }
 0x318   :  { %6214 = vmatpush2.bf16.msra.mxu1 %v7267_v51  ;;  %v7078_v49 = vcombine.high %v2865_v45, %v2869_v46  ;;  %v2737_v51 = vld [vmem:[%s10172_s3 + $0x458] sm:$0xff]  ;;  %v7077_v53 = vcombine.low %v2865_v45, %v2869_v46 }
 0x319   :  { %6259 = vmatpush2.bf16.msra.mxu0 %v6877_v41  ;;  %6215 = vmatprep.subr.bf16.mxu1 %v7260_v52  ;;  %v2741_v41 = vld [vmem:[%s10172_s3 + $0x478] sm:$0xff] }
 0x31a   :  { %6314 = vmatprep.subr.bf16.mxu0 %v7126_v54  ;;  %v2857_v52 = vld [vmem:[%s10172_s3 + $0x818] sm:$0xff]  ;;  %v6950_v57 = vcombine.high %v2737_v51, %v2741_v41  ;;  %v6949_v59 = vcombine.low %v2737_v51, %v2741_v41  ;;  %v5918_v41 = vpop.f32.mrf.mxu0 }
 0x31b   :  { %v2861_v54 = vld [vmem:[%s10172_s3 + $0x838] sm:$0xff] }
 0x31c   :  { %6216 = vmatpush2.bf16.msra.mxu1 %v7259_v56  ;;  %6261 = vmatmul.mubr.bf16.vlgmr.msra.gmra.mxu0 %v8439_v20  ;;  %v2889_v20 = vld [vmem:[%s10172_s3 + $0x918] sm:$0xff]  ;;  %v7070_v5 = vcombine.high %v2857_v52, %v2861_v54  ;;  %v7069_v61 = vcombine.low %v2857_v52, %v2861_v54 }
 0x31d   :  { %6315 = vmatpush1.bf16.msra.mxu0 %v7125_v58  ;;  %6346 = vmatprep.mubr.bf16.mxu0 %v8957_v32  ;;  %v2893_v32 = vld [vmem:[%s10172_s3 + $0x938] sm:$0xff] }
 0x31e   :  { %6271 = vmatprep.subr.bf16.mxu1 %v6998_v48  ;;  %6316 = vmatprep.subr.bf16.mxu0 %v7118_v24  ;;  %v7102_v35 = vcombine.high %v2889_v20, %v2893_v32  ;;  %v7101_v14 = vcombine.low %v2889_v20, %v2893_v32  ;;  %v2729_v56 = vld [vmem:[%s10172_s3 + $0x418] sm:$0xff] }
 0x31f   :  { %6218 = vmatmul.mubr.bf16.vlgmr.msra.gmra.mxu1 %v9083_v39  ;;  %v2733_v58 = vld [vmem:[%s10172_s3 + $0x438] sm:$0xff] }
 0x320   :  { %6272 = vmatpush1.bf16.msra.mxu1 %v6997_v3  ;;  %6303 = vmatprep.mubr.bf16.mxu1 %v8674_v22  ;;  %v2885_v22 = vld [vmem:[%s10172_s3 + $0x8f8] sm:$0xff]  ;;  %v6942_v1 = vcombine.high %v2729_v56, %v2733_v58  ;;  %v6941_v37 = vcombine.low %v2729_v56, %v2733_v58 }
 0x321   :  { %6317 = vmatpush1.bf16.msra.mxu0 %v7117_v4  ;;  %6273 = vmatprep.subr.bf16.mxu1 %v6990_v6  ;;  %v7094_v16 = vcombine.high %v2881_v13, %v2885_v22  ;;  %v7093_v31 = vcombine.low %v2881_v13, %v2885_v22  ;;  %v2977_v48 = vld [vmem:[%s10172_s3 + $0xbd8] sm:$0xff] }
 0x322   :  { %6318 = vmatprep.subr.bf16.mxu0 %v7110_v42  ;;  %v2981_v24 = vld [vmem:[%s10172_s3 + $0xbf8] sm:$0xff] }
 0x323   :  { %v7190_v63 = vcombine.high %v2977_v48, %v2981_v24  ;;  %v2849_v3 = vld [vmem:[%s10172_s3 + $0x7d8] sm:$0xff]  ;;  %v7189_v0 = vcombine.low %v2977_v48, %v2981_v24  ;;  %v5920_v48 = vpop.f32.mrf.mxu0 }
 0x324   :  { %6274 = vmatpush1.bf16.msra.mxu1 %v6989_v21  ;;  %v2853_v4 = vld [vmem:[%s10172_s3 + $0x7f8] sm:$0xff] }
 0x325   :  { %6319 = vmatpush1.bf16.msra.mxu0 %v7109_v7  ;;  %6275 = vmatprep.subr.bf16.mxu1 %v6982_v9  ;;  %v2969_v6 = vld [vmem:[%s10172_s3 + $0xb98] sm:$0xff]  ;;  %v7062_v20 = vcombine.high %v2849_v3, %v2853_v4  ;;  %v7061_v11 = vcombine.low %v2849_v3, %v2853_v4 }
 0x326   :  { %6320 = vmatprep.subr.bf16.mxu0 %v7102_v35  ;;  %v2973_v42 = vld [vmem:[%s10172_s3 + $0xbb8] sm:$0xff] }
 0x327   :  { %v7182_v32 = vcombine.high %v2969_v6, %v2973_v42  ;;  %v2841_v21 = vld [vmem:[%s10172_s3 + $0x798] sm:$0xff]  ;;  %v7181_v12 = vcombine.low %v2969_v6, %v2973_v42  ;;  %v5922_v42 = vpop.f32.mrf.mxu0 }
 0x328   :  { %6276 = vmatpush1.bf16.msra.mxu1 %v6981_v44  ;;  %v2845_v7 = vld [vmem:[%s10172_s3 + $0x7b8] sm:$0xff] }
 0x329   :  { %6321 = vmatpush1.bf16.msra.mxu0 %v7101_v14  ;;  %6277 = vmatprep.subr.bf16.mxu1 %v6974_v15  ;;  %v2961_v9 = vld [vmem:[%s10172_s3 + $0xb58] sm:$0xff]  ;;  %v7054_v13 = vcombine.high %v2841_v21, %v2845_v7  ;;  %v7053_v17 = vcombine.low %v2841_v21, %v2845_v7 }
 0x32a   :  { %6322 = vmatprep.subr.bf16.mxu0 %v7094_v16  ;;  %v2965_v35 = vld [vmem:[%s10172_s3 + $0xb78] sm:$0xff] }
 0x32b   :  { %v7174_v22 = vcombine.high %v2961_v9, %v2965_v35  ;;  %v2833_v44 = vld [vmem:[%s10172_s3 + $0x758] sm:$0xff]  ;;  %v7173_v23 = vcombine.low %v2961_v9, %v2965_v35  ;;  %v3123_v35 = vrot.slane %v9643_v34, %v376_v2 }
 0x32c   :  { %6278 = vmatpush1.bf16.msra.mxu1 %v6973_v29  ;;  %v2837_v14 = vld [vmem:[%s10172_s3 + $0x778] sm:$0xff] }
 0x32d   :  { %6323 = vmatpush1.bf16.msra.mxu0 %v7093_v31  ;;  %6279 = vmatprep.subr.bf16.mxu1 %v6966_v33  ;;  %v2953_v15 = vld [vmem:[%s10172_s3 + $0xb18] sm:$0xff]  ;;  %v7046_v26 = vcombine.high %v2833_v44, %v2837_v14  ;;  %v7045_v40 = vcombine.low %v2833_v44, %v2837_v14  ;;  %v3127_v44 = vrot.slane %v9643_v34, %v380_v50 }
 0x32e   :  { %6324 = vmatprep.subr.bf16.mxu0 %v7086_v62  ;;  %v2957_v16 = vld [vmem:[%s10172_s3 + $0xb38] sm:$0xff] }
 0x32f   :  { %v7166_v28 = vcombine.high %v2953_v15, %v2957_v16  ;;  %v2825_v29 = vld [vmem:[%s10172_s3 + $0x718] sm:$0xff]  ;;  %v7165_v43 = vcombine.low %v2953_v15, %v2957_v16 }
 0x330   :  { %6280 = vmatpush1.bf16.msra.mxu1 %v6965_v10  ;;  %v2829_v31 = vld [vmem:[%s10172_s3 + $0x738] sm:$0xff] }
 0x331   :  { %6325 = vmatpush1.bf16.msra.mxu0 %v7085_v8  ;;  %6281 = vmatprep.subr.bf16.mxu1 %v6958_v47  ;;  %v2945_v33 = vld [vmem:[%s10172_s3 + $0xad8] sm:$0xff]  ;;  %v7038_v45 = vcombine.high %v2825_v29, %v2829_v31  ;;  %v7037_v51 = vcombine.low %v2825_v29, %v2829_v31 }
 0x332   :  { %6326 = vmatprep.subr.bf16.mxu0 %v7078_v49  ;;  %v2949_v62 = vld [vmem:[%s10172_s3 + $0xaf8] sm:$0xff] }
 0x333   :  { %v7158_v46 = vcombine.high %v2945_v33, %v2949_v62  ;;  %v2817_v10 = vld [vmem:[%s10172_s3 + $0x6d8] sm:$0xff]  ;;  %v7157_v52 = vcombine.low %v2945_v33, %v2949_v62 }
 0x334   :  { %6282 = vmatpush1.bf16.msra.mxu1 %v6957_v55  ;;  %v2821_v8 = vld [vmem:[%s10172_s3 + $0x6f8] sm:$0xff] }
 0x335   :  { %6327 = vmatpush1.bf16.msra.mxu0 %v7077_v53  ;;  %6283 = vmatprep.subr.bf16.mxu1 %v6950_v57  ;;  %v2937_v47 = vld [vmem:[%s10172_s3 + $0xa98] sm:$0xff]  ;;  %v7030_v54 = vcombine.high %v2817_v10, %v2821_v8  ;;  %v7029_v58 = vcombine.low %v2817_v10, %v2821_v8 }
 0x336   :  { %6328 = vmatprep.subr.bf16.mxu0 %v7070_v5  ;;  %v2941_v49 = vld [vmem:[%s10172_s3 + $0xab8] sm:$0xff] }
 0x337   :  { %v7150_v55 = vcombine.high %v2937_v47, %v2941_v49  ;;  %v2809_v53 = vld [vmem:[%s10172_s3 + $0x698] sm:$0xff]  ;;  %v7149_v24 = vcombine.low %v2937_v47, %v2941_v49 }
 0x338   :  { %6284 = vmatpush1.bf16.msra.mxu1 %v6949_v59  ;;  %v2813_v57 = vld [vmem:[%s10172_s3 + $0x6b8] sm:$0xff] }
 0x339   :  { %6329 = vmatpush1.bf16.msra.mxu0 %v7069_v61  ;;  %6285 = vmatprep.subr.bf16.mxu1 %v6942_v1  ;;  %v2929_v5 = vld [vmem:[%s10172_s3 + $0xa58] sm:$0xff]  ;;  %v7022_v59 = vcombine.high %v2809_v53, %v2813_v57  ;;  %v7021_v6 = vcombine.low %v2809_v53, %v2813_v57 }
 0x33a   :  { %6330 = vmatprep.subr.bf16.mxu0 %v7190_v63  ;;  %v2933_v56 = vld [vmem:[%s10172_s3 + $0xa78] sm:$0xff] }
 0x33b   :  { %v7142_v61 = vcombine.high %v2929_v5, %v2933_v56  ;;  %v2801_v1 = vld [vmem:[%s10172_s3 + $0x658] sm:$0xff] }
 0x33c   :  { %6286 = vmatpush1.bf16.msra.mxu1 %v6941_v37  ;;  %v2805_v63 = vld [vmem:[%s10172_s3 + $0x678] sm:$0xff]  ;;  %v5961_v37 = vpop.f32.mrf.mxu1 }
 0x33d   :  { %6331 = vmatpush2.bf16.msra.mxu0 %v7189_v0  ;;  %6287 = vmatprep.subr.bf16.mxu1 %v7062_v20  ;;  %v2921_v3 = vld [vmem:[%s10172_s3 + $0xa18] sm:$0xff]  ;;  %v7141_v0 = vcombine.low %v2929_v5, %v2933_v56  ;;  %v7014_v20 = vcombine.high %v2801_v1, %v2805_v63  ;;  %v7013_v9 = vcombine.low %v2801_v1, %v2805_v63 }
 0x33e   :  { %6332 = vmatprep.subr.bf16.mxu0 %v7182_v32  ;;  %v2925_v4 = vld [vmem:[%s10172_s3 + $0xa38] sm:$0xff] }
 0x33f   :  { %v7134_v32 = vcombine.high %v2921_v3, %v2925_v4  ;;  %v2793_v21 = vld [vmem:[%s10172_s3 + $0x618] sm:$0xff] }
 0x340   :  { %6288 = vmatpush2.bf16.msra.mxu1 %v7061_v11  ;;  %v2797_v7 = vld [vmem:[%s10172_s3 + $0x638] sm:$0xff]  ;;  %v5924_v11 = vpop.f32.mrf.mxu0 }
 0x341   :  { %6333 = vmatpush2.bf16.msra.mxu0 %v7181_v12  ;;  %6289 = vmatprep.subr.bf16.mxu1 %v7054_v13  ;;  %v5963_v12 = vpop.f32.mrf.mxu1  ;;  %v7133_v13 = vcombine.low %v2921_v3, %v2925_v4  ;;  %v3041_v14 = vld [vmem:[%s10172_s3 + $0xdd8] sm:$0xff]  ;;  %v7005_v16 = vcombine.low %v2793_v21, %v2797_v7 }
 0x342   :  { %6334 = vmatprep.subr.bf16.mxu0 %v7174_v22  ;;  %v7006_v22 = vcombine.high %v2793_v21, %v2797_v7  ;;  %v3045_v15 = vld [vmem:[%s10172_s3 + $0xdf8] sm:$0xff]  ;;  %v6004_v2 = vpop.f32.mrf.mxu0 }
 0x343   :  { %v3033_v50 = vld [vmem:[%s10172_s3 + $0xd98] sm:$0xff]  ;;  %v7253_v62 = vcombine.low %v3041_v14, %v3045_v15 }
 0x344   :  { %6290 = vmatpush2.bf16.msra.mxu1 %v7053_v17  ;;  %v5919_v17 = vadd.f32 %v5918_v41, %v3123_v35  ;;  %v3037_v34 = vld [vmem:[%s10172_s3 + $0xdb8] sm:$0xff]  ;;  %v6006_v31 = vpop.f32.mrf.mxu0 }
 0x345   :  { %6335 = vmatpush2.bf16.msra.mxu0 %v7173_v23  ;;  %6291 = vmatprep.subr.bf16.mxu1 %v7046_v26  ;;  %v5965_v23 = vpop.f32.mrf.mxu1  ;;  %v7254_v26 = vcombine.high %v3041_v14, %v3045_v15  ;;  %v3025_v10 = vld [vmem:[%s10172_s3 + $0xd58] sm:$0xff] }
 0x346   :  { %6336 = vmatprep.subr.bf16.mxu0 %v7166_v28  ;;  %v5921_v28 = vadd.f32 %v5920_v48, %v3127_v44  ;;  %v5962_v29 = vadd.f32 %v5961_v37, %v5919_v17  ;;  %v3029_v8 = vld [vmem:[%s10172_s3 + $0xd78] sm:$0xff]  ;;  %v6008_v47 = vpop.f32.mrf.mxu0 }
 0x347   :  { %v7238_v53 = vcombine.high %v3025_v10, %v3029_v8  ;;  %v3017_v56 = vld [vmem:[%s10172_s3 + $0xd18] sm:$0xff] }
 0x348   :  { %6292 = vmatpush2.bf16.msra.mxu1 %v7045_v40  ;;  %v5964_v33 = vadd.f32 %v5963_v12, %v5921_v28  ;;  %v5967_v40 = vpop.f32.mrf.mxu1  ;;  %v6005_v49 = vadd.f32 %v6004_v2, %v5962_v29  ;;  %v3005_v21 = vld [vmem:[%s10172_s3 + $0xcb8] sm:$0xff] }
 0x349   :  { %6337 = vmatpush2.bf16.msra.mxu0 %v7165_v43  ;;  %6293 = vmatprep.subr.bf16.mxu1 %v7038_v45  ;;  %v7246_v43 = vcombine.high %v3033_v50, %v3037_v34  ;;  %v5923_v45 = vadd.f32 %v5922_v42, %v3123_v35  ;;  %v3013_v42 = vld [vmem:[%s10172_s3 + $0xcf8] sm:$0xff] }
 0x34a   :  { %6338 = vmatprep.subr.bf16.mxu0 %v7158_v46  ;;  %v5925_v46 = vadd.f32 %v5924_v11, %v3127_v44  ;;  %v2993_v35 = vld [vmem:[%s10172_s3 + $0xc58] sm:$0xff] }
 0x34b   :  { %v5966_v41 = vadd.f32 %v5965_v23, %v5923_v45  ;;  %v2997_v11 = vld [vmem:[%s10172_s3 + $0xc78] sm:$0xff] }
 0x34c   :  { %6294 = vmatpush2.bf16.msra.mxu1 %v7037_v51  ;;  %v2989_v44 = vld [vmem:[%s10172_s3 + $0xc38] sm:$0xff]  ;;  %v7205_v14 = vcombine.low %v2993_v35, %v2997_v11 }
 0x34d   :  { %6339 = vmatpush2.bf16.msra.mxu0 %v7157_v52  ;;  %6295 = vmatprep.subr.bf16.mxu1 %v7030_v54  ;;  %v5968_v52 = vadd.f32 %v5967_v40, %v5925_v46  ;;  %v6007_v54 = vadd.f32 %v6006_v31, %v5964_v33  ;;  %v3105_v2 = vld [vmem:[%s10172_s3 + $0xfd8] sm:$0xff] }
 0x34e   :  { %6340 = vmatprep.subr.bf16.mxu0 %v7150_v55  ;;  %v3101_v28 = vld [vmem:[%s10172_s3 + $0xfb8] sm:$0xff] }
 0x34f   :  { %v3089_v29 = vld [vmem:[%s10172_s3 + $0xf58] sm:$0xff] }
 0x350   :  { %6296 = vmatpush2.bf16.msra.mxu1 %v7029_v58  ;;  %v6010_v58 = vpop.f32.mrf.mxu0  ;;  %v3093_v31 = vld [vmem:[%s10172_s3 + $0xf78] sm:$0xff] }
 0x351   :  { %6341 = vmatpush2.bf16.msra.mxu0 %v7149_v24  ;;  %6297 = vmatprep.subr.bf16.mxu1 %v7022_v59  ;;  %v6009_v59 = vadd.f32 %v6008_v47, %v5966_v41  ;;  %v3081_v40 = vld [vmem:[%s10172_s3 + $0xf18] sm:$0xff]  ;;  %v7301_v45 = vcombine.low %v3089_v29, %v3093_v31 }
 0x352   :  { %6342 = vmatprep.subr.bf16.mxu0 %v7142_v61  ;;  %v7237_v61 = vcombine.low %v3025_v10, %v3029_v8  ;;  %v3073_v10 = vld [vmem:[%s10172_s3 + $0xed8] sm:$0xff] }
 0x353   :  { %v3077_v8 = vld [vmem:[%s10172_s3 + $0xef8] sm:$0xff] }
 0x354   :  { %6298 = vmatpush2.bf16.msra.mxu1 %v7021_v6  ;;  %v3009_v6 = vld [vmem:[%s10172_s3 + $0xcd8] sm:$0xff]  ;;  %v7285_v41 = vcombine.low %v3073_v10, %v3077_v8 }
 0x355   :  { %6343 = vmatpush2.bf16.msra.mxu0 %v7141_v0  ;;  %6299 = vmatprep.subr.bf16.mxu1 %v7014_v20  ;;  %v7222_v20 = vcombine.high %v3009_v6, %v3013_v42  ;;  %v7221_v7 = vcombine.low %v3009_v6, %v3013_v42 }
 0x356   :  { %6344 = vmatprep.subr.bf16.mxu0 %v7134_v32  ;;  %v3001_v32 = vld [vmem:[%s10172_s3 + $0xc98] sm:$0xff] }
 0x357   :  { %v7213_v12 = vcombine.low %v3001_v32, %v3005_v21 }
 0x358   :  { %6300 = vmatpush2.bf16.msra.mxu1 %v7013_v9  ;;  %v7214_v9 = vcombine.high %v3001_v32, %v3005_v21 }
 0x359   :  { %6345 = vmatpush2.bf16.msra.mxu0 %v7133_v13  ;;  %6301 = vmatprep.subr.bf16.mxu1 %v7006_v22  ;;  %v7206_v13 = vcombine.high %v2993_v35, %v2997_v11  ;;  %v2985_v22 = vld [vmem:[%s10172_s3 + $0xc18] sm:$0xff] }
 0x35a   :  { %v7198_v15 = vcombine.high %v2985_v22, %v2989_v44  ;;  %v7197_v17 = vcombine.low %v2985_v22, %v2989_v44 }
 0x35c   :  { %6302 = vmatpush2.bf16.msra.mxu1 %v7005_v16  ;;  %6347 = vmatmul.mubr.bf16.vlgmr.msra.gmra.mxu0 %v8959_v38  ;;  %v7245_v38 = vcombine.low %v3033_v50, %v3037_v34  ;;  %v3109_v16 = vld [vmem:[%s10172_s3 + $0xff8] sm:$0xff] }
 0x35d   :  { %6357 = vmatprep.subr.bf16.mxu1 %v7254_v26  ;;  %v7318_v23 = vcombine.high %v3105_v2, %v3109_v16  ;;  %v3097_v26 = vld [vmem:[%s10172_s3 + $0xf98] sm:$0xff]  ;;  %v7317_v50 = vcombine.low %v3105_v2, %v3109_v16 }
 0x35e   :  { %v7310_v34 = vcombine.high %v3097_v26, %v3101_v28  ;;  %v7309_v33 = vcombine.low %v3097_v26, %v3101_v28 }
 0x35f   :  { %v6047_v51 = vpop.f32.mrf.mxu1  ;;  %6304 = vmatmul.mubr.bf16.vlgmr.msra.gmra.mxu1 %v8746_v18  ;;  %v3021_v18 = vld [vmem:[%s10172_s3 + $0xd38] sm:$0xff] }
 0x360   :  { %6358 = vmatpush1.bf16.msra.mxu1 %v7253_v62  ;;  %6389 = vmatprep.mubr.bf16.mxu1 %v9074_v30  ;;  %v6048_v57 = vadd.f32 %v6047_v51, %v6005_v49  ;;  %v6011_v30 = vadd.f32 %v6010_v58, %v5968_v52  ;;  %v7230_v63 = vcombine.high %v3017_v56, %v3021_v18  ;;  %v3065_v51 = vld [vmem:[%s10172_s3 + $0xe98] sm:$0xff] }
 0x361   :  { %v6049_v55 = vpop.f32.mrf.mxu1  ;;  %6359 = vmatprep.subr.bf16.mxu1 %v7246_v43  ;;  %v7229_v0 = vcombine.low %v3017_v56, %v3021_v18  ;;  %v7302_v62 = vcombine.high %v3089_v29, %v3093_v31  ;;  %v3085_v43 = vld [vmem:[%s10172_s3 + $0xf38] sm:$0xff]  ;;  %v7286_v49 = vcombine.high %v3073_v10, %v3077_v8 }
 0x362   :  { %v6050_v5 = vadd.f32 %v6049_v55, %v6007_v54  ;;  %v7294_v46 = vcombine.high %v3081_v40, %v3085_v43  ;;  %v7293_v47 = vcombine.low %v3081_v40, %v3085_v43  ;;  %v3057_v54 = vld [vmem:[%s10172_s3 + $0xe58] sm:$0xff] }
 0x363   :  { %v6051_v48 = vpop.f32.mrf.mxu1  ;;  %v3061_v55 = vld [vmem:[%s10172_s3 + $0xe78] sm:$0xff] }
 0x364   :  { %v7328_v24 = vpack.c.bf16 %v6050_v5, %v6048_v57  ;;  %6360 = vmatpush1.bf16.msra.mxu1 %v7245_v38  ;;  %v6052_v3 = vadd.f32 %v6051_v48, %v6009_v59  ;;  %v3069_v38 = vld [vmem:[%s10172_s3 + $0xeb8] sm:$0xff]  ;;  %v7270_v57 = vcombine.high %v3057_v54, %v3061_v55  ;;  %v7269_v18 = vcombine.low %v3057_v54, %v3061_v55 }
 0x365   :  { %v6053_v1 = vpop.f32.mrf.mxu1  ;;  %6361 = vmatprep.subr.bf16.mxu1 %v7238_v53  ;;  %v7278_v52 = vcombine.high %v3065_v51, %v3069_v38  ;;  %v7277_v53 = vcombine.low %v3065_v51, %v3069_v38  ;;  %v3049_v5 = vld [vmem:[%s10172_s3 + $0xe18] sm:$0xff] }
 0x366   :  { %6449 = vst [vmem:[#allocation2 + $0x8] sm:$0xff] %v7328_v24  ;;  %v6054_v4 = vadd.f32 %v6053_v1, %v6011_v30  ;;  %v3053_v56 = vld [vmem:[%s10172_s3 + $0xe38] sm:$0xff]  ;;  %v6090_v24 = vpop.f32.mrf.mxu0 }
 0x367   :  { %v7262_v58 = vcombine.high %v3049_v5, %v3053_v56  ;;  %v7261_v48 = vcombine.low %v3049_v5, %v3053_v56 }
 0x368   :  { %v7332_v37 = vpack.c.bf16 %v6054_v4, %v6052_v3  ;;  %6362 = vmatpush1.bf16.msra.mxu1 %v7237_v61  ;;  %v6092_v59 = vpop.f32.mrf.mxu0  ;;  %v7348_v3 = vld [vmem:[%s10173_s4] sm:$0xff] }
 0x369   :  { %6363 = vmatprep.subr.bf16.mxu1 %v7230_v63  ;;  %v3131_v4 = vrot.slane %v7348_v3, %v384_v25  ;;  %v3135_v6 = vrot.slane %v7348_v3, %v388_v36  ;;  %v3143_v10 = vrot.slane %v7348_v3, %v396_v19 }
 0x36a   :  { %6456 = vst [vmem:[#allocation2 + $0x28] sm:$0xff] %v7332_v37  ;;  %v6094_v30 = vpop.f32.mrf.mxu0 }
 0x36c   :  { %6364 = vmatpush1.bf16.msra.mxu1 %v7229_v0  ;;  %v6096_v1 = vpop.f32.mrf.mxu0  ;;  %v6091_v0 = vadd.f32 %v6090_v24, %v3131_v4 }
 0x36d   :  { %6365 = vmatprep.subr.bf16.mxu1 %v7222_v20  ;;  %v6097_v35 = vadd.f32 %v6096_v1, %v3135_v6 }
 0x370   :  { %6366 = vmatpush1.bf16.msra.mxu1 %v7221_v7 }
 0x371   :  { %6367 = vmatprep.subr.bf16.mxu1 %v7214_v9  ;;  %v6095_v9 = vadd.f32 %v6094_v30, %v3131_v4 }
 0x374   :  { %6368 = vmatpush1.bf16.msra.mxu1 %v7213_v12 }
 0x375   :  { %6369 = vmatprep.subr.bf16.mxu1 %v7206_v13 }
 0x378   :  { %6370 = vmatpush1.bf16.msra.mxu1 %v7205_v14 }
 0x379   :  { %6371 = vmatprep.subr.bf16.mxu1 %v7198_v15 }
 0x37c   :  { %6372 = vmatpush1.bf16.msra.mxu1 %v7197_v17 }
 0x37d   :  { %6373 = vmatprep.subr.bf16.mxu1 %v7318_v23 }
 0x380   :  { %6374 = vmatpush2.bf16.msra.mxu1 %v7317_v50 }
 0x381   :  { %6375 = vmatprep.subr.bf16.mxu1 %v7310_v34 }
 0x384   :  { %6376 = vmatpush2.bf16.msra.mxu1 %v7309_v33 }
 0x385   :  { %6377 = vmatprep.subr.bf16.mxu1 %v7302_v62 }
 0x388   :  { %6378 = vmatpush2.bf16.msra.mxu1 %v7301_v45 }
 0x389   :  { %6379 = vmatprep.subr.bf16.mxu1 %v7294_v46  ;;  %v3139_v46 = vrot.slane %v7348_v3, %v392_v27 }
 0x38c   :  { %6380 = vmatpush2.bf16.msra.mxu1 %v7293_v47 }
 0x38d   :  { %6381 = vmatprep.subr.bf16.mxu1 %v7286_v49 }
 0x390   :  { %6382 = vmatpush2.bf16.msra.mxu1 %v7285_v41 }
 0x391   :  { %6383 = vmatprep.subr.bf16.mxu1 %v7278_v52 }
 0x394   :  { %6384 = vmatpush2.bf16.msra.mxu1 %v7277_v53 }
 0x395   :  { %6385 = vmatprep.subr.bf16.mxu1 %v7270_v57 }
 0x398   :  { %6386 = vmatpush2.bf16.msra.mxu1 %v7269_v18 }
 0x399   :  { %6387 = vmatprep.subr.bf16.mxu1 %v7262_v58 }
 0x39c   :  { %6388 = vmatpush2.bf16.msra.mxu1 %v7261_v48  ;;  %v6176_v42 = vpop.f32.mrf.mxu0 }
 0x39e   :  { %v6178_v20 = vpop.f32.mrf.mxu0 }
 0x39f   :  { %6390 = vmatmul.mubr.bf16.vlgmr.msra.gmra.mxu1 %v9083_v39  ;;  %v6133_v61 = vpop.f32.mrf.mxu1  ;;  %v6093_v39 = vadd.f32 %v6092_v59, %v3135_v6 }
 0x3a0   :  { %v6134_v32 = vadd.f32 %v6133_v61, %v6091_v0  ;;  %v6180_v11 = vpop.f32.mrf.mxu0 }
 0x3a1   :  { %v6135_v63 = vpop.f32.mrf.mxu1 }
 0x3a2   :  { %v6136_v21 = vadd.f32 %v6135_v63, %v6093_v39  ;;  %v6177_v44 = vadd.f32 %v6176_v42, %v6134_v32  ;;  %v6182_v36 = vpop.f32.mrf.mxu0 }
 0x3a3   :  { %v6137_v37 = vpop.f32.mrf.mxu1 }
 0x3a4   :  { %v6138_v13 = vadd.f32 %v6137_v37, %v6095_v9  ;;  %v6179_v14 = vadd.f32 %v6178_v20, %v6136_v21 }
 0x3a5   :  { %v6139_v7 = vpop.f32.mrf.mxu1 }
 0x3a6   :  { %v6140_v22 = vadd.f32 %v6139_v7, %v6097_v35  ;;  %v6181_v23 = vadd.f32 %v6180_v11, %v6138_v13 }
 0x3a8   :  { %v6183_v26 = vadd.f32 %v6182_v36, %v6140_v22 }
 0x3dc   :  { %v6262_v31 = vpop.f32.mrf.mxu0 }
 0x3dd   :  { %v6263_v49 = vadd.f32 %v6262_v31, %v3139_v46 }
 0x3de   :  { %v6264_v33 = vpop.f32.mrf.mxu0 }
 0x3df   :  { %v6219_v12 = vpop.f32.mrf.mxu1  ;;  %v6265_v51 = vadd.f32 %v6264_v33, %v3143_v10 }
 0x3e0   :  { %v6220_v15 = vadd.f32 %v6219_v12, %v6177_v44  ;;  %v6266_v62 = vpop.f32.mrf.mxu0 }
 0x3e1   :  { %v6221_v25 = vpop.f32.mrf.mxu1  ;;  %v6267_v55 = vadd.f32 %v6266_v62, %v3139_v46 }
 0x3e2   :  { %v6222_v2 = vadd.f32 %v6221_v25, %v6179_v14  ;;  %v6268_v43 = vpop.f32.mrf.mxu0 }
 0x3e3   :  { %v6223_v16 = vpop.f32.mrf.mxu1  ;;  %v6269_v53 = vadd.f32 %v6268_v43, %v3143_v10 }
 0x3e4   :  { %v7329_v17 = vpack.c.bf16 %v6222_v2, %v6220_v15  ;;  %v6224_v50 = vadd.f32 %v6223_v16, %v6181_v23 }
 0x3e5   :  { %v6225_v28 = vpop.f32.mrf.mxu1 }
 0x3e6   :  { %6450 = vst [vmem:[#allocation2 + $0x10] sm:$0xff] %v7329_v17  ;;  %v6226_v34 = vadd.f32 %v6225_v28, %v6183_v26 }
 0x3e8   :  { %v7333_v29 = vpack.c.bf16 %v6226_v34, %v6224_v50 }
 0x3ea   :  { %6457 = vst [vmem:[#allocation2 + $0x30] sm:$0xff] %v7333_v29 }
 0x41c   :  { %v6348_v8 = vpop.f32.mrf.mxu0 }
 0x41e   :  { %v6350_v38 = vpop.f32.mrf.mxu0 }
 0x41f   :  { %v6305_v40 = vpop.f32.mrf.mxu1 }
 0x420   :  { %v6306_v41 = vadd.f32 %v6305_v40, %v6263_v49  ;;  %v6352_v57 = vpop.f32.mrf.mxu0 }
 0x421   :  { %v6307_v45 = vpop.f32.mrf.mxu1 }
 0x422   :  { %v6308_v52 = vadd.f32 %v6307_v45, %v6265_v51  ;;  %v6349_v27 = vadd.f32 %v6348_v8, %v6306_v41  ;;  %v6354_v24 = vpop.f32.mrf.mxu0 }
 0x423   :  { %v6309_v47 = vpop.f32.mrf.mxu1 }
 0x424   :  { %v6310_v56 = vadd.f32 %v6309_v47, %v6267_v55  ;;  %v6351_v58 = vadd.f32 %v6350_v38, %v6308_v52 }
 0x425   :  { %v6311_v54 = vpop.f32.mrf.mxu1 }
 0x426   :  { %v6312_v18 = vadd.f32 %v6311_v54, %v6269_v53  ;;  %v6353_v61 = vadd.f32 %v6352_v57, %v6310_v56 }
 0x428   :  { %v6355_v1 = vadd.f32 %v6354_v24, %v6312_v18 }
 0x45f   :  { %v6391_v5 = vpop.f32.mrf.mxu1 }
 0x460   :  { %v6392_v19 = vadd.f32 %v6391_v5, %v6349_v27 }
 0x461   :  { %v6393_v60 = vpop.f32.mrf.mxu1 }
 0x462   :  { %v6394_v48 = vadd.f32 %v6393_v60, %v6351_v58 }
 0x463   :  { %v6395_v59 = vpop.f32.mrf.mxu1 }
 0x464   :  { %v7330_v30 = vpack.c.bf16 %v6394_v48, %v6392_v19  ;;  %v6396_v3 = vadd.f32 %v6395_v59, %v6353_v61 }
 0x465   :  { %v6397_v63 = vpop.f32.mrf.mxu1 }
 0x466   :  { %6454 = vst.msk [vmem:[#allocation2 + $0x18] sm:$0xff] %vm6453_vm5, %v7330_v30  ;;  %v6398_v4 = vadd.f32 %v6397_v63, %v6355_v1 }
 0x468   :  { %v7334_v6 = vpack.c.bf16 %v6398_v4, %v6396_v3 }
 0x46a   :  { %6458 = vst.msk [vmem:[#allocation2 + $0x38] sm:$0xff] %vm6453_vm5, %v7334_v6 }
 0x46b   :  { %6463 = vsyncadd [#allocation3], 512  ;;  %s7372_s3 = smov [#allocation2]  }
 0x46c   :  { %s6464_s4 = sshll.u32 %s7372_s3, 4  ;;  %s6465_s4 = int_to_ptr.vmem [resolvable:$true] %s6464_s4 }
 0x46d   :  { %s7349_s27 = scalar_lea.vmem %s6465_s4, 512  ;;  %s7353_s28 = scalar_lea.vmem %s6465_s4, 1024 }
 0x46e   :  { %p7350_p0 = scmp.ne.s32.totalorder %s6465_s4, %s7349_s27  ;;  %p7354_p1 = scmp.lt.s32.totalorder %s6465_s4, %s6465_s4 }
 0x46f   :  { %p7355_p2 = scmp.lt.s32.totalorder %s7353_s28, %s7349_s27 }
 0x471   :  { %p7356_p3 = por %p7355_p2, %p7354_p1 }
 0x473   :  { %p7357_p4 = pnand %p7356_p3, %p7350_p0 }
 0x475   :  { %7360 = shalt.err (!%p7357_p4)
}
 0x476   :  { %s7373_s0 = smov 512   ;;  %s7374_s29 = smov 32  }
 0x477   :  { %6470 = dma.vmem_to_hbm [thread:$0]  %s6465_s4, 512, %s10174_s5, [#allocation3], %s7373_s0, %s7373_s0, %s7374_s29  }
 0x478   :  { %7369 = dma.done.wait [#allocation3], 1024  }
 0x479   :  { %7370 = vsyncadd [#allocation3], 4294966272 }
 0x47a   :  { %6474 = vsyncpa [#allocation3], 1 }

</bundles_post_ra>
